<compile_context>
chip_gen: v6e
topology: v6e:2x2x1
jax: 0.10.0
libtpu: 0.0.40
codegen_flags: <defaults>
</compile_context>

<pallas_src>
import functools

import jax
import jax.numpy as jnp
from jax.experimental import pallas as pl
from jax.experimental.pallas import tpu as pltpu


def _is_brs_dawarp_infer_kernel(xpad_ref, wconv_ref, bconv_ref, wlin_ref, blin_ref,
                                out_ref, *, bt, h, w, c_in, row_chunk):
    """One batch tile of `bt` samples; conv + pool chunked over output rows.

    xpad_ref : (bt, H+2, W+2, C_in) bf16   zero-padded NHWC activations
    wconv_ref: (9, C_in, F)         bf16   conv weight, tap-major (ky*3 + kx)
    bconv_ref: (1, F)               f32    conv bias
    wlin_ref : (F, C)               bf16   classifier W^T, pre-scaled by 1/(H*W)
    blin_ref : (1, C)               f32    classifier bias
    out_ref  : (bt, C)              f32    logits
    """
    f = wconv_ref.shape[-1]
    n_chunks = h // row_chunk
    rows = bt * row_chunk * w                     # conv output rows per inner step

    def chunk_body(j, feat):
        r0 = pl.multiple_of(j * row_chunk, row_chunk)
        # 3x3 conv as nine shifted (rows, C_in) @ (C_in, F) MXU matmuls with f32
        # accumulation -- in-VMEM im2col, no HBM patches array (review item #1).
        conv = jnp.zeros((rows, f), jnp.float32)
        for ky in range(3):
            for kx in range(3):
                slab = xpad_ref[:, pl.ds(r0 + ky, row_chunk), pl.ds(kx, w), :]
                conv = conv + jnp.dot(slab.reshape(rows, c_in),
                                      wconv_ref[ky * 3 + kx],
                                      preferred_element_type=jnp.float32)
        conv = jnp.maximum(conv + bconv_ref[...], 0.0)        # bias + ReLU (VPU)
        # Partial global-average-pool; the 1/(H*W) is folded into wlin_ref.
        return feat + jnp.sum(conv.reshape(bt, row_chunk * w, f), axis=1)

    # Chunked accumulation keeps live state at (rows, F) + (bt, F) f32 instead of
    # the full (bt*H*W, F) intermediate (review item #3).
    feat = jax.lax.fori_loop(0, n_chunks, chunk_body,
                             jnp.zeros((bt, f), jnp.float32), unroll=True)

    # Classifier: bf16 operands, f32 accumulation, one lane-batched store.
    out_ref[...] = (jnp.dot(feat.astype(jnp.bfloat16), wlin_ref[...],
                            preferred_element_type=jnp.float32) + blin_ref[...])


def _pick_batch_tile(B, Hp, Wp, C_in):
    """Default batch tile: multiple of 8, divides B, ~<=2 MiB bf16 activation tile,
    and >=2 grid steps whenever B allows (pipeline overlap + v7x 2-TC sharding).
    Falls back to bt == B (legal for the out-block sublane constraint)."""
    per_sample = Hp * Wp * C_in * 2           # bf16 bytes of one padded sample
    target = 2 * 1024 * 1024                  # ~2 MiB tiles sit near the HBM roofline
    bt = B
    cand = 8
    while cand * 2 <= B:                      # keep at least 2 grid steps
        if B % cand == 0 and cand * per_sample <= target:
            bt = cand
        cand *= 2
    return bt


def _pick_row_chunk(H, W, bt):
    """Conv output rows per inner-loop step: cap the live f32 conv intermediate at
    ~(256, F) rows (at bt*H*W=512, F=32 the un-chunked intermediate is the whole
    64-vreg file).  Halving from H keeps the chunk a divisor of H."""
    ch = H
    while ch % 2 == 0 and ch > 1 and bt * ch * W > 256:
        ch //= 2
    return ch


def is_brs_dawarp_forward(x, params, *, batch_tile=None):
    """Inference forward of IS_BRS_DAWarp.  x: NCHW float32."""
    B, C_in, H, W = x.shape
    wconv = params["conv_w"]     # (F, C_in, 3, 3)  PyTorch conv layout
    bconv = params["conv_b"]     # (F,)
    wlin = params["lin_w"]       # (num_classes, F) PyTorch nn.Linear layout
    blin = params["lin_b"]       # (num_classes,)
    F = wconv.shape[0]
    C = wlin.shape[0]
    Hp, Wp = H + 2, W + 2

    # --- glue (plain JAX): NCHW -> NHWC, cast to bf16 *before* padding so the
    # only activation stream the kernel pulls from HBM is half-width, then pad=1.
    x_pad = jnp.pad(jnp.transpose(x, (0, 2, 3, 1)).astype(jnp.bfloat16),
                    ((0, 0), (1, 1), (1, 1), (0, 0)))

    # Conv weight -> (tap=ky*3+kx, c_in, F), matching the in-kernel tap order.
    wconv_taps = jnp.transpose(wconv, (2, 3, 1, 0)).reshape(9, C_in, F)
    wconv_taps = wconv_taps.astype(jnp.bfloat16)
    # Fold the 1/(H*W) of the average pool into the classifier weight; bf16
    # operands with f32 accumulation inside the kernel.
    wlin_scaled = (wlin.T / float(H * W)).astype(jnp.bfloat16)

    bt = _pick_batch_tile(B, Hp, Wp, C_in) if batch_tile is None else batch_tile
    assert B % bt == 0, "batch_tile must divide the batch"
    assert bt % 8 == 0 or bt == B, \
        "out-block sublane constraint: batch_tile must be a multiple of 8 or equal B"
    row_chunk = _pick_row_chunk(H, W, bt)

    kernel = functools.partial(_is_brs_dawarp_infer_kernel,
                               bt=bt, h=H, w=W, c_in=C_in, row_chunk=row_chunk)

    out = pl.pallas_call(
        kernel,
        out_shape=jax.ShapeDtypeStruct((B, C), jnp.float32),
        grid_spec=pltpu.PrefetchScalarGridSpec(
            num_scalar_prefetch=0,
            grid=(B // bt,),
            in_specs=[
                # Padded NHWC activation tile (the only per-step HBM stream).
                pl.BlockSpec((bt, Hp, Wp, C_in), lambda i: (i, 0, 0, 0)),
                # Grid-invariant operands (constant index_map -> DMA'd once).
                # TODO(synk): pipeline_mode=pl.Buffered(1) would drop their
                # redundant second buffer (review item #7); omitted to stay on
                # the conservative API surface -- they total only a few KiB here.
                pl.BlockSpec((9, C_in, F), lambda i: (0, 0, 0)),   # conv taps
                pl.BlockSpec((1, F), lambda i: (0, 0)),            # conv bias
                pl.BlockSpec((F, C), lambda i: (0, 0)),            # classifier W^T/HW
                pl.BlockSpec((1, C), lambda i: (0, 0)),            # classifier bias
            ],
            out_specs=pl.BlockSpec((bt, C), lambda i: (i, 0)),
        ),
        compiler_params=pltpu.CompilerParams(
            # Batch-tile axis is independent -> pipeline and shard across v7x's
            # two TensorCores (the default bt targets >=2 grid steps when B allows).
            dimension_semantics=("parallel",),
            # VMEM budget per step: double-buffered bf16 activation tile
            # (<= 2 MiB each) + a few KiB of weights + the (bt, C) out block,
            # well under the 16/32/32 MiB default scoped limits on v5e/v6e/v7x,
            # so no explicit vmem_limit_bytes override is needed.
        ),
    )(
        x_pad,
        wconv_taps,
        bconv.reshape(1, F).astype(jnp.float32),
        wlin_scaled,
        blin.reshape(1, C).astype(jnp.float32),
    )
    return out


def _reference_forward(x, params):
    """Pure-JAX f32 reference (mirrors the PyTorch module) for verification."""
    wconv, bconv = params["conv_w"], params["conv_b"]
    wlin, blin = params["lin_w"], params["lin_b"]
    conv = jax.lax.conv_general_dilated(
        x, wconv, window_strides=(1, 1), padding=((1, 1), (1, 1)),
        dimension_numbers=("NCHW", "OIHW", "NCHW"))
    conv = jax.nn.relu(conv + bconv[None, :, None, None])
    a = jnp.mean(conv, axis=(2, 3))              # (B, F) global average pool
    return a @ wlin.T + blin[None, :]            # (B, num_classes)


if __name__ == "__main__":
    # small, deterministic shapes
    B, C_in, H, W = 2, 4, 16, 16
    feature_dim, num_classes = 32, 10

    key = jax.random.PRNGKey(0)
    k_x, k_cw, k_cb, k_lw, k_lb = jax.random.split(key, 5)

    x = jax.random.normal(k_x, (B, C_in, H, W), dtype=jnp.float32)
    params = {
        "conv_w": 0.1 * jax.random.normal(k_cw, (feature_dim, C_in, 3, 3), jnp.float32),
        "conv_b": 0.1 * jax.random.normal(k_cb, (feature_dim,), jnp.float32),
        "lin_w": 0.1 * jax.random.normal(k_lw, (num_classes, feature_dim), jnp.float32),
        "lin_b": 0.1 * jax.random.normal(k_lb, (num_classes,), jnp.float32),
    }

    y = jax.block_until_ready(is_brs_dawarp_forward(x, params))
    y_ref = jax.block_until_ready(_reference_forward(x, params))

    assert y.shape == (B, num_classes), y.shape
    # bf16 MXU operands (f32 accumulation) vs an all-f32 reference.
    assert jnp.allclose(y, y_ref, atol=2e-2, rtol=2e-2), (y, y_ref)
    print("KERNEL_OK")
</pallas_src>

<mosaic_0001>
module attributes {stable_mosaic.version = 11 : i64} {
  func.func @_is_brs_dawarp_infer_kernel(%arg0: i32, %arg1: memref<2x18x18x4xbf16, #tpu.memory_space<vmem>>, %arg2: memref<9x4x32xbf16, #tpu.memory_space<vmem>>, %arg3: memref<1x32xf32, #tpu.memory_space<vmem>>, %arg4: memref<32x10xbf16, #tpu.memory_space<vmem>>, %arg5: memref<1x10xf32, #tpu.memory_space<vmem>>, %arg6: memref<2x10xf32, #tpu.memory_space<vmem>>) attributes {dimension_semantics = [#tpu.dimension_semantics<parallel>], iteration_bounds = array<i64: 1>, scalar_prefetch = 0 : i64, scratch_operands = 0 : i64, tpu.core_type = #tpu.core_type<tc>, window_params = [{transform_indices = @transform_0, window_bounds = array<i64: 2, 18, 18, 4>}, {pipeline_mode = #tpu.pipeline_mode<synchronous>, transform_indices = @transform_1, window_bounds = array<i64: 9, 4, 32>}, {pipeline_mode = #tpu.pipeline_mode<synchronous>, transform_indices = @transform_2, window_bounds = array<i64: 1, 32>}, {pipeline_mode = #tpu.pipeline_mode<synchronous>, transform_indices = @transform_3, window_bounds = array<i64: 32, 10>}, {pipeline_mode = #tpu.pipeline_mode<synchronous>, transform_indices = @transform_4, window_bounds = array<i64: 1, 10>}, {transform_indices = @transform_5, window_bounds = array<i64: 2, 10>}]} {
    %cst = arith.constant 0.000000e+00 : f32
    %0 = vector.broadcast %cst : f32 to vector<2x32xf32>
    %c0_i32 = arith.constant 0 : i32
    %c8_i32 = arith.constant 8 : i32
    %1 = arith.muli %c0_i32, %c8_i32 : i32
    %2 = tpu.assume_multiple %1, 8 : i32
    %cst_0 = arith.constant 0.000000e+00 : f32
    %3 = vector.broadcast %cst_0 : f32 to vector<256x32xf32>
    %c0_i32_1 = arith.constant 0 : i32
    %4 = arith.addi %2, %c0_i32_1 : i32
    %c0 = arith.constant 0 : index
    %5 = arith.index_cast %4 : i32 to index
    %c0_2 = arith.constant 0 : index
    %c0_3 = arith.constant 0 : index
    %6 = vector.load %arg1[%c0, %5, %c0_2, %c0_3] : memref<2x18x18x4xbf16, #tpu.memory_space<vmem>>, vector<2x8x16x4xbf16>
    %7 = vector.shape_cast %6 : vector<2x8x16x4xbf16> to vector<256x4xbf16>
    %c0_4 = arith.constant 0 : index
    %c0_5 = arith.constant 0 : index
    %c0_6 = arith.constant 0 : index
    %8 = vector.load %arg2[%c0_4, %c0_5, %c0_6] : memref<9x4x32xbf16, #tpu.memory_space<vmem>>, vector<1x4x32xbf16>
    %9 = vector.shape_cast %8 : vector<1x4x32xbf16> to vector<4x32xbf16>
    %cst_7 = arith.constant dense<0.000000e+00> : vector<256x32xf32>
    %10 = tpu.matmul %7, %9, %cst_7 {dimension_numbers = #tpu.dot_dimension_numbers<[1], [0], [0], [1], [0, 0, 1, 1], [], []>} : vector<256x4xbf16>, vector<4x32xbf16>, vector<256x32xf32> -> vector<256x32xf32>
    %11 = arith.addf %3, %10 : vector<256x32xf32>
    %c0_i32_8 = arith.constant 0 : i32
    %12 = arith.addi %2, %c0_i32_8 : i32
    %c0_9 = arith.constant 0 : index
    %13 = arith.index_cast %12 : i32 to index
    %c1 = arith.constant 1 : index
    %c0_10 = arith.constant 0 : index
    %14 = vector.load %arg1[%c0_9, %13, %c1, %c0_10] : memref<2x18x18x4xbf16, #tpu.memory_space<vmem>>, vector<2x8x16x4xbf16>
    %15 = vector.shape_cast %14 : vector<2x8x16x4xbf16> to vector<256x4xbf16>
    %c1_11 = arith.constant 1 : index
    %c0_12 = arith.constant 0 : index
    %c0_13 = arith.constant 0 : index
    %16 = vector.load %arg2[%c1_11, %c0_12, %c0_13] : memref<9x4x32xbf16, #tpu.memory_space<vmem>>, vector<1x4x32xbf16>
    %17 = vector.shape_cast %16 : vector<1x4x32xbf16> to vector<4x32xbf16>
    %cst_14 = arith.constant dense<0.000000e+00> : vector<256x32xf32>
    %18 = tpu.matmul %15, %17, %cst_14 {dimension_numbers = #tpu.dot_dimension_numbers<[1], [0], [0], [1], [0, 0, 1, 1], [], []>} : vector<256x4xbf16>, vector<4x32xbf16>, vector<256x32xf32> -> vector<256x32xf32>
    %19 = arith.addf %11, %18 : vector<256x32xf32>
    %c0_i32_15 = arith.constant 0 : i32
    %20 = arith.addi %2, %c0_i32_15 : i32
    %c0_16 = arith.constant 0 : index
    %21 = arith.index_cast %20 : i32 to index
    %c2 = arith.constant 2 : index
    %c0_17 = arith.constant 0 : index
    %22 = vector.load %arg1[%c0_16, %21, %c2, %c0_17] : memref<2x18x18x4xbf16, #tpu.memory_space<vmem>>, vector<2x8x16x4xbf16>
    %23 = vector.shape_cast %22 : vector<2x8x16x4xbf16> to vector<256x4xbf16>
    %c2_18 = arith.constant 2 : index
    %c0_19 = arith.constant 0 : index
    %c0_20 = arith.constant 0 : index
    %24 = vector.load %arg2[%c2_18, %c0_19, %c0_20] : memref<9x4x32xbf16, #tpu.memory_space<vmem>>, vector<1x4x32xbf16>
    %25 = vector.shape_cast %24 : vector<1x4x32xbf16> to vector<4x32xbf16>
    %cst_21 = arith.constant dense<0.000000e+00> : vector<256x32xf32>
    %26 = tpu.matmul %23, %25, %cst_21 {dimension_numbers = #tpu.dot_dimension_numbers<[1], [0], [0], [1], [0, 0, 1, 1], [], []>} : vector<256x4xbf16>, vector<4x32xbf16>, vector<256x32xf32> -> vector<256x32xf32>
    %27 = arith.addf %19, %26 : vector<256x32xf32>
    %c1_i32 = arith.constant 1 : i32
    %28 = arith.addi %2, %c1_i32 : i32
    %c0_22 = arith.constant 0 : index
    %29 = arith.index_cast %28 : i32 to index
    %c0_23 = arith.constant 0 : index
    %c0_24 = arith.constant 0 : index
    %30 = vector.load %arg1[%c0_22, %29, %c0_23, %c0_24] : memref<2x18x18x4xbf16, #tpu.memory_space<vmem>>, vector<2x8x16x4xbf16>
    %31 = vector.shape_cast %30 : vector<2x8x16x4xbf16> to vector<256x4xbf16>
    %c3 = arith.constant 3 : index
    %c0_25 = arith.constant 0 : index
    %c0_26 = arith.constant 0 : index
    %32 = vector.load %arg2[%c3, %c0_25, %c0_26] : memref<9x4x32xbf16, #tpu.memory_space<vmem>>, vector<1x4x32xbf16>
    %33 = vector.shape_cast %32 : vector<1x4x32xbf16> to vector<4x32xbf16>
    %cst_27 = arith.constant dense<0.000000e+00> : vector<256x32xf32>
    %34 = tpu.matmul %31, %33, %cst_27 {dimension_numbers = #tpu.dot_dimension_numbers<[1], [0], [0], [1], [0, 0, 1, 1], [], []>} : vector<256x4xbf16>, vector<4x32xbf16>, vector<256x32xf32> -> vector<256x32xf32>
    %35 = arith.addf %27, %34 : vector<256x32xf32>
    %c1_i32_28 = arith.constant 1 : i32
    %36 = arith.addi %2, %c1_i32_28 : i32
    %c0_29 = arith.constant 0 : index
    %37 = arith.index_cast %36 : i32 to index
    %c1_30 = arith.constant 1 : index
    %c0_31 = arith.constant 0 : index
    %38 = vector.load %arg1[%c0_29, %37, %c1_30, %c0_31] : memref<2x18x18x4xbf16, #tpu.memory_space<vmem>>, vector<2x8x16x4xbf16>
    %39 = vector.shape_cast %38 : vector<2x8x16x4xbf16> to vector<256x4xbf16>
    %c4 = arith.constant 4 : index
    %c0_32 = arith.constant 0 : index
    %c0_33 = arith.constant 0 : index
    %40 = vector.load %arg2[%c4, %c0_32, %c0_33] : memref<9x4x32xbf16, #tpu.memory_space<vmem>>, vector<1x4x32xbf16>
    %41 = vector.shape_cast %40 : vector<1x4x32xbf16> to vector<4x32xbf16>
    %cst_34 = arith.constant dense<0.000000e+00> : vector<256x32xf32>
    %42 = tpu.matmul %39, %41, %cst_34 {dimension_numbers = #tpu.dot_dimension_numbers<[1], [0], [0], [1], [0, 0, 1, 1], [], []>} : vector<256x4xbf16>, vector<4x32xbf16>, vector<256x32xf32> -> vector<256x32xf32>
    %43 = arith.addf %35, %42 : vector<256x32xf32>
    %c1_i32_35 = arith.constant 1 : i32
    %44 = arith.addi %2, %c1_i32_35 : i32
    %c0_36 = arith.constant 0 : index
    %45 = arith.index_cast %44 : i32 to index
    %c2_37 = arith.constant 2 : index
    %c0_38 = arith.constant 0 : index
    %46 = vector.load %arg1[%c0_36, %45, %c2_37, %c0_38] : memref<2x18x18x4xbf16, #tpu.memory_space<vmem>>, vector<2x8x16x4xbf16>
    %47 = vector.shape_cast %46 : vector<2x8x16x4xbf16> to vector<256x4xbf16>
    %c5 = arith.constant 5 : index
    %c0_39 = arith.constant 0 : index
    %c0_40 = arith.constant 0 : index
    %48 = vector.load %arg2[%c5, %c0_39, %c0_40] : memref<9x4x32xbf16, #tpu.memory_space<vmem>>, vector<1x4x32xbf16>
    %49 = vector.shape_cast %48 : vector<1x4x32xbf16> to vector<4x32xbf16>
    %cst_41 = arith.constant dense<0.000000e+00> : vector<256x32xf32>
    %50 = tpu.matmul %47, %49, %cst_41 {dimension_numbers = #tpu.dot_dimension_numbers<[1], [0], [0], [1], [0, 0, 1, 1], [], []>} : vector<256x4xbf16>, vector<4x32xbf16>, vector<256x32xf32> -> vector<256x32xf32>
    %51 = arith.addf %43, %50 : vector<256x32xf32>
    %c2_i32 = arith.constant 2 : i32
    %52 = arith.addi %2, %c2_i32 : i32
    %c0_42 = arith.constant 0 : index
    %53 = arith.index_cast %52 : i32 to index
    %c0_43 = arith.constant 0 : index
    %c0_44 = arith.constant 0 : index
    %54 = vector.load %arg1[%c0_42, %53, %c0_43, %c0_44] : memref<2x18x18x4xbf16, #tpu.memory_space<vmem>>, vector<2x8x16x4xbf16>
    %55 = vector.shape_cast %54 : vector<2x8x16x4xbf16> to vector<256x4xbf16>
    %c6 = arith.constant 6 : index
    %c0_45 = arith.constant 0 : index
    %c0_46 = arith.constant 0 : index
    %56 = vector.load %arg2[%c6, %c0_45, %c0_46] : memref<9x4x32xbf16, #tpu.memory_space<vmem>>, vector<1x4x32xbf16>
    %57 = vector.shape_cast %56 : vector<1x4x32xbf16> to vector<4x32xbf16>
    %cst_47 = arith.constant dense<0.000000e+00> : vector<256x32xf32>
    %58 = tpu.matmul %55, %57, %cst_47 {dimension_numbers = #tpu.dot_dimension_numbers<[1], [0], [0], [1], [0, 0, 1, 1], [], []>} : vector<256x4xbf16>, vector<4x32xbf16>, vector<256x32xf32> -> vector<256x32xf32>
    %59 = arith.addf %51, %58 : vector<256x32xf32>
    %c2_i32_48 = arith.constant 2 : i32
    %60 = arith.addi %2, %c2_i32_48 : i32
    %c0_49 = arith.constant 0 : index
    %61 = arith.index_cast %60 : i32 to index
    %c1_50 = arith.constant 1 : index
    %c0_51 = arith.constant 0 : index
    %62 = vector.load %arg1[%c0_49, %61, %c1_50, %c0_51] : memref<2x18x18x4xbf16, #tpu.memory_space<vmem>>, vector<2x8x16x4xbf16>
    %63 = vector.shape_cast %62 : vector<2x8x16x4xbf16> to vector<256x4xbf16>
    %c7 = arith.constant 7 : index
    %c0_52 = arith.constant 0 : index
    %c0_53 = arith.constant 0 : index
    %64 = vector.load %arg2[%c7, %c0_52, %c0_53] : memref<9x4x32xbf16, #tpu.memory_space<vmem>>, vector<1x4x32xbf16>
    %65 = vector.shape_cast %64 : vector<1x4x32xbf16> to vector<4x32xbf16>
    %cst_54 = arith.constant dense<0.000000e+00> : vector<256x32xf32>
    %66 = tpu.matmul %63, %65, %cst_54 {dimension_numbers = #tpu.dot_dimension_numbers<[1], [0], [0], [1], [0, 0, 1, 1], [], []>} : vector<256x4xbf16>, vector<4x32xbf16>, vector<256x32xf32> -> vector<256x32xf32>
    %67 = arith.addf %59, %66 : vector<256x32xf32>
    %c2_i32_55 = arith.constant 2 : i32
    %68 = arith.addi %2, %c2_i32_55 : i32
    %c0_56 = arith.constant 0 : index
    %69 = arith.index_cast %68 : i32 to index
    %c2_57 = arith.constant 2 : index
    %c0_58 = arith.constant 0 : index
    %70 = vector.load %arg1[%c0_56, %69, %c2_57, %c0_58] : memref<2x18x18x4xbf16, #tpu.memory_space<vmem>>, vector<2x8x16x4xbf16>
    %71 = vector.shape_cast %70 : vector<2x8x16x4xbf16> to vector<256x4xbf16>
    %c8 = arith.constant 8 : index
    %c0_59 = arith.constant 0 : index
    %c0_60 = arith.constant 0 : index
    %72 = vector.load %arg2[%c8, %c0_59, %c0_60] : memref<9x4x32xbf16, #tpu.memory_space<vmem>>, vector<1x4x32xbf16>
    %73 = vector.shape_cast %72 : vector<1x4x32xbf16> to vector<4x32xbf16>
    %cst_61 = arith.constant dense<0.000000e+00> : vector<256x32xf32>
    %74 = tpu.matmul %71, %73, %cst_61 {dimension_numbers = #tpu.dot_dimension_numbers<[1], [0], [0], [1], [0, 0, 1, 1], [], []>} : vector<256x4xbf16>, vector<4x32xbf16>, vector<256x32xf32> -> vector<256x32xf32>
    %75 = arith.addf %67, %74 : vector<256x32xf32>
    %c0_62 = arith.constant 0 : index
    %c0_63 = arith.constant 0 : index
    %76 = vector.load %arg3[%c0_62, %c0_63] : memref<1x32xf32, #tpu.memory_space<vmem>>, vector<1x32xf32>
    %77 = vector.broadcast %76 : vector<1x32xf32> to vector<256x32xf32>
    %78 = arith.addf %75, %77 : vector<256x32xf32>
    %cst_64 = arith.constant 0.000000e+00 : f32
    %79 = vector.broadcast %cst_64 : f32 to vector<256x32xf32>
    %80 = arith.maximumf %78, %79 : vector<256x32xf32>
    %81 = vector.shape_cast %80 : vector<256x32xf32> to vector<2x128x32xf32>
    %cst_65 = arith.constant dense<0.000000e+00> : vector<2x32xf32>
    %82 = vector.multi_reduction <add>, %81, %cst_65 [1] : vector<2x128x32xf32> to vector<2x32xf32>
    %83 = arith.addf %0, %82 : vector<2x32xf32>
    %c1_i32_66 = arith.constant 1 : i32
    %c8_i32_67 = arith.constant 8 : i32
    %84 = arith.muli %c1_i32_66, %c8_i32_67 : i32
    %85 = tpu.assume_multiple %84, 8 : i32
    %cst_68 = arith.constant 0.000000e+00 : f32
    %86 = vector.broadcast %cst_68 : f32 to vector<256x32xf32>
    %c0_i32_69 = arith.constant 0 : i32
    %87 = arith.addi %85, %c0_i32_69 : i32
    %c0_70 = arith.constant 0 : index
    %88 = arith.index_cast %87 : i32 to index
    %c0_71 = arith.constant 0 : index
    %c0_72 = arith.constant 0 : index
    %89 = vector.load %arg1[%c0_70, %88, %c0_71, %c0_72] : memref<2x18x18x4xbf16, #tpu.memory_space<vmem>>, vector<2x8x16x4xbf16>
    %90 = vector.shape_cast %89 : vector<2x8x16x4xbf16> to vector<256x4xbf16>
    %c0_73 = arith.constant 0 : index
    %c0_74 = arith.constant 0 : index
    %c0_75 = arith.constant 0 : index
    %91 = vector.load %arg2[%c0_73, %c0_74, %c0_75] : memref<9x4x32xbf16, #tpu.memory_space<vmem>>, vector<1x4x32xbf16>
    %92 = vector.shape_cast %91 : vector<1x4x32xbf16> to vector<4x32xbf16>
    %cst_76 = arith.constant dense<0.000000e+00> : vector<256x32xf32>
    %93 = tpu.matmul %90, %92, %cst_76 {dimension_numbers = #tpu.dot_dimension_numbers<[1], [0], [0], [1], [0, 0, 1, 1], [], []>} : vector<256x4xbf16>, vector<4x32xbf16>, vector<256x32xf32> -> vector<256x32xf32>
    %94 = arith.addf %86, %93 : vector<256x32xf32>
    %c0_i32_77 = arith.constant 0 : i32
    %95 = arith.addi %85, %c0_i32_77 : i32
    %c0_78 = arith.constant 0 : index
    %96 = arith.index_cast %95 : i32 to index
    %c1_79 = arith.constant 1 : index
    %c0_80 = arith.constant 0 : index
    %97 = vector.load %arg1[%c0_78, %96, %c1_79, %c0_80] : memref<2x18x18x4xbf16, #tpu.memory_space<vmem>>, vector<2x8x16x4xbf16>
    %98 = vector.shape_cast %97 : vector<2x8x16x4xbf16> to vector<256x4xbf16>
    %c1_81 = arith.constant 1 : index
    %c0_82 = arith.constant 0 : index
    %c0_83 = arith.constant 0 : index
    %99 = vector.load %arg2[%c1_81, %c0_82, %c0_83] : memref<9x4x32xbf16, #tpu.memory_space<vmem>>, vector<1x4x32xbf16>
    %100 = vector.shape_cast %99 : vector<1x4x32xbf16> to vector<4x32xbf16>
    %cst_84 = arith.constant dense<0.000000e+00> : vector<256x32xf32>
    %101 = tpu.matmul %98, %100, %cst_84 {dimension_numbers = #tpu.dot_dimension_numbers<[1], [0], [0], [1], [0, 0, 1, 1], [], []>} : vector<256x4xbf16>, vector<4x32xbf16>, vector<256x32xf32> -> vector<256x32xf32>
    %102 = arith.addf %94, %101 : vector<256x32xf32>
    %c0_i32_85 = arith.constant 0 : i32
    %103 = arith.addi %85, %c0_i32_85 : i32
    %c0_86 = arith.constant 0 : index
    %104 = arith.index_cast %103 : i32 to index
    %c2_87 = arith.constant 2 : index
    %c0_88 = arith.constant 0 : index
    %105 = vector.load %arg1[%c0_86, %104, %c2_87, %c0_88] : memref<2x18x18x4xbf16, #tpu.memory_space<vmem>>, vector<2x8x16x4xbf16>
    %106 = vector.shape_cast %105 : vector<2x8x16x4xbf16> to vector<256x4xbf16>
    %c2_89 = arith.constant 2 : index
    %c0_90 = arith.constant 0 : index
    %c0_91 = arith.constant 0 : index
    %107 = vector.load %arg2[%c2_89, %c0_90, %c0_91] : memref<9x4x32xbf16, #tpu.memory_space<vmem>>, vector<1x4x32xbf16>
    %108 = vector.shape_cast %107 : vector<1x4x32xbf16> to vector<4x32xbf16>
    %cst_92 = arith.constant dense<0.000000e+00> : vector<256x32xf32>
    %109 = tpu.matmul %106, %108, %cst_92 {dimension_numbers = #tpu.dot_dimension_numbers<[1], [0], [0], [1], [0, 0, 1, 1], [], []>} : vector<256x4xbf16>, vector<4x32xbf16>, vector<256x32xf32> -> vector<256x32xf32>
    %110 = arith.addf %102, %109 : vector<256x32xf32>
    %c1_i32_93 = arith.constant 1 : i32
    %111 = arith.addi %85, %c1_i32_93 : i32
    %c0_94 = arith.constant 0 : index
    %112 = arith.index_cast %111 : i32 to index
    %c0_95 = arith.constant 0 : index
    %c0_96 = arith.constant 0 : index
    %113 = vector.load %arg1[%c0_94, %112, %c0_95, %c0_96] : memref<2x18x18x4xbf16, #tpu.memory_space<vmem>>, vector<2x8x16x4xbf16>
    %114 = vector.shape_cast %113 : vector<2x8x16x4xbf16> to vector<256x4xbf16>
    %c3_97 = arith.constant 3 : index
    %c0_98 = arith.constant 0 : index
    %c0_99 = arith.constant 0 : index
    %115 = vector.load %arg2[%c3_97, %c0_98, %c0_99] : memref<9x4x32xbf16, #tpu.memory_space<vmem>>, vector<1x4x32xbf16>
    %116 = vector.shape_cast %115 : vector<1x4x32xbf16> to vector<4x32xbf16>
    %cst_100 = arith.constant dense<0.000000e+00> : vector<256x32xf32>
    %117 = tpu.matmul %114, %116, %cst_100 {dimension_numbers = #tpu.dot_dimension_numbers<[1], [0], [0], [1], [0, 0, 1, 1], [], []>} : vector<256x4xbf16>, vector<4x32xbf16>, vector<256x32xf32> -> vector<256x32xf32>
    %118 = arith.addf %110, %117 : vector<256x32xf32>
    %c1_i32_101 = arith.constant 1 : i32
    %119 = arith.addi %85, %c1_i32_101 : i32
    %c0_102 = arith.constant 0 : index
    %120 = arith.index_cast %119 : i32 to index
    %c1_103 = arith.constant 1 : index
    %c0_104 = arith.constant 0 : index
    %121 = vector.load %arg1[%c0_102, %120, %c1_103, %c0_104] : memref<2x18x18x4xbf16, #tpu.memory_space<vmem>>, vector<2x8x16x4xbf16>
    %122 = vector.shape_cast %121 : vector<2x8x16x4xbf16> to vector<256x4xbf16>
    %c4_105 = arith.constant 4 : index
    %c0_106 = arith.constant 0 : index
    %c0_107 = arith.constant 0 : index
    %123 = vector.load %arg2[%c4_105, %c0_106, %c0_107] : memref<9x4x32xbf16, #tpu.memory_space<vmem>>, vector<1x4x32xbf16>
    %124 = vector.shape_cast %123 : vector<1x4x32xbf16> to vector<4x32xbf16>
    %cst_108 = arith.constant dense<0.000000e+00> : vector<256x32xf32>
    %125 = tpu.matmul %122, %124, %cst_108 {dimension_numbers = #tpu.dot_dimension_numbers<[1], [0], [0], [1], [0, 0, 1, 1], [], []>} : vector<256x4xbf16>, vector<4x32xbf16>, vector<256x32xf32> -> vector<256x32xf32>
    %126 = arith.addf %118, %125 : vector<256x32xf32>
    %c1_i32_109 = arith.constant 1 : i32
    %127 = arith.addi %85, %c1_i32_109 : i32
    %c0_110 = arith.constant 0 : index
    %128 = arith.index_cast %127 : i32 to index
    %c2_111 = arith.constant 2 : index
    %c0_112 = arith.constant 0 : index
    %129 = vector.load %arg1[%c0_110, %128, %c2_111, %c0_112] : memref<2x18x18x4xbf16, #tpu.memory_space<vmem>>, vector<2x8x16x4xbf16>
    %130 = vector.shape_cast %129 : vector<2x8x16x4xbf16> to vector<256x4xbf16>
    %c5_113 = arith.constant 5 : index
    %c0_114 = arith.constant 0 : index
    %c0_115 = arith.constant 0 : index
    %131 = vector.load %arg2[%c5_113, %c0_114, %c0_115] : memref<9x4x32xbf16, #tpu.memory_space<vmem>>, vector<1x4x32xbf16>
    %132 = vector.shape_cast %131 : vector<1x4x32xbf16> to vector<4x32xbf16>
    %cst_116 = arith.constant dense<0.000000e+00> : vector<256x32xf32>
    %133 = tpu.matmul %130, %132, %cst_116 {dimension_numbers = #tpu.dot_dimension_numbers<[1], [0], [0], [1], [0, 0, 1, 1], [], []>} : vector<256x4xbf16>, vector<4x32xbf16>, vector<256x32xf32> -> vector<256x32xf32>
    %134 = arith.addf %126, %133 : vector<256x32xf32>
    %c2_i32_117 = arith.constant 2 : i32
    %135 = arith.addi %85, %c2_i32_117 : i32
    %c0_118 = arith.constant 0 : index
    %136 = arith.index_cast %135 : i32 to index
    %c0_119 = arith.constant 0 : index
    %c0_120 = arith.constant 0 : index
    %137 = vector.load %arg1[%c0_118, %136, %c0_119, %c0_120] : memref<2x18x18x4xbf16, #tpu.memory_space<vmem>>, vector<2x8x16x4xbf16>
    %138 = vector.shape_cast %137 : vector<2x8x16x4xbf16> to vector<256x4xbf16>
    %c6_121 = arith.constant 6 : index
    %c0_122 = arith.constant 0 : index
    %c0_123 = arith.constant 0 : index
    %139 = vector.load %arg2[%c6_121, %c0_122, %c0_123] : memref<9x4x32xbf16, #tpu.memory_space<vmem>>, vector<1x4x32xbf16>
    %140 = vector.shape_cast %139 : vector<1x4x32xbf16> to vector<4x32xbf16>
    %cst_124 = arith.constant dense<0.000000e+00> : vector<256x32xf32>
    %141 = tpu.matmul %138, %140, %cst_124 {dimension_numbers = #tpu.dot_dimension_numbers<[1], [0], [0], [1], [0, 0, 1, 1], [], []>} : vector<256x4xbf16>, vector<4x32xbf16>, vector<256x32xf32> -> vector<256x32xf32>
    %142 = arith.addf %134, %141 : vector<256x32xf32>
    %c2_i32_125 = arith.constant 2 : i32
    %143 = arith.addi %85, %c2_i32_125 : i32
    %c0_126 = arith.constant 0 : index
    %144 = arith.index_cast %143 : i32 to index
    %c1_127 = arith.constant 1 : index
    %c0_128 = arith.constant 0 : index
    %145 = vector.load %arg1[%c0_126, %144, %c1_127, %c0_128] : memref<2x18x18x4xbf16, #tpu.memory_space<vmem>>, vector<2x8x16x4xbf16>
    %146 = vector.shape_cast %145 : vector<2x8x16x4xbf16> to vector<256x4xbf16>
    %c7_129 = arith.constant 7 : index
    %c0_130 = arith.constant 0 : index
    %c0_131 = arith.constant 0 : index
    %147 = vector.load %arg2[%c7_129, %c0_130, %c0_131] : memref<9x4x32xbf16, #tpu.memory_space<vmem>>, vector<1x4x32xbf16>
    %148 = vector.shape_cast %147 : vector<1x4x32xbf16> to vector<4x32xbf16>
    %cst_132 = arith.constant dense<0.000000e+00> : vector<256x32xf32>
    %149 = tpu.matmul %146, %148, %cst_132 {dimension_numbers = #tpu.dot_dimension_numbers<[1], [0], [0], [1], [0, 0, 1, 1], [], []>} : vector<256x4xbf16>, vector<4x32xbf16>, vector<256x32xf32> -> vector<256x32xf32>
    %150 = arith.addf %142, %149 : vector<256x32xf32>
    %c2_i32_133 = arith.constant 2 : i32
    %151 = arith.addi %85, %c2_i32_133 : i32
    %c0_134 = arith.constant 0 : index
    %152 = arith.index_cast %151 : i32 to index
    %c2_135 = arith.constant 2 : index
    %c0_136 = arith.constant 0 : index
    %153 = vector.load %arg1[%c0_134, %152, %c2_135, %c0_136] : memref<2x18x18x4xbf16, #tpu.memory_space<vmem>>, vector<2x8x16x4xbf16>
    %154 = vector.shape_cast %153 : vector<2x8x16x4xbf16> to vector<256x4xbf16>
    %c8_137 = arith.constant 8 : index
    %c0_138 = arith.constant 0 : index
    %c0_139 = arith.constant 0 : index
    %155 = vector.load %arg2[%c8_137, %c0_138, %c0_139] : memref<9x4x32xbf16, #tpu.memory_space<vmem>>, vector<1x4x32xbf16>
    %156 = vector.shape_cast %155 : vector<1x4x32xbf16> to vector<4x32xbf16>
    %cst_140 = arith.constant dense<0.000000e+00> : vector<256x32xf32>
    %157 = tpu.matmul %154, %156, %cst_140 {dimension_numbers = #tpu.dot_dimension_numbers<[1], [0], [0], [1], [0, 0, 1, 1], [], []>} : vector<256x4xbf16>, vector<4x32xbf16>, vector<256x32xf32> -> vector<256x32xf32>
    %158 = arith.addf %150, %157 : vector<256x32xf32>
    %c0_141 = arith.constant 0 : index
    %c0_142 = arith.constant 0 : index
    %159 = vector.load %arg3[%c0_141, %c0_142] : memref<1x32xf32, #tpu.memory_space<vmem>>, vector<1x32xf32>
    %160 = vector.broadcast %159 : vector<1x32xf32> to vector<256x32xf32>
    %161 = arith.addf %158, %160 : vector<256x32xf32>
    %cst_143 = arith.constant 0.000000e+00 : f32
    %162 = vector.broadcast %cst_143 : f32 to vector<256x32xf32>
    %163 = arith.maximumf %161, %162 : vector<256x32xf32>
    %164 = vector.shape_cast %163 : vector<256x32xf32> to vector<2x128x32xf32>
    %cst_144 = arith.constant dense<0.000000e+00> : vector<2x32xf32>
    %165 = vector.multi_reduction <add>, %164, %cst_144 [1] : vector<2x128x32xf32> to vector<2x32xf32>
    %166 = arith.addf %83, %165 : vector<2x32xf32>
    %c2_i32_145 = arith.constant 2 : i32
    %167 = arith.truncf %166 : vector<2x32xf32> to vector<2x32xbf16>
    %c0_146 = arith.constant 0 : index
    %c0_147 = arith.constant 0 : index
    %168 = vector.load %arg4[%c0_146, %c0_147] : memref<32x10xbf16, #tpu.memory_space<vmem>>, vector<32x10xbf16>
    %cst_148 = arith.constant dense<0.000000e+00> : vector<2x10xf32>
    %169 = tpu.matmul %167, %168, %cst_148 {dimension_numbers = #tpu.dot_dimension_numbers<[1], [0], [0], [1], [0, 0, 1, 1], [], []>} : vector<2x32xbf16>, vector<32x10xbf16>, vector<2x10xf32> -> vector<2x10xf32>
    %c0_149 = arith.constant 0 : index
    %c0_150 = arith.constant 0 : index
    %170 = vector.load %arg5[%c0_149, %c0_150] : memref<1x10xf32, #tpu.memory_space<vmem>>, vector<1x10xf32>
    %171 = vector.broadcast %170 : vector<1x10xf32> to vector<2x10xf32>
    %172 = arith.addf %169, %171 : vector<2x10xf32>
    %c0_151 = arith.constant 0 : index
    %c0_152 = arith.constant 0 : index
    %173 = vector.load %arg6[%c0_151, %c0_152] : memref<2x10xf32, #tpu.memory_space<vmem>>, vector<2x10xf32>
    tpu.vector_store %arg6[%c0_151, %c0_152], %172 {strides = array<i32>} : memref<2x10xf32, #tpu.memory_space<vmem>>, vector<2x10xf32>,
    return
  }
  func.func @transform_0(%arg0: i32) -> (i32, i32, i32, i32) {
    %c0_i32 = arith.constant 0 : i32
    %c0_i32_0 = arith.constant 0 : i32
    %c0_i32_1 = arith.constant 0 : i32
    %c0_i32_2 = arith.constant 0 : i32
    return %arg0, %c0_i32, %c0_i32_0, %c0_i32_1 : i32, i32, i32, i32
  }
  func.func @transform_1(%arg0: i32) -> (i32, i32, i32) {
    %c0_i32 = arith.constant 0 : i32
    %c0_i32_0 = arith.constant 0 : i32
    %c0_i32_1 = arith.constant 0 : i32
    %c0_i32_2 = arith.constant 0 : i32
    return %c0_i32, %c0_i32_0, %c0_i32_1 : i32, i32, i32
  }
  func.func @transform_2(%arg0: i32) -> (i32, i32) {
    %c0_i32 = arith.constant 0 : i32
    %c0_i32_0 = arith.constant 0 : i32
    %c0_i32_1 = arith.constant 0 : i32
    return %c0_i32, %c0_i32_0 : i32, i32
  }
  func.func @transform_3(%arg0: i32) -> (i32, i32) {
    %c0_i32 = arith.constant 0 : i32
    %c0_i32_0 = arith.constant 0 : i32
    %c0_i32_1 = arith.constant 0 : i32
    return %c0_i32, %c0_i32_0 : i32, i32
  }
  func.func @transform_4(%arg0: i32) -> (i32, i32) {
    %c0_i32 = arith.constant 0 : i32
    %c0_i32_0 = arith.constant 0 : i32
    %c0_i32_1 = arith.constant 0 : i32
    return %c0_i32, %c0_i32_0 : i32, i32
  }
  func.func @transform_5(%arg0: i32) -> (i32, i32) {
    %c0_i32 = arith.constant 0 : i32
    %c0_i32_0 = arith.constant 0 : i32
    return %arg0, %c0_i32 : i32, i32
  }
}

</mosaic_0001>

<bundles_post_ra>
// kernel: tpu_custom_call.1
= control target key start
LH: loop header
LB: loop body
LE: loop exit
PB: predicated region body
PF: predicated region fallthrough
CT: control target
= control target key end

     0   :  { %vm560_vm0 = vcmask 1041408   ;;  %vm511_vm1 = vcmask 31744   ;;  %vm74_vm2 = vsmask.f32 3328  ;;  %vm75_vm3 = vsmask.f32 7440  ;;  %s17568_s0 = inlined_call_operand.vmem [shape: bf16[2,18,18,4], index: 0, kind: input, shape index: {}]   ;;  %s17569_s1 = inlined_call_operand.vmem [shape: bf16[9,4,32], index: 1, kind: input, shape index: {}]   ;;  %s17570_s2 = inlined_call_operand.vmem [shape: f32[1,32], index: 2, kind: input, shape index: {}]   ;;  %s17571_s3 = inlined_call_operand.vmem [shape: bf16[32,10], index: 3, kind: input, shape index: {}]   ;;  %s17572_s4 = inlined_call_operand.vmem [shape: f32[1,10], index: 4, kind: input, shape index: {}]   ;;  %s17573_s5 = inlined_call_operand.hbm [shape: f32[2,10], index: 5, kind: output, shape index: {}]  }
   0x1   :  { %v57_v0 = vld [vmem:[%s17569_s1] sm:$0x3]  ;;  %v9490_v1 = vld [vmem:[%s17569_s1 + $0x2] sm:$0x3]  ;;  %v11806_v4 = vld [vmem:[%s17568_s0 + $0x4] sm:$0xf] }
   0x2   :  { %11553 = vmatprep.subr.msk.bf16.mxu1 %vm560_vm0, %v57_v0  ;;  %v11797_v2 = vsel %vm560_vm0, %v57_v0, 0  ;;  %11552 = vmatprep.subr.msk.bf16.mxu0 %vm560_vm0, %v9490_v1  ;;  %v25_v3 = vld [vmem:[%s17568_s0] sm:$0xf]  ;;  %v11809_v5 = vsel %vm560_vm0, %v9490_v1, 0  ;;  %v91_v8 = vshrl.u32 %v11806_v4, 16  ;;  %v17575_v11 = vrot.slane %v11806_v4, 5  ;;  %vm11847_vm4 = vmor %vm74_vm2, %vm75_vm3 }
   0x3   :  { %10967 = vmatpush3.bf16.msra.mxu1 %v11797_v2  ;;  %v78_v6 = vshrl.u32 %v25_v3, 16  ;;  %v81_v7 = vshll.u32 %v25_v3, 16  ;;  %v9523_v9 = vcombine.low %v25_v3, %v11806_v4  ;;  %10933 = vmatpush3.bf16.msra.mxu0 %v11809_v5  ;;  %v27_v10 = vld [vmem:[%s17568_s0 + $0xc] sm:$0xf]  ;;  %v11822_v12 = vld [vmem:[%s17568_s0 + $0x10] sm:$0xf] }
   0x4   :  { %v102_v13 = vshrl.u32 %v27_v10, 16  ;;  %v105_v14 = vshll.u32 %v27_v10, 16  ;;  %v87_v15 = vshll.u32 %v11806_v4, 16  ;;  %v115_v18 = vshrl.u32 %v11822_v12, 16  ;;  %v11831_v20 = vld [vmem:[%s17568_s0 + $0x8] sm:$0x1] }
   0x5   :  { %v80_v16 = vrot.slane %v78_v6, 4  ;;  %v83_v17 = vrot.slane %v81_v7, 5  ;;  %10968 = vmatprep.mubr.msk.bf16.mxu1 %vm511_vm1, %v9523_v9  ;;  %v9524_v19 = vcombine.low %v27_v10, %v11822_v12  ;;  %v11835_v21 = vrot.slane %v17575_v11, 4  ;;  %v9571_v25 = vld [vmem:[%s17569_s1 + $0x4] sm:$0x3] }
   0x6   :  { %v104_v22 = vrot.slane %v102_v13, 4  ;;  %v107_v23 = vrot.slane %v105_v14, 5  ;;  %v17574_v24 = vrot.slane %v11822_v12, 5  ;;  %v89_v27 = vrot.slane %v87_v15, 5  ;;  %11554 = vmatprep.subr.msk.bf16.mxu0 %vm560_vm0, %v9571_v25  ;;  %v11856_v33 = vld [vmem:[%s17568_s0 + $0x14] sm:$0x1] }
   0x7   :  { %10969 = vmatmul.mubr.msk.bf16.vlgmr.msra.gmra.mxu1 %vm511_vm1, %v9524_v19  ;;  %v84_v26 = vor.u32 %v83_v17, %v80_v16  ;;  %v93_v30 = vrot.slane %v91_v8, 4  ;;  %v97_v31 = vshll.u32 %v11831_v20, 16  ;;  %v111_v36 = vshll.u32 %v11822_v12, 16  ;;  %v9636_v38 = vld [vmem:[%s17569_s1 + $0x6] sm:$0x3] }
   0x8   :  { %v11845_v28 = vrot.slane %v17574_v24, 4  ;;  %v108_v35 = vor.u32 %v107_v23, %v104_v22  ;;  %v117_v37 = vrot.slane %v115_v18, 4  ;;  %v121_v41 = vshll.u32 %v11856_v33, 16  ;;  %11555 = vmatprep.subr.msk.bf16.mxu1 %vm560_vm0, %v9636_v38  ;;  %v29_v43 = vld [vmem:[%s17568_s0 + $0x18] sm:$0xf] }
   0x9   :  { %v85_v34 = vrot.slane %v84_v26, 4  ;;  %v94_v39 = vor.u32 %v93_v30, %v89_v27  ;;  %v99_v40 = vrot.slane %v97_v31, 5  ;;  %v113_v46 = vrot.slane %v111_v36, 5  ;;  %v11876_v48 = vld [vmem:[%s17568_s0 + $0x1c] sm:$0xf] }
   0xa   :  { %v109_v45 = vrot.slane %v108_v35, 4  ;;  %v11871_v47 = vsel %vm560_vm0, %v9571_v25, 0  ;;  %v123_v50 = vrot.slane %v121_v41, 5  ;;  %v11879_v51 = vsel %vm560_vm0, %v9636_v38, 0  ;;  %v31_v53 = vld [vmem:[%s17568_s0 + $0x24] sm:$0xf] }
   0xb   :  { %v90_v44 = vsel %vm11847_vm4, %v85_v34, %v89_v27  ;;  %v95_v49 = vrot.slane %v94_v39, 4  ;;  %17648 = vst [vmem:[#allocation5_spill] sm:$0xff] %v11879_v51  ;;  %v126_v52 = vshrl.u32 %v29_v43, 16  ;;  %v118_v55 = vor.u32 %v117_v37, %v113_v46  ;;  %11035 = vmatpush3.bf16.msra.mxu1 %v11879_v51  ;;  %v11891_v58 = vld [vmem:[%s17568_s0 + $0x28] sm:$0xf] }
   0xc   :  { %v114_v54 = vsel %vm11847_vm4, %v109_v45, %v113_v46  ;;  %v129_v56 = vshll.u32 %v29_v43, 16  ;;  %v139_v57 = vshrl.u32 %v11876_v48, 16  ;;  %v9525_v61 = vcombine.low %v29_v43, %v11876_v48  ;;  %v11899_v6 = vld [vmem:[%s17568_s0 + $0x20] sm:$0x1]  ;;  %v11908_v13 = vld [vmem:[%s17568_s0 + $0x2c] sm:$0x1] }
   0xd   :  { %v100_v59 = vsel %vm11847_vm4, %v95_v49, %v99_v40  ;;  %v128_v60 = vrot.slane %v126_v52, 4  ;;  %v150_v62 = vshrl.u32 %v31_v53, 16  ;;  %v119_v0 = vrot.slane %v118_v55, 4  ;;  %v33_v18 = vld [vmem:[%s17568_s0 + $0x30] sm:$0xf] }
   0xe   :  { %v9491_v63 = vcombine.low %v90_v44, %v100_v59  ;;  %v131_v1 = vrot.slane %v129_v56, 5  ;;  %v153_v3 = vshll.u32 %v31_v53, 16  ;;  %10972 = vmatprep.mubr.msk.bf16.mxu1 %vm511_vm1, %v9525_v61  ;;  %v163_v8 = vshrl.u32 %v11891_v58, 16  ;;  %v11923_v34 = vld [vmem:[%s17568_s0 + $0x34] sm:$0xf] }
   0xf   :  { %v152_v7 = vrot.slane %v150_v62, 4  ;;  %v9526_v9 = vcombine.low %v31_v53, %v11891_v58  ;;  %v135_v10 = vshll.u32 %v11876_v48, 16  ;;  %v124_v14 = vsel %vm11847_vm4, %v119_v0, %v123_v50  ;;  %v35_v39 = vld [vmem:[%s17568_s0 + $0x3c] sm:$0xf]  ;;  %v11935_v45 = vld [vmem:[%s17568_s0 + $0x40] sm:$0xf] }
  0x10   :  { %10934 = vmatprep.mubr.msk.bf16.mxu0 %vm511_vm1, %v9491_v63  ;;  %v155_v15 = vrot.slane %v153_v3, 5  ;;  %v132_v16 = vor.u32 %v131_v1, %v128_v60  ;;  %v141_v17 = vrot.slane %v139_v57, 4  ;;  %v9492_v19 = vcombine.low %v114_v54, %v124_v14  ;;  %v11947_v62 = vld [vmem:[%s17568_s0 + $0x38] sm:$0x1] }
  0x11   :  { %10973 = vmatmul.mubr.msk.bf16.gmra.mxu1 %vm511_vm1, %v9526_v9  ;;  %v137_v22 = vrot.slane %v135_v10, 5  ;;  %v145_v23 = vshll.u32 %v11899_v6, 16  ;;  %v159_v25 = vshll.u32 %v11891_v58, 16  ;;  %v165_v30 = vrot.slane %v163_v8, 4 }
  0x12   :  { %v133_v26 = vrot.slane %v132_v16, 4  ;;  %v156_v27 = vor.u32 %v155_v15, %v152_v7  ;;  %v169_v31 = vshll.u32 %v11908_v13, 16  ;;  %10935 = vmatmul.mubr.msk.bf16.vlgmr.msra.gmra.mxu0 %vm511_vm1, %v9492_v19  ;;  %v174_v38 = vshrl.u32 %v33_v18, 16  ;;  %v11954_v7 = vld [vmem:[%s17568_s0 + $0x44] sm:$0x1] }
  0x13   :  { %v142_v35 = vor.u32 %v141_v17, %v137_v22  ;;  %v147_v36 = vrot.slane %v145_v23, 5  ;;  %v161_v37 = vrot.slane %v159_v25, 5  ;;  %11001 = vmatpush3.bf16.msra.mxu0 %v11871_v47  ;;  %v177_v44 = vshll.u32 %v33_v18, 16  ;;  %v37_v15 = vld [vmem:[%s17568_s0 + $0x48] sm:$0xf] }
  0x14   :  { %v138_v40 = vsel %vm11847_vm4, %v133_v26, %v137_v22  ;;  %v157_v41 = vrot.slane %v156_v27, 4  ;;  %v171_v43 = vrot.slane %v169_v31, 5  ;;  %v176_v50 = vrot.slane %v174_v38, 4  ;;  %v11970_v27 = vld [vmem:[%s17568_s0 + $0x4c] sm:$0xf] }
  0x15   :  { %v143_v46 = vrot.slane %v142_v35, 4  ;;  %v166_v49 = vor.u32 %v165_v30, %v161_v37  ;;  %v187_v52 = vshrl.u32 %v11923_v34, 16  ;;  %v179_v54 = vrot.slane %v177_v44, 5 }
  0x16   :  { %v162_v53 = vsel %vm11847_vm4, %v157_v41, %v161_v37  ;;  %v9527_v55 = vcombine.low %v33_v18, %v11923_v34  ;;  %v198_v56 = vshrl.u32 %v35_v39, 16  ;;  %v201_v60 = vshll.u32 %v35_v39, 16  ;;  %v39_v37 = vld [vmem:[%s17568_s0 + $0x54] sm:$0xf] }
  0x17   :  { %v148_v57 = vsel %vm11847_vm4, %v143_v46, %v147_v36  ;;  %v167_v59 = vrot.slane %v166_v49, 4  ;;  %v211_v61 = vshrl.u32 %v11935_v45, 16  ;;  %v9528_v1 = vcombine.low %v35_v39, %v11935_v45 }
  0x18   :  { %v9493_v63 = vcombine.low %v138_v40, %v148_v57  ;;  %10976 = vmatprep.mubr.msk.bf16.mxu1 %vm511_vm1, %v9527_v55  ;;  %v200_v0 = vrot.slane %v198_v56, 4  ;;  %v180_v3 = vor.u32 %v179_v54, %v176_v50  ;;  %v203_v9 = vrot.slane %v201_v60, 5 }
  0x19   :  { %v172_v8 = vsel %vm11847_vm4, %v167_v59, %v171_v43  ;;  %v183_v10 = vshll.u32 %v11923_v34, 16  ;;  %v189_v14 = vrot.slane %v187_v52, 4  ;;  %10977 = vmatmul.mubr.msk.bf16.gmra.mxu1 %vm511_vm1, %v9528_v1  ;;  %v193_v18 = vshll.u32 %v11947_v62, 16  ;;  %v11981_v43 = vld [vmem:[%s17568_s0 + $0x58] sm:$0xf] }
  0x1a   :  { %10938 = vmatprep.mubr.msk.bf16.mxu0 %vm511_vm1, %v9493_v63  ;;  %v9494_v16 = vcombine.low %v162_v53, %v172_v8  ;;  %v181_v17 = vrot.slane %v180_v3, 4  ;;  %v207_v19 = vshll.u32 %v11935_v45, 16  ;;  %v204_v23 = vor.u32 %v203_v9, %v200_v0  ;;  %v12001_v8 = vld [vmem:[%s17568_s0 + $0x5c] sm:$0x1] }
  0x1b   :  { %v185_v22 = vrot.slane %v183_v10, 5  ;;  %v213_v25 = vrot.slane %v211_v61, 4  ;;  %v217_v26 = vshll.u32 %v11954_v7, 16  ;;  %v195_v30 = vrot.slane %v193_v18, 5  ;;  %v11992_v61 = vld [vmem:[%s17568_s0 + $0x50] sm:$0x1] }
  0x1c   :  { %10939 = vmatmul.mubr.msk.bf16.gmra.mxu0 %vm511_vm1, %v9494_v16  ;;  %v209_v31 = vrot.slane %v207_v19, 5  ;;  %v222_v35 = vshrl.u32 %v37_v15, 16  ;;  %v225_v36 = vshll.u32 %v37_v15, 16  ;;  %v205_v40 = vrot.slane %v204_v23, 4  ;;  %v41_v16 = vld [vmem:[%s17568_s0 + $0xd8] sm:$0xf] }
  0x1d   :  { %v186_v38 = vsel %vm11847_vm4, %v181_v17, %v185_v22  ;;  %v190_v39 = vor.u32 %v189_v14, %v185_v22  ;;  %v219_v41 = vrot.slane %v217_v26, 5  ;;  %v235_v50 = vshrl.u32 %v11970_v27, 16 }
  0x1e   :  { %v214_v44 = vor.u32 %v213_v25, %v209_v31  ;;  %v224_v46 = vrot.slane %v222_v35, 4  ;;  %v227_v49 = vrot.slane %v225_v36, 5  ;;  %v210_v53 = vsel %vm11847_vm4, %v205_v40, %v209_v31  ;;  %v12016_v31 = vld [vmem:[%s17568_s0 + $0xdc] sm:$0xf] }
  0x1f   :  { %v191_v52 = vrot.slane %v190_v39, 4  ;;  %v9529_v54 = vcombine.low %v37_v15, %v11970_v27  ;;  %v246_v55 = vshrl.u32 %v39_v37, 16  ;;  %v249_v57 = vshll.u32 %v39_v37, 16  ;;  %v43_v39 = vld [vmem:[%s17568_s0 + $0xe4] sm:$0xf] }
  0x20   :  { %v215_v56 = vrot.slane %v214_v44, 4  ;;  %v259_v59 = vshrl.u32 %v11981_v43, 16  ;;  %v9530_v60 = vcombine.low %v39_v37, %v11981_v43  ;;  %v228_v1 = vor.u32 %v227_v49, %v224_v46  ;;  %v12027_v49 = vld [vmem:[%s17568_s0 + $0xe8] sm:$0xf] }
  0x21   :  { %v196_v63 = vsel %vm11847_vm4, %v191_v52, %v195_v30  ;;  %10980 = vmatprep.mubr.msk.bf16.mxu1 %vm511_vm1, %v9529_v54  ;;  %v248_v0 = vrot.slane %v246_v55, 4  ;;  %v231_v3 = vshll.u32 %v11970_v27, 16  ;;  %v251_v14 = vrot.slane %v249_v57, 5 }
  0x22   :  { %v9495_v9 = vcombine.low %v186_v38, %v196_v63  ;;  %v220_v10 = vsel %vm11847_vm4, %v215_v56, %v219_v41  ;;  %10981 = vmatmul.mubr.msk.bf16.gmra.mxu1 %vm511_vm1, %v9530_v60  ;;  %v237_v15 = vrot.slane %v235_v50, 4  ;;  %v229_v18 = vrot.slane %v228_v1, 4  ;;  %v12036_v60 = vld [vmem:[%s17568_s0 + $0xe0] sm:$0x1] }
  0x23   :  { %v9496_v17 = vcombine.low %v210_v53, %v220_v10  ;;  %v233_v19 = vrot.slane %v231_v3, 5  ;;  %v241_v22 = vshll.u32 %v11992_v61, 16  ;;  %v252_v23 = vor.u32 %v251_v14, %v248_v0  ;;  %v45_v10 = vld [vmem:[%s17568_s0 + $0xf0] sm:$0xf] }
  0x24   :  { %10942 = vmatprep.mubr.msk.bf16.mxu0 %vm511_vm1, %v9495_v9  ;;  %v255_v25 = vshll.u32 %v11981_v43, 16  ;;  %v261_v26 = vrot.slane %v259_v59, 4  ;;  %v265_v30 = vshll.u32 %v12001_v8, 16  ;;  %v270_v38 = vshrl.u32 %v41_v16, 16  ;;  %v12046_v9 = vld [vmem:[%s17568_s0 + $0xec] sm:$0x1] }
  0x25   :  { %10943 = vmatmul.mubr.msk.bf16.gmra.mxu0 %vm511_vm1, %v9496_v17  ;;  %v234_v35 = vsel %vm11847_vm4, %v229_v18, %v233_v19  ;;  %v238_v36 = vor.u32 %v237_v15, %v233_v19  ;;  %v243_v37 = vrot.slane %v241_v22, 5  ;;  %v253_v40 = vrot.slane %v252_v23, 4  ;;  %v12054_v18 = vld [vmem:[%s17568_s0 + $0xf4] sm:$0xf] }
  0x26   :  { %v257_v41 = vrot.slane %v255_v25, 5  ;;  %v267_v44 = vrot.slane %v265_v30, 5  ;;  %v273_v46 = vshll.u32 %v41_v16, 16  ;;  %v272_v52 = vrot.slane %v270_v38, 4  ;;  %v47_v38 = vld [vmem:[%s17568_s0 + $0xfc] sm:$0xf] }
  0x27   :  { %v239_v50 = vrot.slane %v238_v36, 4  ;;  %v283_v53 = vshrl.u32 %v12016_v31, 16  ;;  %v9531_v54 = vcombine.low %v41_v16, %v12016_v31  ;;  %v294_v59 = vshrl.u32 %v43_v39, 16 }
  0x28   :  { %v258_v55 = vsel %vm11847_vm4, %v253_v40, %v257_v41  ;;  %v262_v56 = vor.u32 %v261_v26, %v257_v41  ;;  %v275_v57 = vrot.slane %v273_v46, 5  ;;  %v297_v0 = vshll.u32 %v43_v39, 16  ;;  %v12062_v26 = vld [vmem:[%s17569_s1 + $0x8] sm:$0x3] }
  0x29   :  { %v244_v63 = vsel %vm11847_vm4, %v239_v50, %v243_v37  ;;  %10984 = vmatprep.mubr.msk.bf16.mxu1 %vm511_vm1, %v9531_v54  ;;  %v307_v1 = vshrl.u32 %v12027_v49, 16  ;;  %v9532_v3 = vcombine.low %v43_v39, %v12027_v49  ;;  %v296_v16 = vrot.slane %v294_v59, 4  ;;  %11556 = vmatprep.subr.msk.bf16.mxu0 %vm560_vm0, %v12062_v26  ;;  %v12076_v50 = vld [vmem:[%s17568_s0 + $0x100] sm:$0xf] }
  0x2a   :  { %v9497_v14 = vcombine.low %v234_v35, %v244_v63  ;;  %v263_v15 = vrot.slane %v262_v56, 4  ;;  %v276_v17 = vor.u32 %v275_v57, %v272_v52  ;;  %v299_v19 = vrot.slane %v297_v0, 5 }
  0x2b   :  { %10985 = vmatmul.mubr.msk.bf16.gmra.mxu1 %vm511_vm1, %v9532_v3  ;;  %v279_v22 = vshll.u32 %v12016_v31, 16  ;;  %v285_v23 = vrot.slane %v283_v53, 4  ;;  %v289_v25 = vshll.u32 %v12036_v60, 16  ;;  %v303_v36 = vshll.u32 %v12027_v49, 16 }
  0x2c   :  { %10946 = vmatprep.mubr.msk.bf16.mxu0 %vm511_vm1, %v9497_v14  ;;  %v268_v30 = vsel %vm11847_vm4, %v263_v15, %v267_v44  ;;  %v277_v35 = vrot.slane %v276_v17, 4  ;;  %v309_v37 = vrot.slane %v307_v1, 4  ;;  %v300_v46 = vor.u32 %v299_v19, %v296_v16  ;;  %v12081_v44 = vld [vmem:[%s17569_s1 + $0xa] sm:$0x3]  ;;  %v12093_v15 = vld [vmem:[%s17568_s0 + $0xf8] sm:$0x1] }
  0x2d   :  { %v9498_v39 = vcombine.low %v258_v55, %v268_v30  ;;  %v281_v40 = vrot.slane %v279_v22, 5  ;;  %v291_v41 = vrot.slane %v289_v25, 5  ;;  %v305_v52 = vrot.slane %v303_v36, 5  ;;  %11557 = vmatprep.subr.msk.bf16.mxu1 %vm560_vm0, %v12081_v44 }
  0x2e   :  { %v313_v53 = vshll.u32 %v12046_v9, 16  ;;  %v318_v54 = vshrl.u32 %v45_v10, 16  ;;  %v321_v56 = vshll.u32 %v45_v10, 16  ;;  %v301_v59 = vrot.slane %v300_v46, 4 }
  0x2f   :  { %10947 = vmatmul.mubr.msk.bf16.gmra.mxu0 %vm511_vm1, %v9498_v39  ;;  %v282_v55 = vsel %vm11847_vm4, %v277_v35, %v281_v40  ;;  %v286_v57 = vor.u32 %v285_v23, %v281_v40  ;;  %v331_v63 = vshrl.u32 %v12054_v18, 16  ;;  %v310_v0 = vor.u32 %v309_v37, %v305_v52  ;;  %v12101_v23 = vld [vmem:[%s17568_s0 + $0x104] sm:$0x1] }
  0x30   :  { %v315_v1 = vrot.slane %v313_v53, 5  ;;  %v320_v3 = vrot.slane %v318_v54, 4  ;;  %v323_v14 = vrot.slane %v321_v56, 5  ;;  %v306_v17 = vsel %vm11847_vm4, %v301_v59, %v305_v52 }
  0x31   :  { %v287_v16 = vrot.slane %v286_v57, 4  ;;  %v9533_v19 = vcombine.low %v45_v10, %v12054_v18  ;;  %v342_v22 = vshrl.u32 %v47_v38, 16  ;;  %v311_v25 = vrot.slane %v310_v0, 4  ;;  %v51_v0 = vld [vmem:[%s17568_s0 + $0x114] sm:$0xf] }
  0x32   :  { %v345_v30 = vshll.u32 %v47_v38, 16  ;;  %v355_v35 = vshrl.u32 %v12076_v50, 16  ;;  %v9534_v36 = vcombine.low %v47_v38, %v12076_v50  ;;  %v324_v40 = vor.u32 %v323_v14, %v320_v3  ;;  %v49_v38 = vld [vmem:[%s17568_s0 + $0x108] sm:$0xf] }
  0x33   :  { %v292_v37 = vsel %vm11847_vm4, %v287_v16, %v291_v41  ;;  %10988 = vmatprep.mubr.msk.bf16.mxu1 %vm511_vm1, %v9533_v19  ;;  %v344_v39 = vrot.slane %v342_v22, 4  ;;  %v327_v10 = vshll.u32 %v12054_v18, 16  ;;  %v316_v52 = vsel %vm11847_vm4, %v311_v25, %v315_v1  ;;  %v12118_v41 = vld [vmem:[%s17568_s0 + $0x10c] sm:$0xf] }
  0x34   :  { %v9499_v46 = vcombine.low %v282_v55, %v292_v37  ;;  %v347_v53 = vrot.slane %v345_v30, 5  ;;  %10989 = vmatmul.mubr.msk.bf16.gmra.mxu1 %vm511_vm1, %v9534_v36  ;;  %v333_v54 = vrot.slane %v331_v63, 4  ;;  %v9500_v56 = vcombine.low %v306_v17, %v316_v52  ;;  %v12140_v52 = vld [vmem:[%s17568_s0 + $0x110] sm:$0x1] }
  0x35   :  { %v325_v57 = vrot.slane %v324_v40, 4  ;;  %v329_v59 = vrot.slane %v327_v10, 5  ;;  %v337_v55 = vshll.u32 %v12093_v15, 16  ;;  %v351_v1 = vshll.u32 %v12076_v50, 16 }
  0x36   :  { %10950 = vmatprep.mubr.msk.bf16.mxu0 %vm511_vm1, %v9499_v46  ;;  %v348_v63 = vor.u32 %v347_v53, %v344_v39  ;;  %v357_v3 = vrot.slane %v355_v35, 4  ;;  %v361_v14 = vshll.u32 %v12101_v23, 16  ;;  %v366_v22 = vshrl.u32 %v49_v38, 16  ;;  %v12133_v39 = vld [vmem:[%s17568_s0 + $0x118] sm:$0xf] }
  0x37   :  { %10951 = vmatmul.mubr.msk.bf16.gmra.mxu0 %vm511_vm1, %v9500_v56  ;;  %v330_v16 = vsel %vm11847_vm4, %v325_v57, %v329_v59  ;;  %v334_v17 = vor.u32 %v333_v54, %v329_v59  ;;  %v339_v19 = vrot.slane %v337_v55, 5  ;;  %v353_v30 = vrot.slane %v351_v1, 5  ;;  %v12152_v1 = vld [vmem:[%s17568_s0 + $0x11c] sm:$0x1] }
  0x38   :  { %v349_v25 = vrot.slane %v348_v63, 4  ;;  %v363_v36 = vrot.slane %v361_v14, 5  ;;  %v369_v37 = vshll.u32 %v49_v38, 16  ;;  %v368_v40 = vrot.slane %v366_v22, 4 }
  0x39   :  { %v335_v35 = vrot.slane %v334_v17, 4  ;;  %v379_v10 = vshrl.u32 %v12118_v41, 16  ;;  %v9535_v46 = vcombine.low %v49_v38, %v12118_v41  ;;  %v358_v54 = vor.u32 %v357_v3, %v353_v30 }
  0x3a   :  { %v354_v53 = vsel %vm11847_vm4, %v349_v25, %v353_v30  ;;  %v371_v56 = vrot.slane %v369_v37, 5  ;;  %v390_v57 = vshrl.u32 %v51_v0, 16  ;;  %v393_v55 = vshll.u32 %v51_v0, 16  ;;  %v12160_v25 = vld [vmem:[%s17568_s0 + $0x124] sm:$0xf] }
  0x3b   :  { %v340_v59 = vsel %vm11847_vm4, %v335_v35, %v339_v19  ;;  %10992 = vmatprep.mubr.msk.bf16.mxu1 %vm511_vm1, %v9535_v46  ;;  %v403_v63 = vshrl.u32 %v12133_v39, 16  ;;  %v9536_v38 = vcombine.low %v51_v0, %v12133_v39  ;;  %v359_v17 = vrot.slane %v358_v54, 4  ;;  %v53_v19 = vld [vmem:[%s17568_s0 + $0x120] sm:$0xf] }
  0x3c   :  { %v9501_v14 = vcombine.low %v330_v16, %v340_v59  ;;  %v392_v3 = vrot.slane %v390_v57, 4  ;;  %v372_v22 = vor.u32 %v371_v56, %v368_v40  ;;  %v395_v30 = vrot.slane %v393_v55, 5 }
  0x3d   :  { %10993 = vmatmul.mubr.msk.bf16.gmra.mxu1 %vm511_vm1, %v9536_v38  ;;  %v375_v0 = vshll.u32 %v12118_v41, 16  ;;  %v381_v37 = vrot.slane %v379_v10, 4  ;;  %v385_v16 = vshll.u32 %v12140_v52, 16  ;;  %v364_v35 = vsel %vm11847_vm4, %v359_v17, %v363_v36 }
  0x3e   :  { %10954 = vmatprep.mubr.msk.bf16.mxu0 %vm511_vm1, %v9501_v14  ;;  %v373_v40 = vrot.slane %v372_v22, 4  ;;  %v399_v46 = vshll.u32 %v12133_v39, 16  ;;  %v405_v54 = vrot.slane %v403_v63, 4  ;;  %v9502_v56 = vcombine.low %v354_v53, %v364_v35  ;;  %v55_v14 = vld [vmem:[%s17568_s0 + $0x12c] sm:$0xf] }
  0x3f   :  { %v377_v57 = vrot.slane %v375_v0, 5  ;;  %v387_v59 = vrot.slane %v385_v16, 5  ;;  %v396_v55 = vor.u32 %v395_v30, %v392_v3  ;;  %v409_v38 = vshll.u32 %v12152_v1, 16  ;;  %v12180_v3 = vld [vmem:[%s17568_s0 + $0x130] sm:$0xf] }
  0x40   :  { %v401_v24 = vrot.slane %v399_v46, 5  ;;  %v414_v11 = vshrl.u32 %v53_v19, 16  ;;  %v417_v10 = vshll.u32 %v53_v19, 16  ;;  %10955 = vmatmul.mubr.msk.bf16.gmra.mxu0 %vm511_vm1, %v9502_v56  ;;  %v427_v53 = vshrl.u32 %v12160_v25, 16  ;;  %v11589_v35 = vld [vmem:[%s17568_s0 + $0xc] sm:$0xff]  }
  0x41   :  { %v378_v36 = vsel %vm11847_vm4, %v373_v40, %v377_v57  ;;  %v382_v17 = vor.u32 %v381_v37, %v377_v57  ;;  %v397_v63 = vrot.slane %v396_v55, 4  ;;  %v411_v30 = vrot.slane %v409_v38, 5 }
  0x42   :  { %v406_v22 = vor.u32 %v405_v54, %v401_v24  ;;  %v416_v0 = vrot.slane %v414_v11, 4  ;;  %v419_v16 = vrot.slane %v417_v10, 5  ;;  %v9537_v40 = vcombine.low %v53_v19, %v12160_v25  ;;  %v12193_v11 = vld [vmem:[%s17568_s0 + $0x128] sm:$0x1] }
  0x43   :  { %v383_v46 = vrot.slane %v382_v17, 4  ;;  %v402_v37 = vsel %vm11847_vm4, %v397_v63, %v401_v24  ;;  %v438_v56 = vshrl.u32 %v55_v14, 16  ;;  %v441_v55 = vshll.u32 %v55_v14, 16  ;;  %v12202_v17 = vld [vmem:[%s17568_s0 + $0x134] sm:$0x1] }
  0x44   :  { %v407_v57 = vrot.slane %v406_v22, 4  ;;  %v451_v42 = vshrl.u32 %v12180_v3, 16  ;;  %v9538_v54 = vcombine.low %v55_v14, %v12180_v3  ;;  %10996 = vmatprep.mubr.msk.bf16.mxu1 %vm511_vm1, %v9537_v40  ;;  %v420_v10 = vor.u32 %v419_v16, %v416_v0 }
  0x45   :  { %v388_v38 = vsel %vm11847_vm4, %v383_v46, %v387_v59  ;;  %v440_v24 = vrot.slane %v438_v56, 4  ;;  %v423_v19 = vshll.u32 %v12160_v25, 16  ;;  %v443_v22 = vrot.slane %v441_v55, 5  ;;  %v1017_v59 = vld [vmem:[%s17568_s0] sm:$0xe] }
  0x46   :  { %v9503_v14 = vcombine.low %v378_v36, %v388_v38  ;;  %v412_v63 = vsel %vm11847_vm4, %v407_v57, %v411_v30  ;;  %10997 = vmatmul.mubr.msk.bf16.gmra.mxu1 %vm511_vm1, %v9538_v54  ;;  %v429_v32 = vrot.slane %v427_v53, 4  ;;  %v421_v16 = vrot.slane %v420_v10, 4  ;;  %v1018_v53 = vld [vmem:[%s17568_s0 + $0xc] sm:$0xe] }
  0x47   :  { %v9504_v0 = vcombine.low %v402_v37, %v412_v63  ;;  %v425_v46 = vrot.slane %v423_v19, 5  ;;  %v433_v40 = vshll.u32 %v12193_v11, 16  ;;  %11036 = vmatprep.mubr.msk.bf16.mxu1 %vm511_vm1, %v11589_v35  ;;  %v444_v36 = vor.u32 %v443_v22, %v440_v24  ;;  %v11591_v22 = vld [vmem:[%s17568_s0 + $0x24] sm:$0xff]  }
  0x48   :  { %10958 = vmatprep.mubr.msk.bf16.mxu0 %vm511_vm1, %v9503_v14  ;;  %v447_v30 = vshll.u32 %v12180_v3, 16  ;;  %v453_v56 = vrot.slane %v451_v42, 4  ;;  %v457_v57 = vshll.u32 %v12202_v17, 16  ;;  %vm1065_vm5 = vcmask 1042432   ;;  %v11590_v42 = vld [vmem:[%s17568_s0 + $0x18] sm:$0xff]  }
  0x49   :  { %10959 = vmatmul.mubr.msk.bf16.gmra.mxu0 %vm511_vm1, %v9504_v0  ;;  %v426_v37 = vsel %vm11847_vm4, %v421_v16, %v425_v46  ;;  %v430_v55 = vor.u32 %v429_v32, %v425_v46  ;;  %v435_v54 = vrot.slane %v433_v40, 5  ;;  %v445_v35 = vrot.slane %v444_v36, 4  ;;  %v1019_v36 = vld [vmem:[%s17568_s0 + $0x18] sm:$0xe] }
  0x4a   :  { %v449_v38 = vrot.slane %v447_v30, 5  ;;  %v459_v24 = vrot.slane %v457_v57, 5  ;;  %vm1066_vm6 = vcmask 1046532   ;;  %v17649_v19 = vmov 0  ;;  %v1020_v30 = vld [vmem:[%s17568_s0 + $0x24] sm:$0xe] }
  0x4b   :  { %v431_v10 = vrot.slane %v430_v55, 4  ;;  %vm12224_vm7 = vmor %vm1065_vm5, %vm1066_vm6  ;;  %v9555_v14 = vrot.slane %v1017_v59, 9  ;;  %v9556_v63 = vrot.slane %v1018_v53, 9  ;;  %v12230_v32 = vsel %vm560_vm0, %v12062_v26, 0  ;;  %v1021_v53 = vld [vmem:[%s17568_s0 + $0x30] sm:$0xe] }
  0x4c   :  { %v17650_v19 = vsel %vm12224_vm7, 4294967295, %v17649_v19  ;;  %17652 = vst [vmem:[#allocation7_spill] sm:$0xff] %v12230_v32  ;;  %v450_v0 = vsel %vm11847_vm4, %v445_v35, %v449_v38  ;;  %v454_v16 = vor.u32 %v453_v56, %v449_v38  ;;  %v17653_v46 = vrot.slane %v11831_v20, 5  ;;  %v12280_v35 = vld [vmem:[%s17569_s1 + $0xe] sm:$0x3] }
  0x4d   :  { %17651 = vst [vmem:[#allocation6_spill] sm:$0xff] %v17650_v19  ;;  %v17654_v59 = vrot.slane %v11856_v33, 5  ;;  %v436_v20 = vsel %vm11847_vm4, %v431_v10, %v435_v54  ;;  %v17656_v56 = vrot.slane %v11822_v12, 5  ;;  %v12269_v57 = vsel %vm560_vm0, %v12081_v44, 0 }
  0x4e   :  { %v1074_v40 = vsel %vm12224_vm7, %v11835_v21, %v17653_v46  ;;  %v17655_v21 = vrot.slane %v11806_v4, 5  ;;  %17657 = vst [vmem:[#allocation8_spill] sm:$0xff] %v12269_v57  ;;  %v9505_v55 = vcombine.low %v426_v37, %v436_v20  ;;  %v455_v54 = vrot.slane %v454_v16, 4  ;;  %11037 = vmatmul.mubr.msk.bf16.vlgmr.msra.gmra.mxu1 %vm511_vm1, %v11590_v42  ;;  %v1022_v42 = vld [vmem:[%s17568_s0 + $0x3c] sm:$0xe] }
  0x4f   :  { %v12247_v26 = vsel %vm12224_vm7, %v11845_v28, %v17654_v59  ;;  %v12265_v28 = vsel %vm12224_vm7, %v9556_v63, %v17656_v56  ;;  %11103 = vmatpush3.bf16.msra.mxu1 %v12269_v57  ;;  %11040 = vmatprep.mubr.msk.bf16.mxu1 %vm511_vm1, %v11591_v22  ;;  %v9557_v44 = vrot.slane %v1019_v36, 9  ;;  %v1084_v38 = vrot.slane %v11876_v48, 5  ;;  %v1023_v59 = vld [vmem:[%s17568_s0 + $0x48] sm:$0xe] }
  0x50   :  { %v1071_v33 = vsel %vm12224_vm7, %v9555_v14, %v17655_v21  ;;  %v9573_v12 = vcombine.low %v12265_v28, %v12247_v26  ;;  %v1087_v37 = vrot.slane %v11899_v6, 5  ;;  %v9558_v10 = vrot.slane %v1020_v30, 9  ;;  %10962 = vmatprep.mubr.msk.bf16.mxu0 %vm511_vm1, %v9505_v55  ;;  %11559 = vmatprep.subr.msk.bf16.mxu1 %vm560_vm0, %v12280_v35  ;;  %v11593_v30 = vld [vmem:[%s17568_s0 + $0x3c] sm:$0xff]   ;;  %v1029_v26 = vld [vmem:[%s17568_s0 + $0x108] sm:$0xe] }
  0x51   :  { %v9572_v4 = vcombine.low %v1071_v33, %v1074_v40  ;;  %v460_v14 = vsel %vm11847_vm4, %v455_v54, %v459_v24  ;;  %v1091_v63 = vrot.slane %v11891_v58, 5  ;;  %v1094_v16 = vrot.slane %v11908_v13, 5  ;;  %v11592_v58 = vld [vmem:[%s17568_s0 + $0x30] sm:$0xff]  }
  0x52   :  { %v9559_v22 = vrot.slane %v1021_v53, 9  ;;  %v9506_v48 = vcombine.low %v450_v0, %v460_v14  ;;  %v1085_v6 = vsel %vm12224_vm7, %v9557_v44, %v1084_v38  ;;  %v1086_v46 = vrot.slane %v1084_v38, 4  ;;  %v1025_v44 = vld [vmem:[%s17568_s0 + $0xd8] sm:$0xe] }
  0x53   :  { %v1098_v40 = vrot.slane %v11923_v34, 5  ;;  %v12307_v13 = vsel %vm12224_vm7, %v9558_v10, %v1091_v63  ;;  %v1093_v24 = vrot.slane %v1091_v63, 4  ;;  %v1101_v0 = vrot.slane %v11947_v62, 5  ;;  %v1024_v62 = vld [vmem:[%s17568_s0 + $0x54] sm:$0xe] }
  0x54   :  { %v9560_v36 = vrot.slane %v1022_v42, 9  ;;  %10963 = vmatmul.mubr.msk.bf16.gmra.mxu0 %vm511_vm1, %v9506_v48  ;;  %v1088_v34 = vsel %vm12224_vm7, %v1086_v46, %v1087_v37  ;;  %v1105_v33 = vrot.slane %v11935_v45, 5  ;;  %v1108_v55 = vrot.slane %v11954_v7, 5  ;;  %v1026_v63 = vld [vmem:[%s17568_s0 + $0xe4] sm:$0xe] }
  0x55   :  { %v12318_v20 = vsel %vm12224_vm7, %v9559_v22, %v1098_v40  ;;  %v1100_v21 = vrot.slane %v1098_v40, 4  ;;  %11002 = vmatprep.mubr.msk.bf16.mxu0 %vm511_vm1, %v9572_v4  ;;  %v9574_v56 = vcombine.low %v1085_v6, %v1088_v34  ;;  %v12327_v53 = vsel %vm12224_vm7, %v1093_v24, %v1094_v16 }
  0x56   :  { %v9561_v54 = vrot.slane %v1023_v59, 9  ;;  %v9575_v45 = vcombine.low %v12307_v13, %v12327_v53  ;;  %v12341_v4 = vsel %vm12224_vm7, %v9560_v36, %v1105_v33  ;;  %v1107_v37 = vrot.slane %v1105_v33, 4  ;;  %11041 = vmatmul.mubr.msk.bf16.gmra.mxu1 %vm511_vm1, %v11592_v58  ;;  %v1027_v59 = vld [vmem:[%s17568_s0 + $0xf0] sm:$0xe]  ;;  %v11595_v33 = vld [vmem:[%s17568_s0 + $0x54] sm:$0xff]  }
  0x57   :  { %v12337_v38 = vsel %vm12224_vm7, %v1100_v21, %v1101_v0  ;;  %v1112_v10 = vrot.slane %v11970_v27, 5  ;;  %v1115_v42 = vrot.slane %v11992_v61, 5  ;;  %v9562_v14 = vrot.slane %v1024_v62, 9  ;;  %11044 = vmatprep.mubr.msk.bf16.mxu1 %vm511_vm1, %v11593_v30  ;;  %v1028_v21 = vld [vmem:[%s17568_s0 + $0xfc] sm:$0xe] }
  0x58   :  { %v9576_v7 = vcombine.low %v12318_v20, %v12337_v38  ;;  %v12354_v16 = vsel %vm12224_vm7, %v1107_v37, %v1108_v55  ;;  %v1119_v22 = vrot.slane %v11981_v43, 5  ;;  %v1122_v48 = vrot.slane %v12001_v8, 5  ;;  %v11594_v43 = vld [vmem:[%s17568_s0 + $0x48] sm:$0xff]   ;;  %v9670_v13 = vld [vmem:[%s17568_s0 + $0x10] sm:$0xf] }
  0x59   :  { %v9563_v6 = vrot.slane %v1025_v44, 9  ;;  %v9577_v27 = vcombine.low %v12341_v4, %v12354_v16  ;;  %v12362_v61 = vsel %vm12224_vm7, %v9561_v54, %v1112_v10  ;;  %v1114_v46 = vrot.slane %v1112_v10, 4  ;;  %v9671_v53 = vld [vmem:[%s17568_s0 + $0x14] sm:$0x1] }
  0x5a   :  { %v1126_v40 = vrot.slane %v12016_v31, 5  ;;  %v12373_v8 = vsel %vm12224_vm7, %v9562_v14, %v1119_v22  ;;  %v1121_v58 = vrot.slane %v1119_v22, 4  ;;  %v1129_v24 = vrot.slane %v12036_v60, 5  ;;  %v12391_v60 = vld [vmem:[%s17569_s1 + $0xc] sm:$0x3] }
  0x5b   :  { %v9564_v0 = vrot.slane %v1026_v63, 9  ;;  %v12378_v36 = vsel %vm12224_vm7, %v1114_v46, %v1115_v42  ;;  %v1133_v30 = vrot.slane %v12027_v49, 5  ;;  %v1136_v55 = vrot.slane %v12046_v9, 5  ;;  %v1030_v14 = vld [vmem:[%s17568_s0 + $0x114] sm:$0xe] }
  0x5c   :  { %v12382_v31 = vsel %vm12224_vm7, %v9563_v6, %v1126_v40  ;;  %v1128_v34 = vrot.slane %v1126_v40, 4  ;;  %11003 = vmatmul.mubr.msk.bf16.vlgmr.msra.gmra.mxu0 %vm511_vm1, %v9573_v12  ;;  %v9578_v49 = vcombine.low %v12362_v61, %v12378_v36  ;;  %v12404_v62 = vsel %vm12224_vm7, %v1121_v58, %v1122_v48 }
  0x5d   :  { %v9565_v54 = vrot.slane %v1027_v59, 9  ;;  %11069 = vmatpush3.bf16.msra.mxu0 %v12230_v32  ;;  %11006 = vmatprep.mubr.msk.bf16.mxu0 %vm511_vm1, %v9574_v56  ;;  %v9579_v28 = vcombine.low %v12373_v8, %v12404_v62  ;;  %v12420_v44 = vsel %vm12224_vm7, %v9564_v0, %v1133_v30  ;;  %v1135_v9 = vrot.slane %v1133_v30, 4  ;;  %v1031_v59 = vld [vmem:[%s17568_s0 + $0x120] sm:$0xe]  ;;  %v1032_v30 = vld [vmem:[%s17568_s0 + $0x12c] sm:$0xe] }
  0x5e   :  { %v12416_v12 = vsel %vm12224_vm7, %v1128_v34, %v1129_v24  ;;  %v1140_v10 = vrot.slane %v12054_v18, 5  ;;  %v1143_v42 = vrot.slane %v12093_v15, 5  ;;  %v9566_v56 = vrot.slane %v1028_v21, 9  ;;  %11558 = vmatprep.subr.msk.bf16.mxu0 %vm560_vm0, %v12391_v60  ;;  %11045 = vmatmul.mubr.msk.bf16.gmra.mxu1 %vm511_vm1, %v11594_v43 }
  0x5f   :  { %v9580_v37 = vcombine.low %v12382_v31, %v12416_v12  ;;  %v12434_v63 = vsel %vm12224_vm7, %v1135_v9, %v1136_v55  ;;  %v1147_v22 = vrot.slane %v12076_v50, 5  ;;  %v1150_v18 = vrot.slane %v12101_v23, 5  ;;  %11048 = vmatprep.mubr.msk.bf16.mxu1 %vm511_vm1, %v11595_v33 }
  0x60   :  { %v9567_v48 = vrot.slane %v1029_v26, 9  ;;  %v9581_v15 = vcombine.low %v12420_v44, %v12434_v63  ;;  %v12443_v6 = vsel %vm12224_vm7, %v9565_v54, %v1140_v10  ;;  %v1142_v46 = vrot.slane %v1140_v10, 4  ;;  %v11597_v26 = vld [vmem:[%s17568_s0 + $0xe4] sm:$0xff]  }
  0x61   :  { %v1154_v40 = vrot.slane %v12118_v41, 5  ;;  %v12451_v50 = vsel %vm12224_vm7, %v9566_v56, %v1147_v22  ;;  %v1149_v23 = vrot.slane %v1147_v22, 4  ;;  %v1157_v43 = vrot.slane %v12140_v52, 5  ;;  %v11596_v52 = vld [vmem:[%s17568_s0 + $0x60] sm:$0xff]   ;;  %v9755_v63 = vld [vmem:[%s17568_s0 + $0x48] sm:$0xe] }
  0x62   :  { %v9568_v58 = vrot.slane %v1030_v14, 9  ;;  %v12456_v24 = vsel %vm12224_vm7, %v1142_v46, %v1143_v42  ;;  %v1161_v34 = vrot.slane %v12133_v39, 5  ;;  %v1164_v55 = vrot.slane %v12152_v1, 5  ;;  %v9750_v39 = vld [vmem:[%s17568_s0 + $0xc] sm:$0xe] }
  0x63   :  { %v12460_v0 = vsel %vm12224_vm7, %v9567_v48, %v1154_v40  ;;  %v1156_v41 = vrot.slane %v1154_v40, 4  ;;  %v9582_v21 = vcombine.low %v12443_v6, %v12456_v24  ;;  %v12473_v33 = vsel %vm12224_vm7, %v1149_v23, %v1150_v18  ;;  %v9751_v18 = vld [vmem:[%s17568_s0 + $0x18] sm:$0xe] }
  0x64   :  { %v9569_v54 = vrot.slane %v1031_v59, 9  ;;  %11007 = vmatmul.mubr.msk.bf16.gmra.mxu0 %vm511_vm1, %v9575_v45  ;;  %v9583_v9 = vcombine.low %v12451_v50, %v12473_v33  ;;  %v12494_v10 = vsel %vm12224_vm7, %v9568_v58, %v1161_v34  ;;  %v1163_v42 = vrot.slane %v1161_v34, 4 }
  0x65   :  { %v12490_v1 = vsel %vm12224_vm7, %v1156_v41, %v1157_v43  ;;  %11010 = vmatprep.mubr.msk.bf16.mxu0 %vm511_vm1, %v9576_v7  ;;  %v1168_v56 = vrot.slane %v12160_v25, 5  ;;  %v1171_v14 = vrot.slane %v12193_v11, 5  ;;  %v9570_v22 = vrot.slane %v1032_v30, 9  ;;  %v12522_v25 = vld [vmem:[%s17568_s0 + $0x1c] sm:$0xf] }
  0x66   :  { %v9584_v45 = vcombine.low %v12460_v0, %v12490_v1  ;;  %v12515_v48 = vsel %vm12224_vm7, %v1163_v42, %v1164_v55  ;;  %v1175_v20 = vrot.slane %v12180_v3, 5  ;;  %v1178_v38 = vrot.slane %v12202_v17, 5  ;;  %11049 = vmatmul.mubr.msk.bf16.gmra.mxu1 %vm511_vm1, %v11596_v52  ;;  %v9674_v3 = vld [vmem:[%s17568_s0 + $0x20] sm:$0x1]  ;;  %v9669_v17 = vld [vmem:[%s17568_s0 + $0xc] sm:$0xf] }
  0x67   :  { %v9766_v7 = vrot.slane %v9750_v39, 9  ;;  %v9585_v11 = vcombine.low %v12494_v10, %v12515_v48  ;;  %v12529_v46 = vsel %vm12224_vm7, %v9569_v54, %v1168_v56  ;;  %v1170_v40 = vrot.slane %v1168_v56, 4  ;;  %11052 = vmatprep.mubr.msk.bf16.mxu1 %vm511_vm1, %v11597_v26  ;;  %v9672_v56 = vld [vmem:[%s17568_s0 + $0x18] sm:$0xf]  ;;  %v12793_v1 = vld [vmem:[%s17568_s0 + $0x5c] sm:$0x1] }
  0x68   :  { %v2628_v59 = vrot.slane %v9670_v13, 5  ;;  %v12540_v23 = vsel %vm12224_vm7, %v9570_v22, %v1175_v20  ;;  %v1177_v43 = vrot.slane %v1175_v20, 4  ;;  %v2631_v58 = vrot.slane %v9671_v53, 5  ;;  %v9680_v54 = vld [vmem:[%s17568_s0 + $0x38] sm:$0x1] }
  0x69   :  { %v9767_v41 = vrot.slane %v9751_v18, 9  ;;  %v12544_v34 = vsel %vm12224_vm7, %v1170_v40, %v1171_v14  ;;  %v2635_v55 = vrot.slane %v12522_v25, 5  ;;  %v2638_v26 = vrot.slane %v9674_v3, 5  ;;  %v11598_v14 = vld [vmem:[%s17568_s0 + $0xf0] sm:$0xff]   ;;  %v12788_v0 = vld [vmem:[%s17568_s0 + $0x58] sm:$0xf] }
  0x6a   :  { %v12548_v30 = vsel %vm12224_vm7, %v9766_v7, %v2628_v59  ;;  %v2630_v52 = vrot.slane %v2628_v59, 4  ;;  %v12555_v39 = vsel %vm12224_vm7, %v1177_v43, %v1178_v38  ;;  %v1885_v42 = vshrl.u32 %v9669_v17, 16  ;;  %v11599_v7 = vld [vmem:[%s17568_s0 + $0xfc] sm:$0xff]  }
  0x6b   :  { %v12571_v20 = vsel %vm12224_vm7, %v9767_v41, %v2635_v55  ;;  %v2637_v38 = vrot.slane %v2635_v55, 4  ;;  %v1888_v43 = vshll.u32 %v9669_v17, 16  ;;  %v1898_v16 = vshrl.u32 %v9670_v13, 16  ;;  %v12595_v17 = vld [vmem:[%s17568_s0 + $0x28] sm:$0xf] }
  0x6c   :  { %v12567_v18 = vsel %vm12224_vm7, %v2630_v52, %v2631_v58  ;;  %11011 = vmatmul.mubr.msk.bf16.gmra.mxu0 %vm511_vm1, %v9577_v27  ;;  %v1887_v59 = vrot.slane %v1885_v42, 4  ;;  %v1894_v58 = vshll.u32 %v9670_v13, 16  ;;  %v1904_v27 = vshll.u32 %v9671_v53, 16  ;;  %v12602_v53 = vld [vmem:[%s17568_s0 + $0x2c] sm:$0x1] }
  0x6d   :  { %v9783_v40 = vcombine.low %v12548_v30, %v12567_v18  ;;  %11014 = vmatprep.mubr.msk.bf16.mxu0 %vm511_vm1, %v9578_v49  ;;  %v12588_v4 = vsel %vm12224_vm7, %v2637_v38, %v2638_v26  ;;  %v1909_v41 = vshrl.u32 %v9672_v56, 16  ;;  %v1890_v55 = vrot.slane %v1888_v43, 5 }
  0x6e   :  { %v1896_v22 = vrot.slane %v1894_v58, 5  ;;  %v1912_v42 = vshll.u32 %v9672_v56, 16  ;;  %11053 = vmatmul.mubr.msk.bf16.gmra.mxu1 %vm511_vm1, %v11598_v14  ;;  %v1900_v61 = vrot.slane %v1898_v16, 4  ;;  %v1906_v36 = vrot.slane %v1904_v27, 5  ;;  %v9752_v14 = vld [vmem:[%s17568_s0 + $0x24] sm:$0xe] }
  0x6f   :  { %v1911_v49 = vrot.slane %v1909_v41, 4  ;;  %v1918_v13 = vshll.u32 %v12522_v25, 16  ;;  %11056 = vmatprep.mubr.msk.bf16.mxu1 %vm511_vm1, %v11599_v7  ;;  %v1891_v26 = vor.u32 %v1890_v55, %v1887_v59  ;;  %v1922_v38 = vshrl.u32 %v12522_v25, 16  ;;  %v9753_v7 = vld [vmem:[%s17568_s0 + $0x30] sm:$0xe]  ;;  %v11600_v25 = vld [vmem:[%s17568_s0 + $0x108] sm:$0xff]  }
  0x70   :  { %v1914_v56 = vrot.slane %v1912_v42, 5  ;;  %v1928_v43 = vshll.u32 %v9674_v3, 16  ;;  %v1901_v58 = vor.u32 %v1900_v61, %v1896_v22  ;;  %v12611_v27 = vsel %vm560_vm0, %v12391_v60, 0  ;;  %v12626_v60 = vld [vmem:[%s17568_s0 + $0x34] sm:$0xf] }
  0x71   :  { %v1920_v16 = vrot.slane %v1918_v13, 5  ;;  %17658 = vst [vmem:[#allocation9_spill] sm:$0xff] %v12611_v27  ;;  %v12615_v41 = vsel %vm560_vm0, %v12280_v35, 0  ;;  %v1892_v3 = vrot.slane %v1891_v26, 4  ;;  %v1924_v55 = vrot.slane %v1922_v38, 4 }
  0x72   :  { %17659 = vst [vmem:[#allocation10_spill] sm:$0xff] %v12615_v41  ;;  %v1915_v59 = vor.u32 %v1914_v56, %v1911_v49  ;;  %v1930_v42 = vrot.slane %v1928_v43, 5  ;;  %v1902_v61 = vrot.slane %v1901_v58, 4  ;;  %v9768_v35 = vrot.slane %v9752_v14, 9  ;;  %v11601_v49 = vld [vmem:[%s17568_s0 + $0x114] sm:$0xff]  }
  0x73   :  { %v2642_v13 = vrot.slane %v12595_v17, 5  ;;  %v2645_v52 = vrot.slane %v12602_v53, 5  ;;  %v1897_v26 = vsel %vm11847_vm4, %v1892_v3, %v1896_v22  ;;  %v1925_v38 = vor.u32 %v1924_v55, %v1920_v16  ;;  %v9675_v14 = vld [vmem:[%s17568_s0 + $0x24] sm:$0xf] }
  0x74   :  { %11015 = vmatmul.mubr.msk.bf16.gmra.mxu0 %vm511_vm1, %v9579_v28  ;;  %v1916_v56 = vrot.slane %v1915_v59, 4  ;;  %v9769_v43 = vrot.slane %v9753_v7, 9  ;;  %v1907_v8 = vsel %vm11847_vm4, %v1902_v61, %v1906_v36  ;;  %v2649_v22 = vrot.slane %v12626_v60, 5 }
  0x75   :  { %11018 = vmatprep.mubr.msk.bf16.mxu0 %vm511_vm1, %v9580_v37  ;;  %v12653_v62 = vsel %vm12224_vm7, %v9768_v35, %v2642_v13  ;;  %v2644_v28 = vrot.slane %v2642_v13, 4  ;;  %v12656_v58 = vcombine.low %v1897_v26, %v1907_v8  ;;  %v1926_v3 = vrot.slane %v1925_v38, 4  ;;  %v12694_v8 = vld [vmem:[%s17568_s0 + $0x40] sm:$0xf] }
  0x76   :  { %v1921_v7 = vsel %vm11847_vm4, %v1916_v56, %v1920_v16  ;;  %v2652_v59 = vrot.slane %v9680_v54, 5  ;;  %11057 = vmatmul.mubr.msk.bf16.gmra.mxu1 %vm511_vm1, %v11600_v25  ;;  %v12667_v12 = vsel %vm12224_vm7, %v9769_v43, %v2649_v22  ;;  %v2651_v37 = vrot.slane %v2649_v22, 4 }
  0x77   :  { %v12663_v31 = vsel %vm12224_vm7, %v2644_v28, %v2645_v52  ;;  %v1933_v36 = vshrl.u32 %v9675_v14, 16  ;;  %11060 = vmatprep.mubr.msk.bf16.mxu1 %vm511_vm1, %v11601_v49  ;;  %v1931_v55 = vsel %vm11847_vm4, %v1926_v3, %v1930_v42  ;;  %v1936_v61 = vshll.u32 %v9675_v14, 16  ;;  %v9678_v52 = vld [vmem:[%s17568_s0 + $0x30] sm:$0xf]  ;;  %v11602_v42 = vld [vmem:[%s17568_s0 + $0x120] sm:$0xff]  }
  0x78   :  { %v1942_v25 = vshll.u32 %v12595_v17, 16  ;;  %v12678_v35 = vcombine.low %v1921_v7, %v1931_v55  ;;  %v12682_v13 = vsel %vm12224_vm7, %v2651_v37, %v2652_v59  ;;  %v1946_v26 = vshrl.u32 %v12595_v17, 16  ;;  %v12699_v17 = vld [vmem:[%s17568_s0 + $0x44] sm:$0x1]  ;;  %v9754_v28 = vld [vmem:[%s17568_s0 + $0x3c] sm:$0xe] }
  0x79   :  { %v1935_v49 = vrot.slane %v1933_v36, 4  ;;  %v1938_v38 = vrot.slane %v1936_v61, 5  ;;  %v1952_v14 = vshll.u32 %v12602_v53, 16  ;;  %v1957_v7 = vshrl.u32 %v9678_v52, 16  ;;  %v12708_v53 = vld [vmem:[%s17568_s0 + $0x4c] sm:$0xf] }
  0x7a   :  { %v1944_v43 = vrot.slane %v1942_v25, 5  ;;  %v1948_v22 = vrot.slane %v1946_v26, 4  ;;  %v1960_v3 = vshll.u32 %v9678_v52, 16  ;;  %v1966_v59 = vshll.u32 %v12626_v60, 16  ;;  %v11603_v37 = vld [vmem:[%s17568_s0 + $0x12c] sm:$0xff]  }
  0x7b   :  { %v1939_v36 = vor.u32 %v1938_v38, %v1935_v49  ;;  %v1954_v55 = vrot.slane %v1952_v14, 5  ;;  %v1970_v61 = vshrl.u32 %v12626_v60, 16  ;;  %v1976_v25 = vshll.u32 %v9680_v54, 16 }
  0x7c   :  { %11019 = vmatmul.mubr.msk.bf16.gmra.mxu0 %vm511_vm1, %v9581_v15  ;;  %v1949_v52 = vor.u32 %v1948_v22, %v1944_v43  ;;  %v1959_v26 = vrot.slane %v1957_v7, 4  ;;  %v1962_v56 = vrot.slane %v1960_v3, 5  ;;  %v1968_v44 = vrot.slane %v1966_v59, 5  ;;  %v9686_v22 = vld [vmem:[%s17568_s0 + $0x50] sm:$0x1] }
  0x7d   :  { %11022 = vmatprep.mubr.msk.bf16.mxu0 %vm511_vm1, %v9582_v21  ;;  %v1940_v15 = vrot.slane %v1939_v36, 4  ;;  %v1972_v16 = vrot.slane %v1970_v61, 4  ;;  %v1978_v49 = vrot.slane %v1976_v25, 5  ;;  %v9770_v38 = vrot.slane %v9754_v28, 9  ;;  %v11604_v25 = vld [vmem:[%s17568_s0 + $0x138] sm:$0xff]  }
  0x7e   :  { %11061 = vmatmul.mubr.msk.bf16.gmra.mxu1 %vm511_vm1, %v11602_v42  ;;  %v1950_v54 = vrot.slane %v1949_v52, 4  ;;  %v1963_v60 = vor.u32 %v1962_v56, %v1959_v26  ;;  %v2656_v6 = vrot.slane %v12694_v8, 5  ;;  %v2659_v24 = vrot.slane %v12699_v17, 5  ;;  %v9681_v42 = vld [vmem:[%s17568_s0 + $0x3c] sm:$0xf] }
  0x7f   :  { %11064 = vmatprep.mubr.msk.bf16.mxu1 %vm511_vm1, %v11603_v37  ;;  %v1945_v21 = vsel %vm11847_vm4, %v1940_v15, %v1944_v43  ;;  %v1973_v14 = vor.u32 %v1972_v16, %v1968_v44  ;;  %v9771_v7 = vrot.slane %v9755_v63, 9  ;;  %v2663_v28 = vrot.slane %v12708_v53, 5 }
  0x80   :  { %v1955_v56 = vsel %vm11847_vm4, %v1950_v54, %v1954_v55  ;;  %v1964_v3 = vrot.slane %v1963_v60, 4  ;;  %v12742_v59 = vsel %vm12224_vm7, %v9770_v38, %v2656_v6  ;;  %v2658_v16 = vrot.slane %v2656_v6, 4  ;;  %v9684_v60 = vld [vmem:[%s17568_s0 + $0x48] sm:$0xf] }
  0x81   :  { %v12744_v43 = vcombine.low %v1945_v21, %v1955_v56  ;;  %v1974_v37 = vrot.slane %v1973_v14, 4  ;;  %v12748_v36 = vsel %vm12224_vm7, %v9771_v7, %v2663_v28  ;;  %v2665_v61 = vrot.slane %v2663_v28, 4  ;;  %v9757_v56 = vld [vmem:[%s17568_s0 + $0x60] sm:$0xe] }
  0x82   :  { %v1969_v55 = vsel %vm11847_vm4, %v1964_v3, %v1968_v44  ;;  %v12757_v52 = vsel %vm12224_vm7, %v2658_v16, %v2659_v24  ;;  %v2666_v26 = vrot.slane %v9686_v22, 5  ;;  %v1981_v63 = vshrl.u32 %v9681_v42, 16 }
  0x83   :  { %v1979_v15 = vsel %vm11847_vm4, %v1974_v37, %v1978_v49  ;;  %v1984_v54 = vshll.u32 %v9681_v42, 16  ;;  %v1990_v44 = vshll.u32 %v12694_v8, 16  ;;  %v1994_v49 = vshrl.u32 %v12694_v8, 16  ;;  %v12803_v42 = vld [vmem:[%s17568_s0 + $0x64] sm:$0xf] }
  0x84   :  { %11023 = vmatmul.mubr.msk.bf16.gmra.mxu0 %vm511_vm1, %v9583_v9  ;;  %v12775_v50 = vcombine.low %v1969_v55, %v1979_v15  ;;  %v12779_v33 = vsel %vm12224_vm7, %v2665_v61, %v2666_v26  ;;  %v1983_v9 = vrot.slane %v1981_v63, 4  ;;  %v2000_v14 = vshll.u32 %v12699_v17, 16 }
  0x85   :  { %11026 = vmatprep.mubr.msk.bf16.mxu0 %vm511_vm1, %v9584_v45  ;;  %v1986_v24 = vrot.slane %v1984_v54, 5  ;;  %v1992_v21 = vrot.slane %v1990_v44, 5  ;;  %v9756_v45 = vld [vmem:[%s17568_s0 + $0x54] sm:$0xe]  ;;  %v1996_v8 = vrot.slane %v1994_v49, 4  ;;  %v2005_v7 = vshrl.u32 %v9684_v60, 16 }
  0x86   :  { %11065 = vmatmul.mubr.msk.bf16.gmra.mxu1 %vm511_vm1, %v11604_v25  ;;  %v2008_v28 = vshll.u32 %v9684_v60, 16  ;;  %v2014_v17 = vshll.u32 %v12708_v53, 16  ;;  %v2002_v16 = vrot.slane %v2000_v14, 5  ;;  %v2018_v37 = vshrl.u32 %v12708_v53, 16  ;;  %v9692_v53 = vld [vmem:[%s17568_s0 + $0x68] sm:$0x1] }
  0x87   :  { %11104 = vmatprep.mubr.msk.bf16.mxu1 %vm511_vm1, %v9783_v40  ;;  %v1987_v3 = vor.u32 %v1986_v24, %v1983_v9  ;;  %v2024_v61 = vshll.u32 %v9686_v22, 16  ;;  %v1997_v25 = vor.u32 %v1996_v8, %v1992_v21  ;;  %v2007_v55 = vrot.slane %v2005_v7, 4  ;;  %v9687_v24 = vld [vmem:[%s17568_s0 + $0x54] sm:$0xf] }
  0x88   :  { %v2010_v26 = vrot.slane %v2008_v28, 5  ;;  %v2016_v63 = vrot.slane %v2014_v17, 5  ;;  %v2020_v54 = vrot.slane %v2018_v37, 4  ;;  %v9772_v60 = vrot.slane %v9756_v45, 9  ;;  %v9690_v37 = vld [vmem:[%s17568_s0 + $0x60] sm:$0xf] }
  0x89   :  { %v1988_v15 = vrot.slane %v1987_v3, 4  ;;  %v2026_v44 = vrot.slane %v2024_v61, 5  ;;  %v1998_v49 = vrot.slane %v1997_v25, 4  ;;  %v2670_v38 = vrot.slane %v12788_v0, 5 }
  0x8a   :  { %v2011_v6 = vor.u32 %v2010_v26, %v2007_v55  ;;  %v2673_v30 = vrot.slane %v12793_v1, 5  ;;  %v2021_v40 = vor.u32 %v2020_v54, %v2016_v63  ;;  %v9773_v22 = vrot.slane %v9757_v56, 9  ;;  %v11671_v55 = vld [vmem:[%s17569_s1 + $0x2] sm:$0x3] }
  0x8b   :  { %v1993_v18 = vsel %vm11847_vm4, %v1988_v15, %v1992_v21  ;;  %v2677_v9 = vrot.slane %v12803_v42, 5  ;;  %v17660_v10 = vcombine.low %v12529_v46, %v12544_v34  ;;  %v2003_v48 = vsel %vm11847_vm4, %v1998_v49, %v2002_v16 }
  0x8c   :  { %11027 = vmatmul.mubr.msk.bf16.gmra.mxu0 %vm511_vm1, %v9585_v11  ;;  %v2012_v11 = vrot.slane %v2011_v6, 4  ;;  %v12836_v21 = vsel %vm12224_vm7, %v9772_v60, %v2670_v38  ;;  %v2672_v14 = vrot.slane %v2670_v38, 4  ;;  %v12838_v45 = vcombine.low %v1993_v18, %v2003_v48  ;;  %v9758_v60 = vld [vmem:[%s17568_s0 + $0xe4] sm:$0xe] }
  0x8d   :  { %11030 = vmatprep.mubr.msk.bf16.mxu0 %vm511_vm1, %v17660_v10  ;;  %v2022_v8 = vrot.slane %v2021_v40, 4  ;;  %v12842_v7 = vsel %vm12224_vm7, %v9773_v22, %v2677_v9  ;;  %v2679_v28 = vrot.slane %v2677_v9, 4  ;;  %v17661_v46 = vcombine.low %v12571_v20, %v12588_v4 }
  0x8e   :  { %v2017_v34 = vsel %vm11847_vm4, %v2012_v11, %v2016_v63  ;;  %v12852_v6 = vsel %vm12224_vm7, %v2672_v14, %v2673_v30  ;;  %v2680_v38 = vrot.slane %v9692_v53, 5  ;;  %v2029_v17 = vshrl.u32 %v9687_v24, 16  ;;  %v9759_v11 = vld [vmem:[%s17568_s0 + $0xf0] sm:$0xe] }
  0x8f   :  { %11105 = vmatmul.mubr.msk.bf16.vlgmr.msra.gmra.mxu1 %vm511_vm1, %v17661_v46  ;;  %v17662_v56 = vcombine.low %v12653_v62, %v12663_v31  ;;  %v2027_v20 = vsel %vm11847_vm4, %v2022_v8, %v2026_v44  ;;  %v9789_v4 = vcombine.low %v12836_v21, %v12852_v6  ;;  %v2032_v3 = vshll.u32 %v9687_v24, 16  ;;  %v12884_v44 = vld [vmem:[%s17568_s0 + $0xe8] sm:$0xf] }
  0x90   :  { %11171 = vmatpush3.bf16.msra.mxu1 %v12615_v41  ;;  %v2038_v16 = vshll.u32 %v12788_v0, 16  ;;  %v12867_v61 = vcombine.low %v2017_v34, %v2027_v20  ;;  %v12871_v62 = vsel %vm12224_vm7, %v2679_v28, %v2680_v38  ;;  %v2031_v31 = vrot.slane %v2029_v17, 4  ;;  %v9761_v21 = vld [vmem:[%s17568_s0 + $0x108] sm:$0xe] }
  0x91   :  { %11108 = vmatprep.mubr.msk.bf16.mxu1 %vm511_vm1, %v17662_v56  ;;  %v2042_v25 = vshrl.u32 %v12788_v0, 16  ;;  %11561 = vmatprep.subr.msk.bf16.mxu1 %vm560_vm0, %v11671_v55  ;;  %v9790_v26 = vcombine.low %v12842_v7, %v12871_v62  ;;  %v2034_v63 = vrot.slane %v2032_v3, 5  ;;  %v2048_v54 = vshll.u32 %v12793_v1, 16  ;;  %v12889_v0 = vld [vmem:[%s17568_s0 + $0xec] sm:$0x1] }
  0x92   :  { %v2040_v15 = vrot.slane %v2038_v16, 5  ;;  %v2053_v30 = vshrl.u32 %v9690_v37, 16  ;;  %v2056_v18 = vshll.u32 %v9690_v37, 16  ;;  %v2062_v40 = vshll.u32 %v12803_v42, 16  ;;  %v12898_v1 = vld [vmem:[%s17568_s0 + $0xf4] sm:$0xf] }
  0x93   :  { %v2044_v49 = vrot.slane %v2042_v25, 4  ;;  %v17663_v22 = vcombine.low %v12540_v23, %v12555_v39  ;;  %v2035_v9 = vor.u32 %v2034_v63, %v2031_v31  ;;  %v2050_v24 = vrot.slane %v2048_v54, 5  ;;  %v9702_v7 = vld [vmem:[%s17568_s0 + $0x108] sm:$0xf] }
  0x94   :  { %v2066_v10 = vshrl.u32 %v12803_v42, 16  ;;  %v2072_v48 = vshll.u32 %v9692_v53, 16  ;;  %v2055_v8 = vrot.slane %v2053_v30, 4  ;;  %v2058_v28 = vrot.slane %v2056_v18, 5  ;;  %v12913_v42 = vld [vmem:[%s17568_s0 + $0xf8] sm:$0x1] }
  0x95   :  { %11031 = vmatmul.mubr.msk.bf16.gmra.mxu0 %vm511_vm1, %v17663_v22  ;;  %v2045_v14 = vor.u32 %v2044_v49, %v2040_v15  ;;  %v2064_v46 = vrot.slane %v2062_v40, 5  ;;  %v2036_v34 = vrot.slane %v2035_v9, 4  ;;  %v9774_v38 = vrot.slane %v9758_v60, 9  ;;  %v9696_v49 = vld [vmem:[%s17568_s0 + $0xf0] sm:$0xf] }
  0x96   :  { %11070 = vmatprep.mubr.msk.bf16.mxu0 %vm511_vm1, %v12656_v58  ;;  %v2068_v23 = vrot.slane %v2066_v10, 4  ;;  %v2074_v39 = vrot.slane %v2072_v48, 5  ;;  %v17664_v53 = vcombine.low %v12667_v12, %v12682_v13  ;;  %v2059_v58 = vor.u32 %v2058_v28, %v2055_v8  ;;  %v9693_v13 = vld [vmem:[%s17568_s0 + $0xe4] sm:$0xf]  ;;  %v12956_v9 = vld [vmem:[%s17569_s1 + $0x10] sm:$0x3] }
  0x97   :  { %v2046_v17 = vrot.slane %v2045_v14, 4  ;;  %v2684_v56 = vrot.slane %v12884_v44, 5  ;;  %v2687_v20 = vrot.slane %v12889_v0, 5  ;;  %v17665_v3 = vcombine.low %v12742_v59, %v12757_v52 }
  0x98   :  { %11109 = vmatmul.mubr.msk.bf16.gmra.mxu1 %vm511_vm1, %v17664_v53  ;;  %v2041_v16 = vsel %vm11847_vm4, %v2036_v34, %v2040_v15  ;;  %v2069_v37 = vor.u32 %v2068_v23, %v2064_v46  ;;  %v9775_v31 = vrot.slane %v9759_v11, 9  ;;  %v2691_v12 = vrot.slane %v12898_v1, 5 }
  0x99   :  { %11112 = vmatprep.mubr.msk.bf16.mxu1 %vm511_vm1, %v17665_v3  ;;  %v2051_v25 = vsel %vm11847_vm4, %v2046_v17, %v2050_v24  ;;  %v2060_v55 = vrot.slane %v2059_v58, 4  ;;  %v12935_v59 = vsel %vm12224_vm7, %v9774_v38, %v2684_v56  ;;  %v2686_v52 = vrot.slane %v2684_v56, 4  ;;  %v12986_v38 = vld [vmem:[%s17568_s0 + $0x104] sm:$0x1]  ;;  %v9760_v56 = vld [vmem:[%s17568_s0 + $0xfc] sm:$0xe] }
  0x9a   :  { %v12937_v63 = vcombine.low %v2041_v16, %v2051_v25  ;;  %v2070_v15 = vrot.slane %v2069_v37, 4  ;;  %v12941_v54 = vsel %vm12224_vm7, %v9775_v31, %v2691_v12  ;;  %v2693_v60 = vrot.slane %v2691_v12, 4  ;;  %v13007_v16 = vld [vmem:[%s17568_s0 + $0x10c] sm:$0xf] }
  0x9b   :  { %v2065_v30 = vsel %vm11847_vm4, %v2060_v55, %v2064_v46  ;;  %v12950_v18 = vsel %vm12224_vm7, %v2686_v52, %v2687_v20  ;;  %v2694_v40 = vrot.slane %v12913_v42, 5  ;;  %v2077_v22 = vshrl.u32 %v9693_v13, 16 }
  0x9c   :  { %v2075_v24 = vsel %vm11847_vm4, %v2070_v15, %v2074_v39  ;;  %v9791_v10 = vcombine.low %v12935_v59, %v12950_v18  ;;  %v2080_v48 = vshll.u32 %v9693_v13, 16  ;;  %v2086_v11 = vshll.u32 %v12884_v44, 16 }
  0x9d   :  { %11071 = vmatmul.mubr.msk.bf16.vlgmr.msra.gmra.mxu0 %vm511_vm1, %v12678_v35  ;;  %v12968_v14 = vcombine.low %v2065_v30, %v2075_v24  ;;  %v12972_v8 = vsel %vm12224_vm7, %v2693_v60, %v2694_v40  ;;  %v2079_v35 = vrot.slane %v2077_v22, 4  ;;  %v2090_v28 = vshrl.u32 %v12884_v44, 16 }
  0x9e   :  { %11137 = vmatpush3.bf16.msra.mxu0 %v12611_v27  ;;  %11074 = vmatprep.mubr.msk.bf16.mxu0 %vm511_vm1, %v12744_v43  ;;  %v9792_v46 = vcombine.low %v12941_v54, %v12972_v8  ;;  %v2082_v34 = vrot.slane %v2080_v48, 5  ;;  %v2088_v23 = vrot.slane %v2086_v11, 5  ;;  %v2096_v39 = vshll.u32 %v12889_v0, 16  ;;  %v12981_v43 = vld [vmem:[%s17568_s0 + $0x100] sm:$0xf] }
  0x9f   :  { %11560 = vmatprep.subr.msk.bf16.mxu0 %vm560_vm0, %v12956_v9  ;;  %v17666_v44 = vcombine.low %v12748_v36, %v12779_v33  ;;  %v2092_v53 = vrot.slane %v2090_v28, 4  ;;  %v2101_v0 = vshrl.u32 %v9696_v49, 16  ;;  %v2104_v17 = vshll.u32 %v9696_v49, 16  ;;  %v9705_v8 = vld [vmem:[%s17568_s0 + $0x114] sm:$0xf] }
  0xa0   :  { %v2110_v58 = vshll.u32 %v12898_v1, 16  ;;  %v2083_v20 = vor.u32 %v2082_v34, %v2079_v35  ;;  %v2098_v3 = vrot.slane %v2096_v39, 5  ;;  %v2114_v36 = vshrl.u32 %v12898_v1, 16  ;;  %v9704_v1 = vld [vmem:[%s17568_s0 + $0x110] sm:$0x1] }
  0xa1   :  { %11113 = vmatmul.mubr.msk.bf16.gmra.mxu1 %vm511_vm1, %v17666_v44  ;;  %v2120_v33 = vshll.u32 %v12913_v42, 16  ;;  %v2093_v37 = vor.u32 %v2092_v53, %v2088_v23  ;;  %v2103_v31 = vrot.slane %v2101_v0, 4  ;;  %v2106_v12 = vrot.slane %v2104_v17, 5  ;;  %v9699_v42 = vld [vmem:[%s17568_s0 + $0xfc] sm:$0xf] }
  0xa2   :  { %11116 = vmatprep.mubr.msk.bf16.mxu1 %vm511_vm1, %v9789_v4  ;;  %v2112_v13 = vrot.slane %v2110_v58, 5  ;;  %v2084_v6 = vrot.slane %v2083_v20, 4  ;;  %v2116_v4 = vrot.slane %v2114_v36, 4  ;;  %v9776_v55 = vrot.slane %v9760_v56, 9 }
  0xa3   :  { %v2122_v25 = vrot.slane %v2120_v33, 5  ;;  %v2094_v59 = vrot.slane %v2093_v37, 4  ;;  %v2107_v52 = vor.u32 %v2106_v12, %v2103_v31  ;;  %v2698_v15 = vrot.slane %v12981_v43, 5  ;;  %v13065_v37 = vld [vmem:[%s17568_s0 + $0x118] sm:$0xf] }
  0xa4   :  { %v2701_v60 = vrot.slane %v12986_v38, 5  ;;  %v2089_v49 = vsel %vm11847_vm4, %v2084_v6, %v2088_v23  ;;  %v2117_v30 = vor.u32 %v2116_v4, %v2112_v13  ;;  %v9777_v18 = vrot.slane %v9761_v21, 9  ;;  %v13070_v31 = vld [vmem:[%s17568_s0 + $0x11c] sm:$0x1]  ;;  %v9762_v6 = vld [vmem:[%s17568_s0 + $0x114] sm:$0xe] }
  0xa5   :  { %11075 = vmatmul.mubr.msk.bf16.gmra.mxu0 %vm511_vm1, %v12775_v50  ;;  %v2705_v40 = vrot.slane %v13007_v16, 5  ;;  %v2099_v22 = vsel %vm11847_vm4, %v2094_v59, %v2098_v3  ;;  %v2108_v24 = vrot.slane %v2107_v52, 4  ;;  %v2699_v48 = vsel %vm12224_vm7, %v9776_v55, %v2698_v15 }
  0xa6   :  { %11078 = vmatprep.mubr.msk.bf16.mxu0 %vm511_vm1, %v12838_v45  ;;  %v2700_v11 = vrot.slane %v2698_v15, 4  ;;  %v13031_v35 = vcombine.low %v2089_v49, %v2099_v22  ;;  %v2118_v50 = vrot.slane %v2117_v30, 4  ;;  %v2708_v39 = vrot.slane %v9704_v1, 5 }
  0xa7   :  { %v13035_v28 = vsel %vm12224_vm7, %v9777_v18, %v2705_v40  ;;  %v2707_v34 = vrot.slane %v2705_v40, 4  ;;  %v2113_v45 = vsel %vm11847_vm4, %v2108_v24, %v2112_v13  ;;  %v2125_v44 = vshrl.u32 %v9699_v42, 16 }
  0xa8   :  { %v2702_v23 = vsel %vm12224_vm7, %v2700_v11, %v2701_v60  ;;  %v2123_v53 = vsel %vm11847_vm4, %v2118_v50, %v2122_v25  ;;  %v2128_v17 = vshll.u32 %v9699_v42, 16  ;;  %v2134_v58 = vshll.u32 %v12981_v43, 16  ;;  %v13082_v42 = vld [vmem:[%s17568_s0 + $0x124] sm:$0xf]  ;;  %v9710_v11 = vld [vmem:[%s17568_s0 + $0x128] sm:$0x1] }
  0xa9   :  { %11117 = vmatmul.mubr.msk.bf16.gmra.mxu1 %vm511_vm1, %v9790_v26  ;;  %v9793_v0 = vcombine.low %v2699_v48, %v2702_v23  ;;  %v13052_v62 = vcombine.low %v2113_v45, %v2123_v53  ;;  %v13056_v26 = vsel %vm12224_vm7, %v2707_v34, %v2708_v39  ;;  %v2127_v56 = vrot.slane %v2125_v44, 4 }
  0xaa   :  { %11120 = vmatprep.mubr.msk.bf16.mxu1 %vm511_vm1, %v9791_v10  ;;  %v2138_v10 = vshrl.u32 %v12981_v43, 16  ;;  %v9794_v20 = vcombine.low %v13035_v28, %v13056_v26  ;;  %v2130_v3 = vrot.slane %v2128_v17, 5  ;;  %v2136_v36 = vrot.slane %v2134_v58, 5  ;;  %v13157_v28 = vld [vmem:[%s17568_s0 + $0x13c] sm:$0xf] }
  0xab   :  { %v2144_v33 = vshll.u32 %v12986_v38, 16  ;;  %v2149_v13 = vshrl.u32 %v9702_v7, 16  ;;  %v2152_v43 = vshll.u32 %v9702_v7, 16  ;;  %v2158_v21 = vshll.u32 %v13007_v16, 16 }
  0xac   :  { %v2140_v12 = vrot.slane %v2138_v10, 4  ;;  %v2131_v38 = vor.u32 %v2130_v3, %v2127_v56  ;;  %v2162_v25 = vshrl.u32 %v13007_v16, 16  ;;  %v2168_v55 = vshll.u32 %v9704_v1, 16 }
  0xad   :  { %11079 = vmatmul.mubr.msk.bf16.gmra.mxu0 %vm511_vm1, %v12867_v61  ;;  %v2146_v4 = vrot.slane %v2144_v33, 5  ;;  %v2151_v52 = vrot.slane %v2149_v13, 4  ;;  %v2154_v15 = vrot.slane %v2152_v43, 5  ;;  %v2160_v60 = vrot.slane %v2158_v21, 5  ;;  %v9763_v61 = vld [vmem:[%s17568_s0 + $0x120] sm:$0xe] }
  0xae   :  { %11082 = vmatprep.mubr.msk.bf16.mxu0 %vm511_vm1, %v12937_v63  ;;  %v2141_v59 = vor.u32 %v2140_v12, %v2136_v36  ;;  %v2132_v49 = vrot.slane %v2131_v38, 4  ;;  %v2164_v30 = vrot.slane %v2162_v25, 4  ;;  %v2170_v16 = vrot.slane %v2168_v55, 5  ;;  %v9708_v12 = vld [vmem:[%s17568_s0 + $0x120] sm:$0xf] }
  0xaf   :  { %v9778_v1 = vrot.slane %v9762_v6, 9  ;;  %v2155_v40 = vor.u32 %v2154_v15, %v2151_v52  ;;  %v2712_v63 = vrot.slane %v13065_v37, 5  ;;  %v2715_v22 = vrot.slane %v13070_v31, 5  ;;  %v13137_v55 = vld [vmem:[%s17568_s0 + $0x130] sm:$0xf] }
  0xb0   :  { %v2142_v18 = vrot.slane %v2141_v59, 4  ;;  %v2137_v24 = vsel %vm11847_vm4, %v2132_v49, %v2136_v36  ;;  %v2165_v48 = vor.u32 %v2164_v30, %v2160_v60  ;;  %v9779_v50 = vrot.slane %v9763_v61, 9  ;;  %v9764_v15 = vld [vmem:[%s17568_s0 + $0x12c] sm:$0xe] }
  0xb1   :  { %11121 = vmatmul.mubr.msk.bf16.gmra.mxu1 %vm511_vm1, %v9792_v46  ;;  %v2719_v54 = vrot.slane %v13082_v42, 5  ;;  %v2156_v34 = vrot.slane %v2155_v40, 4  ;;  %v2713_v45 = vsel %vm12224_vm7, %v9778_v1, %v2712_v63  ;;  %v2714_v23 = vrot.slane %v2712_v63, 4 }
  0xb2   :  { %11124 = vmatprep.mubr.msk.bf16.mxu1 %vm511_vm1, %v9793_v0  ;;  %v2147_v46 = vsel %vm11847_vm4, %v2142_v18, %v2146_v4  ;;  %v2166_v44 = vrot.slane %v2165_v48, 4  ;;  %v2722_v7 = vrot.slane %v9710_v11, 5  ;;  %v2173_v56 = vshrl.u32 %v9705_v8, 16  ;;  %v9765_v18 = vld [vmem:[%s17568_s0 + $0x138] sm:$0xe] }
  0xb3   :  { %v9728_v39 = vcombine.low %v2137_v24, %v2147_v46  ;;  %v13111_v53 = vsel %vm12224_vm7, %v9779_v50, %v2719_v54  ;;  %v2721_v0 = vrot.slane %v2719_v54, 4  ;;  %v2161_v17 = vsel %vm11847_vm4, %v2156_v34, %v2160_v60  ;;  %v9716_v46 = vld [vmem:[%s17568_s0 + $0x140] sm:$0x1] }
  0xb4   :  { %v2716_v58 = vsel %vm12224_vm7, %v2714_v23, %v2715_v22  ;;  %v2171_v10 = vsel %vm11847_vm4, %v2166_v44, %v2170_v16  ;;  %v2176_v36 = vshll.u32 %v9705_v8, 16  ;;  %v2182_v33 = vshll.u32 %v13065_v37, 16  ;;  %v9711_v23 = vld [vmem:[%s17568_s0 + $0x12c] sm:$0xf] }
  0xb5   :  { %11083 = vmatmul.mubr.msk.bf16.gmra.mxu0 %vm511_vm1, %v12968_v14  ;;  %v9795_v3 = vcombine.low %v2713_v45, %v2716_v58  ;;  %v13127_v13 = vcombine.low %v2161_v17, %v2171_v10  ;;  %v2723_v43 = vsel %vm12224_vm7, %v2721_v0, %v2722_v7  ;;  %v2175_v14 = vrot.slane %v2173_v56, 4  ;;  %v9714_v10 = vld [vmem:[%s17568_s0 + $0x138] sm:$0xf] }
  0xb6   :  { %11086 = vmatprep.mubr.msk.bf16.mxu0 %vm511_vm1, %v13031_v35  ;;  %v2186_v21 = vshrl.u32 %v13065_v37, 16  ;;  %v9796_v6 = vcombine.low %v13111_v53, %v2723_v43  ;;  %v2178_v38 = vrot.slane %v2176_v36, 5  ;;  %v2184_v4 = vrot.slane %v2182_v33, 5  ;;  %v13142_v35 = vld [vmem:[%s17568_s0 + $0x134] sm:$0x1] }
  0xb7   :  { %v2192_v25 = vshll.u32 %v13070_v31, 16  ;;  %v2197_v59 = vshrl.u32 %v9708_v12, 16  ;;  %v2200_v52 = vshll.u32 %v9708_v12, 16  ;;  %v2206_v31 = vshll.u32 %v13082_v42, 16 }
  0xb8   :  { %v2188_v37 = vrot.slane %v2186_v21, 4  ;;  %v2179_v60 = vor.u32 %v2178_v38, %v2175_v14  ;;  %v2210_v49 = vshrl.u32 %v13082_v42, 16  ;;  %v2216_v30 = vshll.u32 %v9710_v11, 16 }
  0xb9   :  { %11125 = vmatmul.mubr.msk.bf16.gmra.mxu1 %vm511_vm1, %v9794_v20  ;;  %v2194_v61 = vrot.slane %v2192_v25, 5  ;;  %v2199_v20 = vrot.slane %v2197_v59, 4  ;;  %v2202_v16 = vrot.slane %v2200_v52, 5  ;;  %v2208_v1 = vrot.slane %v2206_v31, 5 }
  0xba   :  { %11128 = vmatprep.mubr.msk.bf16.mxu1 %vm511_vm1, %v9795_v3  ;;  %v2189_v26 = vor.u32 %v2188_v37, %v2184_v4  ;;  %v2180_v40 = vrot.slane %v2179_v60, 4  ;;  %v2212_v63 = vrot.slane %v2210_v49, 4  ;;  %v2218_v22 = vrot.slane %v2216_v30, 5  ;;  %v9880_v37 = vld [vmem:[%s17568_s0 + $0x18] sm:$0xf] }
  0xbb   :  { %v9780_v24 = vrot.slane %v9764_v15, 9  ;;  %v2203_v42 = vor.u32 %v2202_v16, %v2199_v20  ;;  %v2726_v11 = vrot.slane %v13137_v55, 5  ;;  %v2729_v50 = vrot.slane %v13142_v35, 5  ;;  %v9881_v60 = vld [vmem:[%s17568_s0 + $0x1c] sm:$0xf] }
  0xbc   :  { %v2190_v48 = vrot.slane %v2189_v26, 4  ;;  %v2185_v54 = vsel %vm11847_vm4, %v2180_v40, %v2184_v4  ;;  %v2213_v8 = vor.u32 %v2212_v63, %v2208_v1  ;;  %v9781_v34 = vrot.slane %v9765_v18, 9 }
  0xbd   :  { %11087 = vmatmul.mubr.msk.bf16.gmra.mxu0 %vm511_vm1, %v13052_v62  ;;  %v2733_v45 = vrot.slane %v13157_v28, 5  ;;  %v2204_v44 = vrot.slane %v2203_v42, 4  ;;  %v2727_v53 = vsel %vm12224_vm7, %v9780_v24, %v2726_v11  ;;  %v2728_v0 = vrot.slane %v2726_v11, 4 }
  0xbe   :  { %11090 = vmatprep.mubr.msk.bf16.mxu0 %vm511_vm1, %v9728_v39  ;;  %v2195_v62 = vsel %vm11847_vm4, %v2190_v48, %v2194_v61  ;;  %v2214_v58 = vrot.slane %v2213_v8, 4  ;;  %v2736_v36 = vrot.slane %v9716_v46, 5  ;;  %v2221_v33 = vshrl.u32 %v9711_v23, 16 }
  0xbf   :  { %v9730_v17 = vcombine.low %v2185_v54, %v2195_v62  ;;  %v2734_v7 = vsel %vm12224_vm7, %v9781_v34, %v2733_v45  ;;  %v2735_v56 = vrot.slane %v2733_v45, 4  ;;  %v2209_v39 = vsel %vm11847_vm4, %v2204_v44, %v2208_v1  ;;  %v9883_v62 = vld [vmem:[%s17568_s0 + $0x24] sm:$0xf] }
  0xc0   :  { %v2730_v3 = vsel %vm12224_vm7, %v2728_v0, %v2729_v50  ;;  %v2219_v12 = vsel %vm11847_vm4, %v2214_v58, %v2218_v22  ;;  %v2224_v14 = vshll.u32 %v9711_v23, 16  ;;  %v2230_v21 = vshll.u32 %v13137_v55, 16  ;;  %v13225_v58 = vld [vmem:[%s17568_s0 + $0x28] sm:$0xf] }
  0xc1   :  { %11129 = vmatmul.mubr.msk.bf16.gmra.mxu1 %vm511_vm1, %v9796_v6  ;;  %v9797_v43 = vcombine.low %v2727_v53, %v2730_v3  ;;  %v9731_v38 = vcombine.low %v2209_v39, %v2219_v12  ;;  %v2737_v4 = vsel %vm12224_vm7, %v2735_v56, %v2736_v36  ;;  %v2223_v6 = vrot.slane %v2221_v33, 4  ;;  %v13234_v12 = vld [vmem:[%s17568_s0 + $0x2c] sm:$0x1] }
  0xc2   :  { %v2234_v25 = vshrl.u32 %v13137_v55, 16  ;;  %v9798_v59 = vcombine.low %v2734_v7, %v2737_v4  ;;  %v2226_v52 = vrot.slane %v2224_v14, 5  ;;  %v2232_v31 = vrot.slane %v2230_v21, 5 }
  0xc3   :  { %11132 = vmatprep.mubr.msk.bf16.mxu1 %vm511_vm1, %v9797_v43  ;;  %v2240_v15 = vshll.u32 %v13142_v35, 16  ;;  %v2245_v49 = vshrl.u32 %v9714_v10, 16  ;;  %v2248_v30 = vshll.u32 %v9714_v10, 16  ;;  %v2254_v55 = vshll.u32 %v13157_v28, 16 }
  0xc4   :  { %v2236_v61 = vrot.slane %v2234_v25, 4  ;;  %v2227_v26 = vor.u32 %v2226_v52, %v2223_v6  ;;  %v2258_v16 = vshrl.u32 %v13157_v28, 16  ;;  %v2264_v1 = vshll.u32 %v9716_v46, 16 }
  0xc5   :  { %11091 = vmatmul.mubr.msk.bf16.gmra.mxu0 %vm511_vm1, %v13127_v13  ;;  %v2242_v20 = vrot.slane %v2240_v15, 5  ;;  %v2247_v18 = vrot.slane %v2245_v49, 4  ;;  %v2250_v40 = vrot.slane %v2248_v30, 5  ;;  %v2256_v63 = vrot.slane %v2254_v55, 5  ;;  %v9882_v13 = vld [vmem:[%s17568_s0 + $0x20] sm:$0x1] }
  0xc6   :  { %11094 = vmatprep.mubr.msk.bf16.mxu0 %vm511_vm1, %v9730_v17  ;;  %v2237_v35 = vor.u32 %v2236_v61, %v2232_v31  ;;  %v2228_v22 = vrot.slane %v2227_v26, 4  ;;  %v2260_v24 = vrot.slane %v2258_v16, 4  ;;  %v2266_v48 = vrot.slane %v2264_v1, 5  ;;  %v9888_v61 = vld [vmem:[%s17568_s0 + $0x38] sm:$0x1] }
  0xc7   :  { %v3443_v42 = vshrl.u32 %v9880_v37, 16  ;;  %v2251_v50 = vor.u32 %v2250_v40, %v2247_v18  ;;  %v3446_v28 = vshll.u32 %v9880_v37, 16  ;;  %v3452_v54 = vshll.u32 %v9881_v60, 16  ;;  %v13213_v8 = vpop.f32.mrf.mxu1  ;;  %v9889_v16 = vld [vmem:[%s17568_s0 + $0x3c] sm:$0xf] }
  0xc8   :  { %v2238_v11 = vrot.slane %v2237_v35, 4  ;;  %v2233_v46 = vsel %vm11847_vm4, %v2228_v22, %v2232_v31  ;;  %v2261_v34 = vor.u32 %v2260_v24, %v2256_v63  ;;  %v3456_v23 = vshrl.u32 %v9881_v60, 16  ;;  %v9916_v18 = vld [vmem:[%s17568_s0 + $0x120] sm:$0xf] }
  0xc9   :  { %11133 = vmatmul.mubr.msk.bf16.gmra.mxu1 %vm511_vm1, %v9798_v59  ;;  %v3445_v45 = vrot.slane %v3443_v42, 4  ;;  %v2252_v53 = vrot.slane %v2251_v50, 4  ;;  %v3448_v0 = vrot.slane %v3446_v28, 5  ;;  %v3454_v17 = vrot.slane %v3452_v54, 5  ;;  %v13227_v7 = vpop.f32.mrf.mxu1  ;;  %v9886_v59 = vld [vmem:[%s17568_s0 + $0x30] sm:$0xf] }
  0xca   :  { %v2243_v44 = vsel %vm11847_vm4, %v2238_v11, %v2242_v20  ;;  %v2262_v10 = vrot.slane %v2261_v34, 4  ;;  %v3458_v39 = vrot.slane %v3456_v23, 4  ;;  %v3462_v3 = vshll.u32 %v9882_v13, 16  ;;  %v11605_v50 = vld [vmem:[%s17568_s0 + $0x18] sm:$0xff]  }
  0xcb   :  { %v9732_v56 = vcombine.low %v2233_v46, %v2243_v44  ;;  %v2257_v36 = vsel %vm11847_vm4, %v2252_v53, %v2256_v63  ;;  %v3449_v33 = vor.u32 %v3448_v0, %v3445_v45  ;;  %v3467_v43 = vshrl.u32 %v9883_v62, 16  ;;  %v13236_v21 = vpop.f32.mrf.mxu1  ;;  %v9890_v53 = vld [vmem:[%s17568_s0 + $0x40] sm:$0xf] }
  0xcc   :  { %v3470_v14 = vshll.u32 %v9883_v62, 16  ;;  %v2267_v4 = vsel %vm11847_vm4, %v2262_v10, %v2266_v48  ;;  %v3459_v6 = vor.u32 %v3458_v39, %v3454_v17  ;;  %v3464_v25 = vrot.slane %v3462_v3, 5 }
  0xcd   :  { %11095 = vmatmul.mubr.msk.bf16.gmra.mxu0 %vm511_vm1, %v9731_v38  ;;  %v3476_v37 = vshll.u32 %v13225_v58, 16  ;;  %v9733_v52 = vcombine.low %v2257_v36, %v2267_v4  ;;  %v3450_v31 = vrot.slane %v3449_v33, 4  ;;  %v3469_v15 = vrot.slane %v3467_v43, 4  ;;  %v9887_v38 = vld [vmem:[%s17568_s0 + $0x34] sm:$0xf]  ;;  %v13254_v20 = vpop.f32.mrf.mxu1 }
  0xce   :  { %11098 = vmatprep.mubr.msk.bf16.mxu0 %vm511_vm1, %v9732_v56  ;;  %v3472_v60 = vrot.slane %v3470_v14, 5  ;;  %v3460_v49 = vrot.slane %v3459_v6, 4  ;;  %v3480_v55 = vshrl.u32 %v13225_v58, 16  ;;  %v3486_v26 = vshll.u32 %v13234_v12, 16  ;;  %v13290_v14 = vld [vmem:[%s17568_s0 + $0x44] sm:$0x1] }
  0xcf   :  { %v3478_v30 = vrot.slane %v3476_v37, 5  ;;  %v3455_v1 = vsel %vm11847_vm4, %v3450_v31, %v3454_v17  ;;  %v13267_v48 = vsel %vm560_vm0, %v12956_v9, 0  ;;  %v3491_v13 = vshrl.u32 %v9886_v59, 16  ;;  %v11606_v37 = vld [vmem:[%s17568_s0 + $0x24] sm:$0xff]  }
  0xd0   :  { %v3473_v35 = vor.u32 %v3472_v60, %v3469_v15  ;;  %v3465_v63 = vsel %vm11847_vm4, %v3460_v49, %v3464_v25  ;;  %v3482_v22 = vrot.slane %v3480_v55, 4  ;;  %v3488_v24 = vrot.slane %v3486_v26, 5  ;;  %17667 = vst [vmem:[#allocation11_spill] sm:$0xff] %v13267_v48  ;;  %v9893_v55 = vld [vmem:[%s17568_s0 + $0x4c] sm:$0xf] }
  0xd1   :  { %v9929_v42 = vcombine.low %v3455_v1, %v3465_v63  ;;  %v3494_v28 = vshll.u32 %v9886_v59, 16  ;;  %v3500_v46 = vshll.u32 %v9887_v38, 16  ;;  %v3504_v34 = vshrl.u32 %v9887_v38, 16  ;;  %v13272_v23 = vpop.f32.mrf.mxu1 }
  0xd2   :  { %v3474_v11 = vrot.slane %v3473_v35, 4  ;;  %v3483_v54 = vor.u32 %v3482_v22, %v3478_v30  ;;  %v3510_v45 = vshll.u32 %v9888_v61, 16  ;;  %v3493_v62 = vrot.slane %v3491_v13, 4  ;;  %v10936_v56 = vpop.f32.mrf.mxu0  ;;  %v11607_v13 = vld [vmem:[%s17568_s0 + $0x30] sm:$0xff]  }
  0xd3   :  { %11172 = vmatprep.mubr.msk.bf16.mxu1 %vm511_vm1, %v9929_v42  ;;  %v3496_v44 = vrot.slane %v3494_v28, 5  ;;  %v3515_v0 = vshrl.u32 %v9889_v16, 16  ;;  %v3502_v10 = vrot.slane %v3500_v46, 5  ;;  %v3506_v39 = vrot.slane %v3504_v34, 4  ;;  %v13281_v36 = vpop.f32.mrf.mxu1 }
  0xd4   :  { %v3479_v9 = vsel %vm11847_vm4, %v3474_v11, %v3478_v30  ;;  %v3484_v17 = vrot.slane %v3483_v54, 4  ;;  %v3512_v3 = vrot.slane %v3510_v45, 5  ;;  %v13285_v33 = vadd.f32 %v13213_v8, %v10936_v56  ;;  %v598_v59 = vpop.f32.mrf.mxu0  ;;  %v9892_v30 = vld [vmem:[%s17568_s0 + $0x48] sm:$0xf] }
  0xd5   :  { %11099 = vmatmul.mubr.msk.bf16.gmra.mxu0 %vm511_vm1, %v9733_v52  ;;  %v3497_v43 = vor.u32 %v3496_v44, %v3493_v62  ;;  %v3517_v4 = vrot.slane %v3515_v0, 4  ;;  %v3518_v6 = vshll.u32 %v9889_v16, 16  ;;  %v3507_v52 = vor.u32 %v3506_v39, %v3502_v10  ;;  %v13297_v15 = vpop.f32.mrf.mxu1 }
  0xd6   :  { %11138 = vmatprep.mubr.msk.bf16.mxu0 %vm511_vm1, %v11605_v50  ;;  %v3489_v25 = vsel %vm11847_vm4, %v3484_v17, %v3488_v24  ;;  %v3524_v31 = vshll.u32 %v9890_v53, 16  ;;  %v3528_v8 = vshrl.u32 %v9890_v53, 16  ;;  %v13300_v38 = vadd.f32 %v13227_v7, %v598_v59  ;;  %v10937_v16 = vpop.f32.mrf.mxu0  ;;  %v9894_v7 = vld [vmem:[%s17568_s0 + $0x50] sm:$0x1]  ;;  %v11672_v17 = vld [vmem:[%s17569_s1 + $0x4] sm:$0x3] }
  0xd7   :  { %v9930_v60 = vcombine.low %v3479_v9, %v3489_v25  ;;  %v3498_v61 = vrot.slane %v3497_v43, 4  ;;  %v3520_v49 = vrot.slane %v3518_v6, 5  ;;  %v3508_v26 = vrot.slane %v3507_v52, 4  ;;  %v13309_v22 = vpop.f32.mrf.mxu1 }
  0xd8   :  { %v3526_v1 = vrot.slane %v3524_v31, 5  ;;  %v3530_v35 = vrot.slane %v3528_v8, 4  ;;  %v3534_v63 = vshll.u32 %v13290_v14, 16  ;;  %v13318_v42 = vadd.f32 %v13236_v21, %v10937_v16  ;;  %v601_v34 = vpop.f32.mrf.mxu0  ;;  %v9895_v21 = vld [vmem:[%s17568_s0 + $0x54] sm:$0xf] }
  0xd9   :  { %11173 = vmatmul.mubr.msk.bf16.vlgmr.msra.gmra.mxu1 %vm511_vm1, %v9930_v60  ;;  %v3503_v24 = vsel %vm11847_vm4, %v3498_v61, %v3502_v10  ;;  %v3521_v11 = vor.u32 %v3520_v49, %v3517_v4  ;;  %v3513_v28 = vsel %vm11847_vm4, %v3508_v26, %v3512_v3  ;;  %v3539_v45 = vshrl.u32 %v9892_v30, 16  ;;  %v13333_v0 = vpop.f32.mrf.mxu1  ;;  %v13346_v3 = vld [vmem:[%s17568_s0 + $0x5c] sm:$0x1]  ;;  %v11673_v61 = vld [vmem:[%s17569_s1] sm:$0x3] }
  0xda   :  { %11239 = vmatpush3.bf16.msra.mxu1 %v11809_v5  ;;  %v3531_v54 = vor.u32 %v3530_v35, %v3526_v1  ;;  %v3536_v46 = vrot.slane %v3534_v63, 5  ;;  %v9931_v9 = vcombine.low %v3503_v24, %v3513_v28  ;;  %v13331_v44 = vadd.f32 %v13254_v20, %v601_v34  ;;  %v9896_v5 = vld [vmem:[%s17568_s0 + $0x58] sm:$0xf] }
  0xdb   :  { %v3522_v62 = vrot.slane %v3521_v11, 4  ;;  %v3542_v53 = vshll.u32 %v9892_v30, 16  ;;  %11563 = vmatprep.subr.msk.bf16.mxu1 %vm560_vm0, %v11672_v17  ;;  %v3541_v10 = vrot.slane %v3539_v45, 4  ;;  %v3548_v39 = vshll.u32 %v9893_v55, 16  ;;  %v13352_v59 = vpop.f32.mrf.mxu1  ;;  %v11609_v11 = vld [vmem:[%s17568_s0 + $0x48] sm:$0xff]  }
  0xdc   :  { %v3532_v56 = vrot.slane %v3531_v54, 4  ;;  %v3552_v20 = vshrl.u32 %v9893_v55, 16  ;;  %11176 = vmatprep.mubr.msk.bf16.mxu1 %vm511_vm1, %v9931_v9  ;;  %v10940_v4 = vpop.f32.mrf.mxu0  ;;  %v3558_v25 = vshll.u32 %v9894_v7, 16  ;;  %v3566_v7 = vshll.u32 %v9895_v21, 16  ;;  %v9899_v17 = vld [vmem:[%s17568_s0 + $0x64] sm:$0xf] }
  0xdd   :  { %11139 = vmatmul.mubr.msk.bf16.vlgmr.msra.gmra.mxu0 %vm511_vm1, %v11606_v37  ;;  %v3527_v43 = vsel %vm11847_vm4, %v3522_v62, %v3526_v1  ;;  %v3544_v6 = vrot.slane %v3542_v53, 5  ;;  %v3563_v37 = vshrl.u32 %v9895_v21, 16  ;;  %v13358_v31 = vadd.f32 %v13272_v23, %v10940_v4  ;;  %v13364_v1 = vpop.f32.mrf.mxu1  ;;  %v11608_v23 = vld [vmem:[%s17568_s0 + $0x3c] sm:$0xff]  }
  0xde   :  { %11205 = vmatpush3.bf16.msra.mxu0 %v13267_v48  ;;  %v3537_v52 = vsel %vm11847_vm4, %v3532_v56, %v3536_v46  ;;  %11142 = vmatprep.mubr.msk.bf16.mxu0 %vm511_vm1, %v11607_v13  ;;  %v3550_v8 = vrot.slane %v3548_v39, 5  ;;  %v3554_v60 = vrot.slane %v3552_v20, 4  ;;  %v614_v30 = vpop.f32.mrf.mxu0  ;;  %v3560_v26 = vrot.slane %v3558_v25, 5  ;;  %v9898_v13 = vld [vmem:[%s17568_s0 + $0x60] sm:$0xf] }
  0xdf   :  { %11562 = vmatprep.subr.msk.bf16.mxu0 %vm560_vm0, %v11673_v61  ;;  %v9932_v49 = vcombine.low %v3527_v43, %v3537_v52  ;;  %v3545_v55 = vor.u32 %v3544_v6, %v3541_v10  ;;  %v3565_v16 = vrot.slane %v3563_v37, 4  ;;  %v13370_v35 = vadd.f32 %v13281_v36, %v614_v30  ;;  %v13381_v45 = vpop.f32.mrf.mxu1  ;;  %v9900_v20 = vld [vmem:[%s17568_s0 + $0x68] sm:$0x1]  ;;  %v9901_v52 = vld [vmem:[%s17568_s0 + $0x6c] sm:$0xf] }
  0xe0   :  { %v3555_v63 = vor.u32 %v3554_v60, %v3550_v8  ;;  %v3572_v24 = vshll.u32 %v9896_v5, 16  ;;  %v10941_v54 = vpop.f32.mrf.mxu0  ;;  %v3576_v46 = vshrl.u32 %v9896_v5, 16  ;;  %v3582_v34 = vshll.u32 %v13346_v3, 16  ;;  %v9902_v30 = vld [vmem:[%s17568_s0 + $0x70] sm:$0xf] }
  0xe1   :  { %11177 = vmatmul.mubr.msk.bf16.gmra.mxu1 %vm511_vm1, %v9932_v49  ;;  %v3546_v28 = vrot.slane %v3545_v55, 4  ;;  %v13384_v9 = vadd.f32 %v13297_v15, %v10941_v54  ;;  %v3568_v62 = vrot.slane %v3566_v7, 5  ;;  %v3587_v43 = vshrl.u32 %v9898_v13, 16  ;;  %v11611_v54 = vld [vmem:[%s17568_s0 + $0x60] sm:$0xff]  }
  0xe2   :  { %v3556_v21 = vrot.slane %v3555_v63, 4  ;;  %v3574_v53 = vrot.slane %v3572_v24, 5  ;;  %v3578_v5 = vrot.slane %v3576_v46, 4  ;;  %v3584_v10 = vrot.slane %v3582_v34, 5  ;;  %v617_v39 = vpop.f32.mrf.mxu0  ;;  %v13394_v4 = vpop.f32.mrf.mxu1 }
  0xe3   :  { %v3551_v56 = vsel %vm11847_vm4, %v3546_v28, %v3550_v8  ;;  %v3569_v6 = vor.u32 %v3568_v62, %v3565_v16  ;;  %v13400_v25 = vadd.f32 %v13309_v22, %v617_v39  ;;  %v3590_v37 = vshll.u32 %v9898_v13, 16  ;;  %v11610_v16 = vld [vmem:[%s17568_s0 + $0x54] sm:$0xff]  }
  0xe4   :  { %v3561_v15 = vsel %vm11847_vm4, %v3556_v21, %v3560_v26  ;;  %v3579_v60 = vor.u32 %v3578_v5, %v3574_v53  ;;  %v3589_v61 = vrot.slane %v3587_v43, 4  ;;  %v3596_v49 = vshll.u32 %v9899_v17, 16  ;;  %v13409_v55 = vpop.f32.mrf.mxu1 }
  0xe5   :  { %11143 = vmatmul.mubr.msk.bf16.gmra.mxu0 %vm511_vm1, %v11608_v23  ;;  %v9933_v8 = vcombine.low %v3551_v56, %v3561_v15  ;;  %v3570_v26 = vrot.slane %v3569_v6, 4  ;;  %v10944_v22 = vpop.f32.mrf.mxu0  ;;  %v3592_v23 = vrot.slane %v3590_v37, 5  ;;  %v3600_v63 = vshrl.u32 %v9899_v17, 16  ;;  %v9905_v6 = vld [vmem:[%s17568_s0 + $0xf4] sm:$0xf] }
  0xe6   :  { %11146 = vmatprep.mubr.msk.bf16.mxu0 %vm511_vm1, %v11609_v11  ;;  %v3606_v7 = vshll.u32 %v9900_v20, 16  ;;  %v3580_v24 = vrot.slane %v3579_v60, 4  ;;  %v13416_v11 = vadd.f32 %v13333_v0, %v10944_v22  ;;  %v3598_v13 = vrot.slane %v3596_v49, 5  ;;  %v13421_v46 = vpop.f32.mrf.mxu1  ;;  %v13428_v0 = vld [vmem:[%s17568_s0 + $0x74] sm:$0x1] }
  0xe7   :  { %11180 = vmatprep.mubr.msk.bf16.mxu1 %vm511_vm1, %v9933_v8  ;;  %v3611_v28 = vshrl.u32 %v9901_v52, 16  ;;  %v3575_v34 = vsel %vm11847_vm4, %v3570_v26, %v3574_v53  ;;  %v630_v21 = vpop.f32.mrf.mxu0  ;;  %v3593_v62 = vor.u32 %v3592_v23, %v3589_v61  ;;  %v3602_v17 = vrot.slane %v3600_v63, 4  ;;  %v9904_v53 = vld [vmem:[%s17568_s0 + $0xf0] sm:$0xf] }
  0xe8   :  { %v3608_v56 = vrot.slane %v3606_v7, 5  ;;  %v3585_v5 = vsel %vm11847_vm4, %v3580_v24, %v3584_v10  ;;  %v13433_v39 = vadd.f32 %v13352_v59, %v630_v21  ;;  %v3614_v43 = vshll.u32 %v9901_v52, 16  ;;  %v13435_v15 = vpop.f32.mrf.mxu1  ;;  %v9911_v7 = vld [vmem:[%s17568_s0 + $0x10c] sm:$0xf] }
  0xe9   :  { %v3613_v20 = vrot.slane %v3611_v28, 4  ;;  %v9934_v37 = vcombine.low %v3575_v34, %v3585_v5  ;;  %v3594_v8 = vrot.slane %v3593_v62, 4  ;;  %v3603_v60 = vor.u32 %v3602_v17, %v3598_v13  ;;  %v10945_v61 = vpop.f32.mrf.mxu0  ;;  %v11612_v62 = vld [vmem:[%s17568_s0 + $0x6c] sm:$0xff]  }
  0xea   :  { %v3620_v10 = vshll.u32 %v9902_v30, 16  ;;  %v13444_v59 = vadd.f32 %v13364_v1, %v10945_v61  ;;  %v3616_v49 = vrot.slane %v3614_v43, 5  ;;  %v3624_v52 = vshrl.u32 %v9902_v30, 16 }
  0xeb   :  { %v3630_v26 = vshll.u32 %v13428_v0, 16  ;;  %11181 = vmatmul.mubr.msk.bf16.gmra.mxu1 %vm511_vm1, %v9934_v37  ;;  %v3599_v22 = vsel %vm11847_vm4, %v3594_v8, %v3598_v13  ;;  %v3604_v23 = vrot.slane %v3603_v60, 4  ;;  %v633_v24 = vpop.f32.mrf.mxu0  ;;  %v13452_v28 = vpop.f32.mrf.mxu1  ;;  %v3635_v17 = vshrl.u32 %v9904_v53, 16  ;;  %v9907_v60 = vld [vmem:[%s17568_s0 + $0xfc] sm:$0xf] }
  0xec   :  { %v3622_v63 = vrot.slane %v3620_v10, 5  ;;  %v3617_v1 = vor.u32 %v3616_v49, %v3613_v20  ;;  %v3626_v34 = vrot.slane %v3624_v52, 4  ;;  %v13455_v30 = vadd.f32 %v13381_v45, %v633_v24 }
  0xed   :  { %11147 = vmatmul.mubr.msk.bf16.gmra.mxu0 %vm511_vm1, %v11610_v16  ;;  %v3632_v21 = vrot.slane %v3630_v26, 5  ;;  %v9906_v16 = vld [vmem:[%s17568_s0 + $0xf8] sm:$0x1]  ;;  %v3609_v13 = vsel %vm11847_vm4, %v3604_v23, %v3608_v56  ;;  %v3638_v5 = vshll.u32 %v9904_v53, 16  ;;  %v3644_v20 = vshll.u32 %v9905_v6, 16  ;;  %v13466_v43 = vpop.f32.mrf.mxu1 }
  0xee   :  { %11150 = vmatprep.mubr.msk.bf16.mxu0 %vm511_vm1, %v11611_v54  ;;  %v9935_v45 = vcombine.low %v3599_v22, %v3609_v13  ;;  %v3618_v37 = vrot.slane %v3617_v1, 4  ;;  %v3627_v8 = vor.u32 %v3626_v34, %v3622_v63  ;;  %v3648_v54 = vshrl.u32 %v9905_v6, 16  ;;  %v9908_v53 = vld [vmem:[%s17568_s0 + $0x100] sm:$0xf]  ;;  %v9909_v1 = vld [vmem:[%s17568_s0 + $0x104] sm:$0x1] }
  0xef   :  { %v10948_v61 = vpop.f32.mrf.mxu0  ;;  %v3637_v10 = vrot.slane %v3635_v17, 4  ;;  %v3640_v56 = vrot.slane %v3638_v5, 5  ;;  %v3646_v49 = vrot.slane %v3644_v20, 5  ;;  %v3654_v52 = vshll.u32 %v9906_v16, 16  ;;  %v13474_v26 = vpop.f32.mrf.mxu1  ;;  %v11613_v34 = vld [vmem:[%s17568_s0 + $0xf0] sm:$0xff]  }
  0xf0   :  { %11184 = vmatprep.mubr.msk.bf16.mxu1 %vm511_vm1, %v9935_v45  ;;  %v3623_v6 = vsel %vm11847_vm4, %v3618_v37, %v3622_v63  ;;  %v3628_v22 = vrot.slane %v3627_v8, 4  ;;  %v13480_v23 = vadd.f32 %v13394_v4, %v10948_v61  ;;  %v3650_v24 = vrot.slane %v3648_v54, 4  ;;  %v9910_v4 = vld [vmem:[%s17568_s0 + $0x108] sm:$0xf] }
  0xf1   :  { %v646_v16 = vpop.f32.mrf.mxu0  ;;  %v3641_v13 = vor.u32 %v3640_v56, %v3637_v10  ;;  %v3656_v17 = vrot.slane %v3654_v52, 5  ;;  %v3659_v5 = vshrl.u32 %v9907_v60, 16  ;;  %v3662_v20 = vshll.u32 %v9907_v60, 16  ;;  %v13488_v45 = vpop.f32.mrf.mxu1 }
  0xf2   :  { %v3633_v63 = vsel %vm11847_vm4, %v3628_v22, %v3632_v21  ;;  %v13496_v37 = vadd.f32 %v13409_v55, %v646_v16  ;;  %v3651_v8 = vor.u32 %v3650_v24, %v3646_v49  ;;  %v3668_v54 = vshll.u32 %v9908_v53, 16  ;;  %v9913_v22 = vld [vmem:[%s17568_s0 + $0x114] sm:$0xf] }
  0xf3   :  { %v9936_v61 = vcombine.low %v3623_v6, %v3633_v63  ;;  %v3642_v10 = vrot.slane %v3641_v13, 4  ;;  %v10949_v56 = vpop.f32.mrf.mxu0  ;;  %v3661_v60 = vrot.slane %v3659_v5, 4  ;;  %v3664_v52 = vrot.slane %v3662_v20, 5 }
  0xf4   :  { %v3652_v36 = vrot.slane %v3651_v8, 4  ;;  %v13503_v50 = vadd.f32 %v13421_v46, %v10949_v56  ;;  %v3670_v21 = vrot.slane %v3668_v54, 5  ;;  %v3672_v55 = vshrl.u32 %v9908_v53, 16  ;;  %v13509_v6 = vpop.f32.mrf.mxu1 }
  0xf5   :  { %11151 = vmatmul.mubr.msk.bf16.gmra.mxu0 %vm511_vm1, %v11612_v62  ;;  %v9912_v62 = vld [vmem:[%s17568_s0 + $0x110] sm:$0x1]  ;;  %11185 = vmatmul.mubr.msk.bf16.gmra.mxu1 %vm511_vm1, %v9936_v61  ;;  %v3647_v46 = vsel %vm11847_vm4, %v3642_v10, %v3646_v49  ;;  %v3665_v24 = vor.u32 %v3664_v52, %v3661_v60  ;;  %v3678_v16 = vshll.u32 %v9909_v1, 16  ;;  %v649_v53 = vpop.f32.mrf.mxu0  ;;  %v3683_v13 = vshrl.u32 %v9910_v4, 16  ;;  %v9914_v60 = vld [vmem:[%s17568_s0 + $0x118] sm:$0xf] }
  0xf6   :  { %11154 = vmatprep.mubr.msk.bf16.mxu0 %vm511_vm1, %v11613_v34  ;;  %v11614_v34 = vld [vmem:[%s17568_s0 + $0xfc] sm:$0xff]   ;;  %v3657_v5 = vsel %vm11847_vm4, %v3652_v36, %v3656_v17  ;;  %v3674_v20 = vrot.slane %v3672_v55, 4  ;;  %v13523_v63 = vadd.f32 %v13435_v15, %v649_v53  ;;  %v3686_v8 = vshll.u32 %v9910_v4, 16  ;;  %v13525_v54 = vpop.f32.mrf.mxu1  ;;  %v11615_v36 = vld [vmem:[%s17568_s0 + $0x108] sm:$0xff]  }
  0xf7   :  { %v9937_v61 = vcombine.low %v3647_v46, %v3657_v5  ;;  %v3666_v49 = vrot.slane %v3665_v24, 4  ;;  %v3680_v10 = vrot.slane %v3678_v16, 5  ;;  %v10952_v1 = vpop.f32.mrf.mxu0  ;;  %v3685_v56 = vrot.slane %v3683_v13, 4  ;;  %v9915_v13 = vld [vmem:[%s17568_s0 + $0x11c] sm:$0x1] }
  0xf8   :  { %17668 = vst [vmem:[#allocation12_spill] sm:$0xff] %v13523_v63  ;;  %v3675_v17 = vor.u32 %v3674_v20, %v3670_v21  ;;  %v13534_v15 = vadd.f32 %v13452_v28, %v10952_v1  ;;  %v3688_v4 = vrot.slane %v3686_v8, 5  ;;  %v3692_v52 = vshll.u32 %v9911_v7, 16  ;;  %v13536_v55 = vpop.f32.mrf.mxu1 }
  0xf9   :  { %11188 = vmatprep.mubr.msk.bf16.mxu1 %vm511_vm1, %v9937_v61  ;;  %v3671_v46 = vsel %vm11847_vm4, %v3666_v49, %v3670_v21  ;;  %v662_v24 = vpop.f32.mrf.mxu0  ;;  %v3696_v16 = vshrl.u32 %v9911_v7, 16  ;;  %v3702_v53 = vshll.u32 %v9912_v62, 16  ;;  %v3707_v5 = vshrl.u32 %v9913_v22, 16 }
  0xfa   :  { %v3676_v20 = vrot.slane %v3675_v17, 4  ;;  %v13545_v28 = vadd.f32 %v13466_v43, %v662_v24  ;;  %v3689_v8 = vor.u32 %v3688_v4, %v3685_v56  ;;  %v3694_v1 = vrot.slane %v3692_v52, 5  ;;  %v13547_v40 = vpop.f32.mrf.mxu1 }
  0xfb   :  { %v3698_v61 = vrot.slane %v3696_v16, 4  ;;  %v3704_v21 = vrot.slane %v3702_v53, 5  ;;  %v10953_v49 = vpop.f32.mrf.mxu0  ;;  %v3709_v7 = vrot.slane %v3707_v5, 4  ;;  %v3710_v62 = vshll.u32 %v9913_v22, 16 }
  0xfc   :  { %v3681_v17 = vsel %vm11847_vm4, %v3676_v20, %v3680_v10  ;;  %v3690_v43 = vrot.slane %v3689_v8, 4  ;;  %v13556_v56 = vadd.f32 %v13474_v26, %v10953_v49  ;;  %v3716_v4 = vshll.u32 %v9914_v60, 16  ;;  %v11616_v10 = vld [vmem:[%s17568_s0 + $0x114] sm:$0xff]  }
  0xfd   :  { %11155 = vmatmul.mubr.msk.bf16.gmra.mxu0 %vm511_vm1, %v11614_v34  ;;  %v9917_v34 = vld [vmem:[%s17568_s0 + $0x124] sm:$0xf]  ;;  %v9938_v52 = vcombine.low %v3671_v46, %v3681_v17  ;;  %v3699_v22 = vor.u32 %v3698_v61, %v3694_v1  ;;  %v3712_v24 = vrot.slane %v3710_v62, 5  ;;  %v3720_v16 = vshrl.u32 %v9914_v60, 16  ;;  %v665_v53 = vpop.f32.mrf.mxu0  ;;  %v13565_v5 = vpop.f32.mrf.mxu1  ;;  %v9918_v46 = vld [vmem:[%s17568_s0 + $0x128] sm:$0x1] }
  0xfe   :  { %11158 = vmatprep.mubr.msk.bf16.mxu0 %vm511_vm1, %v11615_v36  ;;  %v3695_v26 = vsel %vm11847_vm4, %v3690_v43, %v3694_v1  ;;  %v3718_v20 = vrot.slane %v3716_v4, 5  ;;  %v3726_v36 = vshll.u32 %v9915_v13, 16  ;;  %v13570_v8 = vadd.f32 %v13488_v45, %v665_v53  ;;  %v9919_v17 = vld [vmem:[%s17568_s0 + $0x12c] sm:$0xf]  ;;  %v11617_v45 = vld [vmem:[%s17568_s0 + $0x120] sm:$0xff]  }
  0xff   :  { %11189 = vmatmul.mubr.msk.bf16.gmra.mxu1 %vm511_vm1, %v9938_v52  ;;  %v3700_v60 = vrot.slane %v3699_v22, 4  ;;  %v3713_v61 = vor.u32 %v3712_v24, %v3709_v7  ;;  %v3722_v49 = vrot.slane %v3720_v16, 4  ;;  %v3731_v62 = vshrl.u32 %v9916_v18, 16  ;;  %v13579_v1 = vpop.f32.mrf.mxu1  ;;  %v9920_v7 = vld [vmem:[%s17568_s0 + $0x130] sm:$0xf] }
 0x100   :  { %17669 = vst [vmem:[#allocation13_spill] sm:$0xff] %v13570_v8  ;;  %v3728_v13 = vrot.slane %v3726_v36, 5  ;;  %v3734_v43 = vshll.u32 %v9916_v18, 16  ;;  %v3740_v4 = vshll.u32 %v9917_v34, 16  ;;  %v3744_v53 = vshrl.u32 %v9917_v34, 16  ;;  %v10956_v16 = vpop.f32.mrf.mxu0 }
 0x101   :  { %v3705_v52 = vsel %vm11847_vm4, %v3700_v60, %v3704_v21  ;;  %v3714_v22 = vrot.slane %v3713_v61, 4  ;;  %v3723_v24 = vor.u32 %v3722_v49, %v3718_v20  ;;  %v3733_v48 = vrot.slane %v3731_v62, 4  ;;  %v13589_v41 = vpop.f32.mrf.mxu1 }
 0x102   :  { %v9939_v57 = vcombine.low %v3695_v26, %v3705_v52  ;;  %v13592_v27 = vadd.f32 %v13509_v6, %v10956_v16  ;;  %v3736_v18 = vrot.slane %v3734_v43, 5  ;;  %v3742_v36 = vrot.slane %v3740_v4, 5  ;;  %v678_v32 = vpop.f32.mrf.mxu0 }
 0x103   :  { %v3719_v34 = vsel %vm11847_vm4, %v3714_v22, %v3718_v20  ;;  %v3724_v51 = vrot.slane %v3723_v24, 4  ;;  %v3746_v21 = vrot.slane %v3744_v53, 4  ;;  %v3750_v60 = vshll.u32 %v9918_v46, 16  ;;  %v13597_v61 = vpop.f32.mrf.mxu1 }
 0x104   :  { %11192 = vmatprep.mubr.msk.bf16.mxu1 %vm511_vm1, %v9939_v57  ;;  %v13601_v26 = vadd.f32 %v13525_v54, %v678_v32  ;;  %v3737_v6 = vor.u32 %v3736_v18, %v3733_v48  ;;  %v3755_v49 = vshrl.u32 %v9919_v17, 16  ;;  %v3758_v62 = vshll.u32 %v9919_v17, 16 }
 0x105   :  { %11159 = vmatmul.mubr.msk.bf16.gmra.mxu0 %vm511_vm1, %v11616_v10 }
 0x106   :  { %11162 = vmatprep.mubr.msk.bf16.mxu0 %vm511_vm1, %v11617_v45 }
 0x107   :  { %10 = vsyncpa [#allocation3], 0  ;;  %v3729_v20 = vsel %vm11847_vm4, %v3724_v51, %v3728_v13  ;;  %v3747_v10 = vor.u32 %v3746_v21, %v3742_v36  ;;  %v3752_v43 = vrot.slane %v3750_v60, 5  ;;  %v10957_v4 = vpop.f32.mrf.mxu0  ;;  %v9921_v46 = vld [vmem:[%s17568_s0 + $0x134] sm:$0x1]  ;;  %v3764_v57 = vshll.u32 %v9920_v7, 16  ;;  %v13615_v53 = vpop.f32.mrf.mxu1 }
 0x108   :  { %v9922_v32 = vld [vmem:[%s17568_s0 + $0x138] sm:$0xf]  ;;  %v9940_v48 = vcombine.low %v3719_v34, %v3729_v20  ;;  %v3738_v54 = vrot.slane %v3737_v6, 4  ;;  %v13613_v17 = vadd.f32 %v13536_v55, %v10957_v4  ;;  %v3757_v45 = vrot.slane %v3755_v49, 4  ;;  %v11618_v16 = vld [vmem:[%s17568_s0 + $0x12c] sm:$0xff]   ;;  %s11758_s27 = smov [#allocation2]  }
 0x109   :  { %v3748_v51 = vrot.slane %v3747_v10, 4  ;;  %v3760_v13 = vrot.slane %v3758_v62, 5  ;;  %v3766_v52 = vrot.slane %v3764_v57, 5  ;;  %v3768_v22 = vshrl.u32 %v9920_v7, 16  ;;  %v681_v24 = vpop.f32.mrf.mxu0  ;;  %v9923_v21 = vld [vmem:[%s17568_s0 + $0x13c] sm:$0xf]  ;;  %v13629_v7 = vpop.f32.mrf.mxu1 }
 0x10a   :  { %11193 = vmatmul.mubr.msk.bf16.gmra.mxu1 %vm511_vm1, %v9940_v48  ;;  %v3743_v18 = vsel %vm11847_vm4, %v3738_v54, %v3742_v36  ;;  %v3774_v34 = vshll.u32 %v9921_v46, 16  ;;  %v13624_v55 = vadd.f32 %v13547_v40, %v681_v24  ;;  %v3779_v60 = vshrl.u32 %v9922_v32, 16  ;;  %v11619_v6 = vld [vmem:[%s17568_s0 + $0x138] sm:$0xff]   ;;  %v9924_v40 = vld [vmem:[%s17568_s0 + $0x140] sm:$0x1]  ;;  %s9477_s28 = sshll.u32 %s11758_s27, 4  ;;  %s9478_s28 = int_to_ptr.vmem [resolvable:$true] %s9477_s28 }
 0x10b   :  { %v3753_v49 = vsel %vm11847_vm4, %v3748_v51, %v3752_v43  ;;  %v3761_v62 = vor.u32 %v3760_v13, %v3757_v45  ;;  %v3770_v36 = vrot.slane %v3768_v22, 4  ;;  %v10960_v20 = vpop.f32.mrf.mxu0  ;;  %v3782_v10 = vshll.u32 %v9922_v32, 16  ;;  %v9925_v4 = vld [vmem:[%s17568_s0 + $0x144] sm:$0xf]  ;;  %v13645_v24 = vpop.f32.mrf.mxu1  ;;  %s11734_s29 = scalar_lea.vmem %s9478_s28, 32  ;;  %p11739_p1 = scmp.lt.s32.totalorder %s9478_s28, %s9478_s28 }
 0x10c   :  { %17670 = vst [vmem:[#allocation14_spill] sm:$0xff] %v13624_v55  ;;  %v9941_v46 = vcombine.low %v3743_v18, %v3753_v49  ;;  %v3776_v57 = vrot.slane %v3774_v34, 5  ;;  %v13643_v48 = vadd.f32 %v13565_v5, %v10960_v20  ;;  %v3781_v54 = vrot.slane %v3779_v60, 4  ;;  %v9926_v5 = vld [vmem:[%s17568_s0 + $0x148] sm:$0xf]  ;;  %p11735_p0 = scmp.ne.s32.totalorder %s9478_s28, %s11734_s29  ;;  %p11740_p2 = scmp.lt.s32.totalorder %s11734_s29, %s11734_s29 }
 0x10d   :  { %v3762_v43 = vrot.slane %v3761_v62, 4  ;;  %v3771_v45 = vor.u32 %v3770_v36, %v3766_v52  ;;  %11163 = vmatmul.mubr.msk.bf16.gmra.mxu0 %vm511_vm1, %v11618_v16  ;;  %v694_v51 = vpop.f32.mrf.mxu0  ;;  %v3784_v13 = vrot.slane %v3782_v10, 5  ;;  %v3788_v22 = vshll.u32 %v9923_v21, 16  ;;  %v13656_v49 = vpop.f32.mrf.mxu1 }
 0x10e   :  { %11196 = vmatprep.mubr.msk.bf16.mxu1 %vm511_vm1, %v9941_v46  ;;  %v13650_v32 = vadd.f32 %v13579_v1, %v694_v51  ;;  %v3792_v18 = vshrl.u32 %v9923_v21, 16  ;;  %v3798_v34 = vshll.u32 %v9924_v40, 16  ;;  %v3803_v60 = vshrl.u32 %v9925_v4, 16  ;;  %11166 = vmatprep.mubr.msk.bf16.mxu0 %vm511_vm1, %v11619_v6  ;;  %v9927_v1 = vld [vmem:[%s17568_s0 + $0x14c] sm:$0x1]  ;;  %p11741_p3 = por %p11740_p2, %p11739_p1 }
 0x10f   :  { %v3767_v16 = vsel %vm11847_vm4, %v3762_v43, %v3766_v52  ;;  %v3772_v62 = vrot.slane %v3771_v45, 4  ;;  %v3785_v36 = vor.u32 %v3784_v13, %v3781_v54  ;;  %v3790_v20 = vrot.slane %v3788_v22, 5  ;;  %v10961_v10 = vpop.f32.mrf.mxu0  ;;  %v13666_v6 = vpop.f32.mrf.mxu1  ;;  %v11620_v13 = vld [vmem:[%s17568_s0 + $0x144] sm:$0xff]   ;;  %v10027_v22 = vld [vmem:[%s17568_s0 + $0x60] sm:$0xf] }
 0x110   :  { %v3794_v21 = vrot.slane %v3792_v18, 4  ;;  %v3800_v40 = vrot.slane %v3798_v34, 5  ;;  %v13664_v46 = vadd.f32 %v13589_v41, %v10961_v10  ;;  %v3805_v51 = vrot.slane %v3803_v60, 4  ;;  %17671 = vst [vmem:[#allocation15_spill] sm:$0xff] %v13666_v6  ;;  %p11742_p4 = pnand %p11741_p3, %p11735_p0 }
 0x111   :  { %v3777_v55 = vsel %vm11847_vm4, %v3772_v62, %v3776_v57  ;;  %v3786_v52 = vrot.slane %v3785_v36, 4  ;;  %v3806_v43 = vshll.u32 %v9925_v4, 16  ;;  %v3812_v54 = vshll.u32 %v9926_v5, 16  ;;  %v697_v45 = vpop.f32.mrf.mxu0  ;;  %v10028_v57 = vld [vmem:[%s17568_s0 + $0x64] sm:$0xf]  ;;  %v13679_v62 = vpop.f32.mrf.mxu1 }
 0x112   :  { %v9942_v41 = vcombine.low %v3767_v16, %v3777_v55  ;;  %v3795_v18 = vor.u32 %v3794_v21, %v3790_v20  ;;  %v3816_v34 = vshrl.u32 %v9926_v5, 16  ;;  %v3822_v60 = vshll.u32 %v9927_v1, 16 }
 0x113   :  { %v3791_v4 = vsel %vm11847_vm4, %v3786_v52, %v3790_v20  ;;  %v3808_v36 = vrot.slane %v3806_v43, 5  ;;  %v3814_v10 = vrot.slane %v3812_v54, 5  ;;  %v13684_v8 = vadd.f32 %v13597_v61, %v697_v45  ;;  %v13687_v21 = vpop.f32.mrf.mxu1  ;;  %v10059_v20 = vld [vmem:[%s17568_s0 + $0x68] sm:$0x1] }
 0x114   :  { %11197 = vmatmul.mubr.msk.bf16.gmra.mxu1 %vm511_vm1, %v9942_v41  ;;  %v3796_v55 = vrot.slane %v3795_v18, 4  ;;  %v3818_v16 = vrot.slane %v3816_v34, 4  ;;  %v3824_v5 = vrot.slane %v3822_v60, 5  ;;  %v4790_v1 = vshrl.u32 %v10027_v22, 16  ;;  %17673 = vst [vmem:[#allocation17_spill] sm:$0xff] %v13687_v21  ;;  %v10964_v63 = vpop.f32.mrf.mxu0 }
 0x115   :  { %17672 = vst [vmem:[#allocation16_spill] sm:$0xff] %v13684_v8  ;;  %v3809_v6 = vor.u32 %v3808_v36, %v3805_v51  ;;  %11167 = vmatmul.mubr.msk.bf16.gmra.mxu0 %vm511_vm1, %v11620_v13  ;;  %v4793_v52 = vshll.u32 %v10027_v22, 16  ;;  %v4799_v43 = vshll.u32 %v10028_v57, 16  ;;  %v4803_v61 = vshrl.u32 %v10028_v57, 16  ;;  %v10029_v51 = vld [vmem:[%s17568_s0 + $0x6c] sm:$0xf]  ;;  %v13701_v13 = vpop.f32.mrf.mxu1 }
 0x116   :  { %v3801_v54 = vsel %vm11847_vm4, %v3796_v55, %v3800_v40  ;;  %v3819_v45 = vor.u32 %v3818_v16, %v3814_v10  ;;  %v13696_v41 = vadd.f32 %v13615_v53, %v10964_v63  ;;  %v4792_v18 = vrot.slane %v4790_v1, 4  ;;  %17674 = vst [vmem:[#allocation18_spill] sm:$0xff] %v13701_v13  ;;  %v710_v36 = vpop.f32.mrf.mxu0 }
 0x117   :  { %v9943_v34 = vcombine.low %v3791_v4, %v3801_v54  ;;  %v3810_v60 = vrot.slane %v3809_v6, 4  ;;  %v4795_v22 = vrot.slane %v4793_v52, 5  ;;  %v4801_v8 = vrot.slane %v4799_v43, 5  ;;  %v13706_v63 = vpop.f32.mrf.mxu1  ;;  %v10030_v6 = vld [vmem:[%s17568_s0 + $0x70] sm:$0xf] }
 0x118   :  { %v3820_v57 = vrot.slane %v3819_v45, 4  ;;  %v13704_v21 = vadd.f32 %v13629_v7, %v710_v36  ;;  %v4805_v40 = vrot.slane %v4803_v61, 4  ;;  %v4809_v55 = vshll.u32 %v10059_v20, 16  ;;  %17675 = vst [vmem:[#allocation19_spill] sm:$0xff] %v13706_v63  ;;  %v10965_v1 = vpop.f32.mrf.mxu0  ;;  %v10060_v7 = vld [vmem:[%s17568_s0 + $0x74] sm:$0x1] }
 0x119   :  { %11200 = vmatprep.mubr.msk.bf16.mxu1 %vm511_vm1, %v9943_v34  ;;  %v3815_v53 = vsel %vm11847_vm4, %v3810_v60, %v3814_v10  ;;  %v4796_v16 = vor.u32 %v4795_v22, %v4792_v18  ;;  %v4814_v4 = vshrl.u32 %v10029_v51, 16  ;;  %v4817_v52 = vshll.u32 %v10029_v51, 16  ;;  %v9961_v10 = vld [vmem:[%s17568_s0 + $0x18] sm:$0xe]  ;;  %v13725_v45 = vpop.f32.mrf.mxu1 }
 0x11a   :  { %v3825_v20 = vsel %vm11847_vm4, %v3820_v57, %v3824_v5  ;;  %v4806_v43 = vor.u32 %v4805_v40, %v4801_v8  ;;  %v4811_v61 = vrot.slane %v4809_v55, 5  ;;  %v13720_v54 = vadd.f32 %v13645_v24, %v10965_v1  ;;  %v713_v22 = vpop.f32.mrf.mxu0  ;;  %v9962_v1 = vld [vmem:[%s17568_s0 + $0x24] sm:$0xe] }
 0x11b   :  { %v9944_v18 = vcombine.low %v3815_v53, %v3825_v20  ;;  %v4797_v34 = vrot.slane %v4796_v16, 4  ;;  %v4816_v60 = vrot.slane %v4814_v4, 4  ;;  %v4819_v36 = vrot.slane %v4817_v52, 5  ;;  %v13727_v57 = vpop.f32.mrf.mxu1 }
 0x11c   :  { %v4807_v51 = vrot.slane %v4806_v43, 4  ;;  %v4823_v13 = vshll.u32 %v10030_v6, 16  ;;  %v4827_v63 = vshrl.u32 %v10030_v6, 16  ;;  %v4833_v5 = vshll.u32 %v10060_v7, 16  ;;  %v11004_v16 = vpop.f32.mrf.mxu0 }
 0x11d   :  { %11201 = vmatmul.mubr.msk.bf16.gmra.mxu1 %vm511_vm1, %v9944_v18  ;;  %v4802_v24 = vsel %vm11847_vm4, %v4797_v34, %v4801_v8  ;;  %v4820_v40 = vor.u32 %v4819_v36, %v4816_v60  ;;  %v13733_v55 = vadd.f32 %v13656_v49, %v713_v22  ;;  %v9977_v53 = vrot.slane %v9961_v10, 9  ;;  %v13740_v20 = vpop.f32.mrf.mxu1  ;;  %v11674_v49 = vld [vmem:[%s17568_s0 + $0x1c] sm:$0xf]  ;;  %v11675_v18 = vld [vmem:[%s17568_s0 + $0x20] sm:$0x1] }
 0x11e   :  { %v4812_v6 = vsel %vm11847_vm4, %v4807_v51, %v4811_v61  ;;  %v4825_v7 = vrot.slane %v4823_v13, 5  ;;  %v4829_v4 = vrot.slane %v4827_v63, 4  ;;  %v4835_v52 = vrot.slane %v4833_v5, 5  ;;  %17677 = vst [vmem:[#allocation21_spill] sm:$0xff] %v13740_v20  ;;  %v1315_v60 = vpop.f32.mrf.mxu0  ;;  %v10031_v13 = vld [vmem:[%s17568_s0 + $0x78] sm:$0xf] }
 0x11f   :  { %17676 = vst [vmem:[#allocation20_spill] sm:$0xff] %v13733_v55  ;;  %v10075_v43 = vcombine.low %v4802_v24, %v4812_v6  ;;  %v4821_v8 = vrot.slane %v4820_v40, 4  ;;  %v4186_v10 = vrot.slane %v11674_v49, 5  ;;  %v4189_v34 = vrot.slane %v11675_v18, 5  ;;  %v10032_v5 = vld [vmem:[%s17568_s0 + $0x7c] sm:$0xf]  ;;  %v13759_v24 = vpop.f32.mrf.mxu1 }
 0x120   :  { %v4830_v63 = vor.u32 %v4829_v4, %v4825_v7  ;;  %v13752_v61 = vadd.f32 %v11004_v16, %v13285_v33  ;;  %v9978_v36 = vrot.slane %v9962_v1, 9  ;;  %v17678_v22 = vrot.slane %v13225_v58, 5  ;;  %v11005_v1 = vpop.f32.mrf.mxu0  ;;  %v10034_v20 = vld [vmem:[%s17568_s0 + $0x88] sm:$0xf] }
 0x121   :  { %11240 = vmatprep.mubr.msk.bf16.mxu1 %vm511_vm1, %v10075_v43  ;;  %v4826_v40 = vsel %vm11847_vm4, %v4821_v8, %v4825_v7  ;;  %v4187_v6 = vsel %vm12224_vm7, %v9977_v53, %v4186_v10  ;;  %v4188_v33 = vrot.slane %v4186_v10, 4  ;;  %v13767_v16 = vadd.f32 %v1315_v60, %v13300_v38  ;;  %v10061_v53 = vld [vmem:[%s17568_s0 + $0x80] sm:$0x1]  ;;  %v13780_v8 = vpop.f32.mrf.mxu1 }
 0x122   :  { %v4195_v51 = vrot.slane %v17678_v22, 4  ;;  %v4831_v4 = vrot.slane %v4830_v63, 4  ;;  %v17679_v49 = vmov %v17678_v22  ;;  %v17680_v22 = vrot.slane %v13234_v12, 5  ;;  %17681 = vst [vmem:[#allocation22_spill] sm:$0xff] %v13780_v8  ;;  %v10033_v12 = vld [vmem:[%s17568_s0 + $0x84] sm:$0xf]  ;;  %v1318_v63 = vpop.f32.mrf.mxu0 }
 0x123   :  { %v4194_v18 = vsel %vm12224_vm7, %v9978_v36, %v17679_v49  ;;  %v4838_v7 = vshrl.u32 %v10031_v13, 16  ;;  %v4190_v38 = vsel %vm12224_vm7, %v4188_v33, %v4189_v34  ;;  %v4841_v58 = vshll.u32 %v10031_v13, 16  ;;  %v13792_v8 = vpop.f32.mrf.mxu1 }
 0x124   :  { %v4197_v43 = vsel %vm12224_vm7, %v4195_v51, %v17680_v22  ;;  %v4847_v60 = vshll.u32 %v10032_v5, 16  ;;  %v4836_v36 = vsel %vm11847_vm4, %v4831_v4, %v4835_v52  ;;  %v9994_v51 = vcombine.low %v4187_v6, %v4190_v38  ;;  %17682 = vst [vmem:[#allocation23_spill] sm:$0xff] %v13792_v8  ;;  %v11008_v55 = vpop.f32.mrf.mxu0 }
 0x125   :  { %v9995_v10 = vcombine.low %v4194_v18, %v4197_v43  ;;  %v4840_v49 = vrot.slane %v4838_v7, 4  ;;  %v4851_v22 = vshrl.u32 %v10032_v5, 16  ;;  %v10076_v34 = vcombine.low %v4826_v40, %v4836_v36  ;;  %v10062_v43 = vld [vmem:[%s17568_s0 + $0x8c] sm:$0x1]  ;;  %v13801_v7 = vpop.f32.mrf.mxu1 }
 0x126   :  { %v4843_v13 = vrot.slane %v4841_v58, 5  ;;  %v4849_v33 = vrot.slane %v4847_v60, 5  ;;  %v4857_v18 = vshll.u32 %v10061_v53, 16  ;;  %11206 = vmatprep.mubr.msk.bf16.mxu0 %vm511_vm1, %v9994_v51  ;;  %v13799_v5 = vadd.f32 %v11005_v1, %v13318_v42  ;;  %17683 = vst [vmem:[#allocation24_spill] sm:$0xff] %v13801_v7  ;;  %v9963_v60 = vld [vmem:[%s17568_s0 + $0x30] sm:$0xe]  ;;  %v1331_v36 = vpop.f32.mrf.mxu0 }
 0x127   :  { %v4853_v52 = vrot.slane %v4851_v22, 4  ;;  %v4862_v6 = vshrl.u32 %v10033_v12, 16  ;;  %v4865_v4 = vshll.u32 %v10033_v12, 16  ;;  %11241 = vmatmul.mubr.msk.bf16.vlgmr.msra.gmra.mxu1 %vm511_vm1, %v10076_v34  ;;  %11207 = vmatmul.mubr.msk.bf16.vlgmr.msra.gmra.mxu0 %vm511_vm1, %v9995_v10  ;;  %v4871_v38 = vshll.u32 %v10034_v20, 16  ;;  %v13810_v22 = vpop.f32.mrf.mxu1 }
 0x128   :  { %v4844_v40 = vor.u32 %v4843_v13, %v4840_v49  ;;  %v4859_v53 = vrot.slane %v4857_v18, 5  ;;  %v4875_v58 = vshrl.u32 %v10034_v20, 16  ;;  %11273 = vmatpush3.bf16.msra.mxu0 %v11797_v2  ;;  %11307 = vmatpush3.bf16.msra.mxu1 %v11871_v47  ;;  %v4881_v51 = vshll.u32 %v10062_v43, 16  ;;  %17684 = vst [vmem:[#allocation25_spill] sm:$0xff] %v13810_v22  ;;  %v9964_v13 = vld [vmem:[%s17568_s0 + $0x3c] sm:$0xe]  ;;  %v11009_v18 = vpop.f32.mrf.mxu0 }
 0x129   :  { %v4854_v42 = vor.u32 %v4853_v52, %v4849_v33  ;;  %v4864_v1 = vrot.slane %v4862_v6, 4  ;;  %v4867_v12 = vrot.slane %v4865_v4, 5  ;;  %v4873_v49 = vrot.slane %v4871_v38, 5  ;;  %v11676_v2 = vld [vmem:[%s17569_s1 + $0x6] sm:$0x3]  ;;  %v13826_v6 = vpop.f32.mrf.mxu1 }
 0x12a   :  { %v4845_v10 = vrot.slane %v4844_v40, 4  ;;  %v4877_v34 = vrot.slane %v4875_v58, 4  ;;  %v13813_v20 = vadd.f32 %v1318_v63, %v13331_v44  ;;  %11564 = vmatprep.subr.msk.bf16.mxu0 %vm560_vm0, %v11676_v2  ;;  %v11677_v47 = vld [vmem:[%s17569_s1 + $0x8] sm:$0x3]  ;;  %v4883_v63 = vrot.slane %v4881_v51, 5  ;;  %17685 = vst [vmem:[#allocation26_spill] sm:$0xff] %v13826_v6 }
 0x12b   :  { %11565 = vmatprep.subr.msk.bf16.mxu1 %vm560_vm0, %v11677_v47  ;;  %v4855_v43 = vrot.slane %v4854_v42, 4  ;;  %v4868_v44 = vor.u32 %v4867_v12, %v4864_v1  ;;  %v9979_v52 = vrot.slane %v9963_v60, 9  ;;  %v11678_v38 = vld [vmem:[%s17568_s0 + $0x34] sm:$0xf]  ;;  %v11679_v2 = vld [vmem:[%s17568_s0 + $0x38] sm:$0x1]  ;;  %v13839_v42 = vpop.f32.mrf.mxu0  ;;  %v13844_v12 = vadd.f32 %v11008_v55, %v13358_v31 }
 0x12c   :  { %v4850_v4 = vsel %vm11847_vm4, %v4845_v10, %v4849_v33  ;;  %v4878_v40 = vor.u32 %v4877_v34, %v4873_v49  ;;  %v4200_v58 = vrot.slane %v11678_v38, 5  ;;  %v4203_v47 = vrot.slane %v11679_v2, 5  ;;  %v10035_v60 = vld [vmem:[%s17568_s0 + $0x90] sm:$0xf]  ;;  %v10036_v10 = vld [vmem:[%s17568_s0 + $0x94] sm:$0xf]  ;;  %v13849_v34 = vpop.f32.mrf.mxu1 }
 0x12d   :  { %v4860_v33 = vsel %vm11847_vm4, %v4855_v43, %v4859_v53  ;;  %v4869_v1 = vrot.slane %v4868_v44, 4  ;;  %v9980_v51 = vrot.slane %v9964_v13, 9  ;;  %17686 = vst [vmem:[#allocation27_spill] sm:$0xff] %v13849_v34  ;;  %v13853_v22 = vpop.f32.mrf.mxu0  ;;  %v11680_v31 = vld [vmem:[%s17568_s0 + $0x40] sm:$0xf]  ;;  %v13861_v13 = vadd.f32 %v1331_v36, %v13370_v35 }
 0x12e   :  { %v10077_v38 = vcombine.low %v4850_v4, %v4860_v33  ;;  %v4879_v2 = vrot.slane %v4878_v40, 4  ;;  %v4201_v7 = vsel %vm12224_vm7, %v9979_v52, %v4200_v58  ;;  %v4202_v6 = vrot.slane %v4200_v58, 4  ;;  %v13863_v44 = vpop.f32.mrf.mxu1  ;;  %v10037_v35 = vld [vmem:[%s17568_s0 + $0x9c] sm:$0xf] }
 0x12f   :  { %v4874_v53 = vsel %vm11847_vm4, %v4869_v1, %v4873_v49  ;;  %v4207_v55 = vrot.slane %v11680_v31, 5  ;;  %v4886_v43 = vshrl.u32 %v10035_v60, 16  ;;  %17687 = vst [vmem:[#allocation28_spill] sm:$0xff] %v13863_v44  ;;  %v10063_v49 = vld [vmem:[%s17568_s0 + $0x98] sm:$0x1]  ;;  %v4889_v40 = vshll.u32 %v10035_v60, 16  ;;  %v13876_v36 = vpop.f32.mrf.mxu0 }
 0x130   :  { %11244 = vmatprep.mubr.msk.bf16.mxu1 %vm511_vm1, %v10077_v38  ;;  %v4884_v52 = vsel %vm11847_vm4, %v4879_v2, %v4883_v63  ;;  %v4204_v4 = vsel %vm12224_vm7, %v4202_v6, %v4203_v47  ;;  %v4895_v58 = vshll.u32 %v10036_v10, 16  ;;  %v13880_v2 = vpop.f32.mrf.mxu1  ;;  %v4899_v44 = vshrl.u32 %v10036_v10, 16  ;;  %v10038_v60 = vld [vmem:[%s17568_s0 + $0xa0] sm:$0xf]  ;;  %v10064_v10 = vld [vmem:[%s17568_s0 + $0xa4] sm:$0x1] }
 0x131   :  { %v10078_v33 = vcombine.low %v4874_v53, %v4884_v52  ;;  %v9996_v1 = vcombine.low %v4201_v7, %v4204_v4  ;;  %v4208_v63 = vsel %vm12224_vm7, %v9980_v51, %v4207_v55  ;;  %v4209_v38 = vrot.slane %v4207_v55, 4  ;;  %17688 = vst [vmem:[#allocation29_spill] sm:$0xff] %v13880_v2  ;;  %v13885_v34 = vpop.f32.mrf.mxu0 }
 0x132   :  { %v4888_v6 = vrot.slane %v4886_v43, 4  ;;  %v4891_v47 = vrot.slane %v4889_v40, 5  ;;  %v4897_v31 = vrot.slane %v4895_v58, 5  ;;  %v17689_v7 = vrot.slane %v13290_v14, 5  ;;  %v13899_v52 = vpop.f32.mrf.mxu1  ;;  %v9965_v14 = vld [vmem:[%s17568_s0 + $0x48] sm:$0xe] }
 0x133   :  { %11245 = vmatmul.mubr.msk.bf16.gmra.mxu1 %vm511_vm1, %v10078_v33  ;;  %11210 = vmatprep.mubr.msk.bf16.mxu0 %vm511_vm1, %v9996_v1  ;;  %v4905_v53 = vshll.u32 %v10063_v49, 16  ;;  %v13894_v55 = vadd.f32 %v11009_v18, %v13384_v9  ;;  %v4910_v43 = vshrl.u32 %v10037_v35, 16  ;;  %17690 = vst [vmem:[#allocation30_spill] sm:$0xff] %v13899_v52  ;;  %v4901_v58 = vrot.slane %v4899_v44, 4  ;;  %v13904_v1 = vpop.f32.mrf.mxu0 }
 0x134   :  { %v4211_v51 = vsel %vm12224_vm7, %v4209_v38, %v17689_v7  ;;  %v4892_v40 = vor.u32 %v4891_v47, %v4888_v6  ;;  %v4913_v33 = vshll.u32 %v10037_v35, 16  ;;  %v4919_v18 = vshll.u32 %v10038_v60, 16  ;;  %v13906_v7 = vpop.f32.mrf.mxu1 }
 0x135   :  { %v9997_v4 = vcombine.low %v4208_v63, %v4211_v51  ;;  %v4907_v49 = vrot.slane %v4905_v53, 5  ;;  %v4912_v9 = vrot.slane %v4910_v43, 4  ;;  %v4923_v38 = vshrl.u32 %v10038_v60, 16  ;;  %17691 = vst [vmem:[#allocation31_spill] sm:$0xff] %v13906_v7  ;;  %v13909_v44 = vpop.f32.mrf.mxu0  ;;  %v9966_v60 = vld [vmem:[%s17568_s0 + $0x54] sm:$0xe] }
 0x136   :  { %v4893_v2 = vrot.slane %v4892_v40, 4  ;;  %v4902_v52 = vor.u32 %v4901_v58, %v4897_v31  ;;  %v4915_v63 = vrot.slane %v4913_v33, 5  ;;  %v4929_v6 = vshll.u32 %v10064_v10, 16  ;;  %v13918_v43 = vpop.f32.mrf.mxu1 }
 0x137   :  { %11211 = vmatmul.mubr.msk.bf16.gmra.mxu0 %vm511_vm1, %v9997_v4  ;;  %v4921_v35 = vrot.slane %v4919_v18, 5  ;;  %v4925_v47 = vrot.slane %v4923_v38, 4  ;;  %v13913_v51 = vadd.f32 %v13839_v42, %v13400_v25  ;;  %v9981_v53 = vrot.slane %v9965_v14, 9  ;;  %17693 = vst [vmem:[#allocation33_spill] sm:$0xff] %v13918_v43  ;;  %v13922_v33 = vpop.f32.mrf.mxu0  ;;  %v11681_v25 = vld [vmem:[%s17568_s0 + $0x4c] sm:$0xf] }
 0x138   :  { %v4898_v4 = vsel %vm11847_vm4, %v4893_v2, %v4897_v31  ;;  %v4903_v40 = vrot.slane %v4902_v52, 4  ;;  %v4916_v10 = vor.u32 %v4915_v63, %v4912_v9  ;;  %v4931_v58 = vrot.slane %v4929_v6, 5  ;;  %v11682_v14 = vld [vmem:[%s17568_s0 + $0x50] sm:$0x1]  ;;  %v13934_v2 = vpop.f32.mrf.mxu1  ;;  %v11683_v63 = vld [vmem:[%s17568_s0 + $0x58] sm:$0xf] }
 0x139   :  { %17692 = vst [vmem:[#allocation32_spill] sm:$0xff] %v13913_v51  ;;  %v4926_v18 = vor.u32 %v4925_v47, %v4921_v35  ;;  %v4214_v42 = vrot.slane %v11681_v25, 5  ;;  %v4217_v38 = vrot.slane %v11682_v14, 5  ;;  %v13932_v43 = vadd.f32 %v13853_v22, %v13416_v11  ;;  %17694 = vst [vmem:[#allocation34_spill] sm:$0xff] %v13934_v2  ;;  %v10039_v47 = vld [vmem:[%s17568_s0 + $0xa8] sm:$0xf]  ;;  %v13944_v25 = vpop.f32.mrf.mxu0 }
 0x13a   :  { %v4908_v31 = vsel %vm11847_vm4, %v4903_v40, %v4907_v49  ;;  %v4917_v52 = vrot.slane %v4916_v10, 4  ;;  %v9982_v9 = vrot.slane %v9966_v60, 9  ;;  %v4221_v6 = vrot.slane %v11683_v63, 5  ;;  %v13951_v49 = vld [vmem:[%s17568_s0 + $0xac] sm:$0xf]  ;;  %v13953_v60 = vpop.f32.mrf.mxu1 }
 0x13b   :  { %v10079_v11 = vcombine.low %v4898_v4, %v4908_v31  ;;  %v4927_v22 = vrot.slane %v4926_v18, 4  ;;  %v4215_v14 = vsel %vm12224_vm7, %v9981_v53, %v4214_v42  ;;  %v4216_v2 = vrot.slane %v4214_v42, 4  ;;  %17695 = vst [vmem:[#allocation35_spill] sm:$0xff] %v13953_v60  ;;  %v13963_v53 = vpop.f32.mrf.mxu0 }
 0x13c   :  { %v4922_v40 = vsel %vm11847_vm4, %v4917_v52, %v4921_v35  ;;  %v4222_v10 = vsel %vm12224_vm7, %v9982_v9, %v4221_v6  ;;  %v4223_v63 = vrot.slane %v4221_v6, 4  ;;  %v13961_v4 = vadd.f32 %v13876_v36, %v13433_v39  ;;  %v13973_v35 = vld [vmem:[%s17568_s0 + $0xb0] sm:$0x1]  ;;  %v10041_v39 = vld [vmem:[%s17568_s0 + $0xb4] sm:$0xf]  ;;  %v13978_v36 = vpop.f32.mrf.mxu1 }
 0x13d   :  { %11248 = vmatprep.mubr.msk.bf16.mxu1 %vm511_vm1, %v10079_v11  ;;  %v4932_v18 = vsel %vm11847_vm4, %v4927_v22, %v4931_v58  ;;  %v4218_v42 = vsel %vm12224_vm7, %v4216_v2, %v4217_v38  ;;  %v4934_v31 = vshrl.u32 %v10039_v47, 16  ;;  %v4937_v52 = vshll.u32 %v10039_v47, 16  ;;  %17696 = vst [vmem:[#allocation36_spill] sm:$0xff] %v13978_v36  ;;  %v13988_v11 = vld [vmem:[%s17568_s0 + $0xb8] sm:$0xf]  ;;  %v13990_v47 = vpop.f32.mrf.mxu0 }
 0x13e   :  { %v10080_v9 = vcombine.low %v4922_v40, %v4932_v18  ;;  %v9998_v6 = vcombine.low %v4215_v14, %v4218_v42  ;;  %v17697_v58 = vrot.slane %v13346_v3, 5  ;;  %v4943_v2 = vshll.u32 %v13951_v49, 16  ;;  %17698 = vst [vmem:[#allocation37_spill] sm:$0xff] %v13988_v11  ;;  %v13996_v3 = vld [vmem:[%s17568_s0 + $0xbc] sm:$0x1]  ;;  %v13998_v14 = vpop.f32.mrf.mxu1 }
 0x13f   :  { %v4936_v60 = vrot.slane %v4934_v31, 4  ;;  %v4939_v7 = vrot.slane %v4937_v52, 5  ;;  %v4947_v40 = vshrl.u32 %v13951_v49, 16  ;;  %17699 = vst [vmem:[#allocation38_spill] sm:$0xff] %v13996_v3  ;;  %17700 = vst [vmem:[#allocation39_spill] sm:$0xff] %v13998_v14  ;;  %v4953_v18 = vshll.u32 %v13973_v35, 16  ;;  %v14007_v31 = vpop.f32.mrf.mxu0 }
 0x140   :  { %v4225_v38 = vsel %vm12224_vm7, %v4223_v63, %v17697_v58  ;;  %11249 = vmatmul.mubr.msk.bf16.gmra.mxu1 %vm511_vm1, %v10080_v9  ;;  %11214 = vmatprep.mubr.msk.bf16.mxu0 %vm511_vm1, %v9998_v6  ;;  %v4945_v63 = vrot.slane %v4943_v2, 5  ;;  %v4958_v42 = vshrl.u32 %v10041_v39, 16  ;;  %v4967_v14 = vshll.u32 %v13988_v11, 16  ;;  %v9967_v9 = vld [vmem:[%s17568_s0 + $0x60] sm:$0xe]  ;;  %v14014_v6 = vpop.f32.mrf.mxu1 }
 0x141   :  { %v9999_v22 = vcombine.low %v4222_v10, %v4225_v38  ;;  %v14005_v10 = vadd.f32 %v13885_v34, %v13444_v59  ;;  %v4940_v52 = vor.u32 %v4939_v7, %v4936_v60  ;;  %v4949_v58 = vrot.slane %v4947_v40, 4  ;;  %17702 = vst [vmem:[#allocation41_spill] sm:$0xff] %v14014_v6  ;;  %v14018_v51 = vpop.f32.mrf.mxu0  ;;  %v9968_v40 = vld [vmem:[%s17568_s0 + $0x6c] sm:$0xe] }
 0x142   :  { %v4961_v38 = vshll.u32 %v10041_v39, 16  ;;  %v4955_v2 = vrot.slane %v4953_v18, 5  ;;  %v4960_v36 = vrot.slane %v4958_v42, 4  ;;  %v4971_v59 = vshrl.u32 %v13988_v11, 16  ;;  %v14023_v8 = vpop.f32.mrf.mxu1 }
 0x143   :  { %17701 = vst [vmem:[#allocation40_spill] sm:$0xff] %v14005_v10  ;;  %11215 = vmatmul.mubr.msk.bf16.gmra.mxu0 %vm511_vm1, %v9999_v22  ;;  %v4977_v34 = vshll.u32 %v13996_v3, 16  ;;  %v4941_v22 = vrot.slane %v4940_v52, 4  ;;  %v4950_v7 = vor.u32 %v4949_v58, %v4945_v63  ;;  %v4969_v39 = vrot.slane %v4967_v14, 5  ;;  %17703 = vst [vmem:[#allocation42_spill] sm:$0xff] %v14023_v8  ;;  %v14029_v3 = vpop.f32.mrf.mxu0 }
 0x144   :  { %v4963_v60 = vrot.slane %v4961_v38, 5  ;;  %v4973_v10 = vrot.slane %v4971_v59, 4  ;;  %v14027_v18 = vadd.f32 %v13904_v1, %v13455_v30  ;;  %v9983_v42 = vrot.slane %v9967_v9, 9  ;;  %v11684_v38 = vld [vmem:[%s17568_s0 + $0x64] sm:$0xf]  ;;  %v14036_v8 = vpop.f32.mrf.mxu1 }
 0x145   :  { %v4979_v6 = vrot.slane %v4977_v34, 5  ;;  %v4946_v52 = vsel %vm11847_vm4, %v4941_v22, %v4945_v63  ;;  %v4951_v58 = vrot.slane %v4950_v7, 4  ;;  %v4228_v11 = vrot.slane %v11684_v38, 5  ;;  %17705 = vst [vmem:[#allocation44_spill] sm:$0xff] %v14036_v8  ;;  %v11685_v30 = vld [vmem:[%s17568_s0 + $0x68] sm:$0x1]  ;;  %v14050_v34 = vpop.f32.mrf.mxu0 }
 0x146   :  { %17704 = vst [vmem:[#allocation43_spill] sm:$0xff] %v14027_v18  ;;  %v4964_v14 = vor.u32 %v4963_v60, %v4960_v36  ;;  %v4974_v59 = vor.u32 %v4973_v10, %v4969_v39  ;;  %v4231_v1 = vrot.slane %v11685_v30, 5  ;;  %v14043_v9 = vadd.f32 %v13909_v44, %v13480_v23  ;;  %v14048_v36 = vld [vmem:[%s17568_s0 + $0x138] sm:$0xf]  ;;  %v14056_v38 = vpop.f32.mrf.mxu1 }
 0x147   :  { %v9984_v63 = vrot.slane %v9968_v40, 9  ;;  %17706 = vst [vmem:[#allocation45_spill] sm:$0xff] %v14048_v36  ;;  %v4956_v10 = vsel %vm11847_vm4, %v4951_v58, %v4955_v2  ;;  %v4229_v7 = vsel %vm12224_vm7, %v9983_v42, %v4228_v11  ;;  %v4230_v60 = vrot.slane %v4228_v11, 4  ;;  %17707 = vst [vmem:[#allocation46_spill] sm:$0xff] %v14056_v38  ;;  %v11686_v40 = vld [vmem:[%s17568_s0 + $0x70] sm:$0xf]  ;;  %v14070_v42 = vpop.f32.mrf.mxu0 }
 0x148   :  { %v4965_v22 = vrot.slane %v4964_v14, 4  ;;  %v10081_v23 = vcombine.low %v4946_v52, %v4956_v10  ;;  %v4975_v44 = vrot.slane %v4974_v59, 4  ;;  %v4235_v30 = vrot.slane %v11686_v40, 5  ;;  %v14068_v2 = vld [vmem:[%s17568_s0 + $0x13c] sm:$0xf]  ;;  %v14083_v14 = vpop.f32.mrf.mxu1 }
 0x149   :  { %v14063_v8 = vadd.f32 %v13922_v33, %v13496_v37  ;;  %17709 = vst [vmem:[#allocation48_spill] sm:$0xff] %v14068_v2  ;;  %v4232_v52 = vsel %vm12224_vm7, %v4230_v60, %v4231_v1  ;;  %v14079_v58 = vld [vmem:[%s17568_s0 + $0x140] sm:$0x1]  ;;  %v4982_v37 = vshrl.u32 %v14048_v36, 16  ;;  %v4985_v33 = vshll.u32 %v14048_v36, 16  ;;  %17711 = vst [vmem:[#allocation50_spill] sm:$0xff] %v14083_v14  ;;  %v14095_v60 = vpop.f32.mrf.mxu0 }
 0x14a   :  { %v4970_v11 = vsel %vm11847_vm4, %v4965_v22, %v4969_v39  ;;  %17710 = vst [vmem:[#allocation49_spill] sm:$0xff] %v14079_v58  ;;  %11252 = vmatprep.mubr.msk.bf16.mxu1 %vm511_vm1, %v10081_v23  ;;  %v4980_v59 = vsel %vm11847_vm4, %v4975_v44, %v4979_v6  ;;  %v10000_v39 = vcombine.low %v4229_v7, %v4232_v52  ;;  %v4237_v10 = vrot.slane %v4235_v30, 4  ;;  %v14093_v22 = vld [vmem:[%s17568_s0 + $0x144] sm:$0xf]  ;;  %v14101_v6 = vld [vmem:[%s17568_s0 + $0x148] sm:$0xf]  ;;  %v14103_v7 = vpop.f32.mrf.mxu1 }
 0x14b   :  { %17708 = vst [vmem:[#allocation47_spill] sm:$0xff] %v14063_v8  ;;  %v4236_v1 = vsel %vm12224_vm7, %v9984_v63, %v4235_v30  ;;  %17712 = vst [vmem:[#allocation51_spill] sm:$0xff] %v14093_v22  ;;  %v10082_v40 = vcombine.low %v4970_v11, %v4980_v59  ;;  %v4984_v38 = vrot.slane %v4982_v37, 4  ;;  %v4987_v14 = vrot.slane %v4985_v33, 5  ;;  %v14119_v37 = vld [vmem:[%s17568_s0 + $0x14c] sm:$0x1]  ;;  %v14121_v33 = vpop.f32.mrf.mxu0 }
 0x14c   :  { %v4991_v23 = vshll.u32 %v14068_v2, 16  ;;  %17713 = vst [vmem:[#allocation52_spill] sm:$0xff] %v14101_v6  ;;  %17714 = vst [vmem:[#allocation53_spill] sm:$0xff] %v14103_v7  ;;  %11218 = vmatprep.mubr.msk.bf16.mxu0 %vm511_vm1, %v10000_v39  ;;  %v17715_v63 = vrot.slane %v13428_v0, 5  ;;  %v4995_v30 = vshrl.u32 %v14068_v2, 16  ;;  %v5001_v11 = vshll.u32 %v14079_v58, 16 }
 0x14d   :  { %v14114_v52 = vadd.f32 %v13944_v25, %v13503_v50  ;;  %17717 = vst [vmem:[#allocation55_spill] sm:$0xff] %v14119_v37  ;;  %11253 = vmatmul.mubr.msk.bf16.gmra.mxu1 %vm511_vm1, %v10082_v40  ;;  %v4988_v59 = vor.u32 %v4987_v14, %v4984_v38  ;;  %v5009_v50 = vshll.u32 %v14093_v22, 16  ;;  %v5015_v25 = vshll.u32 %v14101_v6, 16  ;;  %v9969_v36 = vld [vmem:[%s17568_s0 + $0xf0] sm:$0xe]  ;;  %v14132_v18 = vpop.f32.mrf.mxu0 }
 0x14e   :  { %v4239_v44 = vsel %vm12224_vm7, %v4237_v10, %v17715_v63  ;;  %v4993_v39 = vrot.slane %v4991_v23, 5  ;;  %v5006_v10 = vshrl.u32 %v14093_v22, 16  ;;  %v14125_v63 = vpop.f32.mrf.mxu1  ;;  %v4997_v7 = vrot.slane %v4995_v30, 4 }
 0x14f   :  { %17716 = vst [vmem:[#allocation54_spill] sm:$0xff] %v14114_v52  ;;  %v10001_v0 = vcombine.low %v4236_v1, %v4239_v44  ;;  %17718 = vst [vmem:[#allocation56_spill] sm:$0xff] %v14125_v63  ;;  %v4989_v1 = vrot.slane %v4988_v59, 4  ;;  %v5019_v14 = vshrl.u32 %v14101_v6, 16  ;;  %v5025_v40 = vshll.u32 %v14119_v37, 16  ;;  %v14142_v58 = vpop.f32.mrf.mxu0 }
 0x150   :  { %v5008_v38 = vrot.slane %v5006_v10, 4  ;;  %v14137_v23 = vpop.f32.mrf.mxu1  ;;  %v4998_v44 = vor.u32 %v4997_v7, %v4993_v39  ;;  %v5003_v30 = vrot.slane %v5001_v11, 5  ;;  %v5011_v63 = vrot.slane %v5009_v50, 5  ;;  %v9970_v52 = vld [vmem:[%s17568_s0 + $0xfc] sm:$0xe] }
 0x151   :  { %11219 = vmatmul.mubr.msk.bf16.gmra.mxu0 %vm511_vm1, %v10001_v0  ;;  %17719 = vst [vmem:[#allocation57_spill] sm:$0xff] %v14137_v23  ;;  %v5017_v22 = vrot.slane %v5015_v25, 5  ;;  %v4994_v0 = vsel %vm11847_vm4, %v4989_v1, %v4993_v39  ;;  %v5021_v59 = vrot.slane %v5019_v14, 4  ;;  %v5027_v10 = vrot.slane %v5025_v40, 5  ;;  %v11687_v7 = vld [vmem:[%s17568_s0 + $0xf4] sm:$0xf]  ;;  %v14154_v8 = vpop.f32.mrf.mxu0 }
 0x152   :  { %v9985_v6 = vrot.slane %v9969_v36, 9  ;;  %v14146_v2 = vpop.f32.mrf.mxu1  ;;  %v4999_v37 = vrot.slane %v4998_v44, 4  ;;  %v5012_v23 = vor.u32 %v5011_v63, %v5008_v38  ;;  %v4242_v11 = vrot.slane %v11687_v7, 5  ;;  %v11688_v50 = vld [vmem:[%s17568_s0 + $0xf8] sm:$0x1] }
 0x153   :  { %17720 = vst [vmem:[#allocation58_spill] sm:$0xff] %v14146_v2  ;;  %v4245_v25 = vrot.slane %v11688_v50, 5  ;;  %v5022_v39 = vor.u32 %v5021_v59, %v5017_v22  ;;  %v14158_v36 = vadd.f32 %v13990_v47, %v13534_v15  ;;  %v9986_v1 = vrot.slane %v9970_v52, 9  ;;  %v11689_v63 = vld [vmem:[%s17568_s0 + $0x100] sm:$0xf]  ;;  %v14174_v47 = vpop.f32.mrf.mxu0 }
 0x154   :  { %v4249_v38 = vrot.slane %v11689_v63, 5  ;;  %v14163_v14 = vpop.f32.mrf.mxu1  ;;  %v5004_v40 = vsel %vm11847_vm4, %v4999_v37, %v5003_v30  ;;  %v5013_v44 = vrot.slane %v5012_v23, 4  ;;  %v4243_v7 = vsel %vm12224_vm7, %v9985_v6, %v4242_v11  ;;  %v14172_v15 = vld [vmem:[%s17568_s0 + $0x150] sm:$0xf]  ;;  %v14181_v37 = vld [vmem:[%s17568_s0 + $0x154] sm:$0xf] }
 0x155   :  { %17721 = vst [vmem:[#allocation59_spill] sm:$0xff] %v14158_v36  ;;  %17722 = vst [vmem:[#allocation60_spill] sm:$0xff] %v14163_v14  ;;  %v4244_v59 = vrot.slane %v4242_v11, 4  ;;  %v10083_v52 = vcombine.low %v4994_v0, %v5004_v40  ;;  %v5023_v50 = vrot.slane %v5022_v39, 4  ;;  %v11690_v0 = vld [vmem:[%s17568_s0 + $0x104] sm:$0x1]  ;;  %v14194_v39 = vadd.f32 %v14007_v31, %v13545_v28 }
 0x156   :  { %17723 = vst [vmem:[#allocation61_spill] sm:$0xff] %v14172_v15  ;;  %v4250_v63 = vsel %vm12224_vm7, %v9986_v1, %v4249_v38  ;;  %v4251_v14 = vrot.slane %v4249_v38, 4  ;;  %17724 = vst [vmem:[#allocation62_spill] sm:$0xff] %v14181_v37  ;;  %v14183_v6 = vpop.f32.mrf.mxu1  ;;  %v5018_v23 = vsel %vm11847_vm4, %v5013_v44, %v5017_v22  ;;  %v4252_v11 = vrot.slane %v11690_v0, 5  ;;  %v14199_v1 = vld [vmem:[%s17568_s0 + $0x158] sm:$0x1]  ;;  %v14201_v38 = vpop.f32.mrf.mxu0 }
 0x157   :  { %17725 = vst [vmem:[#allocation63_spill] sm:$0xff] %v14183_v6  ;;  %v4246_v30 = vsel %vm12224_vm7, %v4244_v59, %v4245_v25  ;;  %17726 = vst [vmem:[#allocation64_spill] sm:$0xff] %v14194_v39  ;;  %11256 = vmatprep.mubr.msk.bf16.mxu1 %vm511_vm1, %v10083_v52  ;;  %v5028_v22 = vsel %vm11847_vm4, %v5023_v50, %v5027_v10  ;;  %v5030_v40 = vshrl.u32 %v14172_v15, 16  ;;  %v5033_v44 = vshll.u32 %v14172_v15, 16  ;;  %v14211_v28 = vld [vmem:[%s17568_s0 + $0x15c] sm:$0xf] }
 0x158   :  { %17727 = vst [vmem:[#allocation65_spill] sm:$0xff] %v14199_v1  ;;  %v10002_v25 = vcombine.low %v4243_v7, %v4246_v30  ;;  %17728 = vst [vmem:[#allocation66_spill] sm:$0xff] %v14211_v28  ;;  %v14213_v31 = vpop.f32.mrf.mxu1  ;;  %v10084_v59 = vcombine.low %v5018_v23, %v5028_v22  ;;  %v4253_v0 = vsel %vm12224_vm7, %v4251_v14, %v4252_v11  ;;  %v5039_v52 = vshll.u32 %v14181_v37, 16  ;;  %v14222_v7 = vld [vmem:[%s17568_s0 + $0x160] sm:$0xf]  ;;  %v14224_v50 = vpop.f32.mrf.mxu0 }
 0x159   :  { %17729 = vst [vmem:[#allocation67_spill] sm:$0xff] %v14213_v31  ;;  %v5043_v10 = vshrl.u32 %v14181_v37, 16  ;;  %17730 = vst [vmem:[#allocation68_spill] sm:$0xff] %v14222_v7  ;;  %v10003_v30 = vcombine.low %v4250_v63, %v4253_v0  ;;  %v5032_v6 = vrot.slane %v5030_v40, 4  ;;  %v5035_v31 = vrot.slane %v5033_v44, 5 }
 0x15a   :  { %11222 = vmatprep.mubr.msk.bf16.mxu0 %vm511_vm1, %v10002_v25  ;;  %v5049_v23 = vshll.u32 %v14199_v1, 16  ;;  %v14231_v14 = vld [vmem:[%s17568_s0 + $0x164] sm:$0x1]  ;;  %v14233_v11 = vpop.f32.mrf.mxu1  ;;  %11257 = vmatmul.mubr.msk.bf16.gmra.mxu1 %vm511_vm1, %v10084_v59  ;;  %v5041_v22 = vrot.slane %v5039_v52, 5  ;;  %v14238_v15 = vadd.f32 %v14018_v51, %v13556_v56  ;;  %v5054_v63 = vshrl.u32 %v14211_v28, 16  ;;  %v14241_v25 = vpop.f32.mrf.mxu0 }
 0x15b   :  { %17731 = vst [vmem:[#allocation69_spill] sm:$0xff] %v14231_v14  ;;  %17732 = vst [vmem:[#allocation70_spill] sm:$0xff] %v14233_v11  ;;  %v5045_v2 = vrot.slane %v5043_v10, 4  ;;  %11223 = vmatmul.mubr.msk.bf16.gmra.mxu0 %vm511_vm1, %v10003_v30  ;;  %v5036_v40 = vor.u32 %v5035_v31, %v5032_v6  ;;  %v5057_v0 = vshll.u32 %v14211_v28, 16  ;;  %v5063_v11 = vshll.u32 %v14222_v7, 16 }
 0x15c   :  { %17733 = vst [vmem:[#allocation71_spill] sm:$0xff] %v14238_v15  ;;  %v5051_v44 = vrot.slane %v5049_v23, 5  ;;  %v9971_v59 = vld [vmem:[%s17568_s0 + $0x108] sm:$0xe]  ;;  %v14249_v52 = vpop.f32.mrf.mxu1  ;;  %v5056_v51 = vrot.slane %v5054_v63, 4  ;;  %v5067_v10 = vshrl.u32 %v14222_v7, 16  ;;  %v14253_v15 = vpop.f32.mrf.mxu0 }
 0x15d   :  { %17734 = vst [vmem:[#allocation72_spill] sm:$0xff] %v14249_v52  ;;  %v5046_v56 = vor.u32 %v5045_v2, %v5041_v22  ;;  %v5073_v1 = vshll.u32 %v14231_v14, 16  ;;  %v5037_v6 = vrot.slane %v5036_v40, 4  ;;  %v5059_v31 = vrot.slane %v5057_v0, 5  ;;  %v9972_v23 = vld [vmem:[%s17568_s0 + $0x114] sm:$0xe] }
 0x15e   :  { %v5065_v30 = vrot.slane %v5063_v11, 5  ;;  %v14258_v28 = vpop.f32.mrf.mxu1  ;;  %v5069_v39 = vrot.slane %v5067_v10, 4  ;;  %v9987_v2 = vrot.slane %v9971_v59, 9  ;;  %v14260_v63 = vpop.f32.mrf.mxu0  ;;  %v11691_v11 = vld [vmem:[%s17568_s0 + $0x10c] sm:$0xf]  ;;  %vm4661_vm8 = vcmask 261120  }
 0x15f   :  { %17735 = vst [vmem:[#allocation73_spill] sm:$0xff] %v14258_v28  ;;  %v5047_v37 = vrot.slane %v5046_v56, 4  ;;  %v5075_v52 = vrot.slane %v5073_v1, 5  ;;  %v5042_v14 = vsel %vm11847_vm4, %v5037_v6, %v5041_v22  ;;  %v5060_v7 = vor.u32 %v5059_v31, %v5056_v51  ;;  %v11692_v0 = vld [vmem:[%s17568_s0 + $0x110] sm:$0x1] }
 0x160   :  { %v4256_v40 = vrot.slane %v11691_v11, 5  ;;  %v4259_v28 = vrot.slane %v11692_v0, 5  ;;  %v14270_v56 = vpop.f32.mrf.mxu1  ;;  %v5070_v59 = vor.u32 %v5069_v39, %v5065_v30  ;;  %v14276_v22 = vadd.f32 %v14050_v34, %v13592_v27  ;;  %v14281_v10 = vld [vmem:[%s17568_s0 + $0x168] sm:$0xf]  ;;  %v14283_v6 = vpop.f32.mrf.mxu0  ;;  %v11693_v27 = vld [vmem:[%s17568_s0 + $0x118] sm:$0xf] }
 0x161   :  { %17736 = vst [vmem:[#allocation74_spill] sm:$0xff] %v14270_v56  ;;  %v5052_v1 = vsel %vm11847_vm4, %v5047_v37, %v5051_v44  ;;  %v9988_v51 = vrot.slane %v9972_v23, 9  ;;  %17738 = vst [vmem:[#allocation76_spill] sm:$0xff] %v14281_v10  ;;  %v5061_v11 = vrot.slane %v5060_v7, 4  ;;  %v4263_v34 = vrot.slane %v11693_v27, 5 }
 0x162   :  { %17737 = vst [vmem:[#allocation75_spill] sm:$0xff] %v14276_v22  ;;  %v10085_v31 = vcombine.low %v5042_v14, %v5052_v1  ;;  %v4257_v0 = vsel %vm12224_vm7, %v9987_v2, %v4256_v40  ;;  %v4258_v56 = vrot.slane %v4256_v40, 4  ;;  %v14287_v37 = vpop.f32.mrf.mxu1  ;;  %v5071_v39 = vrot.slane %v5070_v59, 4  ;;  %v11694_v44 = vld [vmem:[%s17568_s0 + $0x11c] sm:$0x1]  ;;  %v14304_v2 = vpop.f32.mrf.mxu0 }
 0x163   :  { %17739 = vst [vmem:[#allocation77_spill] sm:$0xff] %v14287_v37  ;;  %v4266_v23 = vrot.slane %v11694_v44, 5  ;;  %v14297_v7 = vadd.f32 %v14070_v42, %v13601_v26  ;;  %v14302_v14 = vld [vmem:[%s17568_s0 + $0x16c] sm:$0xf]  ;;  %v5066_v40 = vsel %vm11847_vm4, %v5061_v11, %v5065_v30  ;;  %v14314_v26 = vld [vmem:[%s17568_s0 + $0x170] sm:$0x1]  ;;  %v4264_v30 = vsel %vm12224_vm7, %v9988_v51, %v4263_v34 }
 0x164   :  { %17741 = vst [vmem:[#allocation79_spill] sm:$0xff] %v14302_v14  ;;  %11260 = vmatprep.mubr.msk.bf16.mxu1 %vm511_vm1, %v10085_v31  ;;  %v4260_v1 = vsel %vm12224_vm7, %v4258_v56, %v4259_v28  ;;  %17742 = vst [vmem:[#allocation80_spill] sm:$0xff] %v14314_v26  ;;  %v5078_v42 = vshrl.u32 %v14281_v10, 16  ;;  %v5081_v59 = vshll.u32 %v14281_v10, 16  ;;  %v14318_v27 = vpop.f32.mrf.mxu1  ;;  %v5076_v31 = vsel %vm11847_vm4, %v5071_v39, %v5075_v52  ;;  %v14327_v28 = vld [vmem:[%s17568_s0 + $0x174] sm:$0xf]  ;;  %v14329_v56 = vpop.f32.mrf.mxu0 }
 0x165   :  { %17740 = vst [vmem:[#allocation78_spill] sm:$0xff] %v14297_v7  ;;  %17743 = vst [vmem:[#allocation81_spill] sm:$0xff] %v14318_v27  ;;  %v10004_v44 = vcombine.low %v4257_v0, %v4260_v1  ;;  %v4265_v11 = vrot.slane %v4263_v34, 4  ;;  %v10086_v37 = vcombine.low %v5066_v40, %v5076_v31  ;;  %v5087_v27 = vshll.u32 %v14302_v14, 16  ;;  %v14335_v52 = vld [vmem:[%s17568_s0 + $0x178] sm:$0xf] }
 0x166   :  { %17744 = vst [vmem:[#allocation82_spill] sm:$0xff] %v14327_v28  ;;  %17745 = vst [vmem:[#allocation83_spill] sm:$0xff] %v14329_v56  ;;  %v5080_v7 = vrot.slane %v5078_v42, 4  ;;  %v5083_v10 = vrot.slane %v5081_v59, 5  ;;  %v14337_v0 = vpop.f32.mrf.mxu1  ;;  %v5091_v39 = vshrl.u32 %v14302_v14, 16  ;;  %v5097_v34 = vshll.u32 %v14314_v26, 16  ;;  %v14353_v42 = vpop.f32.mrf.mxu0 }
 0x167   :  { %17746 = vst [vmem:[#allocation84_spill] sm:$0xff] %v14335_v52  ;;  %17747 = vst [vmem:[#allocation85_spill] sm:$0xff] %v14337_v0  ;;  %11226 = vmatprep.mubr.msk.bf16.mxu0 %vm511_vm1, %v10004_v44  ;;  %v4267_v51 = vsel %vm12224_vm7, %v4265_v11, %v4266_v23  ;;  %v14346_v40 = vadd.f32 %v14095_v60, %v13613_v17  ;;  %v14351_v1 = vld [vmem:[%s17568_s0 + $0x17c] sm:$0x1]  ;;  %11261 = vmatmul.mubr.msk.bf16.gmra.mxu1 %vm511_vm1, %v10086_v37  ;;  %v5089_v23 = vrot.slane %v5087_v27, 5  ;;  %vm11757_vm9 = vmmov 0  }
 0x168   :  { %17749 = vst [vmem:[#allocation87_spill] sm:$0xff] %v14351_v1  ;;  %v10005_v59 = vcombine.low %v4264_v30, %v4267_v51  ;;  %v5084_v31 = vor.u32 %v5083_v10, %v5080_v7  ;;  %v5102_v44 = vshrl.u32 %v14327_v28, 16  ;;  %v14357_v11 = vpop.f32.mrf.mxu1  ;;  %v5093_v0 = vrot.slane %v5091_v39, 4  ;;  %v14364_v26 = vpop.f32.mrf.mxu0  ;;  %v9974_v14 = vld [vmem:[%s17568_s0 + $0x12c] sm:$0xe] }
 0x169   :  { %17748 = vst [vmem:[#allocation86_spill] sm:$0xff] %v14346_v40  ;;  %17750 = vst [vmem:[#allocation88_spill] sm:$0xff] %v14357_v11  ;;  %v5105_v17 = vshll.u32 %v14327_v28, 16  ;;  %v5111_v60 = vshll.u32 %v14335_v52, 16  ;;  %v9973_v40 = vld [vmem:[%s17568_s0 + $0x120] sm:$0xe] }
 0x16a   :  { %11227 = vmatmul.mubr.msk.bf16.gmra.mxu0 %vm511_vm1, %v10005_v59  ;;  %v5085_v37 = vrot.slane %v5084_v31, 4  ;;  %v5104_v10 = vrot.slane %v5102_v44, 4  ;;  %v5115_v7 = vshrl.u32 %v14335_v52, 16  ;;  %v5121_v27 = vshll.u32 %v14351_v1, 16  ;;  %v14369_v30 = vpop.f32.mrf.mxu1  ;;  %v14374_v22 = vpop.f32.mrf.mxu0 }
 0x16b   :  { %17751 = vst [vmem:[#allocation89_spill] sm:$0xff] %v14369_v30  ;;  %v5094_v51 = vor.u32 %v5093_v0, %v5089_v23  ;;  %v5099_v39 = vrot.slane %v5097_v34, 5  ;;  %v5107_v11 = vrot.slane %v5105_v17, 5  ;;  %v5113_v28 = vrot.slane %v5111_v60, 5  ;;  %v11695_v0 = vld [vmem:[%s17568_s0 + $0x124] sm:$0xf] }
 0x16c   :  { %v5090_v59 = vsel %vm11847_vm4, %v5085_v37, %v5089_v23  ;;  %v5117_v31 = vrot.slane %v5115_v7, 4  ;;  %v5123_v44 = vrot.slane %v5121_v27, 5  ;;  %v9989_v52 = vrot.slane %v9973_v40, 9  ;;  %v14378_v36 = vpop.f32.mrf.mxu1  ;;  %v11696_v17 = vld [vmem:[%s17568_s0 + $0x128] sm:$0x1]  ;;  %v14386_v56 = vpop.f32.mrf.mxu0 }
 0x16d   :  { %17752 = vst [vmem:[#allocation90_spill] sm:$0xff] %v14378_v36  ;;  %v5095_v1 = vrot.slane %v5094_v51, 4  ;;  %v5108_v30 = vor.u32 %v5107_v11, %v5104_v10  ;;  %v4270_v34 = vrot.slane %v11695_v0, 5  ;;  %v4273_v60 = vrot.slane %v11696_v17, 5  ;;  %v11697_v11 = vld [vmem:[%s17568_s0 + $0x130] sm:$0xf] }
 0x16e   :  { %v5118_v23 = vor.u32 %v5117_v31, %v5113_v28  ;;  %v14390_v40 = vadd.f32 %v14132_v18, %v13643_v48  ;;  %v9990_v37 = vrot.slane %v9974_v14, 9  ;;  %v4277_v10 = vrot.slane %v11697_v11, 5  ;;  %v14395_v7 = vpop.f32.mrf.mxu1  ;;  %v14404_v48 = vld [vmem:[%s17568_s0 + $0x180] sm:$0xf]  ;;  %v14406_v18 = vpop.f32.mrf.mxu0 }
 0x16f   :  { %17754 = vst [vmem:[#allocation92_spill] sm:$0xff] %v14395_v7  ;;  %v5100_v27 = vsel %vm11847_vm4, %v5095_v1, %v5099_v39  ;;  %v5109_v51 = vrot.slane %v5108_v30, 4  ;;  %v4271_v0 = vsel %vm12224_vm7, %v9989_v52, %v4270_v34  ;;  %v4272_v31 = vrot.slane %v4270_v34, 4  ;;  %17755 = vst [vmem:[#allocation93_spill] sm:$0xff] %v14404_v48  ;;  %v14413_v1 = vld [vmem:[%s17568_s0 + $0x184] sm:$0xf] }
 0x170   :  { %17753 = vst [vmem:[#allocation91_spill] sm:$0xff] %v14390_v40  ;;  %v10087_v14 = vcombine.low %v5090_v59, %v5100_v27  ;;  %v5119_v17 = vrot.slane %v5118_v23, 4  ;;  %v4278_v11 = vsel %vm12224_vm7, %v9990_v37, %v4277_v10  ;;  %v4279_v7 = vrot.slane %v4277_v10, 4  ;;  %17756 = vst [vmem:[#allocation94_spill] sm:$0xff] %v14413_v1  ;;  %v14415_v52 = vpop.f32.mrf.mxu1  ;;  %v11698_v59 = vld [vmem:[%s17568_s0 + $0x134] sm:$0x1]  ;;  %v14433_v10 = vpop.f32.mrf.mxu0 }
 0x171   :  { %17757 = vst [vmem:[#allocation95_spill] sm:$0xff] %v14415_v52  ;;  %v5114_v30 = vsel %vm11847_vm4, %v5109_v51, %v5113_v28  ;;  %v4274_v39 = vsel %vm12224_vm7, %v4272_v31, %v4273_v60  ;;  %v4280_v34 = vrot.slane %v11698_v59, 5  ;;  %v14426_v23 = vadd.f32 %v14142_v58, %v13650_v32  ;;  %v14431_v37 = vld [vmem:[%s17568_s0 + $0x188] sm:$0x1]  ;;  %v14443_v32 = vld [vmem:[%s17568_s0 + $0x18c] sm:$0xf] }
 0x172   :  { %17759 = vst [vmem:[#allocation97_spill] sm:$0xff] %v14431_v37  ;;  %11264 = vmatprep.mubr.msk.bf16.mxu1 %vm511_vm1, %v10087_v14  ;;  %v5124_v28 = vsel %vm11847_vm4, %v5119_v17, %v5123_v44  ;;  %v10006_v60 = vcombine.low %v4271_v0, %v4274_v39  ;;  %v5126_v27 = vshrl.u32 %v14404_v48, 16  ;;  %v5129_v51 = vshll.u32 %v14404_v48, 16  ;;  %17760 = vst [vmem:[#allocation98_spill] sm:$0xff] %v14443_v32  ;;  %v14445_v58 = vpop.f32.mrf.mxu1  ;;  %v14454_v0 = vld [vmem:[%s17568_s0 + $0x190] sm:$0xf]  ;;  %v14456_v17 = vpop.f32.mrf.mxu0 }
 0x173   :  { %17758 = vst [vmem:[#allocation96_spill] sm:$0xff] %v14426_v23  ;;  %17761 = vst [vmem:[#allocation99_spill] sm:$0xff] %v14445_v58  ;;  %v10088_v31 = vcombine.low %v5114_v30, %v5124_v28  ;;  %v4281_v59 = vsel %vm12224_vm7, %v4279_v7, %v4280_v34  ;;  %v5135_v14 = vshll.u32 %v14413_v1, 16  ;;  %v5139_v44 = vshrl.u32 %v14413_v1, 16  ;;  %v14463_v7 = vld [vmem:[%s17568_s0 + $0x194] sm:$0x1] }
 0x174   :  { %17762 = vst [vmem:[#allocation100_spill] sm:$0xff] %v14454_v0  ;;  %11230 = vmatprep.mubr.msk.bf16.mxu0 %vm511_vm1, %v10006_v60  ;;  %v10007_v39 = vcombine.low %v4278_v11, %v4281_v59  ;;  %v5128_v52 = vrot.slane %v5126_v27, 4  ;;  %v5131_v58 = vrot.slane %v5129_v51, 5  ;;  %v5145_v30 = vshll.u32 %v14431_v37, 16  ;;  %17763 = vst [vmem:[#allocation101_spill] sm:$0xff] %v14463_v7  ;;  %v14465_v34 = vpop.f32.mrf.mxu1  ;;  %v14473_v60 = vpop.f32.mrf.mxu0 }
 0x175   :  { %17764 = vst [vmem:[#allocation102_spill] sm:$0xff] %v14465_v34  ;;  %11265 = vmatmul.mubr.msk.bf16.gmra.mxu1 %vm511_vm1, %v10088_v31  ;;  %v5137_v28 = vrot.slane %v5135_v14, 5  ;;  %v5141_v36 = vrot.slane %v5139_v44, 4  ;;  %v14470_v48 = vadd.f32 %v14154_v8, %v13664_v46  ;;  %v5150_v11 = vshrl.u32 %v14443_v32, 16  ;;  %v9975_v31 = vld [vmem:[%s17568_s0 + $0x138] sm:$0xe] }
 0x176   :  { %11231 = vmatmul.mubr.msk.bf16.gmra.mxu0 %vm511_vm1, %v10007_v39  ;;  %v5132_v27 = vor.u32 %v5131_v58, %v5128_v52  ;;  %v5147_v51 = vrot.slane %v5145_v30, 5  ;;  %v5153_v59 = vshll.u32 %v14443_v32, 16  ;;  %v5159_v34 = vshll.u32 %v14454_v0, 16  ;;  %v14481_v14 = vpop.f32.mrf.mxu1  ;;  %v9976_v30 = vld [vmem:[%s17568_s0 + $0x144] sm:$0xe] }
 0x177   :  { %17765 = vst [vmem:[#allocation103_spill] sm:$0xff] %v14470_v48  ;;  %17766 = vst [vmem:[#allocation104_spill] sm:$0xff] %v14481_v14  ;;  %v5142_v46 = vor.u32 %v5141_v36, %v5137_v28  ;;  %v5152_v8 = vrot.slane %v5150_v11, 4  ;;  %v5163_v44 = vshrl.u32 %v14454_v0, 16  ;;  %v5169_v37 = vshll.u32 %v14463_v7, 16  ;;  %v14485_v48 = vpop.f32.mrf.mxu0 }
 0x178   :  { %v5133_v52 = vrot.slane %v5132_v27, 4  ;;  %v5155_v58 = vrot.slane %v5153_v59, 5  ;;  %v5161_v39 = vrot.slane %v5159_v34, 5  ;;  %v14490_v32 = vpop.f32.mrf.mxu1  ;;  %v9991_v36 = vrot.slane %v9975_v31, 9  ;;  %v11699_v34 = vld [vmem:[%s17568_s0 + $0x13c] sm:$0xf] }
 0x179   :  { %17767 = vst [vmem:[#allocation105_spill] sm:$0xff] %v14490_v32  ;;  %v5143_v1 = vrot.slane %v5142_v46, 4  ;;  %v5165_v23 = vrot.slane %v5163_v44, 4  ;;  %v5171_v14 = vrot.slane %v5169_v37, 5  ;;  %v14492_v11 = vpop.f32.mrf.mxu0  ;;  %v4284_v27 = vrot.slane %v11699_v34, 5 }
 0x17a   :  { %v5138_v7 = vsel %vm11847_vm4, %v5133_v52, %v5137_v28  ;;  %v5156_v0 = vor.u32 %v5155_v58, %v5152_v8  ;;  %v11700_v59 = vld [vmem:[%s17568_s0 + $0x140] sm:$0x1]  ;;  %v14502_v46 = vpop.f32.mrf.mxu1  ;;  %v14508_v28 = vadd.f32 %v14201_v38, %v13696_v41  ;;  %v9992_v8 = vrot.slane %v9976_v30, 9  ;;  %v10139_v44 = vld [vmem:[%s17568_s0 + $0x60] sm:$0xe] }
 0x17b   :  { %v4287_v32 = vrot.slane %v11700_v59, 5  ;;  %17768 = vst [vmem:[#allocation106_spill] sm:$0xff] %v14502_v46  ;;  %v5148_v37 = vsel %vm11847_vm4, %v5143_v1, %v5147_v51  ;;  %v5166_v31 = vor.u32 %v5165_v23, %v5161_v39  ;;  %v14513_v52 = vpop.f32.mrf.mxu0  ;;  %v4285_v59 = vsel %vm12224_vm7, %v9991_v36, %v4284_v27  ;;  %v11701_v41 = vld [vmem:[%s17568_s0 + $0x148] sm:$0xf]  ;;  %v11702_v23 = vld [vmem:[%s17568_s0 + $0x14c] sm:$0x1] }
 0x17c   :  { %v10089_v58 = vcombine.low %v5138_v7, %v5148_v37  ;;  %v5157_v34 = vrot.slane %v5156_v0, 4  ;;  %v4286_v46 = vrot.slane %v4284_v27, 4  ;;  %v14517_v40 = vpop.f32.mrf.mxu1  ;;  %v4291_v38 = vrot.slane %v11701_v41, 5  ;;  %v11703_v37 = vld [vmem:[%s17568_s0 + $0x64] sm:$0xf] }
 0x17d   :  { %17769 = vst [vmem:[#allocation107_spill] sm:$0xff] %v14517_v40  ;;  %v5167_v1 = vrot.slane %v5166_v31, 4  ;;  %v4294_v51 = vrot.slane %v11702_v23, 5  ;;  %v14527_v0 = vadd.f32 %v14224_v50, %v13704_v21  ;;  %v14529_v7 = vpop.f32.mrf.mxu0  ;;  %v10155_v27 = vrot.slane %v10139_v44, 9  ;;  %v10140_v21 = vld [vmem:[%s17568_s0 + $0x6c] sm:$0xe] }
 0x17e   :  { %11268 = vmatprep.mubr.msk.bf16.mxu1 %vm511_vm1, %v10089_v58  ;;  %v5162_v30 = vsel %vm11847_vm4, %v5157_v34, %v5161_v39  ;;  %v4288_v36 = vsel %vm12224_vm7, %v4286_v46, %v4287_v32  ;;  %v5769_v31 = vrot.slane %v11703_v37, 5  ;;  %v14542_v50 = vpop.f32.mrf.mxu1  ;;  %v4292_v39 = vsel %vm12224_vm7, %v9992_v8, %v4291_v38  ;;  %v11704_v40 = vld [vmem:[%s17568_s0 + $0x68] sm:$0x1] }
 0x17f   :  { %17770 = vst [vmem:[#allocation108_spill] sm:$0xff] %v14527_v0  ;;  %17771 = vst [vmem:[#allocation109_spill] sm:$0xff] %v14542_v50  ;;  %v5172_v58 = vsel %vm11847_vm4, %v5167_v1, %v5171_v14  ;;  %v10008_v41 = vcombine.low %v4285_v59, %v4288_v36  ;;  %v4293_v32 = vrot.slane %v4291_v38, 4  ;;  %v14548_v46 = vpop.f32.mrf.mxu0  ;;  %v5772_v50 = vrot.slane %v11704_v40, 5  ;;  %v14567_v1 = vld [vmem:[%s17568_s0 + $0x70] sm:$0xf] }
 0x180   :  { %v10090_v44 = vcombine.low %v5162_v30, %v5172_v58  ;;  %v5770_v34 = vsel %vm12224_vm7, %v10155_v27, %v5769_v31  ;;  %v5771_v23 = vrot.slane %v5769_v31, 4  ;;  %v14555_v0 = vpop.f32.mrf.mxu1  ;;  %v14562_v8 = vadd.f32 %v14241_v25, %v13720_v54  ;;  %v10141_v40 = vld [vmem:[%s17568_s0 + $0x78] sm:$0xe]  ;;  %v11706_v25 = vld [vmem:[%s17568_s0 + $0x74] sm:$0x1] }
 0x181   :  { %17772 = vst [vmem:[#allocation110_spill] sm:$0xff] %v14555_v0  ;;  %11234 = vmatprep.mubr.msk.bf16.mxu0 %vm511_vm1, %v10008_v41  ;;  %v4295_v14 = vsel %vm12224_vm7, %v4293_v32, %v4294_v51  ;;  %v10156_v59 = vrot.slane %v10140_v21, 9  ;;  %v5776_v38 = vrot.slane %v14567_v1, 5  ;;  %v14573_v30 = vpop.f32.mrf.mxu0  ;;  %v5779_v36 = vrot.slane %v11706_v25, 5  ;;  %v11707_v41 = vld [vmem:[%s17568_s0 + $0x60] sm:$0xf] }
 0x182   :  { %11269 = vmatmul.mubr.msk.bf16.gmra.mxu1 %vm511_vm1, %v10090_v44  ;;  %v10009_v51 = vcombine.low %v4292_v39, %v4295_v14  ;;  %v5773_v54 = vsel %vm12224_vm7, %v5771_v23, %v5772_v50  ;;  %v14581_v27 = vpop.f32.mrf.mxu1  ;;  %v10107_v39 = vcombine.low %v11707_v41, %v11703_v37  ;;  %v10142_v50 = vld [vmem:[%s17568_s0 + $0x84] sm:$0xe]  ;;  %v17774_v44 = vld [vmem:[#allocation12_spill] sm:$0xff]  ;;  %vm9411_vm10 = vcmask 1041409  }
 0x183   :  { %17773 = vst [vmem:[#allocation111_spill] sm:$0xff] %v14581_v27  ;;  %v10171_v31 = vcombine.low %v5770_v34, %v5773_v54  ;;  %v5777_v21 = vsel %vm12224_vm7, %v10156_v59, %v5776_v38  ;;  %v5778_v58 = vrot.slane %v5776_v38, 4  ;;  %v14591_v32 = vpop.f32.mrf.mxu0  ;;  %v14595_v23 = vadd.f32 %v13963_v53, %v17774_v44  ;;  %v17775_v34 = vld [vmem:[#allocation15_spill] sm:$0xff]  ;;  %v11708_v53 = vld [vmem:[%s17568_s0 + $0x7c] sm:$0xf] }
 0x184   :  { %11235 = vmatmul.mubr.msk.bf16.gmra.mxu0 %vm511_vm1, %v10009_v51  ;;  %v1806_v14 = vadd.f32 %v17775_v34, %v13752_v61  ;;  %v1804_v59 = vadd.f32 %v13679_v62, %v13767_v16  ;;  %v10157_v38 = vrot.slane %v10141_v40, 9  ;;  %v14602_v37 = vpop.f32.mrf.mxu1  ;;  %v5783_v51 = vrot.slane %v11708_v53, 5  ;;  %v11709_v61 = vld [vmem:[%s17568_s0 + $0x80] sm:$0x1]  ;;  %v17777_v16 = vld [vmem:[#allocation17_spill] sm:$0xff] }
 0x185   :  { %17776 = vst [vmem:[#allocation12_spill] sm:$0xff] %v14602_v37  ;;  %11308 = vmatprep.mubr.msk.bf16.mxu1 %vm511_vm1, %v10171_v31  ;;  %v5780_v54 = vsel %vm12224_vm7, %v5778_v58, %v5779_v36  ;;  %11274 = vmatprep.mubr.msk.bf16.mxu0 %vm511_vm1, %v10107_v39  ;;  %v5786_v62 = vrot.slane %v11709_v61, 5  ;;  %v1807_v40 = vadd.f32 %v17777_v16, %v13799_v5  ;;  %v14616_v25 = vpop.f32.mrf.mxu0  ;;  %v10158_v41 = vrot.slane %v10142_v50, 9  ;;  %v14634_v5 = vld [vmem:[%s17568_s0 + $0x88] sm:$0xf] }
 0x186   :  { %v10172_v31 = vcombine.low %v5777_v21, %v5780_v54  ;;  %v14619_v36 = vadd.f32 %v14260_v63, %v1806_v14  ;;  %v14622_v58 = vadd.f32 %v14283_v6, %v1804_v59  ;;  %v14624_v39 = vpop.f32.mrf.mxu1  ;;  %v5784_v44 = vsel %vm12224_vm7, %v10157_v38, %v5783_v51  ;;  %v17779_v6 = vld [vmem:[#allocation13_spill] sm:$0xff]  ;;  %v11711_v14 = vld [vmem:[%s17568_s0 + $0x6c] sm:$0xf]  ;;  %v17780_v54 = vld [vmem:[#allocation19_spill] sm:$0xff] }
 0x187   :  { %17778 = vst [vmem:[#allocation15_spill] sm:$0xff] %v14624_v39  ;;  %v5785_v34 = vrot.slane %v5783_v51, 4  ;;  %v14629_v61 = vadd.f32 %v14304_v2, %v1807_v40  ;;  %v5790_v63 = vrot.slane %v14634_v5, 5  ;;  %v14637_v21 = vpop.f32.mrf.mxu0  ;;  %v14641_v50 = vadd.f32 %v14029_v3, %v17779_v6  ;;  %v11712_v59 = vld [vmem:[%s17568_s0 + $0x8c] sm:$0x1] }
 0x188   :  { %v10108_v2 = vcombine.low %v11711_v14, %v14567_v1  ;;  %v5793_v38 = vrot.slane %v11712_v59, 5  ;;  %v1810_v51 = vadd.f32 %v17780_v54, %v13844_v12  ;;  %v10143_v16 = vld [vmem:[%s17568_s0 + $0x90] sm:$0xe]  ;;  %v14655_v3 = vpop.f32.mrf.mxu1  ;;  %v11713_v59 = vld [vmem:[%s17568_s0 + $0x78] sm:$0xf]  ;;  %vm9469_vm11 = vcmask 74752  }
 0x189   :  { %17781 = vst [vmem:[#allocation17_spill] sm:$0xff] %v14655_v3  ;;  %v17782_v40 = vld [vmem:[#allocation14_spill] sm:$0xff]  ;;  %v5787_v1 = vsel %vm12224_vm7, %v5785_v34, %v5786_v62  ;;  %v5792_v14 = vrot.slane %v5790_v63, 4  ;;  %v10109_v0 = vcombine.low %v11713_v59, %v11708_v53  ;;  %v14666_v12 = vpop.f32.mrf.mxu0  ;;  %v5791_v3 = vsel %vm12224_vm7, %v10158_v41, %v5790_v63  ;;  %v17783_v34 = vld [vmem:[#allocation7_spill] sm:$0xff]  ;;  %v17784_v63 = vld [vmem:[#allocation16_spill] sm:$0xff] }
 0x18a   :  { %v14659_v6 = vadd.f32 %v14121_v33, %v17782_v40  ;;  %11309 = vmatmul.mubr.msk.bf16.vlgmr.msra.gmra.mxu1 %vm511_vm1, %v10172_v31  ;;  %v10173_v54 = vcombine.low %v5784_v44, %v5787_v1  ;;  %v14672_v33 = vadd.f32 %v14353_v42, %v1810_v51  ;;  %v1808_v62 = vadd.f32 %v13725_v45, %v13861_v13  ;;  %v14682_v31 = vld [vmem:[%s17568_s0 + $0x94] sm:$0xf]  ;;  %v11715_v42 = vld [vmem:[%s17568_s0 + $0x98] sm:$0x1]  ;;  %v10144_v45 = vld [vmem:[%s17568_s0 + $0x9c] sm:$0xe]  ;;  %v14704_v1 = vpop.f32.mrf.mxu1 }
 0x18b   :  { %11375 = vmatpush3.bf16.msra.mxu1 %v17783_v34  ;;  %v5794_v40 = vsel %vm12224_vm7, %v5792_v14, %v5793_v38  ;;  %v10159_v53 = vrot.slane %v10143_v16, 9  ;;  %v5797_v44 = vrot.slane %v14682_v31, 5  ;;  %v5800_v41 = vrot.slane %v11715_v42, 5  ;;  %v14691_v13 = vpop.f32.mrf.mxu0  ;;  %17785 = vst [vmem:[#allocation13_spill] sm:$0xff] %v14704_v1  ;;  %v17786_v14 = vld [vmem:[#allocation5_spill] sm:$0xff]  ;;  %v17788_v42 = vld [vmem:[#allocation18_spill] sm:$0xff] }
 0x18c   :  { %v14695_v38 = vadd.f32 %v14174_v47, %v17784_v63  ;;  %11275 = vmatmul.mubr.msk.bf16.vlgmr.msra.gmra.mxu0 %vm511_vm1, %v10108_v2  ;;  %11312 = vmatprep.mubr.msk.bf16.mxu1 %vm511_vm1, %v10173_v54  ;;  %v14700_v51 = vadd.f32 %v14364_v26, %v1808_v62  ;;  %v1811_v16 = vadd.f32 %v13727_v57, %v13894_v55  ;;  %v14713_v2 = vld [vmem:[%s17568_s0 + $0xa0] sm:$0xf]  ;;  %v10160_v55 = vrot.slane %v10144_v45, 9  ;;  %v17794_v1 = vld [vmem:[#allocation38_spill] sm:$0xff] }
 0x18d   :  { %11341 = vmatpush3.bf16.msra.mxu0 %v17786_v14  ;;  %v10174_v59 = vcombine.low %v5791_v3, %v5794_v40  ;;  %11278 = vmatprep.mubr.msk.bf16.mxu0 %vm511_vm1, %v10109_v0  ;;  %v5798_v47 = vsel %vm12224_vm7, %v10159_v53, %v5797_v44  ;;  %v5799_v34 = vrot.slane %v5797_v44, 4  ;;  %v5804_v26 = vrot.slane %v14713_v2, 5  ;;  %v14716_v54 = vpop.f32.mrf.mxu0  ;;  %v11717_v0 = vld [vmem:[%s17568_s0 + $0xa4] sm:$0x1]  ;;  %v10145_v40 = vld [vmem:[%s17568_s0 + $0xa8] sm:$0xe] }
 0x18e   :  { %v14719_v57 = vadd.f32 %v14374_v22, %v1811_v16  ;;  %v5807_v3 = vrot.slane %v11717_v0, 5  ;;  %v1814_v62 = vadd.f32 %v13759_v24, %v13932_v43  ;;  %v11718_v53 = vld [vmem:[%s17569_s1 + $0xa] sm:$0x3]  ;;  %v17787_v22 = vld [vmem:[#allocation20_spill] sm:$0xff]  ;;  %v1805_v45 = vadd.f32 %v17788_v42, %v13813_v20  ;;  %v11719_v16 = vld [vmem:[%s17569_s1 + $0xc] sm:$0x3] }
 0x18f   :  { %11566 = vmatprep.subr.msk.bf16.mxu0 %vm560_vm0, %v11718_v53  ;;  %v14735_v44 = vadd.f32 %v14253_v15, %v17787_v22  ;;  %v5801_v24 = vsel %vm12224_vm7, %v5799_v34, %v5800_v41  ;;  %v5806_v43 = vrot.slane %v5804_v26, 4  ;;  %v14741_v63 = vpop.f32.mrf.mxu0  ;;  %11567 = vmatprep.subr.msk.bf16.mxu1 %vm560_vm0, %v11719_v16  ;;  %v11720_v15 = vld [vmem:[%s17568_s0 + $0x84] sm:$0xf]  ;;  %v17789_v41 = vld [vmem:[#allocation22_spill] sm:$0xff]  ;;  %v10146_v53 = vld [vmem:[%s17568_s0 + $0xb4] sm:$0xe]  ;;  %v14759_v22 = vpop.f32.mrf.mxu1 }
 0x190   :  { %v10110_v14 = vcombine.low %v11720_v15, %v14634_v5  ;;  %v10175_v0 = vcombine.low %v5798_v47, %v5801_v24  ;;  %v14752_v20 = vadd.f32 %v14406_v18, %v1814_v62  ;;  %v1812_v34 = vadd.f32 %v17789_v41, %v13961_v4  ;;  %17790 = vst [vmem:[#allocation19_spill] sm:$0xff] %v14759_v22  ;;  %v11721_v42 = vld [vmem:[%s17568_s0 + $0x90] sm:$0xf]  ;;  %v17791_v41 = vld [vmem:[#allocation40_spill] sm:$0xff] }
 0x191   :  { %v10111_v16 = vcombine.low %v11721_v42, %v14682_v31  ;;  %v10161_v5 = vrot.slane %v10145_v40, 9  ;;  %v5811_v47 = vrot.slane %v13951_v49, 5  ;;  %v5814_v18 = vrot.slane %v13973_v35, 5  ;;  %v14767_v62 = vpop.f32.mrf.mxu0  ;;  %v17792_v31 = vld [vmem:[#allocation23_spill] sm:$0xff]  ;;  %v17793_v42 = vld [vmem:[#allocation37_spill] sm:$0xff] }
 0x192   :  { %11313 = vmatmul.mubr.msk.bf16.gmra.mxu1 %vm511_vm1, %v10174_v59  ;;  %v5805_v4 = vsel %vm12224_vm7, %v10160_v55, %v5804_v26  ;;  %v5808_v24 = vsel %vm12224_vm7, %v5806_v43, %v5807_v3  ;;  %v14775_v15 = vadd.f32 %v14433_v10, %v1812_v34  ;;  %v1815_v40 = vadd.f32 %v17792_v31, %v17791_v41  ;;  %v17795_v26 = vld [vmem:[#allocation32_spill] sm:$0xff]  ;;  %v17796_v55 = vld [vmem:[#allocation21_spill] sm:$0xff]  ;;  %v17800_v41 = vld [vmem:[#allocation83_spill] sm:$0xff] }
 0x193   :  { %11316 = vmatprep.mubr.msk.bf16.mxu1 %vm511_vm1, %v10175_v0  ;;  %v5813_v49 = vrot.slane %v5811_v47, 4  ;;  %v10162_v35 = vrot.slane %v10146_v53, 9  ;;  %v5818_v22 = vrot.slane %v17793_v42, 5  ;;  %v5821_v59 = vrot.slane %v17794_v1, 5  ;;  %v14782_v39 = vpop.f32.mrf.mxu0  ;;  %v17798_v0 = vld [vmem:[#allocation25_spill] sm:$0xff]  ;;  %v14794_v53 = vpop.f32.mrf.mxu1  ;;  %v17805_v42 = vld [vmem:[#allocation47_spill] sm:$0xff] }
 0x194   :  { %11279 = vmatmul.mubr.msk.bf16.gmra.mxu0 %vm511_vm1, %v10110_v14  ;;  %v1809_v3 = vadd.f32 %v17796_v55, %v17795_v26  ;;  %v5812_v10 = vsel %vm12224_vm7, %v10161_v5, %v5811_v47  ;;  %v14790_v43 = vadd.f32 %v14456_v17, %v1815_v40  ;;  %v1818_v34 = vadd.f32 %v17798_v0, %v14043_v9  ;;  %v11722_v14 = vld [vmem:[%s17568_s0 + $0x9c] sm:$0xf]  ;;  %v10147_v9 = vld [vmem:[%s17568_s0 + $0x138] sm:$0xe]  ;;  %v17806_v26 = vld [vmem:[#allocation26_spill] sm:$0xff] }
 0x195   :  { %17799 = vst [vmem:[#allocation7_spill] sm:$0xff] %v14794_v53  ;;  %v14797_v1 = vadd.f32 %v17800_v41, %v1805_v45  ;;  %11282 = vmatprep.mubr.msk.bf16.mxu0 %vm511_vm1, %v10111_v16  ;;  %v10112_v31 = vcombine.low %v11722_v14, %v14713_v2  ;;  %v5815_v17 = vsel %vm12224_vm7, %v5813_v49, %v5814_v18  ;;  %v5820_v5 = vrot.slane %v5818_v22, 4  ;;  %v14809_v47 = vpop.f32.mrf.mxu0  ;;  %v17807_v0 = vld [vmem:[#allocation48_spill] sm:$0xff]  ;;  %v14839_v14 = vpop.f32.mrf.mxu1  ;;  %v17819_v53 = vld [vmem:[#allocation29_spill] sm:$0xff] }
 0x196   :  { %17797 = vst [vmem:[#allocation14_spill] sm:$0xff] %v14790_v43  ;;  %17802 = vst [vmem:[#allocation5_spill] sm:$0xff] %v14809_v47  ;;  %v10176_v45 = vcombine.low %v5805_v4, %v5808_v24  ;;  %v14812_v40 = vadd.f32 %v14386_v56, %v1809_v3  ;;  %v14815_v16 = vadd.f32 %v14485_v48, %v1818_v34  ;;  %v5825_v4 = vrot.slane %v17807_v0, 5  ;;  %v10148_v56 = vld [vmem:[%s17568_s0 + $0x144] sm:$0xe] }
 0x197   :  { %17801 = vst [vmem:[#allocation16_spill] sm:$0xff] %v14797_v1  ;;  %v1816_v2 = vadd.f32 %v17806_v26, %v17805_v42  ;;  %v10177_v55 = vcombine.low %v5812_v10, %v5815_v17  ;;  %v14821_v18 = vsel %vm12224_vm7, %v10162_v35, %v5818_v22  ;;  %v14825_v49 = vsel %vm12224_vm7, %v5820_v5, %v5821_v59  ;;  %v14831_v48 = vpop.f32.mrf.mxu0  ;;  %v17809_v10 = vld [vmem:[#allocation49_spill] sm:$0xff]  ;;  %v17810_v22 = vld [vmem:[#allocation54_spill] sm:$0xff]  ;;  %v17811_v35 = vld [vmem:[#allocation27_spill] sm:$0xff] }
 0x198   :  { %17803 = vst [vmem:[#allocation20_spill] sm:$0xff] %v14812_v40  ;;  %17804 = vst [vmem:[#allocation18_spill] sm:$0xff] %v14815_v16  ;;  %v10163_v3 = vrot.slane %v10147_v9, 9  ;;  %v5828_v34 = vrot.slane %v17809_v10, 5  ;;  %v1819_v41 = vadd.f32 %v17811_v35, %v17810_v22  ;;  %v17813_v59 = vld [vmem:[#allocation43_spill] sm:$0xff]  ;;  %v17814_v17 = vld [vmem:[#allocation24_spill] sm:$0xff] }
 0x199   :  { %v14834_v24 = vadd.f32 %v14492_v11, %v1816_v2  ;;  %17812 = vst [vmem:[#allocation40_spill] sm:$0xff] %v14839_v14  ;;  %v1813_v5 = vadd.f32 %v17814_v17, %v17813_v59  ;;  %v11723_v42 = vld [vmem:[%s17568_s0 + $0xa8] sm:$0xf]  ;;  %v11724_v11 = vld [vmem:[%s17568_s0 + $0xac] sm:$0xf]  ;;  %v5827_v9 = vrot.slane %v5825_v4, 4  ;;  %v14850_v47 = vpop.f32.mrf.mxu0  ;;  %v14886_v27 = vpop.f32.mrf.mxu1 }
 0x19a   :  { %v10113_v26 = vcombine.low %v11723_v42, %v11724_v11  ;;  %v17815_v2 = vld [vmem:[#allocation52_spill] sm:$0xff]  ;;  %11317 = vmatmul.mubr.msk.bf16.gmra.mxu1 %vm511_vm1, %v10176_v45  ;;  %v14854_v22 = vadd.f32 %v14513_v52, %v1819_v41  ;;  %v10164_v35 = vrot.slane %v10148_v56, 9  ;;  %v17817_v59 = vld [vmem:[#allocation55_spill] sm:$0xff]  ;;  %v10178_v11 = vcombine.low %v14821_v18, %v14825_v49  ;;  %17824 = vst [vmem:[#allocation32_spill] sm:$0xff] %v14886_v27 }
 0x19b   :  { %17808 = vst [vmem:[#allocation22_spill] sm:$0xff] %v14834_v24  ;;  %v5832_v10 = vrot.slane %v17815_v2, 5  ;;  %v5835_v17 = vrot.slane %v17817_v59, 5  ;;  %v17818_v14 = vld [vmem:[#allocation59_spill] sm:$0xff]  ;;  %11320 = vmatprep.mubr.msk.bf16.mxu1 %vm511_vm1, %v10177_v55  ;;  %v14866_v45 = vadd.f32 %v14473_v60, %v1813_v5  ;;  %v5826_v55 = vsel %vm12224_vm7, %v10163_v3, %v5825_v4  ;;  %v17822_v49 = vld [vmem:[#allocation64_spill] sm:$0xff]  ;;  %v17823_v5 = vld [vmem:[#allocation30_spill] sm:$0xff] }
 0x19c   :  { %17816 = vst [vmem:[#allocation23_spill] sm:$0xff] %v14854_v22  ;;  %v1822_v37 = vadd.f32 %v17819_v53, %v17818_v14  ;;  %v10149_v42 = vld [vmem:[%s17568_s0 + $0x150] sm:$0xe]  ;;  %v11725_v52 = vld [vmem:[%s17568_s0 + $0xb4] sm:$0xf]  ;;  %v14874_v14 = vpop.f32.mrf.mxu0  ;;  %11283 = vmatmul.mubr.msk.bf16.gmra.mxu0 %vm511_vm1, %v10112_v31  ;;  %v5829_v60 = vsel %vm12224_vm7, %v5827_v9, %v5828_v34  ;;  %v1820_v59 = vadd.f32 %v17823_v5, %v17822_v49  ;;  %v17826_v31 = vld [vmem:[#allocation45_spill] sm:$0xff] }
 0x19d   :  { %17820 = vst [vmem:[#allocation37_spill] sm:$0xff] %v14866_v45  ;;  %v11726_v53 = vld [vmem:[%s17568_s0 + $0xb8] sm:$0xf]  ;;  %v5834_v41 = vrot.slane %v5832_v10, 4  ;;  %11286 = vmatprep.mubr.msk.bf16.mxu0 %vm511_vm1, %v10113_v26  ;;  %v10115_v45 = vcombine.low %v17826_v31, %v17807_v0  ;;  %v10165_v4 = vrot.slane %v10149_v42, 9  ;;  %v17827_v3 = vld [vmem:[#allocation62_spill] sm:$0xff]  ;;  %v14912_v42 = vpop.f32.mrf.mxu1  ;;  %v10179_v5 = vcombine.low %v5826_v55, %v5829_v60 }
 0x19e   :  { %v10114_v56 = vcombine.low %v11725_v52, %v11726_v53  ;;  %v14882_v18 = vadd.f32 %v14548_v46, %v1822_v37  ;;  %v17825_v52 = vld [vmem:[#allocation28_spill] sm:$0xff]  ;;  %v5839_v40 = vrot.slane %v17827_v3, 5  ;;  %v14894_v34 = vpop.f32.mrf.mxu0  ;;  %v14898_v46 = vsel %vm12224_vm7, %v10164_v35, %v5832_v10  ;;  %v17830_v9 = vld [vmem:[#allocation31_spill] sm:$0xff]  ;;  %17831 = vst [vmem:[#allocation25_spill] sm:$0xff] %v14912_v42  ;;  %v17833_v31 = vld [vmem:[#allocation65_spill] sm:$0xff] }
 0x19f   :  { %v1817_v53 = vadd.f32 %v17825_v52, %v14595_v23  ;;  %v14902_v37 = vsel %vm12224_vm7, %v5834_v41, %v5835_v17  ;;  %v14905_v26 = vadd.f32 %v14573_v30, %v1820_v59  ;;  %v17829_v23 = vld [vmem:[#allocation71_spill] sm:$0xff]  ;;  %v10150_v0 = vld [vmem:[%s17568_s0 + $0x15c] sm:$0xe]  ;;  %v5842_v17 = vrot.slane %v17833_v31, 5  ;;  %v10151_v55 = vld [vmem:[%s17568_s0 + $0x168] sm:$0xe]  ;;  %v14931_v60 = vpop.f32.mrf.mxu1 }
 0x1a0   :  { %17821 = vst [vmem:[#allocation38_spill] sm:$0xff] %v14882_v18  ;;  %v1823_v49 = vadd.f32 %v17830_v9, %v17829_v23  ;;  %v17832_v10 = vld [vmem:[#allocation51_spill] sm:$0xff]  ;;  %v5841_v52 = vrot.slane %v5839_v40, 4  ;;  %v14917_v41 = vpop.f32.mrf.mxu0  ;;  %v17836_v23 = vld [vmem:[#allocation68_spill] sm:$0xff]  ;;  %17839 = vst [vmem:[#allocation26_spill] sm:$0xff] %v14931_v60  ;;  %v10180_v31 = vcombine.low %v14898_v46, %v14902_v37 }
 0x1a1   :  { %17828 = vst [vmem:[#allocation21_spill] sm:$0xff] %v14905_v26  ;;  %v14920_v30 = vadd.f32 %v14529_v7, %v1817_v53  ;;  %v5846_v9 = vrot.slane %v17836_v23, 5  ;;  %v17837_v27 = vld [vmem:[#allocation75_spill] sm:$0xff]  ;;  %v17838_v26 = vld [vmem:[#allocation34_spill] sm:$0xff]  ;;  %v5840_v7 = vsel %vm12224_vm7, %v10165_v4, %v5839_v40  ;;  %v10166_v53 = vrot.slane %v10150_v0, 9 }
 0x1a2   :  { %v14923_v59 = vadd.f32 %v14591_v32, %v1823_v49  ;;  %v1826_v42 = vadd.f32 %v17838_v26, %v17837_v27  ;;  %v17840_v32 = vld [vmem:[#allocation69_spill] sm:$0xff]  ;;  %v10152_v35 = vld [vmem:[%s17568_s0 + $0x174] sm:$0xe]  ;;  %v14941_v27 = vpop.f32.mrf.mxu0  ;;  %11321 = vmatmul.mubr.msk.bf16.gmra.mxu1 %vm511_vm1, %v10178_v11  ;;  %v17844_v40 = vld [vmem:[#allocation78_spill] sm:$0xff]  ;;  %v10167_v11 = vrot.slane %v10151_v55, 9 }
 0x1a3   :  { %17834 = vst [vmem:[#allocation83_spill] sm:$0xff] %v14920_v30  ;;  %v5849_v49 = vrot.slane %v17840_v32, 5  ;;  %v17841_v26 = vld [vmem:[#allocation33_spill] sm:$0xff]  ;;  %v17845_v4 = vld [vmem:[#allocation35_spill] sm:$0xff]  ;;  %v14953_v32 = vpop.f32.mrf.mxu1  ;;  %11324 = vmatprep.mubr.msk.bf16.mxu1 %vm511_vm1, %v10179_v5  ;;  %v10168_v5 = vrot.slane %v10152_v35, 9  ;;  %v17853_v55 = vld [vmem:[#allocation84_spill] sm:$0xff] }
 0x1a4   :  { %17835 = vst [vmem:[#allocation47_spill] sm:$0xff] %v14923_v59  ;;  %v1821_v60 = vadd.f32 %v17841_v26, %v14641_v50  ;;  %v17842_v30 = vld [vmem:[#allocation61_spill] sm:$0xff]  ;;  %v14949_v37 = vadd.f32 %v14637_v21, %v1826_v42  ;;  %v1824_v0 = vadd.f32 %v17845_v4, %v17844_v40  ;;  %17846 = vst [vmem:[#allocation49_spill] sm:$0xff] %v14953_v32  ;;  %v17847_v18 = vld [vmem:[#allocation79_spill] sm:$0xff]  ;;  %v14960_v24 = vpop.f32.mrf.mxu0  ;;  %11287 = vmatmul.mubr.msk.bf16.gmra.mxu0 %vm511_vm1, %v10114_v56 }
 0x1a5   :  { %v5843_v59 = vsel %vm12224_vm7, %v5841_v52, %v5842_v17  ;;  %v5853_v22 = vrot.slane %v17847_v18, 5  ;;  %v17848_v50 = vld [vmem:[#allocation80_spill] sm:$0xff]  ;;  %v5848_v21 = vrot.slane %v5846_v9, 4  ;;  %v17850_v40 = vld [vmem:[#allocation86_spill] sm:$0xff]  ;;  %v14968_v32 = vpop.f32.mrf.mxu1  ;;  %11290 = vmatprep.mubr.msk.bf16.mxu0 %vm511_vm1, %v10115_v45  ;;  %v17854_v56 = vld [vmem:[#allocation87_spill] sm:$0xff] }
 0x1a6   :  { %17843 = vst [vmem:[#allocation48_spill] sm:$0xff] %v14949_v37  ;;  %v5856_v26 = vrot.slane %v17848_v50, 5  ;;  %v14964_v42 = vadd.f32 %v14666_v12, %v1824_v0  ;;  %v17851_v4 = vld [vmem:[#allocation36_spill] sm:$0xff]  ;;  %17852 = vst [vmem:[#allocation27_spill] sm:$0xff] %v14968_v32  ;;  %v5860_v50 = vrot.slane %v17853_v55, 5  ;;  %v5863_v37 = vrot.slane %v17854_v56, 5  ;;  %v14977_v16 = vpop.f32.mrf.mxu0 }
 0x1a7   :  { %v1827_v46 = vadd.f32 %v17851_v4, %v17850_v40  ;;  %v14973_v52 = vsel %vm12224_vm7, %v10167_v11, %v5853_v22  ;;  %v5855_v17 = vrot.slane %v5853_v22, 4  ;;  %17855 = vst [vmem:[#allocation43_spill] sm:$0xff] %v14977_v16  ;;  %v10181_v12 = vcombine.low %v5840_v7, %v5843_v59  ;;  %v17857_v45 = vld [vmem:[#allocation91_spill] sm:$0xff]  ;;  %v17858_v40 = vld [vmem:[#allocation41_spill] sm:$0xff]  ;;  %v14991_v11 = vpop.f32.mrf.mxu1 }
 0x1a8   :  { %17849 = vst [vmem:[#allocation54_spill] sm:$0xff] %v14964_v42  ;;  %v14981_v0 = vsel %vm12224_vm7, %v10166_v53, %v5846_v9  ;;  %v1830_v4 = vadd.f32 %v17858_v40, %v17857_v45  ;;  %v10153_v22 = vld [vmem:[%s17568_s0 + $0x180] sm:$0xe]  ;;  %17859 = vst [vmem:[#allocation52_spill] sm:$0xff] %v14991_v11  ;;  %v14999_v59 = vsel %vm12224_vm7, %v10168_v5, %v5860_v50  ;;  %v5862_v9 = vrot.slane %v5860_v50, 4  ;;  %v17861_v45 = vld [vmem:[#allocation66_spill] sm:$0xff] }
 0x1a9   :  { %v14984_v35 = vadd.f32 %v14691_v13, %v1827_v46  ;;  %v14995_v56 = vsel %vm12224_vm7, %v5855_v17, %v5856_v26  ;;  %v17860_v13 = vld [vmem:[#allocation82_spill] sm:$0xff]  ;;  %v15006_v46 = vpop.f32.mrf.mxu0  ;;  %v17863_v5 = vld [vmem:[#allocation96_spill] sm:$0xff]  ;;  %v15017_v32 = vpop.f32.mrf.mxu1  ;;  %v5850_v7 = vsel %vm12224_vm7, %v5848_v21, %v5849_v49  ;;  %v10169_v42 = vrot.slane %v10153_v22, 9  ;;  %v17870_v22 = vld [vmem:[#allocation97_spill] sm:$0xff] }
 0x1aa   :  { %v10154_v53 = vld [vmem:[%s17568_s0 + $0x18c] sm:$0xe]  ;;  %v15013_v17 = vadd.f32 %v14741_v63, %v1830_v4  ;;  %17865 = vst [vmem:[#allocation59_spill] sm:$0xff] %v15017_v32  ;;  %11325 = vmatmul.mubr.msk.bf16.gmra.mxu1 %vm511_vm1, %v10180_v31  ;;  %v17871_v26 = vld [vmem:[#allocation100_spill] sm:$0xff]  ;;  %v17872_v31 = vld [vmem:[#allocation101_spill] sm:$0xff] }
 0x1ab   :  { %17856 = vst [vmem:[#allocation24_spill] sm:$0xff] %v14984_v35  ;;  %v17864_v50 = vld [vmem:[#allocation42_spill] sm:$0xff]  ;;  %v15023_v35 = vsel %vm12224_vm7, %v5862_v9, %v5863_v37  ;;  %v15026_v1 = vpop.f32.mrf.mxu0  ;;  %v10170_v21 = vrot.slane %v10154_v53, 9  ;;  %11328 = vmatprep.mubr.msk.bf16.mxu1 %vm511_vm1, %v10181_v12  ;;  %v15038_v37 = vadd.f32 %v14616_v25, %v1821_v60  ;;  %v5870_v9 = vrot.slane %v17870_v22, 5  ;;  %v15043_v43 = vpop.f32.mrf.mxu1  ;;  %v17875_v25 = vld [vmem:[#allocation93_spill] sm:$0xff] }
 0x1ac   :  { %17862 = vst [vmem:[#allocation55_spill] sm:$0xff] %v15013_v17  ;;  %v1828_v11 = vadd.f32 %v17864_v50, %v17863_v5  ;;  %v17866_v40 = vld [vmem:[#allocation94_spill] sm:$0xff]  ;;  %v17867_v5 = vld [vmem:[#allocation103_spill] sm:$0xff]  ;;  %v17868_v50 = vld [vmem:[#allocation44_spill] sm:$0xff]  ;;  %v5874_v32 = vrot.slane %v17871_v26, 5  ;;  %v5877_v17 = vrot.slane %v17872_v31, 5 }
 0x1ad   :  { %v5867_v16 = vrot.slane %v17866_v40, 5  ;;  %v1831_v49 = vadd.f32 %v17868_v50, %v17867_v5  ;;  %17869 = vst [vmem:[#allocation29_spill] sm:$0xff] %v15038_v37  ;;  %17873 = vst [vmem:[#allocation64_spill] sm:$0xff] %v15043_v43  ;;  %v15045_v63 = vpop.f32.mrf.mxu0  ;;  %v17876_v53 = vld [vmem:[#allocation50_spill] sm:$0xff]  ;;  %v17885_v37 = vld [vmem:[#allocation56_spill] sm:$0xff] }
 0x1ae   :  { %v15032_v4 = vadd.f32 %v14767_v62, %v1828_v11  ;;  %v17874_v62 = vcombine.low %v17832_v10, %v17815_v2  ;;  %v1834_v5 = vadd.f32 %v17876_v53, %v14508_v28  ;;  %v10267_v50 = vld [vmem:[%s17568_s0 + $0x6c] sm:$0xf]  ;;  %v10268_v2 = vld [vmem:[%s17568_s0 + $0x70] sm:$0xf]  ;;  %v10182_v10 = vcombine.low %v14981_v0, %v5850_v7  ;;  %v17879_v53 = vld [vmem:[#allocation76_spill] sm:$0xff] }
 0x1af   :  { %v5869_v11 = vrot.slane %v5867_v16, 4  ;;  %v15052_v12 = vadd.f32 %v14782_v39, %v1831_v49  ;;  %v17877_v39 = vcombine.low %v17842_v30, %v17827_v3  ;;  %v15071_v49 = vsel %vm12224_vm7, %v10170_v21, %v5874_v32  ;;  %v17878_v22 = vld [vmem:[#allocation98_spill] sm:$0xff]  ;;  %v17881_v30 = vld [vmem:[#allocation108_spill] sm:$0xff]  ;;  %v17882_v7 = vld [vmem:[#allocation53_spill] sm:$0xff] }
 0x1b0   :  { %11291 = vmatmul.mubr.msk.bf16.gmra.mxu0 %vm511_vm1, %v17874_v62  ;;  %v5876_v28 = vrot.slane %v5874_v32, 4  ;;  %v15075_v62 = vpop.f32.mrf.mxu0  ;;  %v10119_v60 = vcombine.low %v17879_v53, %v17847_v18  ;;  %v15081_v0 = vsel %vm12224_vm7, %v10169_v42, %v5867_v16  ;;  %v15084_v3 = vadd.f32 %v14831_v48, %v1834_v5  ;;  %v10269_v32 = vld [vmem:[%s17568_s0 + $0x74] sm:$0x1]  ;;  %v10270_v16 = vld [vmem:[%s17568_s0 + $0x78] sm:$0xf]  ;;  %v15098_v48 = vpop.f32.mrf.mxu1 }
 0x1b1   :  { %11294 = vmatprep.mubr.msk.bf16.mxu0 %vm511_vm1, %v17877_v39  ;;  %v1832_v21 = vadd.f32 %v17882_v7, %v17881_v30  ;;  %v6574_v31 = vshrl.u32 %v10267_v50, 16  ;;  %v6577_v18 = vshll.u32 %v10267_v50, 16  ;;  %v6583_v53 = vshll.u32 %v10268_v2, 16  ;;  %17883 = vst [vmem:[#allocation28_spill] sm:$0xff] %v15098_v48 }
 0x1b2   :  { %17880 = vst [vmem:[#allocation30_spill] sm:$0xff] %v15084_v3  ;;  %v15093_v39 = vsel %vm12224_vm7, %v5876_v28, %v5877_v17  ;;  %v15100_v42 = vpop.f32.mrf.mxu0  ;;  %v15104_v5 = vsel %vm12224_vm7, %v5869_v11, %v5870_v9  ;;  %v6587_v50 = vshrl.u32 %v10268_v2, 16  ;;  %v10271_v28 = vld [vmem:[%s17568_s0 + $0x7c] sm:$0xf]  ;;  %v1835_v19 = vadd.f32 %v17885_v37, %v14562_v8  ;;  %v10272_v9 = vld [vmem:[%s17568_s0 + $0x80] sm:$0x1]  ;;  %v15121_v11 = vpop.f32.mrf.mxu1  ;;  %11329 = vmatmul.mubr.msk.bf16.gmra.mxu1 %vm511_vm1, %v10182_v10 }
 0x1b3   :  { %v15109_v17 = vadd.f32 %v14850_v47, %v1832_v21  ;;  %v6576_v7 = vrot.slane %v6574_v31, 4  ;;  %v6579_v43 = vrot.slane %v6577_v18, 5  ;;  %v15114_v48 = vrot.slane %v6583_v53, 5  ;;  %17886 = vst [vmem:[#allocation62_spill] sm:$0xff] %v15121_v11 }
 0x1b4   :  { %v15123_v47 = vpop.f32.mrf.mxu0  ;;  %v6589_v2 = vrot.slane %v6587_v50, 4  ;;  %v6593_v21 = vshll.u32 %v10269_v32, 16  ;;  %v6598_v30 = vshrl.u32 %v10270_v16, 16  ;;  %v6601_v31 = vshll.u32 %v10270_v16, 16  ;;  %v15133_v11 = vpop.f32.mrf.mxu1 }
 0x1b5   :  { %17884 = vst [vmem:[#allocation45_spill] sm:$0xff] %v15109_v17  ;;  %v17887_v18 = vcombine.low %v14973_v52, %v14995_v56  ;;  %v6580_v8 = vor.u32 %v6579_v43, %v6576_v7  ;;  %v15131_v37 = vadd.f32 %v14874_v14, %v1835_v19  ;;  %v6607_v53 = vshll.u32 %v10271_v28, 16  ;;  %17888 = vst [vmem:[#allocation71_spill] sm:$0xff] %v15133_v11  ;;  %v17890_v43 = vld [vmem:[#allocation39_spill] sm:$0xff]  ;;  %v17930_v11 = vld [vmem:[#allocation16_spill] sm:$0xff] }
 0x1b6   :  { %v6611_v17 = vshrl.u32 %v10271_v28, 16  ;;  %v15135_v3 = vpop.f32.mrf.mxu0  ;;  %v17889_v10 = vcombine.low %v17861_v45, %v17836_v23  ;;  %v6590_v32 = vor.u32 %v6589_v2, %v15114_v48  ;;  %v6600_v52 = vrot.slane %v6598_v30, 4  ;;  %v10273_v23 = vld [vmem:[%s17568_s0 + $0x84] sm:$0xf]  ;;  %v15150_v45 = vpop.f32.mrf.mxu1 }
 0x1b7   :  { %11332 = vmatprep.mubr.msk.bf16.mxu1 %vm511_vm1, %v17887_v18  ;;  %v6603_v56 = vrot.slane %v6601_v31, 5  ;;  %v6617_v16 = vshll.u32 %v10272_v9, 16  ;;  %v1825_v19 = vadd.f32 %v17890_v43, %v14659_v6  ;;  %v6581_v14 = vrot.slane %v6580_v8, 4  ;;  %17891 = vst [vmem:[#allocation31_spill] sm:$0xff] %v15150_v45  ;;  %v17892_v31 = vld [vmem:[#allocation58_spill] sm:$0xff]  ;;  %v17894_v8 = vld [vmem:[#allocation60_spill] sm:$0xff] }
 0x1b8   :  { %11295 = vmatmul.mubr.msk.bf16.gmra.mxu0 %vm511_vm1, %v17889_v10  ;;  %v15145_v50 = vrot.slane %v6607_v53, 5  ;;  %v6613_v28 = vrot.slane %v6611_v17, 4  ;;  %v15152_v7 = vpop.f32.mrf.mxu0  ;;  %v6591_v30 = vrot.slane %v6590_v32, 4  ;;  %v6595_v2 = vrot.slane %v6593_v21, 5  ;;  %v15167_v10 = vld [vmem:[%s17568_s0 + $0x88] sm:$0xf] }
 0x1b9   :  { %11298 = vmatprep.mubr.msk.bf16.mxu0 %vm511_vm1, %v10119_v60  ;;  %v6604_v9 = vor.u32 %v6603_v56, %v6600_v52  ;;  %v3002_v6 = vadd.f32 %v17892_v31, %v14619_v36  ;;  %v15157_v60 = vadd.f32 %v14716_v54, %v1825_v19  ;;  %v10185_v17 = vcombine.low %v15081_v0, %v15104_v5  ;;  %v15177_v0 = vld [vmem:[%s17568_s0 + $0x8c] sm:$0x1] }
 0x1ba   :  { %v6614_v18 = vor.u32 %v6613_v28, %v15145_v50  ;;  %v3000_v53 = vadd.f32 %v17894_v8, %v14622_v58  ;;  %v15169_v21 = vpop.f32.mrf.mxu0  ;;  %v6619_v36 = vrot.slane %v6617_v16, 5  ;;  %v6622_v5 = vshrl.u32 %v10273_v23, 16  ;;  %v15188_v16 = vpop.f32.mrf.mxu1 }
 0x1bb   :  { %17893 = vst [vmem:[#allocation51_spill] sm:$0xff] %v15157_v60  ;;  %v6605_v32 = vrot.slane %v6604_v9, 4  ;;  %v15172_v54 = vadd.f32 %v14917_v41, %v3002_v6  ;;  %v6586_v58 = vsel %vm11847_vm4, %v6581_v14, %v15114_v48  ;;  %v6625_v43 = vshll.u32 %v10273_v23, 16  ;;  %v10276_v41 = vld [vmem:[%s17568_s0 + $0x90] sm:$0xf]  ;;  %17895 = vst [vmem:[#allocation65_spill] sm:$0xff] %v15188_v16 }
 0x1bc   :  { %v6615_v52 = vrot.slane %v6614_v18, 4  ;;  %v15183_v56 = vadd.f32 %v14941_v27, %v3000_v53  ;;  %v15190_v19 = vpop.f32.mrf.mxu0  ;;  %v17896_v28 = vcombine.low %v14999_v59, %v15023_v35  ;;  %v6596_v48 = vsel %vm11847_vm4, %v6591_v30, %v6595_v2  ;;  %v17897_v35 = vld [vmem:[#allocation63_spill] sm:$0xff]  ;;  %v15212_v2 = vpop.f32.mrf.mxu1  ;;  %v17916_v16 = vld [vmem:[#allocation77_spill] sm:$0xff] }
 0x1bd   :  { %v6624_v14 = vrot.slane %v6622_v5, 4  ;;  %v6631_v27 = vshll.u32 %v15167_v10, 16  ;;  %v6635_v23 = vshrl.u32 %v15167_v10, 16  ;;  %v6610_v9 = vsel %vm11847_vm4, %v6605_v32, %v15145_v50  ;;  %v15210_v30 = vld [vmem:[%s17568_s0 + $0x94] sm:$0xf]  ;;  %17898 = vst [vmem:[#allocation68_spill] sm:$0xff] %v15212_v2 }
 0x1be   :  { %11333 = vmatmul.mubr.msk.bf16.gmra.mxu1 %vm511_vm1, %v17896_v28  ;;  %v6627_v31 = vrot.slane %v6625_v43, 5  ;;  %v6641_v6 = vshll.u32 %v15177_v0, 16  ;;  %v3003_v59 = vadd.f32 %v17897_v35, %v14629_v61  ;;  %v15214_v18 = vpop.f32.mrf.mxu0  ;;  %v6620_v50 = vsel %vm11847_vm4, %v6615_v52, %v6619_v36  ;;  %v15225_v61 = vld [vmem:[%s17568_s0 + $0x98] sm:$0x1]  ;;  %v15234_v36 = vpop.f32.mrf.mxu1 }
 0x1bf   :  { %11336 = vmatprep.mubr.msk.bf16.mxu1 %vm511_vm1, %v10185_v17  ;;  %v17899_v17 = vcombine.low %v17860_v13, %v17853_v55  ;;  %v6633_v8 = vrot.slane %v6631_v27, 5  ;;  %v6637_v53 = vrot.slane %v6635_v23, 4  ;;  %v6646_v32 = vshrl.u32 %v10276_v41, 16  ;;  %17901 = vst [vmem:[#allocation75_spill] sm:$0xff] %v15234_v36 }
 0x1c0   :  { %v17900_v5 = vcombine.low %v17875_v25, %v17866_v40  ;;  %v6628_v43 = vor.u32 %v6627_v31, %v6624_v14  ;;  %v6643_v55 = vrot.slane %v6641_v6, 5  ;;  %v15232_v13 = vadd.f32 %v14960_v24, %v3003_v59  ;;  %v15236_v52 = vpop.f32.mrf.mxu0  ;;  %v15241_v31 = vpop.f32.mrf.mxu1 }
 0x1c1   :  { %11299 = vmatmul.mubr.msk.bf16.gmra.mxu0 %vm511_vm1, %v17899_v17  ;;  %v6649_v28 = vshll.u32 %v10276_v41, 16  ;;  %v6638_v27 = vor.u32 %v6637_v53, %v6633_v8  ;;  %v6648_v23 = vrot.slane %v6646_v32, 4  ;;  %v6655_v35 = vshll.u32 %v15210_v30, 16  ;;  %17902 = vst [vmem:[#allocation34_spill] sm:$0xff] %v15241_v31  ;;  %v17903_v53 = vld [vmem:[#allocation70_spill] sm:$0xff] }
 0x1c2   :  { %11302 = vmatprep.mubr.msk.bf16.mxu0 %vm511_vm1, %v17900_v5  ;;  %v6659_v17 = vshrl.u32 %v15210_v30, 16  ;;  %v10315_v60 = vcombine.low %v6586_v58, %v6596_v48  ;;  %v6629_v40 = vrot.slane %v6628_v43, 4  ;;  %v6665_v14 = vshll.u32 %v15225_v61, 16  ;;  %v15243_v24 = vpop.f32.mrf.mxu0  ;;  %v10279_v5 = vld [vmem:[%s17568_s0 + $0x9c] sm:$0xf]  ;;  %v17904_v58 = vld [vmem:[#allocation46_spill] sm:$0xff] }
 0x1c3   :  { %v6651_v25 = vrot.slane %v6649_v28, 5  ;;  %v6639_v41 = vrot.slane %v6638_v27, 4  ;;  %v15245_v6 = vrot.slane %v6655_v35, 5  ;;  %v3006_v32 = vadd.f32 %v17903_v53, %v14672_v33  ;;  %v11637_v28 = vld [vmem:[%s17568_s0 + $0x6c] sm:$0xff]   ;;  %v15264_v33 = vld [vmem:[%s17568_s0 + $0xa0] sm:$0xf] }
 0x1c4   :  { %v6661_v59 = vrot.slane %v6659_v17, 4  ;;  %v15254_v48 = vadd.f32 %v17904_v58, %v14695_v38  ;;  %v10316_v43 = vcombine.low %v6610_v9, %v6620_v50  ;;  %v6634_v27 = vsel %vm11847_vm4, %v6629_v40, %v6633_v8  ;;  %v15266_v17 = vpop.f32.mrf.mxu0 }
 0x1c5   :  { %v6652_v35 = vor.u32 %v6651_v25, %v6648_v23  ;;  %v17906_v38 = vcombine.low %v15071_v49, %v15093_v39  ;;  %v6644_v9 = vsel %vm11847_vm4, %v6639_v41, %v6643_v55  ;;  %v15276_v8 = vadd.f32 %v15006_v46, %v3006_v32  ;;  %v17907_v23 = vld [vmem:[#allocation72_spill] sm:$0xff]  ;;  %v15283_v25 = vld [vmem:[%s17568_s0 + $0xa4] sm:$0x1]  ;;  %v15286_v55 = vpop.f32.mrf.mxu1 }
 0x1c6   :  { %17905 = vst [vmem:[#allocation69_spill] sm:$0xff] %v15254_v48  ;;  %v6662_v50 = vor.u32 %v6661_v59, %v15245_v6  ;;  %v3004_v40 = vadd.f32 %v17907_v23, %v14700_v51  ;;  %v6667_v39 = vrot.slane %v6665_v14, 5  ;;  %v6670_v53 = vshrl.u32 %v10279_v5, 16  ;;  %17908 = vst [vmem:[#allocation33_spill] sm:$0xff] %v15286_v55  ;;  %v15288_v41 = vpop.f32.mrf.mxu0  ;;  %v10282_v14 = vld [vmem:[%s17568_s0 + $0xa8] sm:$0xf] }
 0x1c7   :  { %11337 = vmatmul.mubr.msk.bf16.gmra.mxu1 %vm511_vm1, %v17906_v38  ;;  %v6653_v49 = vrot.slane %v6652_v35, 4  ;;  %v6673_v58 = vshll.u32 %v10279_v5, 16  ;;  %v17909_v46 = vcombine.low %v17878_v22, %v17871_v26  ;;  %v6679_v32 = vshll.u32 %v15264_v33, 16  ;;  %v15309_v22 = vpop.f32.mrf.mxu1 }
 0x1c8   :  { %11376 = vmatprep.mubr.msk.bf16.mxu1 %vm511_vm1, %v10315_v60  ;;  %v6663_v51 = vrot.slane %v6662_v50, 4  ;;  %v15295_v59 = vadd.f32 %v15026_v1, %v3004_v40  ;;  %v6683_v60 = vshrl.u32 %v15264_v33, 16  ;;  %v10317_v5 = vcombine.low %v6634_v27, %v6644_v9  ;;  %v15307_v1 = vld [vmem:[%s17568_s0 + $0xac] sm:$0xf]  ;;  %17910 = vst [vmem:[#allocation61_spill] sm:$0xff] %v15309_v22  ;;  %v15311_v50 = vpop.f32.mrf.mxu0  ;;  %v17911_v27 = vld [vmem:[#allocation73_spill] sm:$0xff] }
 0x1c9   :  { %11303 = vmatmul.mubr.msk.bf16.gmra.mxu0 %vm511_vm1, %v17909_v46  ;;  %v6672_v35 = vrot.slane %v6670_v53, 4  ;;  %v6675_v38 = vrot.slane %v6673_v58, 5  ;;  %v6689_v26 = vshll.u32 %v15283_v25, 16  ;;  %v6658_v23 = vsel %vm11847_vm4, %v6653_v49, %v15245_v6  ;;  %v15321_v53 = vld [vmem:[%s17568_s0 + $0xb0] sm:$0x1]  ;;  %v15325_v55 = vpop.f32.mrf.mxu1  ;;  %v11638_v6 = vld [vmem:[%s17568_s0 + $0x78] sm:$0xff]  }
 0x1ca   :  { %11342 = vmatprep.mubr.msk.bf16.mxu0 %vm511_vm1, %v11637_v28  ;;  %v6681_v40 = vrot.slane %v6679_v32, 5  ;;  %v6685_v28 = vrot.slane %v6683_v60, 4  ;;  %v3007_v9 = vadd.f32 %v17911_v27, %v14719_v57  ;;  %v6668_v58 = vsel %vm11847_vm4, %v6663_v51, %v6667_v39  ;;  %17912 = vst [vmem:[#allocation78_spill] sm:$0xff] %v15325_v55  ;;  %v15327_v31 = vpop.f32.mrf.mxu0  ;;  %v11639_v39 = vld [vmem:[%s17568_s0 + $0x84] sm:$0xff]  }
 0x1cb   :  { %v6676_v46 = vor.u32 %v6675_v38, %v6672_v35  ;;  %v6691_v48 = vrot.slane %v6689_v26, 5  ;;  %v6694_v22 = vshrl.u32 %v10282_v14, 16  ;;  %v6697_v32 = vshll.u32 %v10282_v14, 16  ;;  %v15341_v27 = vpop.f32.mrf.mxu1 }
 0x1cc   :  { %v6686_v57 = vor.u32 %v6685_v28, %v6681_v40  ;;  %v15333_v49 = vadd.f32 %v15045_v63, %v3007_v9  ;;  %v6703_v60 = vshll.u32 %v15307_v1, 16  ;;  %v6707_v38 = vshrl.u32 %v15307_v1, 16  ;;  %17913 = vst [vmem:[#allocation35_spill] sm:$0xff] %v15341_v27  ;;  %v15343_v55 = vpop.f32.mrf.mxu0  ;;  %v17914_v63 = vld [vmem:[#allocation57_spill] sm:$0xff] }
 0x1cd   :  { %v6677_v51 = vrot.slane %v6676_v46, 4  ;;  %v6696_v35 = vrot.slane %v6694_v22, 4  ;;  %v6713_v26 = vshll.u32 %v15321_v53, 16  ;;  %v1833_v14 = vadd.f32 %v17914_v63, %v14735_v44  ;;  %v10285_v22 = vld [vmem:[%s17568_s0 + $0xb4] sm:$0xf]  ;;  %v17915_v46 = vld [vmem:[#allocation9_spill] sm:$0xff] }
 0x1ce   :  { %v6687_v28 = vrot.slane %v6686_v57, 4  ;;  %v6699_v9 = vrot.slane %v6697_v32, 5  ;;  %v15348_v36 = vrot.slane %v6703_v60, 5  ;;  %v10318_v27 = vcombine.low %v6658_v23, %v6668_v58  ;;  %v15362_v57 = vld [vmem:[%s17568_s0 + $0xb8] sm:$0xf]  ;;  %v15364_v32 = vpop.f32.mrf.mxu0 }
 0x1cf   :  { %11377 = vmatmul.mubr.msk.bf16.vlgmr.msra.gmra.mxu1 %vm511_vm1, %v10316_v43  ;;  %v6682_v2 = vsel %vm11847_vm4, %v6677_v51, %v6681_v40  ;;  %v6709_v43 = vrot.slane %v6707_v38, 4  ;;  %v3010_v44 = vadd.f32 %v17916_v16, %v14752_v20  ;;  %17917 = vst [vmem:[#allocation79_spill] sm:$0xff] %v15362_v57  ;;  %v15369_v58 = vrot.slane %v6713_v26, 5  ;;  %v17918_v40 = vld [vmem:[#allocation81_spill] sm:$0xff]  ;;  %v15376_v20 = vld [vmem:[%s17568_s0 + $0xbc] sm:$0x1]  ;;  %v15378_v16 = vpop.f32.mrf.mxu1 }
 0x1d0   :  { %11443 = vmatpush3.bf16.msra.mxu1 %v17915_v46  ;;  %11380 = vmatprep.mubr.msk.bf16.mxu1 %vm511_vm1, %v10317_v5  ;;  %v6692_v5 = vsel %vm11847_vm4, %v6687_v28, %v6691_v48  ;;  %v6700_v23 = vor.u32 %v6699_v9, %v6696_v35  ;;  %v3008_v60 = vadd.f32 %v17918_v40, %v14775_v15  ;;  %v17921_v51 = vld [vmem:[#allocation8_spill] sm:$0xff]  ;;  %v6718_v38 = vshrl.u32 %v10285_v22, 16  ;;  %v15386_v26 = vpop.f32.mrf.mxu0  ;;  %v11640_v40 = vld [vmem:[%s17568_s0 + $0x90] sm:$0xff]  }
 0x1d1   :  { %11343 = vmatmul.mubr.msk.bf16.vlgmr.msra.gmra.mxu0 %vm511_vm1, %v11638_v6  ;;  %17919 = vst [vmem:[#allocation80_spill] sm:$0xff] %v15376_v20  ;;  %17920 = vst [vmem:[#allocation86_spill] sm:$0xff] %v15378_v16  ;;  %v10319_v6 = vcombine.low %v6682_v2, %v6692_v5  ;;  %v6710_v48 = vor.u32 %v6709_v43, %v15348_v36  ;;  %v15384_v35 = vadd.f32 %v15100_v42, %v3010_v44  ;;  %v15395_v2 = vpop.f32.mrf.mxu1  ;;  %v11727_v42 = vld [vmem:[%s17569_s1 + $0xe] sm:$0x3] }
 0x1d2   :  { %11409 = vmatpush3.bf16.msra.mxu0 %v17921_v51  ;;  %11346 = vmatprep.mubr.msk.bf16.mxu0 %vm511_vm1, %v11639_v39  ;;  %17922 = vst [vmem:[#allocation36_spill] sm:$0xff] %v15386_v26  ;;  %v6701_v15 = vrot.slane %v6700_v23, 4  ;;  %v15389_v63 = vadd.f32 %v15123_v47, %v3008_v60  ;;  %v6721_v28 = vshll.u32 %v10285_v22, 16  ;;  %v6727_v9 = vshll.u32 %v15362_v57, 16  ;;  %v10288_v39 = vld [vmem:[%s17568_s0 + $0xc0] sm:$0xf]  ;;  %v15407_v5 = vpop.f32.mrf.mxu0 }
 0x1d3   :  { %17923 = vst [vmem:[#allocation84_spill] sm:$0xff] %v15395_v2  ;;  %11568 = vmatprep.subr.msk.bf16.mxu0 %vm560_vm0, %v11727_v42  ;;  %v11728_v47 = vld [vmem:[%s17569_s1 + $0x10] sm:$0x3]  ;;  %v6711_v22 = vrot.slane %v6710_v48, 4  ;;  %v6720_v46 = vrot.slane %v6718_v38, 4  ;;  %v6731_v43 = vshrl.u32 %v15362_v57, 16  ;;  %v15410_v23 = vadd.f32 %v14894_v34, %v1833_v14  ;;  %v15422_v38 = vpop.f32.mrf.mxu1 }
 0x1d4   :  { %11569 = vmatprep.subr.msk.bf16.mxu1 %vm560_vm0, %v11728_v47  ;;  %v6737_v44 = vshll.u32 %v15376_v20, 16  ;;  %v6723_v60 = vrot.slane %v6721_v28, 5  ;;  %v6729_v51 = vrot.slane %v6727_v9, 5  ;;  %v17924_v42 = vld [vmem:[#allocation14_spill] sm:$0xff]  ;;  %v17925_v2 = vld [vmem:[#allocation85_spill] sm:$0xff]  ;;  %17927 = vst [vmem:[#allocation91_spill] sm:$0xff] %v15422_v38  ;;  %v6706_v34 = vsel %vm11847_vm4, %v6701_v15, %v15348_v36  ;;  %v15438_v38 = vpop.f32.mrf.mxu0 }
 0x1d5   :  { %v3011_v47 = vadd.f32 %v17925_v2, %v17924_v42  ;;  %v15420_v48 = vld [vmem:[%s17568_s0 + $0xc4] sm:$0xf]  ;;  %v6716_v14 = vsel %vm11847_vm4, %v6711_v22, %v15369_v58  ;;  %v11641_v28 = vld [vmem:[%s17568_s0 + $0x9c] sm:$0xff]   ;;  %v6733_v9 = vrot.slane %v6731_v43, 4  ;;  %v15436_v2 = vld [vmem:[%s17568_s0 + $0xc8] sm:$0x1]  ;;  %v15444_v22 = vpop.f32.mrf.mxu1 }
 0x1d6   :  { %17926 = vst [vmem:[#allocation87_spill] sm:$0xff] %v15420_v48  ;;  %17928 = vst [vmem:[#allocation41_spill] sm:$0xff] %v15436_v2  ;;  %v6742_v42 = vshrl.u32 %v10288_v39, 16  ;;  %v6724_v36 = vor.u32 %v6723_v60, %v6720_v46  ;;  %v6739_v15 = vrot.slane %v6737_v44, 5  ;;  %v6745_v58 = vshll.u32 %v10288_v39, 16  ;;  %v15449_v45 = vpop.f32.mrf.mxu0 }
 0x1d7   :  { %11381 = vmatmul.mubr.msk.bf16.gmra.mxu1 %vm511_vm1, %v10318_v27  ;;  %v15442_v26 = vadd.f32 %v15135_v3, %v3011_v47  ;;  %17929 = vst [vmem:[#allocation82_spill] sm:$0xff] %v15444_v22  ;;  %v6734_v43 = vor.u32 %v6733_v9, %v6729_v51  ;;  %v6751_v20 = vshll.u32 %v15420_v48, 16  ;;  %v6755_v57 = vshrl.u32 %v15420_v48, 16  ;;  %v17931_v27 = vld [vmem:[#allocation67_spill] sm:$0xff]  ;;  %v17932_v9 = vld [vmem:[#allocation18_spill] sm:$0xff] }
 0x1d8   :  { %11384 = vmatprep.mubr.msk.bf16.mxu1 %vm511_vm1, %v10319_v6  ;;  %v6744_v16 = vrot.slane %v6742_v42, 4  ;;  %v15453_v46 = vadd.f32 %v17931_v27, %v17930_v11  ;;  %v6725_v3 = vrot.slane %v6724_v36, 4  ;;  %v6747_v39 = vrot.slane %v6745_v58, 5  ;;  %v17933_v42 = vld [vmem:[#allocation89_spill] sm:$0xff]  ;;  %v15463_v11 = vpop.f32.mrf.mxu0 }
 0x1d9   :  { %11347 = vmatmul.mubr.msk.bf16.gmra.mxu0 %vm511_vm1, %v11640_v40  ;;  %v6761_v44 = vshll.u32 %v15436_v2, 16  ;;  %v6735_v6 = vrot.slane %v6734_v43, 4  ;;  %v6753_v60 = vrot.slane %v6751_v20, 5  ;;  %v6757_v47 = vrot.slane %v6755_v57, 4  ;;  %v10291_v48 = vld [vmem:[%s17568_s0 + $0x144] sm:$0xf]  ;;  %v15472_v57 = vpop.f32.mrf.mxu1 }
 0x1da   :  { %11350 = vmatprep.mubr.msk.bf16.mxu0 %vm511_vm1, %v11641_v28  ;;  %v3014_v22 = vadd.f32 %v17933_v42, %v17932_v9  ;;  %17934 = vst [vmem:[#allocation66_spill] sm:$0xff] %v15463_v11  ;;  %v10320_v27 = vcombine.low %v6706_v34, %v6716_v14  ;;  %v6730_v40 = vsel %vm11847_vm4, %v6725_v3, %v6729_v51  ;;  %v15470_v20 = vld [vmem:[%s17568_s0 + $0x148] sm:$0xf]  ;;  %17936 = vst [vmem:[#allocation42_spill] sm:$0xff] %v15472_v57 }
 0x1db   :  { %v6748_v36 = vor.u32 %v6747_v39, %v6744_v16  ;;  %v6763_v58 = vrot.slane %v6761_v44, 5  ;;  %17935 = vst [vmem:[#allocation96_spill] sm:$0xff] %v15470_v20  ;;  %v6740_v28 = vsel %vm11847_vm4, %v6735_v6, %v6739_v15  ;;  %v6758_v43 = vor.u32 %v6757_v47, %v6753_v60  ;;  %v17938_v34 = vld [vmem:[#allocation22_spill] sm:$0xff]  ;;  %v15489_v6 = vpop.f32.mrf.mxu1 }
 0x1dc   :  { %v15477_v9 = vadd.f32 %v15169_v21, %v3014_v22  ;;  %v17939_v14 = vld [vmem:[#allocation90_spill] sm:$0xff]  ;;  %v10321_v3 = vcombine.low %v6730_v40, %v6740_v28  ;;  %v6766_v44 = vshrl.u32 %v10291_v48, 16  ;;  %v6769_v15 = vshll.u32 %v10291_v48, 16  ;;  %17941 = vst [vmem:[#allocation44_spill] sm:$0xff] %v15489_v6  ;;  %v11643_v22 = vld [vmem:[%s17568_s0 + $0xb4] sm:$0xff]  }
 0x1dd   :  { %v3012_v42 = vadd.f32 %v17939_v14, %v17938_v34  ;;  %v15484_v16 = vld [vmem:[%s17568_s0 + $0x14c] sm:$0x1]  ;;  %v6749_v39 = vrot.slane %v6748_v36, 4  ;;  %v6759_v21 = vrot.slane %v6758_v43, 4  ;;  %v6775_v34 = vshll.u32 %v15470_v20, 16  ;;  %v15502_v36 = vpop.f32.mrf.mxu0  ;;  %v15513_v6 = vpop.f32.mrf.mxu1 }
 0x1de   :  { %17937 = vst [vmem:[#allocation94_spill] sm:$0xff] %v15477_v9  ;;  %17940 = vst [vmem:[#allocation103_spill] sm:$0xff] %v15484_v16  ;;  %v11642_v51 = vld [vmem:[%s17568_s0 + $0xa8] sm:$0xff]   ;;  %v6779_v14 = vshrl.u32 %v15470_v20, 16  ;;  %v10294_v40 = vld [vmem:[%s17568_s0 + $0x150] sm:$0xf] }
 0x1df   :  { %v15495_v47 = vadd.f32 %v15190_v19, %v3012_v42  ;;  %11385 = vmatmul.mubr.msk.bf16.gmra.mxu1 %vm511_vm1, %v10320_v27  ;;  %v6754_v48 = vsel %vm11847_vm4, %v6749_v39, %v6753_v60  ;;  %v6768_v28 = vrot.slane %v6766_v44, 4  ;;  %v6771_v43 = vrot.slane %v6769_v15, 5  ;;  %v15511_v42 = vld [vmem:[%s17568_s0 + $0x154] sm:$0xf]  ;;  %17944 = vst [vmem:[#allocation101_spill] sm:$0xff] %v15513_v6  ;;  %v17946_v60 = vld [vmem:[#allocation92_spill] sm:$0xff] }
 0x1e0   :  { %v6785_v19 = vshll.u32 %v15484_v16, 16  ;;  %17943 = vst [vmem:[#allocation100_spill] sm:$0xff] %v15511_v42  ;;  %11388 = vmatprep.mubr.msk.bf16.mxu1 %vm511_vm1, %v10321_v3  ;;  %v6764_v11 = vsel %vm11847_vm4, %v6759_v21, %v6763_v58  ;;  %v6777_v27 = vrot.slane %v6775_v34, 5  ;;  %v6781_v57 = vrot.slane %v6779_v14, 4  ;;  %v17945_v20 = vld [vmem:[#allocation23_spill] sm:$0xff]  ;;  %v15526_v3 = vpop.f32.mrf.mxu1  ;;  %v15533_v14 = vpop.f32.mrf.mxu0 }
 0x1e1   :  { %17942 = vst [vmem:[#allocation97_spill] sm:$0xff] %v15495_v47  ;;  %v3015_v39 = vadd.f32 %v17946_v60, %v17945_v20  ;;  %v15523_v44 = vld [vmem:[%s17568_s0 + $0x158] sm:$0x1]  ;;  %11351 = vmatmul.mubr.msk.bf16.gmra.mxu0 %vm511_vm1, %v11642_v51  ;;  %v10322_v15 = vcombine.low %v6754_v48, %v6764_v11  ;;  %v6772_v16 = vor.u32 %v6771_v43, %v6768_v28  ;;  %v6790_v47 = vshrl.u32 %v10294_v40, 16 }
 0x1e2   :  { %17947 = vst [vmem:[#allocation93_spill] sm:$0xff] %v15523_v44  ;;  %v6787_v6 = vrot.slane %v6785_v19, 5  ;;  %17948 = vst [vmem:[#allocation50_spill] sm:$0xff] %v15526_v3  ;;  %11354 = vmatprep.mubr.msk.bf16.mxu0 %vm511_vm1, %v11643_v22  ;;  %v6782_v58 = vor.u32 %v6781_v57, %v6777_v27  ;;  %v6793_v20 = vshll.u32 %v10294_v40, 16  ;;  %v6799_v34 = vshll.u32 %v15511_v42, 16  ;;  %v17950_v48 = vld [vmem:[#allocation43_spill] sm:$0xff]  ;;  %v15544_v40 = vpop.f32.mrf.mxu1 }
 0x1e3   :  { %v15530_v21 = vadd.f32 %v15214_v18, %v3015_v39  ;;  %v6773_v60 = vrot.slane %v6772_v16, 4  ;;  %v6792_v2 = vrot.slane %v6790_v47, 4  ;;  %v6803_v11 = vshrl.u32 %v15511_v42, 16  ;;  %v10297_v18 = vld [vmem:[%s17568_s0 + $0x15c] sm:$0xf]  ;;  %17951 = vst [vmem:[#allocation76_spill] sm:$0xff] %v15544_v40 }
 0x1e4   :  { %v6809_v51 = vshll.u32 %v15523_v44, 16  ;;  %v15539_v28 = vadd.f32 %v17950_v48, %v15453_v46  ;;  %v6783_v22 = vrot.slane %v6782_v58, 4  ;;  %v6795_v57 = vrot.slane %v6793_v20, 5  ;;  %v17952_v19 = vld [vmem:[#allocation20_spill] sm:$0xff]  ;;  %v17953_v16 = vld [vmem:[#allocation74_spill] sm:$0xff]  ;;  %v17955_v20 = vld [vmem:[#allocation99_spill] sm:$0xff] }
 0x1e5   :  { %17949 = vst [vmem:[#allocation98_spill] sm:$0xff] %v15530_v21  ;;  %v6801_v43 = vrot.slane %v6799_v34, 5  ;;  %v3005_v47 = vadd.f32 %v17953_v16, %v17952_v19  ;;  %v11644_v39 = vld [vmem:[%s17568_s0 + $0xc0] sm:$0xff]   ;;  %v6778_v46 = vsel %vm11847_vm4, %v6773_v60, %v6777_v27  ;;  %v6805_v48 = vrot.slane %v6803_v11, 4  ;;  %v17954_v58 = vld [vmem:[#allocation38_spill] sm:$0xff] }
 0x1e6   :  { %v3018_v34 = vadd.f32 %v17955_v20, %v17954_v58  ;;  %v15558_v3 = vld [vmem:[%s17568_s0 + $0x160] sm:$0xf]  ;;  %v6788_v40 = vsel %vm11847_vm4, %v6783_v22, %v6787_v6  ;;  %v6796_v19 = vor.u32 %v6795_v57, %v6792_v2  ;;  %v6811_v16 = vrot.slane %v6809_v51, 5  ;;  %v11645_v44 = vld [vmem:[%s17568_s0 + $0x144] sm:$0xff]   ;;  %v15572_v58 = vpop.f32.mrf.mxu1  ;;  %v15574_v20 = vpop.f32.mrf.mxu0 }
 0x1e7   :  { %17956 = vst [vmem:[#allocation108_spill] sm:$0xff] %v15558_v3  ;;  %v17957_v42 = vld [vmem:[#allocation21_spill] sm:$0xff]  ;;  %v17958_v27 = vld [vmem:[#allocation102_spill] sm:$0xff]  ;;  %17960 = vst [vmem:[#allocation56_spill] sm:$0xff] %v15572_v58  ;;  %11389 = vmatmul.mubr.msk.bf16.gmra.mxu1 %vm511_vm1, %v10322_v15  ;;  %v10323_v2 = vcombine.low %v6778_v46, %v6788_v40  ;;  %v6806_v6 = vor.u32 %v6805_v48, %v6801_v43  ;;  %v6814_v22 = vshrl.u32 %v10297_v18, 16  ;;  %v6823_v21 = vshll.u32 %v15558_v3, 16 }
 0x1e8   :  { %v3016_v60 = vadd.f32 %v17958_v27, %v17957_v42  ;;  %v15570_v11 = vld [vmem:[%s17568_s0 + $0x164] sm:$0x1]  ;;  %v15578_v51 = vadd.f32 %v15243_v24, %v3018_v34  ;;  %v6797_v57 = vrot.slane %v6796_v19, 4  ;;  %v6817_v27 = vshll.u32 %v10297_v18, 16  ;;  %v10300_v58 = vld [vmem:[%s17568_s0 + $0x168] sm:$0xf]  ;;  %v15587_v9 = vpop.f32.mrf.mxu1 }
 0x1e9   :  { %17959 = vst [vmem:[#allocation53_spill] sm:$0xff] %v15570_v11  ;;  %17962 = vst [vmem:[#allocation58_spill] sm:$0xff] %v15587_v9  ;;  %11355 = vmatmul.mubr.msk.bf16.gmra.mxu0 %vm511_vm1, %v11644_v39  ;;  %11392 = vmatprep.mubr.msk.bf16.mxu1 %vm511_vm1, %v10323_v2  ;;  %v6807_v24 = vrot.slane %v6806_v6, 4  ;;  %v6816_v15 = vrot.slane %v6814_v22, 4  ;;  %v6827_v40 = vshrl.u32 %v15558_v3, 16  ;;  %v6825_v48 = vrot.slane %v6823_v21, 5  ;;  %v15605_v6 = vpop.f32.mrf.mxu0 }
 0x1ea   :  { %v15581_v42 = vadd.f32 %v15266_v17, %v3016_v60  ;;  %v6833_v17 = vshll.u32 %v15570_v11, 16  ;;  %v6802_v18 = vsel %vm11847_vm4, %v6797_v57, %v6801_v43  ;;  %11358 = vmatprep.mubr.msk.bf16.mxu0 %vm511_vm1, %v11645_v44  ;;  %v6819_v46 = vrot.slane %v6817_v27, 5  ;;  %v17963_v34 = vld [vmem:[#allocation47_spill] sm:$0xff]  ;;  %v17964_v19 = vld [vmem:[#allocation104_spill] sm:$0xff]  ;;  %v15601_v39 = vld [vmem:[%s17568_s0 + $0x16c] sm:$0xf]  ;;  %v15603_v2 = vpop.f32.mrf.mxu1 }
 0x1eb   :  { %v3019_v60 = vadd.f32 %v17964_v19, %v17963_v34  ;;  %17965 = vst [vmem:[#allocation60_spill] sm:$0xff] %v15601_v39  ;;  %17966 = vst [vmem:[#allocation63_spill] sm:$0xff] %v15603_v2  ;;  %v6812_v22 = vsel %vm11847_vm4, %v6807_v24, %v6811_v16  ;;  %v6829_v43 = vrot.slane %v6827_v40, 4  ;;  %v15612_v44 = vld [vmem:[%s17568_s0 + $0x170] sm:$0x1]  ;;  %v6838_v21 = vshrl.u32 %v10300_v58, 16 }
 0x1ec   :  { %17961 = vst [vmem:[#allocation39_spill] sm:$0xff] %v15581_v42  ;;  %v6835_v57 = vrot.slane %v6833_v17, 5  ;;  %17967 = vst [vmem:[#allocation70_spill] sm:$0xff] %v15612_v44  ;;  %v10324_v27 = vcombine.low %v6802_v18, %v6812_v22  ;;  %v6820_v34 = vor.u32 %v6819_v46, %v6816_v15  ;;  %v6841_v9 = vshll.u32 %v10300_v58, 16  ;;  %v11646_v2 = vld [vmem:[%s17568_s0 + $0x150] sm:$0xff]   ;;  %v15629_v58 = vpop.f32.mrf.mxu1  ;;  %v15631_v46 = vpop.f32.mrf.mxu0 }
 0x1ed   :  { %v15615_v19 = vadd.f32 %v15288_v41, %v3019_v60  ;;  %v6830_v11 = vor.u32 %v6829_v43, %v6825_v48  ;;  %v6840_v16 = vrot.slane %v6838_v21, 4  ;;  %v6847_v24 = vshll.u32 %v15601_v39, 16  ;;  %v11647_v41 = vld [vmem:[%s17568_s0 + $0x15c] sm:$0xff]   ;;  %17969 = vst [vmem:[#allocation72_spill] sm:$0xff] %v15629_v58 }
 0x1ee   :  { %v6851_v40 = vshrl.u32 %v15601_v39, 16  ;;  %v15623_v17 = vadd.f32 %v15075_v62, %v3005_v47  ;;  %v6821_v3 = vrot.slane %v6820_v34, 4  ;;  %v6843_v18 = vrot.slane %v6841_v9, 5  ;;  %v17970_v21 = vld [vmem:[#allocation48_spill] sm:$0xff]  ;;  %v17971_v62 = vld [vmem:[#allocation106_spill] sm:$0xff]  ;;  %v17972_v34 = vld [vmem:[#allocation37_spill] sm:$0xff] }
 0x1ef   :  { %17968 = vst [vmem:[#allocation46_spill] sm:$0xff] %v15615_v19  ;;  %v6857_v15 = vshll.u32 %v15612_v44, 16  ;;  %11393 = vmatmul.mubr.msk.bf16.gmra.mxu1 %vm511_vm1, %v10324_v27  ;;  %v6831_v60 = vrot.slane %v6830_v11, 4  ;;  %v6849_v22 = vrot.slane %v6847_v24, 5  ;;  %v3022_v47 = vadd.f32 %v17971_v62, %v17970_v21  ;;  %v10303_v9 = vld [vmem:[%s17568_s0 + $0x174] sm:$0xf]  ;;  %v15648_v27 = vpop.f32.mrf.mxu1  ;;  %v15650_v24 = vpop.f32.mrf.mxu0 }
 0x1f0   :  { %v6853_v43 = vrot.slane %v6851_v40, 4  ;;  %v17973_v44 = vld [vmem:[#allocation88_spill] sm:$0xff]  ;;  %v6826_v58 = vsel %vm11847_vm4, %v6821_v3, %v6825_v48  ;;  %v6844_v19 = vor.u32 %v6843_v18, %v6840_v16  ;;  %17975 = vst [vmem:[#allocation57_spill] sm:$0xff] %v15648_v27  ;;  %v17977_v3 = vld [vmem:[#allocation54_spill] sm:$0xff]  ;;  %v17978_v48 = vld [vmem:[#allocation107_spill] sm:$0xff] }
 0x1f1   :  { %v3009_v39 = vadd.f32 %v17973_v44, %v17972_v34  ;;  %v6859_v42 = vrot.slane %v6857_v15, 5  ;;  %v15646_v11 = vld [vmem:[%s17568_s0 + $0x178] sm:$0xf]  ;;  %11359 = vmatmul.mubr.msk.bf16.gmra.mxu0 %vm511_vm1, %v11646_v2  ;;  %v6836_v40 = vsel %vm11847_vm4, %v6831_v60, %v6835_v57  ;;  %v15656_v21 = vadd.f32 %v15327_v31, %v3022_v47  ;;  %v15663_v18 = vld [vmem:[%s17568_s0 + $0x17c] sm:$0x1]  ;;  %v15666_v27 = vpop.f32.mrf.mxu1 }
 0x1f2   :  { %17974 = vst [vmem:[#allocation73_spill] sm:$0xff] %v15646_v11  ;;  %v6854_v44 = vor.u32 %v6853_v43, %v6849_v22  ;;  %v3020_v16 = vadd.f32 %v17978_v48, %v17977_v3  ;;  %17979 = vst [vmem:[#allocation77_spill] sm:$0xff] %v15663_v18  ;;  %v10325_v15 = vcombine.low %v6826_v58, %v6836_v40  ;;  %v6845_v62 = vrot.slane %v6844_v19, 4  ;;  %v10306_v47 = vld [vmem:[%s17568_s0 + $0x180] sm:$0xf]  ;;  %v15685_v40 = vpop.f32.mrf.mxu0  ;;  %v11648_v3 = vld [vmem:[%s17568_s0 + $0x168] sm:$0xff]  }
 0x1f3   :  { %17976 = vst [vmem:[#allocation9_spill] sm:$0xff] %v15656_v21  ;;  %11362 = vmatprep.mubr.msk.bf16.mxu0 %vm511_vm1, %v11647_v41  ;;  %v6862_v2 = vshrl.u32 %v10303_v9, 16  ;;  %v6865_v34 = vshll.u32 %v10303_v9, 16  ;;  %17980 = vst [vmem:[#allocation81_spill] sm:$0xff] %v15666_v27  ;;  %v6871_v60 = vshll.u32 %v15646_v11, 16  ;;  %v6875_v43 = vshrl.u32 %v15646_v11, 16 }
 0x1f4   :  { %v6855_v57 = vrot.slane %v6854_v44, 4  ;;  %v15669_v31 = vadd.f32 %v15343_v55, %v3020_v16  ;;  %11396 = vmatprep.mubr.msk.bf16.mxu1 %vm511_vm1, %v10325_v15  ;;  %v6850_v19 = vsel %vm11847_vm4, %v6845_v62, %v6849_v22  ;;  %v6881_v9 = vshll.u32 %v15663_v18, 16  ;;  %v15683_v55 = vld [vmem:[%s17568_s0 + $0x184] sm:$0xf]  ;;  %v17983_v16 = vld [vmem:[#allocation24_spill] sm:$0xff] }
 0x1f5   :  { %v6864_v41 = vrot.slane %v6862_v2, 4  ;;  %v6867_v58 = vrot.slane %v6865_v34, 5  ;;  %17982 = vst [vmem:[#allocation14_spill] sm:$0xff] %v15683_v55  ;;  %v6873_v48 = vrot.slane %v6871_v60, 5  ;;  %v6877_v22 = vrot.slane %v6875_v43, 4  ;;  %v17984_v15 = vld [vmem:[#allocation109_spill] sm:$0xff]  ;;  %v15699_v34 = vpop.f32.mrf.mxu1 }
 0x1f6   :  { %17981 = vst [vmem:[#allocation8_spill] sm:$0xff] %v15669_v31  ;;  %v6860_v44 = vsel %vm11847_vm4, %v6855_v57, %v6859_v42  ;;  %v3023_v62 = vadd.f32 %v17984_v15, %v17983_v16  ;;  %v15697_v2 = vld [vmem:[%s17568_s0 + $0x188] sm:$0x1]  ;;  %17986 = vst [vmem:[#allocation16_spill] sm:$0xff] %v15699_v34  ;;  %v6883_v11 = vrot.slane %v6881_v9, 5  ;;  %v6886_v42 = vshrl.u32 %v10306_v47, 16 }
 0x1f7   :  { %17985 = vst [vmem:[#allocation85_spill] sm:$0xff] %v15697_v2  ;;  %v10326_v27 = vcombine.low %v6850_v19, %v6860_v44  ;;  %v6868_v18 = vor.u32 %v6867_v58, %v6864_v41  ;;  %v11649_v57 = vld [vmem:[%s17568_s0 + $0x174] sm:$0xff]   ;;  %v6878_v60 = vor.u32 %v6877_v22, %v6873_v48  ;;  %v6889_v16 = vshll.u32 %v10306_v47, 16  ;;  %v15711_v58 = vpop.f32.mrf.mxu0 }
 0x1f8   :  { %v15705_v43 = vadd.f32 %v15364_v32, %v3023_v62  ;;  %v6895_v15 = vshll.u32 %v15683_v55, 16  ;;  %v6888_v21 = vrot.slane %v6886_v42, 4  ;;  %v6899_v19 = vshrl.u32 %v15683_v55, 16  ;;  %v17988_v22 = vld [vmem:[#allocation83_spill] sm:$0xff] }
 0x1f9   :  { %11397 = vmatmul.mubr.msk.bf16.gmra.mxu1 %vm511_vm1, %v10326_v27  ;;  %v6869_v31 = vrot.slane %v6868_v18, 4  ;;  %v6905_v41 = vshll.u32 %v15697_v2, 16  ;;  %v15714_v9 = vadd.f32 %v15152_v7, %v3009_v39  ;;  %11363 = vmatmul.mubr.msk.bf16.gmra.mxu0 %vm511_vm1, %v11648_v3  ;;  %v6879_v32 = vrot.slane %v6878_v60, 4  ;;  %v10309_v27 = vld [vmem:[%s17568_s0 + $0x18c] sm:$0xf]  ;;  %v15720_v18 = vpop.f32.mrf.mxu1  ;;  %v17989_v62 = vld [vmem:[#allocation95_spill] sm:$0xff]  ;;  %v15748_v55 = vpop.f32.mrf.mxu0 }
 0x1fa   :  { %v6891_v44 = vrot.slane %v6889_v16, 5  ;;  %v6897_v47 = vrot.slane %v6895_v15, 5  ;;  %17987 = vst [vmem:[#allocation67_spill] sm:$0xff] %v15720_v18  ;;  %v3013_v42 = vadd.f32 %v17989_v62, %v17988_v22  ;;  %v6901_v2 = vrot.slane %v6899_v19, 4  ;;  %11366 = vmatprep.mubr.msk.bf16.mxu0 %vm511_vm1, %v11649_v57  ;;  %v17990_v7 = vld [vmem:[#allocation55_spill] sm:$0xff]  ;;  %v17993_v22 = vld [vmem:[#allocation12_spill] sm:$0xff] }
 0x1fb   :  { %v6874_v34 = vsel %vm11847_vm4, %v6869_v31, %v6873_v48  ;;  %v17991_v39 = vld [vmem:[#allocation111_spill] sm:$0xff]  ;;  %v6884_v16 = vsel %vm11847_vm4, %v6879_v32, %v6883_v11  ;;  %v6907_v18 = vrot.slane %v6905_v41, 5  ;;  %v3024_v62 = vadd.f32 %v17993_v22, %v15032_v4  ;;  %v15743_v48 = vpop.f32.mrf.mxu1  ;;  %v11650_v4 = vld [vmem:[%s17568_s0 + $0x180] sm:$0xff]  }
 0x1fc   :  { %v3026_v3 = vadd.f32 %v17991_v39, %v17990_v7  ;;  %v15732_v60 = vld [vmem:[%s17568_s0 + $0x190] sm:$0xf]  ;;  %v6892_v15 = vor.u32 %v6891_v44, %v6888_v21  ;;  %v15741_v31 = vld [vmem:[%s17568_s0 + $0x194] sm:$0x1]  ;;  %17995 = vst [vmem:[#allocation22_spill] sm:$0xff] %v15743_v48  ;;  %v10327_v57 = vcombine.low %v6874_v34, %v6884_v16  ;;  %v6902_v19 = vor.u32 %v6901_v2, %v6897_v47 }
 0x1fd   :  { %17992 = vst [vmem:[#allocation18_spill] sm:$0xff] %v15732_v60  ;;  %17994 = vst [vmem:[#allocation89_spill] sm:$0xff] %v15741_v31  ;;  %v6910_v39 = vshrl.u32 %v10309_v27, 16  ;;  %v15754_v21 = vadd.f32 %v15438_v38, %v3024_v62  ;;  %v6913_v41 = vshll.u32 %v10309_v27, 16  ;;  %v6919_v32 = vshll.u32 %v15732_v60, 16  ;;  %v11651_v38 = vld [vmem:[%s17568_s0 + $0x18c] sm:$0xff]   ;;  %v15766_v16 = vpop.f32.mrf.mxu1  ;;  %v15768_v27 = vpop.f32.mrf.mxu0 }
 0x1fe   :  { %v15746_v7 = vadd.f32 %v15407_v5, %v3026_v3  ;;  %v6893_v11 = vrot.slane %v6892_v15, 4  ;;  %v10312_v2 = vld [vmem:[%s17568_s0 + $0x198] sm:$0xf]  ;;  %11400 = vmatprep.mubr.msk.bf16.mxu1 %vm511_vm1, %v10327_v57  ;;  %v6903_v5 = vrot.slane %v6902_v19, 4  ;;  %v6923_v44 = vshrl.u32 %v15732_v60, 16  ;;  %17998 = vst [vmem:[#allocation92_spill] sm:$0xff] %v15766_v16 }
 0x1ff   :  { %17997 = vst [vmem:[#allocation23_spill] sm:$0xff] %v15754_v21  ;;  %v6912_v34 = vrot.slane %v6910_v39, 4  ;;  %v6929_v3 = vshll.u32 %v15741_v31, 16  ;;  %v6915_v22 = vrot.slane %v6913_v41, 5  ;;  %v6921_v62 = vrot.slane %v6919_v32, 5  ;;  %v17999_v57 = vld [vmem:[#allocation15_spill] sm:$0xff] }
 0x200   :  { %17996 = vst [vmem:[#allocation90_spill] sm:$0xff] %v15746_v7  ;;  %v6898_v15 = vsel %vm11847_vm4, %v6893_v11, %v6897_v47  ;;  %v3027_v19 = vadd.f32 %v17999_v57, %v15052_v12  ;;  %v15777_v39 = vld [vmem:[%s17568_s0 + $0x19c] sm:$0xf]  ;;  %v6908_v48 = vsel %vm11847_vm4, %v6903_v5, %v6907_v18  ;;  %v6925_v31 = vrot.slane %v6923_v44, 4  ;;  %v15784_v60 = vld [vmem:[%s17568_s0 + $0x1a0] sm:$0x1]  ;;  %v15786_v11 = vpop.f32.mrf.mxu0 }
 0x201   :  { %18000 = vst [vmem:[#allocation43_spill] sm:$0xff] %v15777_v39  ;;  %v6931_v16 = vrot.slane %v6929_v3, 5  ;;  %18001 = vst [vmem:[#allocation20_spill] sm:$0xff] %v15784_v60  ;;  %v6934_v47 = vshrl.u32 %v10312_v2, 16  ;;  %v10328_v41 = vcombine.low %v6898_v15, %v6908_v48  ;;  %11367 = vmatmul.mubr.msk.bf16.gmra.mxu0 %vm511_vm1, %v11650_v4  ;;  %v6916_v12 = vor.u32 %v6915_v22, %v6912_v34  ;;  %v15795_v3 = vpop.f32.mrf.mxu1  ;;  %v18004_v22 = vld [vmem:[#allocation30_spill] sm:$0xff] }
 0x202   :  { %v15790_v32 = vadd.f32 %v15449_v45, %v3027_v19  ;;  %v6937_v57 = vshll.u32 %v10312_v2, 16  ;;  %v6926_v21 = vor.u32 %v6925_v31, %v6921_v62  ;;  %v6943_v5 = vshll.u32 %v15777_v39, 16  ;;  %11370 = vmatprep.mubr.msk.bf16.mxu0 %vm511_vm1, %v11651_v38  ;;  %18003 = vst [vmem:[#allocation38_spill] sm:$0xff] %v15795_v3  ;;  %v15802_v2 = vpop.f32.mrf.mxu0  ;;  %v18005_v19 = vld [vmem:[#allocation13_spill] sm:$0xff] }
 0x203   :  { %v6936_v18 = vrot.slane %v6934_v47, 4  ;;  %v6947_v44 = vshrl.u32 %v15777_v39, 16  ;;  %v15798_v7 = vadd.f32 %v15236_v52, %v3013_v42  ;;  %11401 = vmatmul.mubr.msk.bf16.gmra.mxu1 %vm511_vm1, %v10328_v41  ;;  %v6917_v48 = vrot.slane %v6916_v12, 4  ;;  %v18006_v38 = vld [vmem:[#allocation29_spill] sm:$0xff]  ;;  %v11652_v12 = vld [vmem:[%s17568_s0 + $0x198] sm:$0xff]  }
 0x204   :  { %18002 = vst [vmem:[#allocation74_spill] sm:$0xff] %v15790_v32  ;;  %v6939_v4 = vrot.slane %v6937_v57, 5  ;;  %v6953_v45 = vshll.u32 %v15784_v60, 16  ;;  %v6927_v31 = vrot.slane %v6926_v21, 4  ;;  %v6945_v34 = vrot.slane %v6943_v5, 5  ;;  %v18007_v39 = vld [vmem:[#allocation105_spill] sm:$0xff]  ;;  %v15831_v32 = vpop.f32.mrf.mxu0 }
 0x205   :  { %v6949_v15 = vrot.slane %v6947_v44, 4  ;;  %v3030_v47 = vadd.f32 %v18005_v19, %v18004_v22  ;;  %v15808_v3 = vadd.f32 %v18007_v39, %v18006_v38  ;;  %v6922_v52 = vsel %vm11847_vm4, %v6917_v48, %v6921_v62  ;;  %v10347_v21 = vld [vmem:[%s17568_s0 + $0x6c] sm:$0xe]  ;;  %v18008_v44 = vld [vmem:[#allocation45_spill] sm:$0xff]  ;;  %v18009_v22 = vld [vmem:[#allocation19_spill] sm:$0xff] }
 0x206   :  { %v6940_v42 = vor.u32 %v6939_v4, %v6936_v18  ;;  %v6955_v41 = vrot.slane %v6953_v45, 5  ;;  %v6932_v57 = vsel %vm11847_vm4, %v6927_v31, %v6931_v16  ;;  %v3028_v62 = vadd.f32 %v18009_v22, %v18008_v44  ;;  %v15825_v18 = vpop.f32.mrf.mxu1  ;;  %v18010_v45 = vld [vmem:[#allocation7_spill] sm:$0xff]  ;;  %v18011_v38 = vld [vmem:[#allocation40_spill] sm:$0xff] }
 0x207   :  { %v6950_v5 = vor.u32 %v6949_v15, %v6945_v34  ;;  %v15821_v39 = vadd.f32 %v15502_v36, %v3030_v47  ;;  %v10329_v48 = vcombine.low %v6922_v52, %v6932_v57  ;;  %v3031_v19 = vadd.f32 %v18010_v45, %v15131_v37  ;;  %v11729_v15 = vld [vmem:[%s17568_s0 + $0x70] sm:$0xf]  ;;  %v10348_v52 = vld [vmem:[%s17568_s0 + $0x78] sm:$0xe] }
 0x208   :  { %v6941_v4 = vrot.slane %v6940_v42, 4  ;;  %v3029_v60 = vadd.f32 %v18011_v38, %v15410_v23  ;;  %v15834_v31 = vadd.f32 %v15533_v14, %v3028_v62  ;;  %v10363_v36 = vrot.slane %v10347_v21, 9  ;;  %v15842_v37 = vpop.f32.mrf.mxu1  ;;  %v11730_v21 = vld [vmem:[%s17568_s0 + $0x74] sm:$0x1]  ;;  %v15871_v62 = vld [vmem:[%s17570_s2] ss:$0 sm:$0xff] }
 0x209   :  { %v6951_v16 = vrot.slane %v6950_v5, 4  ;;  %v7312_v47 = vrot.slane %v11729_v15, 5  ;;  %11404 = vmatprep.mubr.msk.bf16.mxu1 %vm511_vm1, %v10329_v48  ;;  %11371 = vmatmul.mubr.msk.bf16.gmra.mxu0 %vm511_vm1, %v11652_v12  ;;  %v15849_v14 = vadd.f32 %v15574_v20, %v3031_v19  ;;  %v7315_v57 = vrot.slane %v11730_v21, 5  ;;  %v15857_v5 = vpop.f32.mrf.mxu0  ;;  %v10349_v19 = vld [vmem:[%s17568_s0 + $0x84] sm:$0xe] }
 0x20a   :  { %v6946_v23 = vsel %vm11847_vm4, %v6941_v4, %v6945_v34  ;;  %v15852_v42 = vadd.f32 %v15605_v6, %v3029_v60  ;;  %v11653_v34 = vld [vmem:[%s17568_s0 + $0x78] sm:$0xff]   ;;  %v10364_v4 = vrot.slane %v10348_v52, 9  ;;  %v15879_v38 = vpop.f32.mrf.mxu1 }
 0x20b   :  { %v6956_v44 = vsel %vm11847_vm4, %v6951_v16, %v6955_v41  ;;  %v7313_v20 = vsel %vm12224_vm7, %v10363_v36, %v7312_v47  ;;  %v7314_v22 = vrot.slane %v7312_v47, 4  ;;  %v18013_v6 = vld [vmem:[#allocation32_spill] sm:$0xff]  ;;  %v18014_v47 = vld [vmem:[#allocation25_spill] sm:$0xff] }
 0x20c   :  { %v4090_v60 = vadd.f32 %v18013_v6, %v15172_v54  ;;  %v10330_v48 = vcombine.low %v6946_v23, %v6956_v44  ;;  %v11731_v41 = vld [vmem:[%s17568_s0 + $0x7c] sm:$0xf]  ;;  %v11732_v36 = vld [vmem:[%s17568_s0 + $0x80] sm:$0x1]  ;;  %v4088_v52 = vadd.f32 %v18014_v47, %v15183_v56  ;;  %v18015_v6 = vld [vmem:[#allocation26_spill] sm:$0xff] }
 0x20d   :  { %v7319_v45 = vrot.slane %v11731_v41, 5  ;;  %v7316_v54 = vsel %vm12224_vm7, %v7314_v22, %v7315_v57  ;;  %v7322_v15 = vrot.slane %v11732_v36, 5  ;;  %v4091_v57 = vadd.f32 %v18015_v6, %v15232_v13  ;;  %v15894_v22 = vpop.f32.mrf.mxu0  ;;  %v18016_v56 = vld [vmem:[#allocation49_spill] sm:$0xff] }
 0x20e   :  { %v4560_v16 = vadd.f32 %v15631_v46, %v4090_v60  ;;  %11405 = vmatmul.mubr.msk.bf16.gmra.mxu1 %vm511_vm1, %v10330_v48  ;;  %v10379_v23 = vcombine.low %v7313_v20, %v7316_v54  ;;  %v4558_v60 = vadd.f32 %v15650_v24, %v4088_v52  ;;  %v4089_v41 = vadd.f32 %v18016_v56, %v15539_v28  ;;  %v15910_v24 = vpop.f32.mrf.mxu1 }
 0x20f   :  { %v7320_v21 = vsel %vm12224_vm7, %v10364_v4, %v7319_v45  ;;  %v7321_v44 = vrot.slane %v7319_v45, 4  ;;  %11444 = vmatprep.mubr.msk.bf16.mxu1 %vm511_vm1, %v11653_v34  ;;  %v10365_v48 = vrot.slane %v10349_v19, 9  ;;  %v4561_v4 = vadd.f32 %v15685_v40, %v4091_v57  ;;  %v10350_v34 = vld [vmem:[%s17568_s0 + $0x90] sm:$0xe]  ;;  %v11654_v40 = vld [vmem:[%s17568_s0 + $0x84] sm:$0xff]   ;;  %v15922_v52 = vpop.f32.mrf.mxu0 }
 0x210   :  { %v4599_v46 = vadd.f32 %v15871_v62, %v4560_v16  ;;  %11410 = vmatprep.mubr.msk.bf16.mxu0 %vm511_vm1, %v10379_v23  ;;  %v7326_v13 = vrot.slane %v15167_v10, 5  ;;  %v7329_v45 = vrot.slane %v15177_v0, 5  ;;  %v4597_v19 = vadd.f32 %v15871_v62, %v4558_v60  ;;  %v15939_v60 = vpop.f32.mrf.mxu1 }
 0x211   :  { %v7323_v20 = vsel %vm12224_vm7, %v7321_v44, %v7322_v15  ;;  %v4559_v16 = vadd.f32 %v15711_v58, %v4089_v41  ;;  %v4600_v10 = vadd.f32 %v15871_v62, %v4561_v4  ;;  %v18017_v15 = vld [vmem:[#allocation27_spill] sm:$0xff]  ;;  %v15926_v23 = vadd.f32 %v15311_v50, %v15808_v3  ;;  %v10351_v4 = vld [vmem:[%s17568_s0 + $0x9c] sm:$0xe] }
 0x212   :  { %v4631_v54 = vmax.f32 %v4599_v46, 0.0  ;;  %v10380_v28 = vcombine.low %v7320_v21, %v7323_v20  ;;  %v7327_v0 = vsel %vm12224_vm7, %v10365_v48, %v7326_v13  ;;  %v7328_v36 = vrot.slane %v7326_v13, 4  ;;  %v11655_v21 = vld [vmem:[%s17568_s0 + $0x90] sm:$0xff]  }
 0x213   :  { %v4094_v47 = vadd.f32 %v18017_v15, %v15276_v8  ;;  %v4629_v58 = vmax.f32 %v4597_v19, 0.0  ;;  %v4598_v44 = vadd.f32 %v15871_v62, %v4559_v16  ;;  %v10366_v6 = vrot.slane %v10350_v34, 9  ;;  %v18018_v46 = vld [vmem:[#allocation10_spill] sm:$0xff]  ;;  %v15950_v34 = vpop.f32.mrf.mxu1  ;;  %v18020_v19 = vld [vmem:[#allocation52_spill] sm:$0xff] }
 0x214   :  { %11411 = vmatmul.mubr.msk.bf16.vlgmr.msra.gmra.mxu0 %vm511_vm1, %v10380_v28  ;;  %v4665_v57 = vsel %vm4661_vm8, %v4631_v54, 0.0  ;;  %v7330_v8 = vsel %vm12224_vm7, %v7328_v36, %v7329_v45  ;;  %v7333_v3 = vrot.slane %v15210_v30, 5  ;;  %v4632_v56 = vmax.f32 %v4600_v10, 0.0  ;;  %v15952_v54 = vpop.f32.mrf.mxu0  ;;  %v18019_v28 = vld [vmem:[#allocation11_spill] sm:$0xff] }
 0x215   :  { %11477 = vmatpush3.bf16.msra.mxu0 %v18018_v46  ;;  %v4564_v50 = vadd.f32 %v15748_v55, %v4094_v47  ;;  %v4630_v41 = vmax.f32 %v4598_v44, 0.0  ;;  %v10381_v48 = vcombine.low %v7327_v0, %v7330_v8  ;;  %v7336_v20 = vrot.slane %v15225_v61, 5  ;;  %v18022_v0 = vld [vmem:[#allocation64_spill] sm:$0xff]  ;;  %v15974_v8 = vpop.f32.mrf.mxu1 }
 0x216   :  { %11445 = vmatmul.mubr.msk.bf16.vlgmr.msra.gmra.mxu1 %vm511_vm1, %v11654_v40  ;;  %v4662_v13 = vsel %vm4661_vm8, %v4629_v58, 0.0  ;;  %v7334_v30 = vsel %vm12224_vm7, %v10366_v6, %v7333_v3  ;;  %v7335_v55 = vrot.slane %v7333_v3, 4  ;;  %v4092_v16 = vadd.f32 %v18020_v19, %v15295_v59  ;;  %v18021_v40 = vld [vmem:[#allocation59_spill] sm:$0xff]  ;;  %v11656_v3 = vld [vmem:[%s17568_s0 + $0x9c] sm:$0xff]  }
 0x217   :  { %v4603_v45 = vadd.f32 %v15871_v62, %v4564_v50  ;;  %11511 = vmatpush3.bf16.msra.mxu1 %v18019_v28  ;;  %11448 = vmatprep.mubr.msk.bf16.mxu1 %vm511_vm1, %v11655_v21  ;;  %v4663_v61 = vsel %vm4661_vm8, %v4630_v41, 0.0  ;;  %v4095_v10 = vadd.f32 %v18021_v40, %v15333_v49  ;;  %v4093_v36 = vadd.f32 %v18022_v0, %v15623_v17  ;;  %v15966_v21 = vpop.f32.mrf.mxu0  ;;  %v10352_v17 = vld [vmem:[%s17568_s0 + $0xa8] sm:$0xe] }
 0x218   :  { %v4664_v15 = vadd.f32 %v4663_v61, %v4662_v13  ;;  %11414 = vmatprep.mubr.msk.bf16.mxu0 %vm511_vm1, %v10381_v48  ;;  %v7337_v58 = vsel %vm12224_vm7, %v7335_v55, %v7336_v20  ;;  %v10367_v44 = vrot.slane %v10351_v4, 9  ;;  %v4562_v46 = vadd.f32 %v15768_v27, %v4092_v16  ;;  %v11657_v20 = vld [vmem:[%s17568_s0 + $0xa8] sm:$0xff]   ;;  %v15997_v16 = vpop.f32.mrf.mxu1 }
 0x219   :  { %v4635_v47 = vmax.f32 %v4603_v45, 0.0  ;;  %v10382_v6 = vcombine.low %v7334_v30, %v7337_v58  ;;  %v4565_v59 = vadd.f32 %v15786_v11, %v4095_v10  ;;  %v4563_v49 = vadd.f32 %v15802_v2, %v4093_v36  ;;  %v15982_v11 = vpop.f32.mrf.mxu0  ;;  %v10353_v36 = vld [vmem:[%s17568_s0 + $0xb4] sm:$0xe] }
 0x21a   :  { %v4667_v50 = vsel %vm4661_vm8, %v4632_v56, 0.0  ;;  %v4666_v41 = vadd.f32 %v4665_v57, %v4664_v15  ;;  %v7340_v48 = vrot.slane %v15264_v33, 5  ;;  %v7343_v27 = vrot.slane %v15283_v25, 5  ;;  %v18023_v57 = vld [vmem:[#allocation28_spill] sm:$0xff] }
 0x21b   :  { %v4601_v2 = vadd.f32 %v15871_v62, %v4562_v46  ;;  %v4604_v56 = vadd.f32 %v15871_v62, %v4565_v59  ;;  %v4602_v4 = vadd.f32 %v15871_v62, %v4563_v49  ;;  %v4098_v13 = vadd.f32 %v18023_v57, %v15384_v35  ;;  %v16007_v15 = vpop.f32.mrf.mxu0 }
 0x21c   :  { %11415 = vmatmul.mubr.msk.bf16.gmra.mxu0 %vm511_vm1, %v10382_v6  ;;  %v4668_v33 = vadd.f32 %v4667_v50, %v4666_v41  ;;  %v7341_v25 = vsel %vm12224_vm7, %v10367_v44, %v7340_v48  ;;  %v7342_v45 = vrot.slane %v7340_v48, 4  ;;  %v10368_v30 = vrot.slane %v10352_v17, 9  ;;  %v18024_v44 = vld [vmem:[#allocation62_spill] sm:$0xff]  ;;  %v18025_v17 = vld [vmem:[#allocation71_spill] sm:$0xff] }
 0x21d   :  { %v4673_v55 = vsel %vm4661_vm8, %v4635_v47, 0.0  ;;  %v4633_v28 = vmax.f32 %v4601_v2, 0.0  ;;  %v4634_v61 = vmax.f32 %v4602_v4, 0.0  ;;  %v4568_v19 = vadd.f32 %v15831_v32, %v4098_v13  ;;  %v18027_v4 = vld [vmem:[#allocation79_spill] sm:$0xff]  ;;  %v16031_v57 = vpop.f32.mrf.mxu0 }
 0x21e   :  { %11449 = vmatmul.mubr.msk.bf16.gmra.mxu1 %vm511_vm1, %v11656_v3  ;;  %v4636_v40 = vmax.f32 %v4604_v56, 0.0  ;;  %v7344_v35 = vsel %vm12224_vm7, %v7342_v45, %v7343_v27  ;;  %v7347_v10 = vrot.slane %v15307_v1, 5  ;;  %v7350_v0 = vrot.slane %v15321_v53, 5  ;;  %v18026_v3 = vld [vmem:[#allocation31_spill] sm:$0xff]  ;;  %v16023_v27 = vpop.f32.mrf.mxu1  ;;  %v10354_v45 = vld [vmem:[%s17568_s0 + $0xc0] sm:$0xe] }
 0x21f   :  { %v4669_v32 = vsel %vm4661_vm8, %v4633_v28, 0.0  ;;  %11452 = vmatprep.mubr.msk.bf16.mxu1 %vm511_vm1, %v11657_v20  ;;  %v4671_v47 = vsel %vm4661_vm8, %v4634_v61, 0.0  ;;  %v10383_v58 = vcombine.low %v7341_v25, %v7344_v35  ;;  %v4096_v6 = vadd.f32 %v18024_v44, %v15389_v63  ;;  %v11658_v63 = vld [vmem:[%s17568_s0 + $0xb4] sm:$0xff]  }
 0x220   :  { %v4670_v46 = vadd.f32 %v4669_v32, %v4668_v33  ;;  %v4607_v1 = vadd.f32 %v15871_v62, %v4568_v19  ;;  %v7348_v53 = vsel %vm12224_vm7, %v10368_v30, %v7347_v10  ;;  %v7349_v59 = vrot.slane %v7347_v10, 4  ;;  %v16042_v30 = vpop.f32.mrf.mxu1  ;;  %v16047_v10 = vpop.f32.mrf.mxu0 }
 0x221   :  { %11418 = vmatprep.mubr.msk.bf16.mxu0 %vm511_vm1, %v10383_v58  ;;  %v4566_v49 = vadd.f32 %v15857_v5, %v4096_v6  ;;  %v4099_v50 = vadd.f32 %v18025_v17, %v15442_v26  ;;  %v4097_v41 = vadd.f32 %v18026_v3, %v15714_v9  ;;  %v10369_v48 = vrot.slane %v10353_v36, 9  ;;  %v11659_v9 = vld [vmem:[%s17568_s0 + $0xc0] sm:$0xff]   ;;  %v18031_v6 = vld [vmem:[#allocation87_spill] sm:$0xff] }
 0x222   :  { %v4672_v2 = vadd.f32 %v4671_v47, %v4670_v46  ;;  %v4639_v20 = vmax.f32 %v4607_v1, 0.0  ;;  %v7351_v56 = vsel %vm12224_vm7, %v7349_v59, %v7350_v0  ;;  %v7354_v5 = vrot.slane %v18027_v4, 5  ;;  %v18028_v36 = vld [vmem:[#allocation80_spill] sm:$0xff]  ;;  %v16057_v1 = vpop.f32.mrf.mxu1 }
 0x223   :  { %v10384_v26 = vcombine.low %v7348_v53, %v7351_v56  ;;  %v4605_v13 = vadd.f32 %v15871_v62, %v4566_v49  ;;  %v4569_v33 = vadd.f32 %v15894_v22, %v4099_v50  ;;  %v4567_v25 = vadd.f32 %v15922_v52, %v4097_v41 }
 0x224   :  { %v4675_v28 = vsel %vm4661_vm8, %v4636_v40, 0.0  ;;  %v4674_v61 = vadd.f32 %v4673_v55, %v4672_v2  ;;  %v7355_v19 = vsel %vm12224_vm7, %v10369_v48, %v7354_v5  ;;  %v7356_v35 = vrot.slane %v7354_v5, 4  ;;  %v18029_v40 = vld [vmem:[#allocation94_spill] sm:$0xff]  ;;  %v18030_v55 = vld [vmem:[#allocation65_spill] sm:$0xff]  ;;  %v16068_v2 = vpop.f32.mrf.mxu0 }
 0x225   :  { %11419 = vmatmul.mubr.msk.bf16.gmra.mxu0 %vm511_vm1, %v10384_v26  ;;  %v4637_v22 = vmax.f32 %v4605_v13, 0.0  ;;  %v4608_v52 = vadd.f32 %v15871_v62, %v4569_v33  ;;  %v4606_v0 = vadd.f32 %v15871_v62, %v4567_v25  ;;  %v7357_v32 = vrot.slane %v18028_v36, 5  ;;  %v18032_v5 = vld [vmem:[#allocation41_spill] sm:$0xff]  ;;  %v11660_v13 = vld [vmem:[%s17568_s0 + $0xcc] sm:$0xff]   ;;  %v18034_v25 = vld [vmem:[#allocation68_spill] sm:$0xff] }
 0x226   :  { %11453 = vmatmul.mubr.msk.bf16.gmra.mxu1 %vm511_vm1, %v11658_v63  ;;  %v4676_v47 = vadd.f32 %v4675_v28, %v4674_v61  ;;  %v4102_v58 = vadd.f32 %v18030_v55, %v18029_v40  ;;  %v10370_v44 = vrot.slane %v10354_v45, 9  ;;  %v7361_v46 = vrot.slane %v18031_v6, 5  ;;  %v10355_v63 = vld [vmem:[%s17568_s0 + $0x144] sm:$0xe]  ;;  %v18035_v28 = vld [vmem:[#allocation98_spill] sm:$0xff]  ;;  %v18036_v61 = vld [vmem:[#allocation75_spill] sm:$0xff] }
 0x227   :  { %v4681_v53 = vsel %vm4661_vm8, %v4639_v20, 0.0  ;;  %v4677_v59 = vsel %vm4661_vm8, %v4637_v22, 0.0  ;;  %11456 = vmatprep.mubr.msk.bf16.mxu1 %vm511_vm1, %v11659_v9  ;;  %v4638_v49 = vmax.f32 %v4606_v0, 0.0  ;;  %v7358_v17 = vsel %vm12224_vm7, %v7356_v35, %v7357_v32  ;;  %v18033_v33 = vld [vmem:[#allocation97_spill] sm:$0xff]  ;;  %v16083_v35 = vpop.f32.mrf.mxu1  ;;  %v18037_v0 = vld [vmem:[#allocation34_spill] sm:$0xff] }
 0x228   :  { %v4678_v50 = vadd.f32 %v4677_v59, %v4676_v47  ;;  %v4640_v3 = vmax.f32 %v4608_v52, 0.0  ;;  %v10385_v41 = vcombine.low %v7355_v19, %v7358_v17  ;;  %v4572_v48 = vadd.f32 %v15952_v54, %v4102_v58  ;;  %v11661_v52 = vld [vmem:[%s17568_s0 + $0x150] sm:$0xff]   ;;  %v18038_v47 = vld [vmem:[#allocation96_spill] sm:$0xff]  ;;  %v4498_v59 = vpop.f32.mrf.mxu0 }
 0x229   :  { %v4679_v20 = vsel %vm4661_vm8, %v4638_v49, 0.0  ;;  %v7362_v56 = vsel %vm12224_vm7, %v10370_v44, %v7361_v46  ;;  %v7363_v4 = vrot.slane %v7361_v46, 4  ;;  %v7364_v26 = vrot.slane %v18032_v5, 5  ;;  %v10356_v46 = vld [vmem:[%s17568_s0 + $0x150] sm:$0xe] }
 0x22a   :  { %v4680_v9 = vadd.f32 %v4679_v20, %v4678_v50  ;;  %11422 = vmatprep.mubr.msk.bf16.mxu0 %vm511_vm1, %v10385_v41  ;;  %v4611_v54 = vadd.f32 %v15871_v62, %v4572_v48  ;;  %v4100_v45 = vadd.f32 %v18034_v25, %v18033_v33  ;;  %v4103_v19 = vadd.f32 %v18036_v61, %v18035_v28  ;;  %v18039_v41 = vld [vmem:[#allocation103_spill] sm:$0xff]  ;;  %v18040_v20 = vld [vmem:[#allocation33_spill] sm:$0xff]  ;;  %v18044_v61 = vld [vmem:[#allocation110_spill] sm:$0xff] }
 0x22b   :  { %v7365_v22 = vsel %vm12224_vm7, %v7363_v4, %v7364_v26  ;;  %v4101_v36 = vadd.f32 %v18037_v0, %v15798_v7  ;;  %v10371_v32 = vrot.slane %v10355_v63, 9  ;;  %v7368_v40 = vrot.slane %v18038_v47, 5  ;;  %v16106_v63 = vpop.f32.mrf.mxu1  ;;  %v18043_v28 = vld [vmem:[#allocation51_spill] sm:$0xff] }
 0x22c   :  { %v4683_v55 = vsel %vm4661_vm8, %v4640_v3, 0.0  ;;  %v4682_v58 = vadd.f32 %v4681_v53, %v4680_v9  ;;  %v10386_v44 = vcombine.low %v7362_v56, %v7365_v22  ;;  %v4570_v6 = vadd.f32 %v15966_v21, %v4100_v45  ;;  %v11228_v45 = vpop.f32.mrf.mxu0 }
 0x22d   :  { %v4643_v49 = vmax.f32 %v4611_v54, 0.0  ;;  %v4573_v17 = vadd.f32 %v15982_v11, %v4103_v19  ;;  %v4571_v50 = vadd.f32 %v16007_v15, %v4101_v36  ;;  %v7370_v7 = vrot.slane %v7368_v40, 4  ;;  %v18042_v54 = vld [vmem:[#allocation93_spill] sm:$0xff]  ;;  %v16117_v25 = vpop.f32.mrf.mxu1 }
 0x22e   :  { %11457 = vmatmul.mubr.msk.bf16.gmra.mxu1 %vm511_vm1, %v11660_v13  ;;  %11423 = vmatmul.mubr.msk.bf16.gmra.mxu0 %vm511_vm1, %v10386_v44  ;;  %v4609_v53 = vadd.f32 %v15871_v62, %v4570_v6  ;;  %v4684_v3 = vadd.f32 %v4683_v55, %v4682_v58  ;;  %v7369_v21 = vsel %vm12224_vm7, %v10371_v32, %v7368_v40  ;;  %v7371_v48 = vrot.slane %v18039_v41, 5  ;;  %v18041_v13 = vld [vmem:[#allocation100_spill] sm:$0xff]  ;;  %v18045_v40 = vld [vmem:[#allocation39_spill] sm:$0xff]  ;;  %v18046_v55 = vld [vmem:[#allocation61_spill] sm:$0xff]  ;;  %v16133_v6 = vpop.f32.mrf.mxu0 }
 0x22f   :  { %11460 = vmatprep.mubr.msk.bf16.mxu1 %vm511_vm1, %v11661_v52  ;;  %v4612_v11 = vadd.f32 %v15871_v62, %v4573_v17  ;;  %v4610_v15 = vadd.f32 %v15871_v62, %v4571_v50  ;;  %v4106_v56 = vadd.f32 %v18040_v20, %v15578_v51  ;;  %v10372_v4 = vrot.slane %v10356_v46, 9  ;;  %v11662_v36 = vld [vmem:[%s17568_s0 + $0x15c] sm:$0xff]  }
 0x230   :  { %v4641_v5 = vmax.f32 %v4609_v53, 0.0  ;;  %v7372_v26 = vsel %vm12224_vm7, %v7370_v7, %v7371_v48  ;;  %v7375_v9 = vrot.slane %v18041_v13, 5  ;;  %v7378_v33 = vrot.slane %v18042_v54, 5  ;;  %v10357_v44 = vld [vmem:[%s17568_s0 + $0x15c] sm:$0xe]  ;;  %v11663_v7 = vld [vmem:[%s17568_s0 + $0x168] sm:$0xff]   ;;  %v16141_v53 = vpop.f32.mrf.mxu1  ;;  %v11229_v20 = vpop.f32.mrf.mxu0 }
 0x231   :  { %v3021_v19 = vadd.f32 %v18044_v61, %v18043_v28  ;;  %v4642_v22 = vmax.f32 %v4610_v15, 0.0  ;;  %v10387_v52 = vcombine.low %v7369_v21, %v7372_v26  ;;  %v4576_v0 = vadd.f32 %v16031_v57, %v4106_v56  ;;  %v18047_v48 = vld [vmem:[#allocation46_spill] sm:$0xff] }
 0x232   :  { %v4685_v51 = vsel %vm4661_vm8, %v4641_v5, 0.0  ;;  %v7376_v32 = vsel %vm12224_vm7, %v10372_v4, %v7375_v9  ;;  %v7377_v47 = vrot.slane %v7375_v9, 4  ;;  %v4104_v58 = vadd.f32 %v18046_v55, %v18045_v40  ;;  %v18048_v15 = vld [vmem:[#allocation78_spill] sm:$0xff]  ;;  %v4514_v55 = vpop.f32.mrf.mxu0 }
 0x233   :  { %v4689_v57 = vsel %vm4661_vm8, %v4643_v49, 0.0  ;;  %v4686_v46 = vadd.f32 %v4685_v51, %v4684_v3  ;;  %v4644_v17 = vmax.f32 %v4612_v11, 0.0  ;;  %v4687_v50 = vsel %vm4661_vm8, %v4642_v22, 0.0  ;;  %11426 = vmatprep.mubr.msk.bf16.mxu0 %vm511_vm1, %v10387_v52  ;;  %v18049_v3 = vld [vmem:[#allocation35_spill] sm:$0xff]  ;;  %v10358_v28 = vld [vmem:[%s17568_s0 + $0x168] sm:$0xe] }
 0x234   :  { %v7379_v21 = vsel %vm12224_vm7, %v7377_v47, %v7378_v33  ;;  %v4574_v41 = vadd.f32 %v16047_v10, %v4104_v58  ;;  %v4107_v49 = vadd.f32 %v18048_v15, %v18047_v48  ;;  %v4105_v11 = vadd.f32 %v18049_v3, %v15926_v23  ;;  %v18050_v10 = vld [vmem:[#allocation108_spill] sm:$0xff]  ;;  %v18051_v22 = vld [vmem:[#allocation53_spill] sm:$0xff]  ;;  %v18053_v51 = vld [vmem:[#allocation86_spill] sm:$0xff] }
 0x235   :  { %v4688_v56 = vadd.f32 %v4687_v50, %v4686_v46  ;;  %v4615_v4 = vadd.f32 %v15871_v62, %v4576_v0  ;;  %v10388_v5 = vcombine.low %v7376_v32, %v7379_v21  ;;  %v10373_v26 = vrot.slane %v10357_v44, 9  ;;  %v18052_v0 = vld [vmem:[#allocation9_spill] sm:$0xff]  ;;  %v11664_v21 = vld [vmem:[%s17568_s0 + $0x174] sm:$0xff]  }
 0x236   :  { %11461 = vmatmul.mubr.msk.bf16.gmra.mxu1 %vm511_vm1, %v11662_v36  ;;  %v4613_v13 = vadd.f32 %v15871_v62, %v4574_v41  ;;  %v4577_v9 = vadd.f32 %v16068_v2, %v4107_v49  ;;  %v4575_v54 = vadd.f32 %v4498_v59, %v4105_v11  ;;  %v7382_v33 = vrot.slane %v18050_v10, 5  ;;  %v16164_v2 = vpop.f32.mrf.mxu1  ;;  %v18056_v48 = vld [vmem:[#allocation60_spill] sm:$0xff]  ;;  %v18057_v11 = vld [vmem:[#allocation70_spill] sm:$0xff]  ;;  %v10359_v10 = vld [vmem:[%s17568_s0 + $0x174] sm:$0xe] }
 0x237   :  { %v4691_v23 = vsel %vm4661_vm8, %v4644_v17, 0.0  ;;  %v4690_v61 = vadd.f32 %v4689_v57, %v4688_v56  ;;  %11427 = vmatmul.mubr.msk.bf16.gmra.mxu0 %vm511_vm1, %v10388_v5  ;;  %11464 = vmatprep.mubr.msk.bf16.mxu1 %vm511_vm1, %v11663_v7  ;;  %v7385_v52 = vrot.slane %v18051_v22, 5  ;;  %v4110_v36 = vadd.f32 %v18053_v51, %v18052_v0  ;;  %v18055_v17 = vld [vmem:[#allocation36_spill] sm:$0xff] }
 0x238   :  { %v4645_v59 = vmax.f32 %v4613_v13, 0.0  ;;  %v4616_v32 = vadd.f32 %v15871_v62, %v4577_v9  ;;  %v4614_v47 = vadd.f32 %v15871_v62, %v4575_v54  ;;  %v7383_v40 = vsel %vm12224_vm7, %v10373_v26, %v7382_v33  ;;  %v16183_v5 = vpop.f32.mrf.mxu1  ;;  %v18060_v51 = vld [vmem:[#allocation8_spill] sm:$0xff] }
 0x239   :  { %v16170_v58 = vadd.f32 %v4691_v23, %v4690_v61  ;;  %v7384_v44 = vrot.slane %v7382_v33, 4  ;;  %v4580_v57 = vadd.f32 %v11228_v45, %v4110_v36  ;;  %v10374_v46 = vrot.slane %v10358_v28, 9  ;;  %v11665_v45 = vld [vmem:[%s17568_s0 + $0x180] sm:$0xff]   ;;  %v11232_v33 = vpop.f32.mrf.mxu0 }
 0x23a   :  { %v3383_v50 = vadd.f32 %v18055_v17, %v3021_v19  ;;  %v4647_v7 = vmax.f32 %v4615_v4, 0.0  ;;  %v4646_v41 = vmax.f32 %v4614_v47, 0.0  ;;  %v7389_v15 = vrot.slane %v18056_v48, 5  ;;  %v18058_v19 = vld [vmem:[#allocation69_spill] sm:$0xff]  ;;  %v18061_v36 = vld [vmem:[#allocation84_spill] sm:$0xff] }
 0x23b   :  { %18054 = vst [vmem:[#allocation99_spill] sm:$0xff] %v16170_v58  ;;  %v4648_v49 = vmax.f32 %v4616_v32, 0.0  ;;  %v7386_v3 = vsel %vm12224_vm7, %v7384_v44, %v7385_v52  ;;  %v7392_v56 = vrot.slane %v18057_v11, 5  ;;  %v18059_v4 = vld [vmem:[#allocation5_spill] sm:$0xff]  ;;  %v4699_v13 = vsel %vm4661_vm8, %v4645_v59, 0.0  ;;  %v16195_v52 = vpop.f32.mrf.mxu1  ;;  %v18062_v32 = vld [vmem:[#allocation91_spill] sm:$0xff] }
 0x23c   :  { %v2555_v26 = vadd.f32 %v18059_v4, %v18058_v19  ;;  %v4700_v9 = vsel %vm4661_vm8, %v4646_v41, 0.0  ;;  %v10389_v54 = vcombine.low %v7383_v40, %v7386_v3  ;;  %v4619_v23 = vadd.f32 %v15871_v62, %v4580_v57  ;;  %v18063_v40 = vld [vmem:[#allocation82_spill] sm:$0xff]  ;;  %v4527_v57 = vpop.f32.mrf.mxu0  ;;  %v18065_v4 = vld [vmem:[#allocation73_spill] sm:$0xff] }
 0x23d   :  { %v4701_v28 = vadd.f32 %v4700_v9, %v4699_v13  ;;  %v7390_v61 = vsel %vm12224_vm7, %v10374_v46, %v7389_v15  ;;  %v7391_v22 = vrot.slane %v7389_v15, 4  ;;  %v4702_v0 = vsel %vm4661_vm8, %v4647_v7, 0.0  ;;  %v16210_v11 = vpop.f32.mrf.mxu1 }
 0x23e   :  { %11465 = vmatmul.mubr.msk.bf16.gmra.mxu1 %vm511_vm1, %v11664_v21  ;;  %11430 = vmatprep.mubr.msk.bf16.mxu0 %vm511_vm1, %v10389_v54  ;;  %v4108_v59 = vadd.f32 %v18061_v36, %v18060_v51  ;;  %v4111_v47 = vadd.f32 %v18062_v32, %v15705_v43  ;;  %v4109_v44 = vadd.f32 %v18063_v40, %v3383_v50  ;;  %v4704_v46 = vsel %vm4661_vm8, %v4648_v49, 0.0  ;;  %v10360_v43 = vld [vmem:[%s17568_s0 + $0x180] sm:$0xe]  ;;  %v18067_v54 = vld [vmem:[#allocation90_spill] sm:$0xff]  ;;  %v11667_v51 = vld [vmem:[%s17568_s0 + $0x198] sm:$0xff]  }
 0x23f   :  { %v4703_v17 = vadd.f32 %v4702_v0, %v4701_v28  ;;  %v7393_v41 = vsel %vm12224_vm7, %v7391_v22, %v7392_v56  ;;  %11468 = vmatprep.mubr.msk.bf16.mxu1 %vm511_vm1, %v11665_v45  ;;  %v10375_v7 = vrot.slane %v10359_v10, 9  ;;  %v18064_v50 = vld [vmem:[#allocation17_spill] sm:$0xff]  ;;  %v7396_v13 = vrot.slane %v18065_v4, 5  ;;  %v18068_v10 = vld [vmem:[#allocation42_spill] sm:$0xff] }
 0x240   :  { %v10390_v21 = vcombine.low %v7390_v61, %v7393_v41  ;;  %v4578_v48 = vadd.f32 %v16133_v6, %v4108_v59  ;;  %v4581_v15 = vadd.f32 %v11229_v20, %v4111_v47  ;;  %v4579_v3 = vadd.f32 %v4514_v55, %v4109_v44  ;;  %v18066_v56 = vld [vmem:[#allocation77_spill] sm:$0xff]  ;;  %v11666_v20 = vld [vmem:[%s17568_s0 + $0x18c] sm:$0xff]   ;;  %v16233_v44 = vpop.f32.mrf.mxu1 }
 0x241   :  { %v3025_v49 = vadd.f32 %v18064_v50, %v2555_v26  ;;  %v4705_v19 = vadd.f32 %v4704_v46, %v4703_v17  ;;  %v7399_v9 = vrot.slane %v18066_v56, 5  ;;  %v4651_v45 = vmax.f32 %v4619_v23, 0.0  ;;  %v11233_v26 = vpop.f32.mrf.mxu0  ;;  %v18069_v36 = vld [vmem:[#allocation66_spill] sm:$0xff] }
 0x242   :  { %11431 = vmatmul.mubr.msk.bf16.gmra.mxu0 %vm511_vm1, %v10390_v21  ;;  %v4617_v6 = vadd.f32 %v15871_v62, %v4578_v48  ;;  %v4618_v55 = vadd.f32 %v15871_v62, %v4579_v3  ;;  %v4114_v28 = vadd.f32 %v18068_v10, %v18067_v54  ;;  %v4620_v61 = vadd.f32 %v15871_v62, %v4581_v15  ;;  %v18070_v17 = vld [vmem:[#allocation14_spill] sm:$0xff]  ;;  %v18071_v21 = vld [vmem:[#allocation85_spill] sm:$0xff]  ;;  %v16254_v10 = vpop.f32.mrf.mxu1 }
 0x243   :  { %v7397_v22 = vsel %vm12224_vm7, %v10375_v7, %v7396_v13  ;;  %v7398_v23 = vrot.slane %v7396_v13, 4  ;;  %v10376_v0 = vrot.slane %v10360_v43, 9  ;;  %v3387_v59 = vadd.f32 %v18069_v36, %v3025_v49  ;;  %v10361_v48 = vld [vmem:[%s17568_s0 + $0x18c] sm:$0xe]  ;;  %v4530_v50 = vpop.f32.mrf.mxu0  ;;  %v18075_v54 = vld [vmem:[#allocation101_spill] sm:$0xff] }
 0x244   :  { %v4649_v32 = vmax.f32 %v4617_v6, 0.0  ;;  %v4650_v47 = vmax.f32 %v4618_v55, 0.0  ;;  %v4584_v40 = vadd.f32 %v11232_v33, %v4114_v28  ;;  %v7403_v41 = vrot.slane %v18070_v17, 5  ;;  %v18074_v55 = vld [vmem:[#allocation74_spill] sm:$0xff] }
 0x245   :  { %v7400_v46 = vsel %vm12224_vm7, %v7398_v23, %v7399_v9  ;;  %v7406_v7 = vrot.slane %v18071_v21, 5  ;;  %v4710_v15 = vsel %vm4661_vm8, %v4651_v45, 0.0  ;;  %v4652_v4 = vmax.f32 %v4620_v61, 0.0  ;;  %v18072_v9 = vld [vmem:[#allocation23_spill] sm:$0xff]  ;;  %v18073_v45 = vld [vmem:[#allocation44_spill] sm:$0xff]  ;;  %v18076_v28 = vld [vmem:[#allocation50_spill] sm:$0xff]  ;;  %v16264_v21 = vpop.f32.mrf.mxu1 }
 0x246   :  { %v4706_v3 = vsel %vm4661_vm8, %v4649_v32, 0.0  ;;  %11469 = vmatmul.mubr.msk.bf16.gmra.mxu1 %vm511_vm1, %v11666_v20  ;;  %v4708_v33 = vsel %vm4661_vm8, %v4650_v47, 0.0  ;;  %v10391_v43 = vcombine.low %v7397_v22, %v7400_v46  ;;  %v7404_v13 = vsel %vm12224_vm7, %v10376_v0, %v7403_v41  ;;  %v11668_v17 = vld [vmem:[%s17568_s0 + $0x1a4] sm:$0xff]  }
 0x247   :  { %v4707_v49 = vadd.f32 %v4706_v3, %v4705_v19  ;;  %v7405_v56 = vrot.slane %v7403_v41, 4  ;;  %11472 = vmatprep.mubr.msk.bf16.mxu1 %vm511_vm1, %v11667_v51  ;;  %v4112_v6 = vadd.f32 %v18073_v45, %v18072_v9  ;;  %v4115_v20 = vadd.f32 %v18075_v54, %v18074_v55  ;;  %v18077_v51 = vld [vmem:[#allocation18_spill] sm:$0xff] }
 0x248   :  { %11434 = vmatprep.mubr.msk.bf16.mxu0 %vm511_vm1, %v10391_v43  ;;  %v4113_v22 = vadd.f32 %v18076_v28, %v3387_v59  ;;  %v10377_v19 = vrot.slane %v10361_v48, 9  ;;  %v4623_v23 = vadd.f32 %v15871_v62, %v4584_v40  ;;  %v7410_v36 = vrot.slane %v18077_v51, 5  ;;  %v11236_v59 = vpop.f32.mrf.mxu0  ;;  %v10362_v40 = vld [vmem:[%s17568_s0 + $0x198] sm:$0xe] }
 0x249   :  { %v4709_v61 = vadd.f32 %v4708_v33, %v4707_v49  ;;  %v7407_v0 = vsel %vm12224_vm7, %v7405_v56, %v7406_v7  ;;  %v4582_v47 = vadd.f32 %v4527_v57, %v4112_v6  ;;  %v4585_v46 = vadd.f32 %v11233_v26, %v4115_v20  ;;  %v18080_v6 = vld [vmem:[#allocation43_spill] sm:$0xff] }
 0x24a   :  { %v10392_v32 = vcombine.low %v7404_v13, %v7407_v0  ;;  %v4583_v41 = vadd.f32 %v4530_v50, %v4113_v22  ;;  %v4712_v48 = vsel %vm4661_vm8, %v4652_v4, 0.0  ;;  %v7411_v3 = vsel %vm12224_vm7, %v10377_v19, %v7410_v36  ;;  %v18078_v50 = vld [vmem:[#allocation89_spill] sm:$0xff]  ;;  %v16277_v13 = vpop.f32.mrf.mxu1  ;;  %v4543_v56 = vpop.f32.mrf.mxu0 }
 0x24b   :  { %v4711_v7 = vadd.f32 %v4710_v15, %v4709_v61  ;;  %v7412_v57 = vrot.slane %v7410_v36, 4  ;;  %v4621_v26 = vadd.f32 %v15871_v62, %v4582_v47  ;;  %v4624_v33 = vadd.f32 %v15871_v62, %v4585_v46  ;;  %v18079_v15 = vld [vmem:[#allocation76_spill] sm:$0xff] }
 0x24c   :  { %11435 = vmatmul.mubr.msk.bf16.gmra.mxu0 %vm511_vm1, %v10392_v32  ;;  %v4622_v43 = vadd.f32 %v15871_v62, %v4583_v41  ;;  %v7413_v49 = vrot.slane %v18078_v50, 5  ;;  %v4118_v4 = vadd.f32 %v18079_v15, %v15821_v39  ;;  %v10378_v45 = vrot.slane %v10362_v40, 9  ;;  %v16285_v19 = vpop.f32.mrf.mxu1  ;;  %v10555_v61 = vld [vmem:[%s17568_s0 + $0x78] sm:$0xe]  ;;  %v11237_v0 = vpop.f32.mrf.mxu0  ;;  %v16298_v47 = vld [vmem:[%s17568_s0 + $0x80] sm:$0x1] }
 0x24d   :  { %v4713_v9 = vadd.f32 %v4712_v48, %v4711_v7  ;;  %v7417_v55 = vrot.slane %v18080_v6, 5  ;;  %v4655_v54 = vmax.f32 %v4623_v23, 0.0  ;;  %v4653_v20 = vmax.f32 %v4621_v26, 0.0  ;;  %v16293_v23 = vld [vmem:[%s17568_s0 + $0x7c] sm:$0xf] }
 0x24e   :  { %11473 = vmatmul.mubr.msk.bf16.gmra.mxu1 %vm511_vm1, %v11668_v17  ;;  %v4654_v28 = vmax.f32 %v4622_v43, 0.0  ;;  %v7414_v22 = vsel %vm12224_vm7, %v7412_v57, %v7413_v49  ;;  %v4656_v51 = vmax.f32 %v4624_v33, 0.0  ;;  %v4588_v36 = vadd.f32 %v11236_v59, %v4118_v4  ;;  %v18081_v40 = vld [vmem:[#allocation20_spill] sm:$0xff]  ;;  %v16305_v48 = vpop.f32.mrf.mxu1  ;;  %v4546_v7 = vpop.f32.mrf.mxu0  ;;  %v10556_v50 = vld [vmem:[%s17568_s0 + $0x84] sm:$0xe] }
 0x24f   :  { %v10393_v39 = vcombine.low %v7411_v3, %v7414_v22  ;;  %v7419_v32 = vrot.slane %v7417_v55, 4  ;;  %v4714_v46 = vsel %vm4661_vm8, %v4653_v20, 0.0  ;;  %v7418_v41 = vsel %vm12224_vm7, %v10378_v45, %v7417_v55  ;;  %v18082_v26 = vld [vmem:[#allocation56_spill] sm:$0xff]  ;;  %v16323_v6 = vld [vmem:[%s17568_s0 + $0x88] sm:$0xf] }
 0x250   :  { %v4716_v17 = vsel %vm4661_vm8, %v4654_v28, 0.0  ;;  %v7420_v59 = vrot.slane %v18081_v40, 5  ;;  %v4715_v3 = vadd.f32 %v4714_v46, %v4713_v9  ;;  %v4627_v57 = vadd.f32 %v15871_v62, %v4588_v36  ;;  %v18083_v9 = vld [vmem:[#allocation58_spill] sm:$0xff]  ;;  %v16327_v55 = vpop.f32.mrf.mxu0 }
 0x251   :  { %11438 = vmatprep.mubr.msk.bf16.mxu0 %vm511_vm1, %v10393_v39  ;;  %v4116_v33 = vadd.f32 %v18082_v26, %v15834_v31  ;;  %v10571_v43 = vrot.slane %v10555_v61, 9  ;;  %v8855_v15 = vrot.slane %v16293_v23, 5  ;;  %v8858_v4 = vrot.slane %v16298_v47, 5  ;;  %v16325_v31 = vpop.f32.mrf.mxu1  ;;  %v16333_v39 = vld [vmem:[%s17568_s0 + $0x8c] sm:$0x1] }
 0x252   :  { %v7421_v49 = vsel %vm12224_vm7, %v7419_v32, %v7420_v59  ;;  %v4119_v45 = vadd.f32 %v18083_v9, %v15849_v14  ;;  %18084 = vst [vmem:[#allocation21_spill] sm:$0xff] %v16325_v31  ;;  %v4718_v20 = vsel %vm4661_vm8, %v4655_v54, 0.0  ;;  %v4717_v28 = vadd.f32 %v4716_v17, %v4715_v3  ;;  %v16339_v59 = vpop.f32.mrf.mxu0  ;;  %v10475_v3 = vld [vmem:[%s17568_s0 + $0x78] sm:$0xf] }
 0x253   :  { %v10394_v22 = vcombine.low %v7418_v41, %v7421_v49  ;;  %v4586_v61 = vadd.f32 %v4543_v56, %v4116_v33  ;;  %v8856_v14 = vsel %vm12224_vm7, %v10571_v43, %v8855_v15  ;;  %v8857_v36 = vrot.slane %v8855_v15, 4  ;;  %v16337_v40 = vpop.f32.mrf.mxu1  ;;  %v18086_v43 = vld [vmem:[#allocation63_spill] sm:$0xff] }
 0x254   :  { %v4589_v32 = vadd.f32 %v11237_v0, %v4119_v45  ;;  %v10572_v46 = vrot.slane %v10556_v50, 9  ;;  %18085 = vst [vmem:[#allocation102_spill] sm:$0xff] %v16337_v40  ;;  %v4720_v54 = vsel %vm4661_vm8, %v4656_v51, 0.0  ;;  %v4719_v17 = vadd.f32 %v4718_v20, %v4717_v28  ;;  %v16355_v49 = vpop.f32.mrf.mxu0 }
 0x255   :  { %11439 = vmatmul.mubr.msk.bf16.gmra.mxu0 %vm511_vm1, %v10394_v22  ;;  %v4625_v56 = vadd.f32 %v15871_v62, %v4586_v61  ;;  %v8862_v41 = vrot.slane %v16323_v6, 5  ;;  %v4659_v26 = vmax.f32 %v4627_v57, 0.0  ;;  %v8859_v0 = vsel %vm12224_vm7, %v8857_v36, %v8858_v4  ;;  %v16353_v50 = vpop.f32.mrf.mxu1 }
 0x256   :  { %v8865_v33 = vrot.slane %v16333_v39, 5  ;;  %v4117_v51 = vadd.f32 %v18086_v43, %v15852_v42  ;;  %18087 = vst [vmem:[#allocation47_spill] sm:$0xff] %v16353_v50  ;;  %v4721_v9 = vadd.f32 %v4720_v54, %v4719_v17  ;;  %v10587_v45 = vcombine.low %v8856_v14, %v8859_v0  ;;  %v16362_v36 = vpop.f32.mrf.mxu0  ;;  %v18098_v50 = vld [vmem:[#allocation72_spill] sm:$0xff] }
 0x257   :  { %v4657_v15 = vmax.f32 %v4625_v56, 0.0  ;;  %v4628_v20 = vadd.f32 %v15871_v62, %v4589_v32  ;;  %v8863_v57 = vsel %vm12224_vm7, %v10572_v46, %v8862_v41  ;;  %v8864_v28 = vrot.slane %v8862_v41, 4  ;;  %v16360_v61 = vpop.f32.mrf.mxu1  ;;  %v10478_v56 = vld [vmem:[%s17568_s0 + $0x84] sm:$0xf] }
 0x258   :  { %v4587_v22 = vadd.f32 %v4546_v7, %v4117_v51  ;;  %v8117_v4 = vshrl.u32 %v10475_v3, 16  ;;  %18088 = vst [vmem:[#allocation104_spill] sm:$0xff] %v16360_v61  ;;  %11512 = vmatprep.mubr.msk.bf16.mxu1 %vm511_vm1, %v10587_v45  ;;  %v8120_v43 = vshll.u32 %v10475_v3, 16  ;;  %v8126_v54 = vshll.u32 %v16293_v23, 16  ;;  %v16377_v0 = vpop.f32.mrf.mxu0 }
 0x259   :  { %v4722_v42 = vsel %vm4661_vm8, %v4657_v15, 0.0  ;;  %v8130_v14 = vshrl.u32 %v16293_v23, 16  ;;  %v4726_v32 = vsel %vm4661_vm8, %v4659_v26, 0.0  ;;  %v8866_v7 = vsel %vm12224_vm7, %v8864_v28, %v8865_v33  ;;  %v16375_v41 = vpop.f32.mrf.mxu1 }
 0x25a   :  { %v4723_v17 = vadd.f32 %v4722_v42, %v4721_v9  ;;  %v4626_v46 = vadd.f32 %v15871_v62, %v4587_v22  ;;  %18089 = vst [vmem:[#allocation48_spill] sm:$0xff] %v16375_v41  ;;  %v10588_v3 = vcombine.low %v8863_v57, %v8866_v7  ;;  %v8119_v51 = vrot.slane %v8117_v4, 4  ;;  %v16382_v62 = vpop.f32.mrf.mxu0 }
 0x25b   :  { %v8122_v15 = vrot.slane %v8120_v43, 5  ;;  %v8128_v23 = vrot.slane %v8126_v54, 5  ;;  %v4660_v45 = vmax.f32 %v4628_v20, 0.0  ;;  %v8132_v9 = vrot.slane %v8130_v14, 4  ;;  %v16380_v33 = vpop.f32.mrf.mxu1 }
 0x25c   :  { %v4658_v26 = vmax.f32 %v4626_v46, 0.0  ;;  %v8136_v42 = vshll.u32 %v16298_v47, 16  ;;  %18090 = vst [vmem:[#allocation106_spill] sm:$0xff] %v16380_v33  ;;  %11513 = vmatmul.mubr.msk.bf16.vlgmr.msra.gmra.mxu1 %vm511_vm1, %v10588_v3  ;;  %v8141_v22 = vshrl.u32 %v10478_v56, 16  ;;  %v8144_v58 = vshll.u32 %v10478_v56, 16  ;;  %v16390_v47 = vpop.f32.mrf.mxu0 }
 0x25d   :  { %v8123_v28 = vor.u32 %v8122_v15, %v8119_v51  ;;  %v8150_v41 = vshll.u32 %v16323_v6, 16  ;;  %v8133_v4 = vor.u32 %v8132_v9, %v8128_v23  ;;  %v8154_v20 = vshrl.u32 %v16323_v6, 16  ;;  %v16388_v54 = vpop.f32.mrf.mxu1  ;;  %v10557_v56 = vld [vmem:[%s17568_s0 + $0x90] sm:$0xe]  ;;  %v10482_v6 = vld [vmem:[%s17568_s0 + $0x94] sm:$0xf] }
 0x25e   :  { %v4724_v57 = vsel %vm4661_vm8, %v4658_v26, 0.0  ;;  %v8138_v43 = vrot.slane %v8136_v42, 5  ;;  %18091 = vst [vmem:[#allocation37_spill] sm:$0xff] %v16388_v54  ;;  %v8143_v46 = vrot.slane %v8141_v22, 4  ;;  %v8146_v33 = vrot.slane %v8144_v58, 5  ;;  %v16401_v42 = vpop.f32.mrf.mxu0 }
 0x25f   :  { %v4725_v14 = vadd.f32 %v4724_v57, %v4723_v17  ;;  %v8124_v7 = vrot.slane %v8123_v28, 4  ;;  %v8134_v3 = vrot.slane %v8133_v4, 4  ;;  %v8152_v51 = vrot.slane %v8150_v41, 5  ;;  %v16399_v9 = vpop.f32.mrf.mxu1  ;;  %v16409_v41 = vld [vmem:[%s17568_s0 + $0x98] sm:$0x1] }
 0x260   :  { %v8156_v15 = vrot.slane %v8154_v20, 4  ;;  %v8160_v26 = vshll.u32 %v16333_v39, 16  ;;  %18092 = vst [vmem:[#allocation88_spill] sm:$0xff] %v16399_v9  ;;  %v4728_v17 = vsel %vm4661_vm8, %v4660_v45, 0.0  ;;  %v8147_v22 = vor.u32 %v8146_v33, %v8143_v46  ;;  %v10558_v39 = vld [vmem:[%s17568_s0 + $0x9c] sm:$0xe] }
 0x261   :  { %v4727_v58 = vadd.f32 %v4726_v32, %v4725_v14  ;;  %v8129_v28 = vsel %vm11847_vm4, %v8124_v7, %v8128_v23  ;;  %v8139_v57 = vsel %vm11847_vm4, %v8134_v3, %v8138_v43  ;;  %v10573_v45 = vrot.slane %v10557_v56, 9  ;;  %v16416_v32 = vpop.f32.mrf.mxu1  ;;  %v16418_v14 = vpop.f32.mrf.mxu0  ;;  %v16425_v9 = vld [vmem:[%s17568_s0 + $0xa0] sm:$0xf]  ;;  %v16430_v43 = vld [vmem:[%s17568_s0 + $0xa4] sm:$0x1] }
 0x262   :  { %v8157_v4 = vor.u32 %v8156_v15, %v8152_v51  ;;  %v8162_v20 = vrot.slane %v8160_v26, 5  ;;  %18093 = vst [vmem:[#allocation54_spill] sm:$0xff] %v16416_v32  ;;  %v10523_v33 = vcombine.low %v8129_v28, %v8139_v57  ;;  %v8148_v7 = vrot.slane %v8147_v22, 4  ;;  %v10481_v26 = vld [vmem:[%s17568_s0 + $0x90] sm:$0xf] }
 0x263   :  { %v16420_v23 = vadd.f32 %v4728_v17, %v4727_v58  ;;  %v8869_v46 = vrot.slane %v10482_v6, 5  ;;  %v8872_v3 = vrot.slane %v16409_v41, 5  ;;  %v10574_v15 = vrot.slane %v10558_v39, 9  ;;  %v16436_v17 = vpop.f32.mrf.mxu1  ;;  %v16438_v58 = vpop.f32.mrf.mxu0 }
 0x264   :  { %v8158_v56 = vrot.slane %v8157_v4, 4  ;;  %18095 = vst [vmem:[#allocation24_spill] sm:$0xff] %v16436_v17  ;;  %11478 = vmatprep.mubr.msk.bf16.mxu0 %vm511_vm1, %v10523_v33  ;;  %v8153_v28 = vsel %vm11847_vm4, %v8148_v7, %v8152_v51  ;;  %v8876_v4 = vrot.slane %v16425_v9, 5  ;;  %v8165_v51 = vshrl.u32 %v10481_v26, 16 }
 0x265   :  { %18094 = vst [vmem:[#allocation107_spill] sm:$0xff] %v16420_v23  ;;  %v8870_v22 = vsel %vm12224_vm7, %v10573_v45, %v8869_v46  ;;  %v8871_v57 = vrot.slane %v8869_v46, 4  ;;  %v8879_v23 = vrot.slane %v16430_v43, 5  ;;  %v16449_v32 = vpop.f32.mrf.mxu1  ;;  %v16451_v17 = vpop.f32.mrf.mxu0  ;;  %v8168_v61 = vshll.u32 %v10481_v26, 16 }
 0x266   :  { %v8163_v39 = vsel %vm11847_vm4, %v8158_v56, %v8162_v20  ;;  %18096 = vst [vmem:[#allocation109_spill] sm:$0xff] %v16449_v32  ;;  %v8877_v45 = vsel %vm12224_vm7, %v10574_v15, %v8876_v4  ;;  %v8878_v46 = vrot.slane %v8876_v4, 4  ;;  %v16463_v32 = vadd.f32 %v16327_v55, %v18098_v50  ;;  %v18099_v15 = vld [vmem:[#allocation57_spill] sm:$0xff] }
 0x267   :  { %v10524_v54 = vcombine.low %v8153_v28, %v8163_v39  ;;  %v8873_v33 = vsel %vm12224_vm7, %v8871_v57, %v8872_v3  ;;  %v16457_v20 = vpop.f32.mrf.mxu1  ;;  %v16459_v56 = vpop.f32.mrf.mxu0  ;;  %v8167_v28 = vrot.slane %v8165_v51, 4  ;;  %v8174_v39 = vshll.u32 %v10482_v6, 16 }
 0x268   :  { %v10589_v7 = vcombine.low %v8870_v22, %v8873_v33  ;;  %18097 = vst [vmem:[#allocation83_spill] sm:$0xff] %v16457_v20  ;;  %v8178_v3 = vshrl.u32 %v10482_v6, 16  ;;  %v10484_v22 = vld [vmem:[%s17568_s0 + $0x9c] sm:$0xf]  ;;  %v16471_v26 = vadd.f32 %v16339_v59, %v18099_v15  ;;  %v8880_v57 = vsel %vm12224_vm7, %v8878_v46, %v8879_v23  ;;  %v18102_v6 = vld [vmem:[#allocation81_spill] sm:$0xff] }
 0x269   :  { %11479 = vmatmul.mubr.msk.bf16.vlgmr.msra.gmra.mxu0 %vm511_vm1, %v10524_v54  ;;  %v8170_v55 = vrot.slane %v8168_v61, 5  ;;  %v8184_v50 = vshll.u32 %v16409_v41, 16  ;;  %v16477_v54 = vpop.f32.mrf.mxu1  ;;  %v16479_v4 = vpop.f32.mrf.mxu0  ;;  %v16483_v33 = vadd.f32 %v16355_v49, %v18102_v6  ;;  %v10590_v51 = vcombine.low %v8877_v45, %v8880_v57  ;;  %v18104_v15 = vld [vmem:[#allocation16_spill] sm:$0xff]  ;;  %v10559_v57 = vld [vmem:[%s17568_s0 + $0xa8] sm:$0xe] }
 0x26a   :  { %18100 = vst [vmem:[#allocation95_spill] sm:$0xff] %v16471_v26  ;;  %11516 = vmatprep.mubr.msk.bf16.mxu1 %vm511_vm1, %v10589_v7  ;;  %18101 = vst [vmem:[#allocation55_spill] sm:$0xff] %v16477_v54  ;;  %v8176_v20 = vrot.slane %v8174_v39, 5  ;;  %v8180_v59 = vrot.slane %v8178_v3, 4  ;;  %v16487_v7 = vadd.f32 %v16362_v36, %v18104_v15  ;;  %v8189_v23 = vshrl.u32 %v10484_v22, 16 }
 0x26b   :  { %18103 = vst [vmem:[#allocation111_spill] sm:$0xff] %v16483_v33  ;;  %v8171_v40 = vor.u32 %v8170_v55, %v8167_v28  ;;  %v8192_v61 = vshll.u32 %v10484_v22, 16  ;;  %v16489_v46 = vpop.f32.mrf.mxu1  ;;  %v16491_v41 = vpop.f32.mrf.mxu0  ;;  %11517 = vmatmul.mubr.msk.bf16.gmra.mxu1 %vm511_vm1, %v10590_v51  ;;  %v8186_v31 = vrot.slane %v8184_v50, 5  ;;  %v8198_v49 = vshll.u32 %v16425_v9, 16  ;;  %v16499_v36 = vld [vmem:[%s17568_s0 + $0xac] sm:$0xf] }
 0x26c   :  { %18105 = vst [vmem:[#allocation12_spill] sm:$0xff] %v16487_v7  ;;  %18106 = vst [vmem:[#allocation15_spill] sm:$0xff] %v16489_v46  ;;  %v8181_v54 = vor.u32 %v8180_v59, %v8176_v20  ;;  %v8202_v45 = vshrl.u32 %v16425_v9, 16  ;;  %v8191_v39 = vrot.slane %v8189_v23, 4  ;;  %v8208_v22 = vshll.u32 %v16430_v43, 16  ;;  %v18108_v9 = vld [vmem:[#allocation67_spill] sm:$0xff] }
 0x26d   :  { %v8172_v28 = vrot.slane %v8171_v40, 4  ;;  %v8194_v3 = vrot.slane %v8192_v61, 5  ;;  %v16505_v55 = vpop.f32.mrf.mxu1  ;;  %v16507_v50 = vpop.f32.mrf.mxu0  ;;  %v16511_v51 = vadd.f32 %v16377_v0, %v18108_v9  ;;  %v8200_v59 = vrot.slane %v8198_v49, 5  ;;  %v10489_v40 = vld [vmem:[%s17568_s0 + $0xb0] sm:$0x1] }
 0x26e   :  { %18107 = vst [vmem:[#allocation30_spill] sm:$0xff] %v16505_v55  ;;  %v8182_v6 = vrot.slane %v8181_v54, 4  ;;  %v8204_v15 = vrot.slane %v8202_v45, 4  ;;  %v8210_v61 = vrot.slane %v8208_v22, 5  ;;  %v18110_v46 = vld [vmem:[#allocation22_spill] sm:$0xff]  ;;  %v18113_v22 = vld [vmem:[#allocation92_spill] sm:$0xff] }
 0x26f   :  { %18109 = vst [vmem:[#allocation13_spill] sm:$0xff] %v16511_v51  ;;  %v8177_v43 = vsel %vm11847_vm4, %v8172_v28, %v8176_v20  ;;  %v8195_v23 = vor.u32 %v8194_v3, %v8191_v39  ;;  %v16520_v55 = vadd.f32 %v16382_v62, %v18110_v46  ;;  %v10560_v0 = vld [vmem:[%s17568_s0 + $0xb4] sm:$0xe]  ;;  %v16525_v54 = vpop.f32.mrf.mxu1  ;;  %v16527_v49 = vpop.f32.mrf.mxu0  ;;  %v10575_v51 = vrot.slane %v10559_v57, 9  ;;  %v16535_v62 = vld [vmem:[%s17568_s0 + $0xb8] sm:$0xf] }
 0x270   :  { %18112 = vst [vmem:[#allocation105_spill] sm:$0xff] %v16525_v54  ;;  %v8187_v45 = vsel %vm11847_vm4, %v8182_v6, %v8186_v31  ;;  %v8205_v9 = vor.u32 %v8204_v15, %v8200_v59  ;;  %v8883_v20 = vrot.slane %v16499_v36, 5  ;;  %v16540_v46 = vld [vmem:[%s17568_s0 + $0xbc] sm:$0x1]  ;;  %v8886_v3 = vrot.slane %v10489_v40, 5 }
 0x271   :  { %18111 = vst [vmem:[#allocation29_spill] sm:$0xff] %v16520_v55  ;;  %v10525_v28 = vcombine.low %v8177_v43, %v8187_v45  ;;  %v8196_v39 = vrot.slane %v8195_v23, 4  ;;  %v16544_v31 = vadd.f32 %v16390_v47, %v18113_v22  ;;  %v10487_v57 = vld [vmem:[%s17568_s0 + $0xa8] sm:$0xf]  ;;  %v16549_v6 = vpop.f32.mrf.mxu1  ;;  %v16551_v15 = vpop.f32.mrf.mxu0  ;;  %v10576_v43 = vrot.slane %v10560_v0, 9 }
 0x272   :  { %18115 = vst [vmem:[#allocation19_spill] sm:$0xff] %v16549_v6  ;;  %v8206_v54 = vrot.slane %v8205_v9, 4  ;;  %v8884_v55 = vsel %vm12224_vm7, %v10575_v51, %v8883_v20  ;;  %v8885_v7 = vrot.slane %v8883_v20, 4  ;;  %v8890_v23 = vrot.slane %v16535_v62, 5  ;;  %v18116_v22 = vld [vmem:[#allocation38_spill] sm:$0xff] }
 0x273   :  { %18114 = vst [vmem:[#allocation45_spill] sm:$0xff] %v16544_v31  ;;  %11482 = vmatprep.mubr.msk.bf16.mxu0 %vm511_vm1, %v10525_v28  ;;  %v8201_v47 = vsel %vm11847_vm4, %v8196_v39, %v8200_v59  ;;  %v8893_v45 = vrot.slane %v16540_v46, 5  ;;  %v16562_v6 = vadd.f32 %v16401_v42, %v18116_v22  ;;  %v16564_v31 = vpop.f32.mrf.mxu1  ;;  %v16566_v9 = vpop.f32.mrf.mxu0  ;;  %v8213_v20 = vshrl.u32 %v10487_v57, 16  ;;  %v10490_v28 = vld [vmem:[%s17568_s0 + $0xb4] sm:$0xf] }
 0x274   :  { %18118 = vst [vmem:[#allocation40_spill] sm:$0xff] %v16564_v31  ;;  %v8211_v51 = vsel %vm11847_vm4, %v8206_v54, %v8210_v61  ;;  %v8887_v0 = vsel %vm12224_vm7, %v8885_v7, %v8886_v3  ;;  %v8216_v59 = vshll.u32 %v10487_v57, 16  ;;  %v8891_v42 = vsel %vm12224_vm7, %v10576_v43, %v8890_v23 }
 0x275   :  { %18117 = vst [vmem:[#allocation7_spill] sm:$0xff] %v16562_v6  ;;  %v10526_v39 = vcombine.low %v8201_v47, %v8211_v51  ;;  %v10591_v33 = vcombine.low %v8884_v55, %v8887_v0  ;;  %v8892_v22 = vrot.slane %v8890_v23, 4  ;;  %v16577_v31 = vpop.f32.mrf.mxu1  ;;  %v16579_v6 = vpop.f32.mrf.mxu0  ;;  %v8215_v61 = vrot.slane %v8213_v20, 4 }
 0x276   :  { %18119 = vst [vmem:[#allocation6_spill] sm:$0xff] %v16577_v31  ;;  %v8218_v54 = vrot.slane %v8216_v59, 5  ;;  %v8222_v7 = vshll.u32 %v16499_v36, 16  ;;  %v8226_v3 = vshrl.u32 %v16499_v36, 16  ;;  %v8232_v57 = vshll.u32 %v10489_v40, 16 }
 0x277   :  { %11483 = vmatmul.mubr.msk.bf16.gmra.mxu0 %vm511_vm1, %v10526_v39  ;;  %11520 = vmatprep.mubr.msk.bf16.mxu1 %vm511_vm1, %v10591_v33  ;;  %v8894_v55 = vsel %vm12224_vm7, %v8892_v22, %v8893_v45  ;;  %v16589_v43 = vadd.f32 %v16418_v14, %v15825_v18  ;;  %v8237_v47 = vshrl.u32 %v10490_v28, 16  ;;  %v16591_v23 = vpop.f32.mrf.mxu1  ;;  %v16593_v51 = vpop.f32.mrf.mxu0  ;;  %v16598_v33 = vld [vmem:[%s17568_s0 + $0xc4] sm:$0xf]  ;;  %v10561_v40 = vld [vmem:[%s17568_s0 + $0xc0] sm:$0xe]  ;;  %v8240_v45 = vshll.u32 %v10490_v28, 16 }
 0x278   :  { %18121 = vst [vmem:[#allocation25_spill] sm:$0xff] %v16591_v23  ;;  %v10592_v0 = vcombine.low %v8891_v42, %v8894_v55  ;;  %v8219_v20 = vor.u32 %v8218_v54, %v8215_v61  ;;  %v8224_v36 = vrot.slane %v8222_v7, 5  ;;  %v8228_v59 = vrot.slane %v8226_v3, 4  ;;  %v16607_v42 = vld [vmem:[%s17568_s0 + $0xc8] sm:$0x1] }
 0x279   :  { %18120 = vst [vmem:[#allocation32_spill] sm:$0xff] %v16589_v43  ;;  %v8234_v18 = vrot.slane %v8232_v57, 5  ;;  %v8239_v14 = vrot.slane %v8237_v47, 4  ;;  %v8246_v39 = vshll.u32 %v16535_v62, 16  ;;  %v16609_v22 = vpop.f32.mrf.mxu1  ;;  %v16611_v61 = vpop.f32.mrf.mxu0  ;;  %v8250_v3 = vshrl.u32 %v16535_v62, 16 }
 0x27a   :  { %18122 = vst [vmem:[#allocation26_spill] sm:$0xff] %v16609_v22  ;;  %11521 = vmatmul.mubr.msk.bf16.gmra.mxu1 %vm511_vm1, %v10592_v0  ;;  %v8220_v54 = vrot.slane %v8219_v20, 4  ;;  %v8229_v7 = vor.u32 %v8228_v59, %v8224_v36  ;;  %v8256_v55 = vshll.u32 %v16540_v46, 16  ;;  %v16619_v28 = vld [vmem:[%s17568_s0 + $0xd0] sm:$0xf]  ;;  %v8242_v57 = vrot.slane %v8240_v45, 5 }
 0x27b   :  { %v8248_v47 = vrot.slane %v8246_v39, 5  ;;  %v16623_v22 = vadd.f32 %v16438_v58, %v15842_v37  ;;  %v10577_v23 = vrot.slane %v10561_v40, 9  ;;  %v10562_v0 = vld [vmem:[%s17568_s0 + $0xcc] sm:$0xe]  ;;  %v16628_v20 = vpop.f32.mrf.mxu1  ;;  %v16630_v62 = vpop.f32.mrf.mxu0  ;;  %v8252_v31 = vrot.slane %v8250_v3, 4 }
 0x27c   :  { %18124 = vst [vmem:[#allocation27_spill] sm:$0xff] %v16628_v20  ;;  %v8225_v46 = vsel %vm11847_vm4, %v8220_v54, %v8224_v36  ;;  %v8230_v59 = vrot.slane %v8229_v7, 4  ;;  %v8258_v45 = vrot.slane %v8256_v55, 5  ;;  %v8243_v39 = vor.u32 %v8242_v57, %v8239_v14  ;;  %v16643_v40 = vld [vmem:[%s17568_s0 + $0xd4] sm:$0x1] }
 0x27d   :  { %18123 = vst [vmem:[#allocation49_spill] sm:$0xff] %v16623_v22  ;;  %v8897_v43 = vrot.slane %v16598_v33, 5  ;;  %v8900_v37 = vrot.slane %v16607_v42, 5  ;;  %v16638_v58 = vadd.f32 %v16451_v17, %v15879_v38  ;;  %v16645_v20 = vpop.f32.mrf.mxu1  ;;  %v16647_v36 = vpop.f32.mrf.mxu0  ;;  %v8253_v54 = vor.u32 %v8252_v31, %v8248_v47  ;;  %v10493_v38 = vld [vmem:[%s17568_s0 + $0xc0] sm:$0xf] }
 0x27e   :  { %18126 = vst [vmem:[#allocation11_spill] sm:$0xff] %v16645_v20  ;;  %v8235_v14 = vsel %vm11847_vm4, %v8230_v59, %v8234_v18  ;;  %v10578_v7 = vrot.slane %v10562_v0, 9  ;;  %v8904_v3 = vrot.slane %v16619_v28, 5  ;;  %v8244_v55 = vrot.slane %v8243_v39, 4 }
 0x27f   :  { %18125 = vst [vmem:[#allocation10_spill] sm:$0xff] %v16638_v58  ;;  %v10527_v17 = vcombine.low %v8225_v46, %v8235_v14  ;;  %v8898_v57 = vsel %vm12224_vm7, %v10577_v23, %v8897_v43  ;;  %v8899_v58 = vrot.slane %v8897_v43, 4  ;;  %v16657_v20 = vpop.f32.mrf.mxu1  ;;  %v16659_v22 = vpop.f32.mrf.mxu0  ;;  %v8254_v26 = vrot.slane %v8253_v54, 4 }
 0x280   :  { %18127 = vst [vmem:[#allocation52_spill] sm:$0xff] %v16657_v20  ;;  %v8905_v31 = vsel %vm12224_vm7, %v10578_v7, %v8904_v3  ;;  %v8906_v18 = vrot.slane %v8904_v3, 4  ;;  %v8907_v0 = vrot.slane %v16643_v40, 5  ;;  %v8249_v46 = vsel %vm11847_vm4, %v8244_v55, %v8248_v47 }
 0x281   :  { %11486 = vmatprep.mubr.msk.bf16.mxu0 %vm511_vm1, %v10527_v17  ;;  %v8901_v23 = vsel %vm12224_vm7, %v8899_v58, %v8900_v37  ;;  %v16671_v43 = vadd.f32 %v16459_v56, %v15910_v24  ;;  %v8261_v59 = vshrl.u32 %v10493_v38, 16  ;;  %v16673_v39 = vpop.f32.mrf.mxu1  ;;  %v16675_v14 = vpop.f32.mrf.mxu0  ;;  %v8259_v54 = vsel %vm11847_vm4, %v8254_v26, %v8258_v45  ;;  %v10496_v37 = vld [vmem:[%s17568_s0 + $0xcc] sm:$0xf] }
 0x282   :  { %18128 = vst [vmem:[#allocation59_spill] sm:$0xff] %v16673_v39  ;;  %v10593_v7 = vcombine.low %v8898_v57, %v8901_v23  ;;  %v8908_v3 = vsel %vm12224_vm7, %v8906_v18, %v8907_v0  ;;  %v8264_v47 = vshll.u32 %v10493_v38, 16  ;;  %v10528_v58 = vcombine.low %v8249_v46, %v8259_v54  ;;  %v16702_v23 = vld [vmem:[%s17568_s0 + $0x154] sm:$0xf] }
 0x283   :  { %v10594_v24 = vcombine.low %v8905_v31, %v8908_v3  ;;  %v8263_v56 = vrot.slane %v8261_v59, 4  ;;  %v8270_v17 = vshll.u32 %v16598_v33, 16  ;;  %v16685_v55 = vpop.f32.mrf.mxu1  ;;  %v16687_v39 = vpop.f32.mrf.mxu0  ;;  %v8274_v45 = vshrl.u32 %v16598_v33, 16 }
 0x284   :  { %18129 = vst [vmem:[#allocation64_spill] sm:$0xff] %v16685_v55  ;;  %11524 = vmatprep.mubr.msk.bf16.mxu1 %vm511_vm1, %v10593_v7  ;;  %v8266_v26 = vrot.slane %v8264_v47, 5  ;;  %v8280_v38 = vshll.u32 %v16607_v42, 16  ;;  %v16694_v57 = vadd.f32 %v16479_v4, %v15939_v60  ;;  %11487 = vmatmul.mubr.msk.bf16.gmra.mxu0 %vm511_vm1, %v10528_v58  ;;  %v8285_v18 = vshrl.u32 %v10496_v37, 16  ;;  %v10563_v7 = vld [vmem:[%s17568_s0 + $0x150] sm:$0xe] }
 0x285   :  { %11525 = vmatmul.mubr.msk.bf16.gmra.mxu1 %vm511_vm1, %v10594_v24  ;;  %v8272_v31 = vrot.slane %v8270_v17, 5  ;;  %v8288_v0 = vshll.u32 %v10496_v37, 16  ;;  %v8294_v46 = vshll.u32 %v16619_v28, 16  ;;  %v16704_v33 = vpop.f32.mrf.mxu1  ;;  %v16706_v42 = vpop.f32.mrf.mxu0  ;;  %v8276_v4 = vrot.slane %v8274_v45, 4  ;;  %v16716_v24 = vld [vmem:[%s17568_s0 + $0x158] sm:$0x1] }
 0x286   :  { %18130 = vst [vmem:[#allocation28_spill] sm:$0xff] %v16704_v33  ;;  %v8267_v60 = vor.u32 %v8266_v26, %v8263_v56  ;;  %v8282_v59 = vrot.slane %v8280_v38, 5  ;;  %v8298_v54 = vshrl.u32 %v16619_v28, 16  ;;  %v8287_v3 = vrot.slane %v8285_v18, 4 }
 0x287   :  { %v8290_v47 = vrot.slane %v8288_v0, 5  ;;  %v8296_v37 = vrot.slane %v8294_v46, 5  ;;  %v8304_v58 = vshll.u32 %v16643_v40, 16  ;;  %v16718_v17 = vpop.f32.mrf.mxu1  ;;  %v16720_v56 = vpop.f32.mrf.mxu0  ;;  %v8277_v28 = vor.u32 %v8276_v4, %v8272_v31  ;;  %v16729_v40 = vld [vmem:[%s17568_s0 + $0x160] sm:$0xf] }
 0x288   :  { %18131 = vst [vmem:[#allocation62_spill] sm:$0xff] %v16718_v17  ;;  %v8268_v26 = vrot.slane %v8267_v60, 4  ;;  %v8300_v45 = vrot.slane %v8298_v54, 4  ;;  %v16724_v38 = vadd.f32 %v16491_v41, %v15950_v34  ;;  %v10579_v46 = vrot.slane %v10563_v7, 9  ;;  %v10564_v60 = vld [vmem:[%s17568_s0 + $0x15c] sm:$0xe] }
 0x289   :  { %v8291_v18 = vor.u32 %v8290_v47, %v8287_v3  ;;  %v8306_v0 = vrot.slane %v8304_v58, 5  ;;  %v8911_v33 = vrot.slane %v16702_v23, 5  ;;  %v16735_v4 = vpop.f32.mrf.mxu1  ;;  %v16737_v54 = vpop.f32.mrf.mxu0  ;;  %v8278_v41 = vrot.slane %v8277_v28, 4  ;;  %v16745_v7 = vld [vmem:[%s17568_s0 + $0x164] sm:$0x1] }
 0x28a   :  { %18132 = vst [vmem:[#allocation71_spill] sm:$0xff] %v16724_v38  ;;  %18133 = vst [vmem:[#allocation31_spill] sm:$0xff] %v16735_v4  ;;  %v8273_v34 = vsel %vm11847_vm4, %v8268_v26, %v8272_v31  ;;  %v8301_v17 = vor.u32 %v8300_v45, %v8296_v37  ;;  %v8914_v55 = vrot.slane %v16716_v24, 5  ;;  %v16751_v4 = vadd.f32 %v16507_v50, %v15974_v8 }
 0x28b   :  { %v8292_v3 = vrot.slane %v8291_v18, 4  ;;  %v8912_v47 = vsel %vm12224_vm7, %v10579_v46, %v8911_v33  ;;  %v8913_v58 = vrot.slane %v8911_v33, 4  ;;  %v16753_v20 = vpop.f32.mrf.mxu1  ;;  %v16755_v31 = vpop.f32.mrf.mxu0  ;;  %v8283_v26 = vsel %vm11847_vm4, %v8278_v41, %v8282_v59  ;;  %v10499_v18 = vld [vmem:[%s17568_s0 + $0x150] sm:$0xf] }
 0x28c   :  { %18134 = vst [vmem:[#allocation79_spill] sm:$0xff] %v16751_v4  ;;  %18135 = vst [vmem:[#allocation80_spill] sm:$0xff] %v16753_v20  ;;  %v8302_v28 = vrot.slane %v8301_v17, 4  ;;  %v10580_v45 = vrot.slane %v10564_v60, 9  ;;  %v8918_v38 = vrot.slane %v16729_v40, 5  ;;  %v10529_v33 = vcombine.low %v8273_v34, %v8283_v26 }
 0x28d   :  { %v8297_v8 = vsel %vm11847_vm4, %v8292_v3, %v8296_v37  ;;  %v8915_v50 = vsel %vm12224_vm7, %v8913_v58, %v8914_v55  ;;  %v8921_v46 = vrot.slane %v16745_v7, 5  ;;  %v16768_v20 = vpop.f32.mrf.mxu1  ;;  %v16770_v59 = vpop.f32.mrf.mxu0  ;;  %v16779_v55 = vadd.f32 %v16527_v49, %v15997_v16  ;;  %v10502_v26 = vld [vmem:[%s17568_s0 + $0x15c] sm:$0xf] }
 0x28e   :  { %18136 = vst [vmem:[#allocation94_spill] sm:$0xff] %v16768_v20  ;;  %v8307_v17 = vsel %vm11847_vm4, %v8302_v28, %v8306_v0  ;;  %v10595_v60 = vcombine.low %v8912_v47, %v8915_v50  ;;  %v8919_v41 = vsel %vm12224_vm7, %v10580_v45, %v8918_v38  ;;  %v8920_v34 = vrot.slane %v8918_v38, 4  ;;  %11490 = vmatprep.mubr.msk.bf16.mxu0 %vm511_vm1, %v10529_v33 }
 0x28f   :  { %v10530_v37 = vcombine.low %v8297_v8, %v8307_v17  ;;  %18137 = vst [vmem:[#allocation65_spill] sm:$0xff] %v16779_v55  ;;  %v8309_v3 = vshrl.u32 %v10499_v18, 16  ;;  %v8312_v58 = vshll.u32 %v10499_v18, 16  ;;  %v16784_v20 = vpop.f32.mrf.mxu1  ;;  %v16786_v0 = vpop.f32.mrf.mxu0  ;;  %v8318_v47 = vshll.u32 %v16702_v23, 16 }
 0x290   :  { %18138 = vst [vmem:[#allocation87_spill] sm:$0xff] %v16784_v20  ;;  %11528 = vmatprep.mubr.msk.bf16.mxu1 %vm511_vm1, %v10595_v60  ;;  %v8922_v38 = vsel %vm12224_vm7, %v8920_v34, %v8921_v46  ;;  %v8322_v16 = vshrl.u32 %v16702_v23, 16  ;;  %v8328_v49 = vshll.u32 %v16716_v24, 16  ;;  %v16797_v33 = vadd.f32 %v16551_v15, %v16023_v27  ;;  %v16806_v23 = vld [vmem:[%s17568_s0 + $0x16c] sm:$0xf] }
 0x291   :  { %11491 = vmatmul.mubr.msk.bf16.gmra.mxu0 %vm511_vm1, %v10530_v37  ;;  %v10596_v28 = vcombine.low %v8919_v41, %v8922_v38  ;;  %v8311_v45 = vrot.slane %v8309_v3, 4  ;;  %v8314_v18 = vrot.slane %v8312_v58, 5  ;;  %v16799_v8 = vpop.f32.mrf.mxu1  ;;  %v16801_v50 = vpop.f32.mrf.mxu0  ;;  %v8320_v46 = vrot.slane %v8318_v47, 5  ;;  %v10565_v37 = vld [vmem:[%s17568_s0 + $0x168] sm:$0xe] }
 0x292   :  { %18139 = vst [vmem:[#allocation41_spill] sm:$0xff] %v16797_v33  ;;  %18140 = vst [vmem:[#allocation97_spill] sm:$0xff] %v16799_v8  ;;  %v8324_v17 = vrot.slane %v8322_v16, 4  ;;  %v8330_v60 = vrot.slane %v8328_v49, 5  ;;  %v8333_v34 = vshrl.u32 %v10502_v26, 16  ;;  %v8336_v41 = vshll.u32 %v10502_v26, 16 }
 0x293   :  { %11529 = vmatmul.mubr.msk.bf16.gmra.mxu1 %vm511_vm1, %v10596_v28  ;;  %v8315_v24 = vor.u32 %v8314_v18, %v8311_v45  ;;  %v8342_v27 = vshll.u32 %v16729_v40, 16  ;;  %v8346_v15 = vshrl.u32 %v16729_v40, 16  ;;  %v16814_v3 = vpop.f32.mrf.mxu1  ;;  %v16816_v58 = vpop.f32.mrf.mxu0  ;;  %v8352_v16 = vshll.u32 %v16745_v7, 16  ;;  %v10507_v40 = vld [vmem:[%s17568_s0 + $0x170] sm:$0x1] }
 0x294   :  { %18141 = vst [vmem:[#allocation68_spill] sm:$0xff] %v16814_v3  ;;  %v8325_v38 = vor.u32 %v8324_v17, %v8320_v46  ;;  %v8335_v47 = vrot.slane %v8333_v34, 4  ;;  %v16821_v49 = vadd.f32 %v16566_v9, %v16042_v30  ;;  %v8338_v28 = vrot.slane %v8336_v41, 5  ;;  %v10566_v30 = vld [vmem:[%s17568_s0 + $0x174] sm:$0xe] }
 0x295   :  { %v8316_v26 = vrot.slane %v8315_v24, 4  ;;  %v8344_v45 = vrot.slane %v8342_v27, 5  ;;  %v8348_v18 = vrot.slane %v8346_v15, 4  ;;  %v16826_v8 = vpop.f32.mrf.mxu1  ;;  %v16828_v3 = vpop.f32.mrf.mxu0  ;;  %v8354_v34 = vrot.slane %v8352_v16, 5  ;;  %v16839_v15 = vld [vmem:[%s17568_s0 + $0x178] sm:$0xf] }
 0x296   :  { %18142 = vst [vmem:[#allocation98_spill] sm:$0xff] %v16821_v49  ;;  %18143 = vst [vmem:[#allocation75_spill] sm:$0xff] %v16826_v8  ;;  %v8326_v17 = vrot.slane %v8325_v38, 4  ;;  %v10581_v20 = vrot.slane %v10565_v37, 9  ;;  %v8925_v7 = vrot.slane %v16806_v23, 5  ;;  %v8339_v24 = vor.u32 %v8338_v28, %v8335_v47 }
 0x297   :  { %v8321_v9 = vsel %vm11847_vm4, %v8316_v26, %v8320_v46  ;;  %v8349_v41 = vor.u32 %v8348_v18, %v8344_v45  ;;  %v8928_v27 = vrot.slane %v10507_v40, 5  ;;  %v16844_v37 = vld [vmem:[%s17568_s0 + $0x17c] sm:$0x1]  ;;  %v16846_v38 = vpop.f32.mrf.mxu1  ;;  %v16848_v16 = vpop.f32.mrf.mxu0  ;;  %v16856_v28 = vadd.f32 %v16579_v6, %v16057_v1  ;;  %v10505_v18 = vld [vmem:[%s17568_s0 + $0x168] sm:$0xf] }
 0x298   :  { %18144 = vst [vmem:[#allocation34_spill] sm:$0xff] %v16846_v38  ;;  %v8331_v46 = vsel %vm11847_vm4, %v8326_v17, %v8330_v60  ;;  %v8926_v47 = vsel %vm12224_vm7, %v10581_v20, %v8925_v7  ;;  %v8927_v26 = vrot.slane %v8925_v7, 4  ;;  %v8340_v49 = vrot.slane %v8339_v24, 4  ;;  %v10508_v24 = vld [vmem:[%s17568_s0 + $0x174] sm:$0xf] }
 0x299   :  { %v10531_v8 = vcombine.low %v8321_v9, %v8331_v46  ;;  %v8350_v38 = vrot.slane %v8349_v41, 4  ;;  %v10582_v33 = vrot.slane %v10566_v30, 9  ;;  %v16861_v55 = vpop.f32.mrf.mxu1  ;;  %v16863_v4 = vpop.f32.mrf.mxu0  ;;  %v8932_v60 = vrot.slane %v16839_v15, 5 }
 0x29a   :  { %18145 = vst [vmem:[#allocation96_spill] sm:$0xff] %v16861_v55  ;;  %v8929_v20 = vsel %vm12224_vm7, %v8927_v26, %v8928_v27  ;;  %v8935_v1 = vrot.slane %v16844_v37, 5  ;;  %v16871_v6 = vadd.f32 %v16593_v51, %v16083_v35  ;;  %v8345_v17 = vsel %vm11847_vm4, %v8340_v49, %v8344_v45 }
 0x29b   :  { %11494 = vmatprep.mubr.msk.bf16.mxu0 %vm511_vm1, %v10531_v8  ;;  %v8355_v7 = vsel %vm11847_vm4, %v8350_v38, %v8354_v34  ;;  %v10597_v30 = vcombine.low %v8926_v47, %v8929_v20  ;;  %v8357_v9 = vshrl.u32 %v10505_v18, 16  ;;  %v16881_v41 = vpop.f32.mrf.mxu1  ;;  %v16883_v27 = vpop.f32.mrf.mxu0  ;;  %v8933_v51 = vsel %vm12224_vm7, %v10582_v33, %v8932_v60 }
 0x29c   :  { %18146 = vst [vmem:[#allocation103_spill] sm:$0xff] %v16881_v41  ;;  %v10532_v35 = vcombine.low %v8345_v17, %v8355_v7  ;;  %v8934_v8 = vrot.slane %v8932_v60, 4  ;;  %v8360_v46 = vshll.u32 %v10505_v18, 16  ;;  %v8366_v45 = vshll.u32 %v16806_v23, 16 }
 0x29d   :  { %11532 = vmatprep.mubr.msk.bf16.mxu1 %vm511_vm1, %v10597_v30  ;;  %v8359_v49 = vrot.slane %v8357_v9, 4  ;;  %v8370_v34 = vshrl.u32 %v16806_v23, 16  ;;  %v8376_v38 = vshll.u32 %v10507_v40, 16  ;;  %v16890_v47 = vpop.f32.mrf.mxu1  ;;  %v16892_v26 = vpop.f32.mrf.mxu0  ;;  %v16899_v18 = vadd.f32 %v16611_v61, %v16106_v63  ;;  %v10567_v40 = vld [vmem:[%s17568_s0 + $0x180] sm:$0xe] }
 0x29e   :  { %18147 = vst [vmem:[#allocation33_spill] sm:$0xff] %v16890_v47  ;;  %11495 = vmatmul.mubr.msk.bf16.gmra.mxu0 %vm511_vm1, %v10532_v35  ;;  %v8936_v20 = vsel %vm12224_vm7, %v8934_v8, %v8935_v1  ;;  %v8362_v33 = vrot.slane %v8360_v46, 5  ;;  %v8381_v60 = vshrl.u32 %v10508_v24, 16  ;;  %v8368_v7 = vrot.slane %v8366_v45, 5  ;;  %v16912_v63 = vld [vmem:[%s17568_s0 + $0x184] sm:$0xf] }
 0x29f   :  { %v10598_v17 = vcombine.low %v8933_v51, %v8936_v20  ;;  %v8372_v30 = vrot.slane %v8370_v34, 4  ;;  %v8378_v23 = vrot.slane %v8376_v38, 5  ;;  %v16904_v9 = vpop.f32.mrf.mxu1  ;;  %v16906_v35 = vpop.f32.mrf.mxu0  ;;  %v8384_v8 = vshll.u32 %v10508_v24, 16  ;;  %v10513_v24 = vld [vmem:[%s17568_s0 + $0x188] sm:$0x1] }
 0x2a0   :  { %18148 = vst [vmem:[#allocation100_spill] sm:$0xff] %v16904_v9  ;;  %v8363_v47 = vor.u32 %v8362_v33, %v8359_v49  ;;  %v8383_v1 = vrot.slane %v8381_v60, 4  ;;  %v8390_v46 = vshll.u32 %v16839_v15, 16  ;;  %v8394_v51 = vshrl.u32 %v16839_v15, 16  ;;  %v16931_v15 = vld [vmem:[%s17568_s0 + $0x190] sm:$0xf] }
 0x2a1   :  { %11533 = vmatmul.mubr.msk.bf16.gmra.mxu1 %vm511_vm1, %v10598_v17  ;;  %v8373_v61 = vor.u32 %v8372_v30, %v8368_v7  ;;  %v8400_v45 = vshll.u32 %v16844_v37, 16  ;;  %v16919_v34 = vadd.f32 %v16630_v62, %v16117_v25  ;;  %v16924_v49 = vpop.f32.mrf.mxu1  ;;  %v16926_v38 = vpop.f32.mrf.mxu0  ;;  %v8386_v33 = vrot.slane %v8384_v8, 5 }
 0x2a2   :  { %18150 = vst [vmem:[#allocation51_spill] sm:$0xff] %v16924_v49  ;;  %v8364_v20 = vrot.slane %v8363_v47, 4  ;;  %v8392_v60 = vrot.slane %v8390_v46, 5  ;;  %v10583_v17 = vrot.slane %v10567_v40, 9  ;;  %v8396_v25 = vrot.slane %v8394_v51, 4 }
 0x2a3   :  { %18149 = vst [vmem:[#allocation93_spill] sm:$0xff] %v16919_v34  ;;  %v8374_v37 = vrot.slane %v8373_v61, 4  ;;  %v8402_v62 = vrot.slane %v8400_v45, 5  ;;  %v8939_v30 = vrot.slane %v16912_v63, 5  ;;  %v10568_v49 = vld [vmem:[%s17568_s0 + $0x18c] sm:$0xe]  ;;  %v16937_v9 = vpop.f32.mrf.mxu1  ;;  %v16939_v47 = vpop.f32.mrf.mxu0  ;;  %v8387_v8 = vor.u32 %v8386_v33, %v8383_v1 }
 0x2a4   :  { %18151 = vst [vmem:[#allocation110_spill] sm:$0xff] %v16937_v9  ;;  %v8369_v40 = vsel %vm11847_vm4, %v8364_v20, %v8368_v7  ;;  %v8942_v46 = vrot.slane %v10513_v24, 5  ;;  %v16945_v61 = vadd.f32 %v16647_v36, %v16141_v53  ;;  %v16950_v51 = vld [vmem:[%s17568_s0 + $0x194] sm:$0x1]  ;;  %v8397_v9 = vor.u32 %v8396_v25, %v8392_v60 }
 0x2a5   :  { %v8379_v45 = vsel %vm11847_vm4, %v8374_v37, %v8378_v23  ;;  %v8940_v41 = vsel %vm12224_vm7, %v10583_v17, %v8939_v30  ;;  %v8941_v55 = vrot.slane %v8939_v30, 4  ;;  %v16956_v7 = vpop.f32.mrf.mxu1  ;;  %v16958_v1 = vpop.f32.mrf.mxu0  ;;  %v8388_v53 = vrot.slane %v8387_v8, 4 }
 0x2a6   :  { %18152 = vst [vmem:[#allocation39_spill] sm:$0xff] %v16945_v61  ;;  %18153 = vst [vmem:[#allocation61_spill] sm:$0xff] %v16956_v7  ;;  %v10533_v20 = vcombine.low %v8369_v40, %v8379_v45  ;;  %v10584_v36 = vrot.slane %v10568_v49, 9  ;;  %v8946_v33 = vrot.slane %v16931_v15, 5  ;;  %v10511_v61 = vld [vmem:[%s17568_s0 + $0x180] sm:$0xf]  ;;  %v16969_v37 = vadd.f32 %v16659_v22, %v16164_v2 }
 0x2a7   :  { %v8398_v34 = vrot.slane %v8397_v9, 4  ;;  %v8943_v23 = vsel %vm12224_vm7, %v8941_v55, %v8942_v46  ;;  %v8949_v17 = vrot.slane %v16950_v51, 5  ;;  %v16971_v25 = vpop.f32.mrf.mxu1  ;;  %v16973_v30 = vpop.f32.mrf.mxu0  ;;  %v8393_v49 = vsel %vm11847_vm4, %v8388_v53, %v8392_v60  ;;  %v10514_v45 = vld [vmem:[%s17568_s0 + $0x18c] sm:$0xf] }
 0x2a8   :  { %18154 = vst [vmem:[#allocation46_spill] sm:$0xff] %v16969_v37  ;;  %18155 = vst [vmem:[#allocation78_spill] sm:$0xff] %v16971_v25  ;;  %11498 = vmatprep.mubr.msk.bf16.mxu0 %vm511_vm1, %v10533_v20  ;;  %v10599_v40 = vcombine.low %v8940_v41, %v8943_v23  ;;  %v8947_v9 = vsel %vm12224_vm7, %v10584_v36, %v8946_v33  ;;  %v8948_v55 = vrot.slane %v8946_v33, 4  ;;  %v8405_v46 = vshrl.u32 %v10511_v61, 16 }
 0x2a9   :  { %v8403_v8 = vsel %vm11847_vm4, %v8398_v34, %v8402_v62  ;;  %v8408_v2 = vshll.u32 %v10511_v61, 16  ;;  %v8414_v22 = vshll.u32 %v16912_v63, 16  ;;  %v16986_v20 = vpop.f32.mrf.mxu1  ;;  %v16988_v25 = vpop.f32.mrf.mxu0  ;;  %v8418_v34 = vshrl.u32 %v16912_v63, 16  ;;  %v17006_v63 = vld [vmem:[%s17568_s0 + $0x19c] sm:$0xf] }
 0x2aa   :  { %18156 = vst [vmem:[#allocation35_spill] sm:$0xff] %v16986_v20  ;;  %v10534_v41 = vcombine.low %v8393_v49, %v8403_v8  ;;  %11536 = vmatprep.mubr.msk.bf16.mxu1 %vm511_vm1, %v10599_v40  ;;  %v8950_v60 = vsel %vm12224_vm7, %v8948_v55, %v8949_v17  ;;  %v8424_v62 = vshll.u32 %v10513_v24, 16  ;;  %v8407_v53 = vrot.slane %v8405_v46, 4  ;;  %v10569_v46 = vld [vmem:[%s17568_s0 + $0x198] sm:$0xe] }
 0x2ab   :  { %v10600_v61 = vcombine.low %v8947_v9, %v8950_v60  ;;  %v8410_v36 = vrot.slane %v8408_v2, 5  ;;  %v8416_v33 = vrot.slane %v8414_v22, 5  ;;  %v16994_v23 = vpop.f32.mrf.mxu1  ;;  %v16996_v7 = vpop.f32.mrf.mxu0  ;;  %v8420_v20 = vrot.slane %v8418_v34, 4 }
 0x2ac   :  { %18157 = vst [vmem:[#allocation108_spill] sm:$0xff] %v16994_v23  ;;  %11499 = vmatmul.mubr.msk.bf16.gmra.mxu0 %vm511_vm1, %v10534_v41  ;;  %v8426_v49 = vrot.slane %v8424_v62, 5  ;;  %v17001_v40 = vadd.f32 %v16675_v14, %v16183_v5  ;;  %v8429_v17 = vshrl.u32 %v10514_v45, 16  ;;  %v8432_v9 = vshll.u32 %v10514_v45, 16 }
 0x2ad   :  { %11537 = vmatmul.mubr.msk.bf16.gmra.mxu1 %vm511_vm1, %v10600_v61  ;;  %v8411_v24 = vor.u32 %v8410_v36, %v8407_v53  ;;  %v8438_v55 = vshll.u32 %v16931_v15, 16  ;;  %v8442_v8 = vshrl.u32 %v16931_v15, 16  ;;  %v17014_v5 = vpop.f32.mrf.mxu1  ;;  %v17016_v14 = vpop.f32.mrf.mxu0  ;;  %v8421_v2 = vor.u32 %v8420_v20, %v8416_v33  ;;  %v10519_v15 = vld [vmem:[%s17568_s0 + $0x1a0] sm:$0x1] }
 0x2ae   :  { %18158 = vst [vmem:[#allocation53_spill] sm:$0xff] %v17001_v40  ;;  %18159 = vst [vmem:[#allocation9_spill] sm:$0xff] %v17014_v5  ;;  %v8431_v22 = vrot.slane %v8429_v17, 4  ;;  %v8448_v41 = vshll.u32 %v16950_v51, 16  ;;  %v17021_v60 = vadd.f32 %v16687_v39, %v16195_v52  ;;  %v8434_v34 = vrot.slane %v8432_v9, 5 }
 0x2af   :  { %v8412_v45 = vrot.slane %v8411_v24, 4  ;;  %v8440_v62 = vrot.slane %v8438_v55, 5  ;;  %v8444_v61 = vrot.slane %v8442_v8, 4  ;;  %v17026_v53 = vpop.f32.mrf.mxu1  ;;  %v17028_v36 = vpop.f32.mrf.mxu0  ;;  %v8422_v20 = vrot.slane %v8421_v2, 4  ;;  %v10570_v52 = vld [vmem:[%s17568_s0 + $0x1a4] sm:$0xe] }
 0x2b0   :  { %18160 = vst [vmem:[#allocation86_spill] sm:$0xff] %v17021_v60  ;;  %18161 = vst [vmem:[#allocation36_spill] sm:$0xff] %v17026_v53  ;;  %v8450_v17 = vrot.slane %v8448_v41, 5  ;;  %v10585_v5 = vrot.slane %v10569_v46, 9  ;;  %v8953_v51 = vrot.slane %v17006_v63, 5  ;;  %v8435_v24 = vor.u32 %v8434_v34, %v8431_v22 }
 0x2b1   :  { %v8417_v39 = vsel %vm11847_vm4, %v8412_v45, %v8416_v33  ;;  %v8445_v9 = vor.u32 %v8444_v61, %v8440_v62  ;;  %v8956_v55 = vrot.slane %v10519_v15, 5  ;;  %v17039_v8 = vld [vmem:[%s17568_s0 + $0x1a8] sm:$0xf]  ;;  %v17044_v46 = vld [vmem:[%s17568_s0 + $0x1ac] sm:$0x1]  ;;  %v17046_v2 = vpop.f32.mrf.mxu1  ;;  %v17048_v41 = vpop.f32.mrf.mxu0  ;;  %v8427_v33 = vsel %vm11847_vm4, %v8422_v20, %v8426_v49 }
 0x2b2   :  { %18162 = vst [vmem:[#allocation60_spill] sm:$0xff] %v17046_v2  ;;  %v8954_v22 = vsel %vm12224_vm7, %v10585_v5, %v8953_v51  ;;  %v8955_v45 = vrot.slane %v8953_v51, 4  ;;  %v17056_v34 = vadd.f32 %v16706_v42, %v16210_v11  ;;  %v10517_v61 = vld [vmem:[%s17568_s0 + $0x198] sm:$0xf]  ;;  %v10535_v53 = vcombine.low %v8417_v39, %v8427_v33 }
 0x2b3   :  { %v8436_v23 = vrot.slane %v8435_v24, 4  ;;  %v8446_v2 = vrot.slane %v8445_v9, 4  ;;  %v10586_v60 = vrot.slane %v10570_v52, 9  ;;  %v17061_v40 = vpop.f32.mrf.mxu1  ;;  %v17063_v37 = vpop.f32.mrf.mxu0  ;;  %v8960_v5 = vrot.slane %v17039_v8, 5  ;;  %v10520_v24 = vld [vmem:[%s17568_s0 + $0x1a4] sm:$0xf] }
 0x2b4   :  { %v8957_v49 = vsel %vm12224_vm7, %v8955_v45, %v8956_v55  ;;  %v8963_v11 = vrot.slane %v17044_v46, 5  ;;  %v17071_v42 = vadd.f32 %v16720_v56, %v16233_v44  ;;  %11502 = vmatprep.mubr.msk.bf16.mxu0 %vm511_vm1, %v10535_v53  ;;  %v8453_v39 = vshrl.u32 %v10517_v61, 16 }
 0x2b5   :  { %v8441_v20 = vsel %vm11847_vm4, %v8436_v23, %v8440_v62  ;;  %v8451_v51 = vsel %vm11847_vm4, %v8446_v2, %v8450_v17  ;;  %v10601_v52 = vcombine.low %v8954_v22, %v8957_v49  ;;  %v17081_v9 = vpop.f32.mrf.mxu1  ;;  %v17083_v55 = vpop.f32.mrf.mxu0  ;;  %v8961_v56 = vsel %vm12224_vm7, %v10586_v60, %v8960_v5 }
 0x2b6   :  { %18163 = vst [vmem:[#allocation70_spill] sm:$0xff] %v17081_v9  ;;  %v10536_v44 = vcombine.low %v8441_v20, %v8451_v51  ;;  %v8962_v53 = vrot.slane %v8960_v5, 4  ;;  %v8456_v33 = vshll.u32 %v10517_v61, 16  ;;  %v8455_v23 = vrot.slane %v8453_v39, 4 }
 0x2b7   :  { %11540 = vmatprep.mubr.msk.bf16.mxu1 %vm511_vm1, %v10601_v52  ;;  %v8462_v62 = vshll.u32 %v17006_v63, 16  ;;  %v8466_v17 = vshrl.u32 %v17006_v63, 16  ;;  %v8472_v2 = vshll.u32 %v10519_v15, 16  ;;  %v17090_v22 = vpop.f32.mrf.mxu0  ;;  %v17097_v60 = vadd.f32 %v16737_v54, %v16254_v10 }
 0x2b8   :  { %11503 = vmatmul.mubr.msk.bf16.gmra.mxu0 %vm511_vm1, %v10536_v44  ;;  %v8964_v45 = vsel %vm12224_vm7, %v8962_v53, %v8963_v11  ;;  %v8458_v49 = vrot.slane %v8456_v33, 5  ;;  %v8477_v61 = vshrl.u32 %v10520_v24, 16  ;;  %v8480_v44 = vshll.u32 %v10520_v24, 16 }
 0x2b9   :  { %v17099_v5 = vpop.f32.mrf.mxu1  ;;  %v10602_v20 = vcombine.low %v8961_v56, %v8964_v45  ;;  %v8464_v51 = vrot.slane %v8462_v62, 5  ;;  %v8468_v52 = vrot.slane %v8466_v17, 4  ;;  %v8474_v63 = vrot.slane %v8472_v2, 5  ;;  %v17101_v15 = vpop.f32.mrf.mxu0 }
 0x2ba   :  { %v8459_v39 = vor.u32 %v8458_v49, %v8455_v23  ;;  %v8479_v9 = vrot.slane %v8477_v61, 4  ;;  %v8486_v12 = vshll.u32 %v17039_v8, 16  ;;  %v8490_v54 = vshrl.u32 %v17039_v8, 16 }
 0x2bb   :  { %v17104_v11 = vpop.f32.mrf.mxu1  ;;  %11541 = vmatmul.mubr.msk.bf16.gmra.mxu1 %vm511_vm1, %v10602_v20  ;;  %v8469_v10 = vor.u32 %v8468_v52, %v8464_v51  ;;  %v8496_v53 = vshll.u32 %v17044_v46, 16  ;;  %v17111_v56 = vadd.f32 %v16755_v31, %v16264_v21  ;;  %v17113_v33 = vpop.f32.mrf.mxu0  ;;  %v8482_v62 = vrot.slane %v8480_v44, 5 }
 0x2bc   :  { %v8460_v23 = vrot.slane %v8459_v39, 4  ;;  %v8488_v24 = vrot.slane %v8486_v12, 5  ;;  %v17117_v17 = vadd.f32 %v16770_v59, %v16277_v13  ;;  %v8492_v49 = vrot.slane %v8490_v54, 4  ;;  %v18165_v13 = vld [vmem:[#allocation95_spill] sm:$0xff]  ;;  %v18166_v59 = vld [vmem:[#allocation21_spill] sm:$0xff] }
 0x2bd   :  { %v17119_v2 = vpop.f32.mrf.mxu1  ;;  %v8470_v45 = vrot.slane %v8469_v10, 4  ;;  %v8498_v8 = vrot.slane %v8496_v53, 5  ;;  %v17123_v46 = vadd.f32 %v16786_v0, %v16285_v19  ;;  %v17125_v21 = vpop.f32.mrf.mxu0  ;;  %v8483_v61 = vor.u32 %v8482_v62, %v8479_v9  ;;  %v18167_v12 = vld [vmem:[#allocation111_spill] sm:$0xff]  ;;  %v18168_v10 = vld [vmem:[#allocation102_spill] sm:$0xff]  ;;  %v18169_v0 = vld [vmem:[#allocation12_spill] sm:$0xff] }
 0x2be   :  { %18164 = vst [vmem:[#allocation69_spill] sm:$0xff] %v17119_v2  ;;  %v8465_v31 = vsel %vm11847_vm4, %v8460_v23, %v8464_v51  ;;  %v6138_v20 = vadd.f32 %v16305_v48, %v16463_v32  ;;  %v6136_v52 = vadd.f32 %v18166_v59, %v18165_v13  ;;  %v8493_v44 = vor.u32 %v8492_v49, %v8488_v24  ;;  %v18170_v54 = vld [vmem:[#allocation47_spill] sm:$0xff]  ;;  %v18171_v49 = vld [vmem:[#allocation13_spill] sm:$0xff]  ;;  %v18172_v13 = vld [vmem:[#allocation104_spill] sm:$0xff] }
 0x2bf   :  { %v8475_v39 = vsel %vm11847_vm4, %v8470_v45, %v8474_v63  ;;  %v6139_v19 = vadd.f32 %v18168_v10, %v18167_v12  ;;  %v6137_v53 = vadd.f32 %v18170_v54, %v18169_v0  ;;  %v17139_v2 = vpop.f32.mrf.mxu1  ;;  %v17141_v51 = vpop.f32.mrf.mxu0  ;;  %v8484_v23 = vrot.slane %v8483_v61, 4  ;;  %v18174_v61 = vld [vmem:[#allocation48_spill] sm:$0xff] }
 0x2c0   :  { %v10537_v9 = vcombine.low %v8465_v31, %v8475_v39  ;;  %v17144_v48 = vadd.f32 %v16801_v50, %v6138_v20  ;;  %v17147_v32 = vadd.f32 %v16816_v58, %v6136_v52  ;;  %v8494_v63 = vrot.slane %v8493_v44, 4  ;;  %v18173_v31 = vld [vmem:[#allocation29_spill] sm:$0xff]  ;;  %v18176_v52 = vld [vmem:[#allocation106_spill] sm:$0xff]  ;;  %v18179_v0 = vld [vmem:[#allocation32_spill] sm:$0xff] }
 0x2c1   :  { %v17150_v62 = vadd.f32 %v16828_v3, %v6139_v19  ;;  %v17153_v45 = vadd.f32 %v16848_v16, %v6137_v53  ;;  %v6142_v59 = vadd.f32 %v18172_v13, %v18171_v49  ;;  %v11368_v12 = vpop.f32.mrf.mxu0  ;;  %v8489_v50 = vsel %vm11847_vm4, %v8484_v23, %v8488_v24  ;;  %v18175_v20 = vld [vmem:[#allocation45_spill] sm:$0xff]  ;;  %v18177_v3 = vld [vmem:[#allocation7_spill] sm:$0xff]  ;;  %v18180_v54 = vld [vmem:[#allocation88_spill] sm:$0xff] }
 0x2c2   :  { %11506 = vmatprep.mubr.msk.bf16.mxu0 %vm511_vm1, %v10537_v9  ;;  %v6140_v58 = vadd.f32 %v18174_v61, %v18173_v31  ;;  %v6143_v39 = vadd.f32 %v18176_v52, %v18175_v20  ;;  %v18178_v44 = vld [vmem:[#allocation37_spill] sm:$0xff]  ;;  %v8499_v16 = vsel %vm11847_vm4, %v8494_v63, %v8498_v8  ;;  %v6146_v53 = vadd.f32 %v18180_v54, %v18179_v0  ;;  %v18182_v24 = vld [vmem:[#allocation54_spill] sm:$0xff] }
 0x2c3   :  { %v6141_v10 = vadd.f32 %v18178_v44, %v18177_v3  ;;  %v17169_v19 = vadd.f32 %v16863_v4, %v6142_v59  ;;  %v18181_v9 = vld [vmem:[#allocation49_spill] sm:$0xff]  ;;  %v17175_v49 = vpop.f32.mrf.mxu1  ;;  %v6462_v13 = vpop.f32.mrf.mxu0  ;;  %v10538_v31 = vcombine.low %v8489_v50, %v8499_v16  ;;  %v18183_v63 = vld [vmem:[#allocation10_spill] sm:$0xff]  ;;  %v18184_v59 = vld [vmem:[#allocation24_spill] sm:$0xff] }
 0x2c4   :  { %v6144_v23 = vadd.f32 %v18182_v24, %v18181_v9  ;;  %v17178_v61 = vadd.f32 %v16883_v27, %v6140_v58  ;;  %v17181_v20 = vadd.f32 %v16892_v26, %v6143_v39  ;;  %v17187_v4 = vadd.f32 %v16926_v38, %v6146_v53  ;;  %v18185_v50 = vld [vmem:[#allocation109_spill] sm:$0xff]  ;;  %v18186_v26 = vld [vmem:[#allocation83_spill] sm:$0xff]  ;;  %v18192_v54 = vld [vmem:[#allocation30_spill] sm:$0xff] }
 0x2c5   :  { %v17184_v29 = vadd.f32 %v16906_v35, %v6141_v10  ;;  %v6147_v52 = vadd.f32 %v18184_v59, %v18183_v63  ;;  %v6145_v3 = vadd.f32 %v18185_v50, %v16671_v43  ;;  %v17196_v27 = vpop.f32.mrf.mxu1  ;;  %v11369_v58 = vpop.f32.mrf.mxu0  ;;  %11507 = vmatmul.mubr.msk.bf16.gmra.mxu0 %vm511_vm1, %v10538_v31  ;;  %v6150_v35 = vadd.f32 %v18186_v26, %v16694_v57  ;;  %v18187_v39 = vld [vmem:[#allocation71_spill] sm:$0xff]  ;;  %v18191_v0 = vld [vmem:[#allocation65_spill] sm:$0xff]  ;;  %v18195_v31 = vld [vmem:[#allocation98_spill] sm:$0xff] }
 0x2c6   :  { %v17190_v8 = vadd.f32 %v16939_v47, %v6144_v23  ;;  %v18188_v38 = vld [vmem:[#allocation55_spill] sm:$0xff]  ;;  %v6149_v53 = vadd.f32 %v18192_v54, %v18191_v0  ;;  %v18193_v24 = vld [vmem:[#allocation41_spill] sm:$0xff]  ;;  %v18198_v0 = vld [vmem:[#allocation6_spill] sm:$0xff] }
 0x2c7   :  { %v6148_v44 = vadd.f32 %v18188_v38, %v18187_v39  ;;  %v18189_v10 = vld [vmem:[#allocation79_spill] sm:$0xff]  ;;  %v6504_v9 = vadd.f32 %v16958_v1, %v6147_v52  ;;  %v6502_v43 = vadd.f32 %v16973_v30, %v6145_v3  ;;  %v18194_v23 = vld [vmem:[#allocation105_spill] sm:$0xff]  ;;  %v17213_v57 = vpop.f32.mrf.mxu1  ;;  %v6465_v26 = vpop.f32.mrf.mxu0  ;;  %v6507_v39 = vadd.f32 %v16988_v25, %v6150_v35  ;;  %v18197_v52 = vld [vmem:[#allocation40_spill] sm:$0xff] }
 0x2c8   :  { %v18190_v47 = vld [vmem:[#allocation15_spill] sm:$0xff]  ;;  %v6154_v63 = vadd.f32 %v18194_v23, %v18193_v24  ;;  %v6155_v3 = vadd.f32 %v18197_v52, %v16856_v28  ;;  %v6153_v54 = vadd.f32 %v18198_v0, %v16871_v6  ;;  %v18200_v25 = vld [vmem:[#allocation25_spill] sm:$0xff]  ;;  %v18209_v52 = vld [vmem:[#allocation86_spill] sm:$0xff] }
 0x2c9   :  { %v6151_v16 = vadd.f32 %v18190_v47, %v18189_v10  ;;  %v18196_v59 = vld [vmem:[#allocation19_spill] sm:$0xff]  ;;  %v6505_v38 = vadd.f32 %v16996_v7, %v6148_v44  ;;  %v6506_v47 = vadd.f32 %v17028_v36, %v6149_v53  ;;  %v17225_v24 = vpop.f32.mrf.mxu1  ;;  %v11372_v23 = vpop.f32.mrf.mxu0  ;;  %v6158_v7 = vadd.f32 %v18200_v25, %v16899_v18  ;;  %v18201_v35 = vld [vmem:[#allocation93_spill] sm:$0xff]  ;;  %v18205_v53 = vld [vmem:[#allocation46_spill] sm:$0xff] }
 0x2ca   :  { %v6152_v50 = vadd.f32 %v18196_v59, %v18195_v31  ;;  %v6511_v1 = vadd.f32 %v17048_v41, %v6154_v63  ;;  %18199 = vst [vmem:[#allocation5_spill] sm:$0xff] %v17225_v24  ;;  %v18203_v36 = vld [vmem:[#allocation39_spill] sm:$0xff]  ;;  %v6512_v28 = vadd.f32 %v17083_v55, %v6155_v3  ;;  %v6510_v31 = vadd.f32 %v17090_v22, %v6153_v54  ;;  %v18207_v6 = vld [vmem:[#allocation53_spill] sm:$0xff]  ;;  %v18208_v59 = vld [vmem:[#allocation52_spill] sm:$0xff] }
 0x2cb   :  { %v6508_v10 = vadd.f32 %v17016_v14, %v6151_v16  ;;  %v18202_v14 = vld [vmem:[#allocation26_spill] sm:$0xff]  ;;  %v18204_v16 = vld [vmem:[#allocation27_spill] sm:$0xff]  ;;  %v6478_v18 = vpop.f32.mrf.mxu0  ;;  %v6515_v25 = vadd.f32 %v17101_v15, %v6158_v7  ;;  %v18211_v55 = vld [vmem:[#allocation64_spill] sm:$0xff] }
 0x2cc   :  { %v6509_v30 = vadd.f32 %v17063_v37, %v6152_v50  ;;  %v6156_v44 = vadd.f32 %v18202_v14, %v18201_v35  ;;  %v6159_v41 = vadd.f32 %v18204_v16, %v18203_v36  ;;  %v18206_v37 = vld [vmem:[#allocation11_spill] sm:$0xff]  ;;  %v6162_v50 = vadd.f32 %v18208_v59, %v18207_v6  ;;  %v18212_v54 = vld [vmem:[#allocation28_spill] sm:$0xff]  ;;  %v18213_v59 = vld [vmem:[#allocation62_spill] sm:$0xff] }
 0x2cd   :  { %v6157_v63 = vadd.f32 %v18206_v37, %v18205_v53  ;;  %v18210_v0 = vld [vmem:[#allocation59_spill] sm:$0xff]  ;;  %v6163_v22 = vadd.f32 %v18211_v55, %v17056_v34  ;;  %v6161_v37 = vadd.f32 %v18212_v54, %v17071_v42  ;;  %v11373_v6 = vpop.f32.mrf.mxu0 }
 0x2ce   :  { %v6160_v24 = vadd.f32 %v18210_v0, %v18209_v52  ;;  %v6513_v35 = vadd.f32 %v17113_v33, %v6156_v44  ;;  %v6516_v14 = vadd.f32 %v17125_v21, %v6159_v41  ;;  %v6519_v16 = vadd.f32 %v11368_v12, %v6162_v50  ;;  %v11406_v3 = vpop.f32.mrf.mxu1  ;;  %v18214_v15 = vld [vmem:[#allocation31_spill] sm:$0xff]  ;;  %v18215_v21 = vld [vmem:[#allocation80_spill] sm:$0xff] }
 0x2cf   :  { %v6514_v36 = vadd.f32 %v17141_v51, %v6157_v63  ;;  %v6166_v52 = vadd.f32 %v18213_v59, %v17097_v60  ;;  %v6164_v33 = vadd.f32 %v18214_v15, %v17111_v56  ;;  %v6167_v7 = vadd.f32 %v18215_v21, %v17117_v17  ;;  %v18216_v51 = vld [vmem:[#allocation94_spill] sm:$0xff]  ;;  %v6481_v44 = vpop.f32.mrf.mxu0  ;;  %v18217_v41 = vld [vmem:[#allocation87_spill] sm:$0xff]  ;;  %v18218_v63 = vld [vmem:[#allocation97_spill] sm:$0xff] }
 0x2d0   :  { %v6517_v53 = vadd.f32 %v6462_v13, %v6160_v24  ;;  %v6165_v12 = vadd.f32 %v18216_v51, %v17123_v46  ;;  %v6520_v13 = vadd.f32 %v11369_v58, %v6163_v22  ;;  %v6518_v24 = vadd.f32 %v6465_v26, %v6161_v37  ;;  %v7199_v34 = vpop.f32.mrf.mxu1  ;;  %v18219_v17 = vld [vmem:[#allocation68_spill] sm:$0xff]  ;;  %v18220_v46 = vld [vmem:[#allocation75_spill] sm:$0xff]  ;;  %v18221_v26 = vld [vmem:[#allocation34_spill] sm:$0xff] }
 0x2d1   :  { %v7216_v42 = vadd.f32 %v18217_v41, %v17144_v48  ;;  %v7214_v50 = vadd.f32 %v18218_v63, %v17147_v32  ;;  %v6523_v60 = vadd.f32 %v11372_v23, %v6166_v52  ;;  %v6521_v0 = vadd.f32 %v6478_v18, %v6164_v33  ;;  %v18222_v37 = vld [vmem:[#allocation96_spill] sm:$0xff]  ;;  %v18223_v32 = vld [vmem:[#allocation103_spill] sm:$0xff]  ;;  %v18224_v18 = vld [vmem:[#allocation33_spill] sm:$0xff] }
 0x2d2   :  { %v6524_v55 = vadd.f32 %v11373_v6, %v6167_v7  ;;  %v6522_v56 = vadd.f32 %v6481_v44, %v6165_v12  ;;  %v11407_v54 = vpop.f32.mrf.mxu1  ;;  %v7217_v59 = vadd.f32 %v18219_v17, %v17150_v62  ;;  %v7215_v58 = vadd.f32 %v18220_v46, %v17153_v45  ;;  %v18225_v52 = vld [vmem:[#allocation100_spill] sm:$0xff]  ;;  %v18226_v62 = vld [vmem:[#allocation51_spill] sm:$0xff]  ;;  %v18227_v51 = vld [vmem:[#allocation110_spill] sm:$0xff] }
 0x2d3   :  { %v7220_v22 = vadd.f32 %v18221_v26, %v17169_v19  ;;  %v7218_v48 = vadd.f32 %v18222_v37, %v17178_v61  ;;  %v7221_v23 = vadd.f32 %v18223_v32, %v17181_v20  ;;  %v7219_v6 = vadd.f32 %v18224_v18, %v17184_v29  ;;  %v18228_v12 = vld [vmem:[#allocation61_spill] sm:$0xff]  ;;  %v18229_v61 = vld [vmem:[#allocation78_spill] sm:$0xff]  ;;  %v18230_v63 = vld [vmem:[#allocation35_spill] sm:$0xff] }
 0x2d4   :  { %v11412_v15 = vpop.f32.mrf.mxu0  ;;  %v7224_v33 = vadd.f32 %v18225_v52, %v17187_v4  ;;  %v7222_v21 = vadd.f32 %v18226_v62, %v17190_v8  ;;  %v7202_v45 = vpop.f32.mrf.mxu1  ;;  %v7225_v19 = vadd.f32 %v18227_v51, %v6504_v9  ;;  %v17279_v44 = vadd.f32 %v18228_v12, %v6502_v43  ;;  %v18231_v29 = vld [vmem:[#allocation108_spill] sm:$0xff]  ;;  %v18232_v4 = vld [vmem:[#allocation9_spill] sm:$0xff]  ;;  %v18235_v32 = vld [vmem:[#allocation70_spill] sm:$0xff] }
 0x2d5   :  { %v7681_v7 = vadd.f32 %v11412_v15, %v7216_v42  ;;  %v17282_v41 = vadd.f32 %v18229_v61, %v6507_v39  ;;  %v17285_v17 = vadd.f32 %v18230_v63, %v6505_v38  ;;  %v17288_v46 = vadd.f32 %v18231_v29, %v6508_v10  ;;  %v18233_v8 = vld [vmem:[#allocation36_spill] sm:$0xff] }
 0x2d6   :  { %v7552_v20 = vpop.f32.mrf.mxu0  ;;  %v17291_v26 = vadd.f32 %v18232_v4, %v6506_v47  ;;  %v17294_v42 = vadd.f32 %v18233_v8, %v6511_v1  ;;  %v11446_v9 = vpop.f32.mrf.mxu1  ;;  %v18234_v43 = vld [vmem:[#allocation60_spill] sm:$0xff]  ;;  %v17300_v39 = vadd.f32 %v17061_v40, %v6512_v28  ;;  %v17303_v38 = vadd.f32 %v18235_v32, %v6510_v31  ;;  %v18236_v1 = vld [vmem:[#allocation69_spill] sm:$0xff] }
 0x2d7   :  { %v7679_v37 = vadd.f32 %v7552_v20, %v7214_v50  ;;  %v17297_v15 = vadd.f32 %v18234_v43, %v6509_v30  ;;  %v17306_v10 = vadd.f32 %v17099_v5, %v6515_v25  ;;  %v17309_v47 = vadd.f32 %v17104_v11, %v6513_v35  ;;  %v18237_v11 = vld [vmem:[#allocation5_spill] sm:$0xff] }
 0x2d8   :  { %v11413_v18 = vpop.f32.mrf.mxu0  ;;  %v17312_v52 = vadd.f32 %v18236_v1, %v6516_v14  ;;  %v17315_v50 = vadd.f32 %v17139_v2, %v6514_v36  ;;  %v7909_v30 = vpop.f32.mrf.mxu1  ;;  %v17318_v40 = vadd.f32 %v17175_v49, %v6519_v16  ;;  %v17321_v28 = vadd.f32 %v17196_v27, %v6517_v53 }
 0x2d9   :  { %v7682_v62 = vadd.f32 %v11413_v18, %v7217_v59  ;;  %v17324_v5 = vadd.f32 %v17213_v57, %v6520_v13  ;;  %v17327_v25 = vadd.f32 %v18237_v11, %v6518_v24  ;;  %v17329_v35 = vadd.f32 %v11406_v3, %v6523_v60 }
 0x2da   :  { %v7555_v31 = vpop.f32.mrf.mxu0  ;;  %v17331_v14 = vadd.f32 %v7199_v34, %v6521_v0  ;;  %v17333_v2 = vadd.f32 %v11407_v54, %v6524_v55  ;;  %v11447_v36 = vpop.f32.mrf.mxu1  ;;  %v17335_v49 = vadd.f32 %v7202_v45, %v6522_v56  ;;  %v17337_v16 = vadd.f32 %v11446_v9, %v7681_v7 }
 0x2db   :  { %v7680_v59 = vadd.f32 %v7555_v31, %v7215_v58  ;;  %v17339_v27 = vadd.f32 %v7909_v30, %v7679_v37  ;;  %v17341_v53 = vadd.f32 %v11447_v36, %v7682_v62 }
 0x2dc   :  { %v11416_v57 = vpop.f32.mrf.mxu0  ;;  %v7912_v13 = vpop.f32.mrf.mxu1 }
 0x2dd   :  { %v7685_v24 = vadd.f32 %v11416_v57, %v7220_v22  ;;  %v17343_v3 = vadd.f32 %v7912_v13, %v7680_v59 }
 0x2de   :  { %v7568_v51 = vpop.f32.mrf.mxu0  ;;  %v11450_v34 = vpop.f32.mrf.mxu1 }
 0x2df   :  { %v7683_v60 = vadd.f32 %v7568_v51, %v7218_v48  ;;  %v17345_v55 = vadd.f32 %v11450_v34, %v7685_v24 }
 0x2e0   :  { %v11417_v0 = vpop.f32.mrf.mxu0  ;;  %v7925_v54 = vpop.f32.mrf.mxu1 }
 0x2e1   :  { %v7686_v56 = vadd.f32 %v11417_v0, %v7221_v23  ;;  %v17347_v45 = vadd.f32 %v7925_v54, %v7683_v60 }
 0x2e2   :  { %v7571_v58 = vpop.f32.mrf.mxu0  ;;  %v11451_v7 = vpop.f32.mrf.mxu1 }
 0x2e3   :  { %v7684_v12 = vadd.f32 %v7571_v58, %v7219_v6  ;;  %v17349_v61 = vadd.f32 %v11451_v7, %v7686_v56 }
 0x2e4   :  { %v7928_v20 = vpop.f32.mrf.mxu1 }
 0x2e5   :  { %v11420_v63 = vpop.f32.mrf.mxu0  ;;  %v17351_v22 = vadd.f32 %v7928_v20, %v7684_v12  ;;  %v11669_v12 = vld [vmem:[%s17571_s3 + $0x8] sm:$0xff]   ;;  %v11756_v20 = vmov 0.0  }
 0x2e6   :  { %v11454_v29 = vpop.f32.mrf.mxu1  ;;  %v7689_v4 = vadd.f32 %v11420_v63, %v7224_v33  ;;  %11544 = vmatprep.subr.bf16.mxu0 %v11756_v20  ;;  %11548 = vmatprep.mubr.msk.bf16.mxu0 %vm11757_vm9, %v11756_v20 }
 0x2e7   :  { %v7584_v8 = vpop.f32.mrf.mxu0  ;;  %11545 = vmatpush3.bf16.msra.mxu0 %v11669_v12 }
 0x2e8   :  { %v7941_v48 = vpop.f32.mrf.mxu1  ;;  %v7687_v9 = vadd.f32 %v7584_v8, %v7222_v21  ;;  %v17353_v37 = vadd.f32 %v11454_v29, %v7689_v4  ;;  %11546 = vmatprep.subr.bf16.mxu0 %v11756_v20 }
 0x2e9   :  { %v11421_v43 = vpop.f32.mrf.mxu0 }
 0x2ea   :  { %v11455_v23 = vpop.f32.mrf.mxu1  ;;  %v7690_v32 = vadd.f32 %v11421_v43, %v7225_v19  ;;  %v17355_v18 = vadd.f32 %v7941_v48, %v7687_v9 }
 0x2eb   :  { %v7587_v1 = vpop.f32.mrf.mxu0 }
 0x2ec   :  { %v7944_v6 = vpop.f32.mrf.mxu1  ;;  %v7688_v30 = vadd.f32 %v7587_v1, %v17279_v44  ;;  %v17358_v62 = vadd.f32 %v11455_v23, %v7690_v32 }
 0x2ee   :  { %v11458_v31 = vpop.f32.mrf.mxu1  ;;  %v11424_v11 = vpop.f32.mrf.mxu0  ;;  %v17360_v36 = vadd.f32 %v7944_v6, %v7688_v30 }
 0x2ef   :  { %v7693_v33 = vadd.f32 %v11424_v11, %v17282_v41 }
 0x2f0   :  { %v7957_v21 = vpop.f32.mrf.mxu1  ;;  %v7600_v59 = vpop.f32.mrf.mxu0 }
 0x2f1   :  { %v7691_v57 = vadd.f32 %v7600_v59, %v17285_v17  ;;  %v17364_v13 = vadd.f32 %v11458_v31, %v7693_v33 }
 0x2f2   :  { %v11459_v19 = vpop.f32.mrf.mxu1  ;;  %v11425_v24 = vpop.f32.mrf.mxu0 }
 0x2f3   :  { %v7694_v51 = vadd.f32 %v11425_v24, %v17288_v46  ;;  %v17367_v34 = vadd.f32 %v7957_v21, %v7691_v57 }
 0x2f4   :  { %v7960_v44 = vpop.f32.mrf.mxu1  ;;  %v7603_v60 = vpop.f32.mrf.mxu0 }
 0x2f5   :  { %v7692_v0 = vadd.f32 %v7603_v60, %v17291_v26  ;;  %v17370_v54 = vadd.f32 %v11459_v19, %v7694_v51 }
 0x2f6   :  { %v11462_v56 = vpop.f32.mrf.mxu1 }
 0x2f7   :  { %v11428_v41 = vpop.f32.mrf.mxu0  ;;  %v17372_v58 = vadd.f32 %v7960_v44, %v7692_v0 }
 0x2f8   :  { %v7973_v7 = vpop.f32.mrf.mxu1  ;;  %v7697_v17 = vadd.f32 %v11428_v41, %v17294_v42 }
 0x2f9   :  { %v7616_v46 = vpop.f32.mrf.mxu0 }
 0x2fa   :  { %v11463_v63 = vpop.f32.mrf.mxu1  ;;  %v7695_v26 = vadd.f32 %v7616_v46, %v17297_v15  ;;  %v17380_v29 = vadd.f32 %v11462_v56, %v7697_v17 }
 0x2fb   :  { %v11429_v4 = vpop.f32.mrf.mxu0 }
 0x2fc   :  { %v17383_v8 = vpop.f32.mrf.mxu1  ;;  %v7698_v42 = vadd.f32 %v11429_v4, %v17300_v39  ;;  %v17386_v48 = vadd.f32 %v7973_v7, %v7695_v26 }
 0x2fd   :  { %v17388_v43 = vpop.f32.mrf.mxu0 }
 0x2fe   :  { %v11466_v9 = vpop.f32.mrf.mxu1  ;;  %v17390_v23 = vadd.f32 %v11463_v63, %v7698_v42 }
 0x300   :  { %v17392_v32 = vpop.f32.mrf.mxu1 }
 0x302   :  { %v11432_v15 = vpop.f32.mrf.mxu0  ;;  %v11467_v1 = vpop.f32.mrf.mxu1 }
 0x303   :  { %v7701_v6 = vadd.f32 %v11432_v15, %v17306_v10 }
 0x304   :  { %v17395_v30 = vpop.f32.mrf.mxu0  ;;  %v17397_v31 = vpop.f32.mrf.mxu1 }
 0x305   :  { %v17399_v11 = vadd.f32 %v11466_v9, %v7701_v6 }
 0x306   :  { %v11433_v39 = vpop.f32.mrf.mxu0  ;;  %v11470_v33 = vpop.f32.mrf.mxu1 }
 0x307   :  { %v7702_v21 = vadd.f32 %v11433_v39, %v17312_v52 }
 0x308   :  { %v17402_v59 = vpop.f32.mrf.mxu0  ;;  %v17404_v57 = vpop.f32.mrf.mxu1 }
 0x309   :  { %v17406_v19 = vadd.f32 %v11467_v1, %v7702_v21 }
 0x30a   :  { %v11471_v24 = vpop.f32.mrf.mxu1 }
 0x30c   :  { %v11436_v51 = vpop.f32.mrf.mxu0  ;;  %v17408_v44 = vpop.f32.mrf.mxu1 }
 0x30d   :  { %v7705_v10 = vadd.f32 %v11436_v51, %v17318_v40 }
 0x30e   :  { %v17411_v60 = vpop.f32.mrf.mxu0  ;;  %v11474_v0 = vpop.f32.mrf.mxu1 }
 0x30f   :  { %v17413_v56 = vadd.f32 %v11470_v33, %v7705_v10 }
 0x310   :  { %v11437_v41 = vpop.f32.mrf.mxu0  ;;  %v17416_v7 = vpop.f32.mrf.mxu1 }
 0x311   :  { %v7706_v52 = vadd.f32 %v11437_v41, %v17324_v5 }
 0x312   :  { %v17418_v17 = vpop.f32.mrf.mxu0  ;;  %v11475_v63 = vpop.f32.mrf.mxu1 }
 0x313   :  { %v17420_v12 = vadd.f32 %v11471_v24, %v7706_v52 }
 0x314   :  { %v17427_v42 = vpop.f32.mrf.mxu1 }
 0x315   :  { %v11440_v46 = vpop.f32.mrf.mxu0  ;;  %18239 = vst [vmem:[#allocation84_spill] sm:$0xff] %v17427_v42 }
 0x316   :  { %v7709_v26 = vadd.f32 %v11440_v46, %v17329_v35 }
 0x317   :  { %v17423_v4 = vpop.f32.mrf.mxu0 }
 0x318   :  { %v17425_v40 = vadd.f32 %v11474_v0, %v7709_v26 }
 0x319   :  { %v11441_v9 = vpop.f32.mrf.mxu0 }
 0x31a   :  { %18238 = vst [vmem:[#allocation8_spill] sm:$0xff] %v17425_v40  ;;  %v7710_v15 = vadd.f32 %v11441_v9, %v17333_v2 }
 0x31b   :  { %v17432_v39 = vpop.f32.mrf.mxu0 }
 0x31c   :  { %v17430_v5 = vadd.f32 %v11475_v63, %v7710_v15  ;;  %v11514_v1 = vpop.f32.mrf.mxu1  ;;  %v11670_v63 = vld [vmem:[%s17571_s3] sm:$0xff]  }
 0x31d   :  { %11547 = vmatpush3.bf16.msra.mxu0 %v11670_v63 }
 0x31e   :  { %18240 = vst [vmem:[#allocation91_spill] sm:$0xff] %v17430_v5  ;;  %v9095_v6 = vpop.f32.mrf.mxu1 }
 0x320   :  { %v11515_v33 = vpop.f32.mrf.mxu1 }
 0x322   :  { %v9098_v24 = vpop.f32.mrf.mxu1 }
 0x329   :  { %v11480_v21 = vpop.f32.mrf.mxu0 }
 0x32a   :  { %v8759_v35 = vadd.f32 %v11480_v21, %v17337_v16  ;;  %v17444_v16 = vld [vmem:[%s17570_s2] ss:$0 sm:$0xff] }
 0x32b   :  { %v8630_v51 = vpop.f32.mrf.mxu0  ;;  %v11518_v41 = vpop.f32.mrf.mxu1 }
 0x32c   :  { %v8757_v10 = vadd.f32 %v8630_v51, %v17339_v27  ;;  %v9224_v52 = vadd.f32 %v11514_v1, %v8759_v35 }
 0x32d   :  { %v11481_v0 = vpop.f32.mrf.mxu0  ;;  %v9111_v9 = vpop.f32.mrf.mxu1 }
 0x32e   :  { %v9222_v46 = vadd.f32 %v9095_v6, %v8757_v10  ;;  %v8760_v2 = vadd.f32 %v11481_v0, %v17341_v53  ;;  %v9256_v53 = vadd.f32 %v17444_v16, %v9224_v52 }
 0x32f   :  { %v8633_v26 = vpop.f32.mrf.mxu0  ;;  %v11519_v21 = vpop.f32.mrf.mxu1 }
 0x330   :  { %v9254_v27 = vadd.f32 %v17444_v16, %v9222_v46  ;;  %v9225_v15 = vadd.f32 %v11515_v33, %v8760_v2  ;;  %v8758_v1 = vadd.f32 %v8633_v26, %v17343_v3  ;;  %v9288_v10 = vmax.f32 %v9256_v53, 0.0 }
 0x331   :  { %v9114_v42 = vpop.f32.mrf.mxu1 }
 0x332   :  { %v9223_v6 = vadd.f32 %v9098_v24, %v8758_v1  ;;  %v9286_v35 = vmax.f32 %v9254_v27, 0.0  ;;  %v9257_v51 = vadd.f32 %v17444_v16, %v9225_v15  ;;  %v9321_v24 = vsel %vm4661_vm8, %v9288_v10, 0.0 }
 0x334   :  { %v9255_v20 = vadd.f32 %v17444_v16, %v9223_v6  ;;  %v9318_v5 = vsel %vm4661_vm8, %v9286_v35, 0.0  ;;  %v9289_v40 = vmax.f32 %v9257_v51, 0.0 }
 0x336   :  { %v9287_v0 = vmax.f32 %v9255_v20, 0.0  ;;  %v9323_v15 = vsel %vm4661_vm8, %v9289_v40, 0.0 }
 0x337   :  { %v11484_v46 = vpop.f32.mrf.mxu0 }
 0x338   :  { %v9319_v33 = vsel %vm4661_vm8, %v9287_v0, 0.0  ;;  %v8763_v2 = vadd.f32 %v11484_v46, %v17345_v55 }
 0x339   :  { %v9320_v3 = vadd.f32 %v9319_v33, %v9318_v5  ;;  %v8646_v52 = vpop.f32.mrf.mxu0 }
 0x33a   :  { %v8761_v26 = vadd.f32 %v8646_v52, %v17347_v45  ;;  %v11522_v27 = vpop.f32.mrf.mxu1  ;;  %v9228_v53 = vadd.f32 %v11518_v41, %v8763_v2 }
 0x33b   :  { %v9322_v63 = vadd.f32 %v9321_v24, %v9320_v3  ;;  %v11485_v1 = vpop.f32.mrf.mxu0 }
 0x33c   :  { %v9226_v6 = vadd.f32 %v9111_v9, %v8761_v26  ;;  %v8764_v51 = vadd.f32 %v11485_v1, %v17349_v61  ;;  %v9127_v20 = vpop.f32.mrf.mxu1  ;;  %v9260_v46 = vadd.f32 %v17444_v16, %v9228_v53 }
 0x33d   :  { %v9324_v35 = vadd.f32 %v9323_v15, %v9322_v63  ;;  %v8649_v0 = vpop.f32.mrf.mxu0 }
 0x33e   :  { %v9258_v5 = vadd.f32 %v17444_v16, %v9226_v6  ;;  %v9229_v55 = vadd.f32 %v11519_v21, %v8764_v51  ;;  %v8762_v10 = vadd.f32 %v8649_v0, %v17351_v22  ;;  %v11523_v33 = vpop.f32.mrf.mxu1  ;;  %v9292_v2 = vmax.f32 %v9260_v46, 0.0 }
 0x340   :  { %v9290_v45 = vmax.f32 %v9258_v5, 0.0  ;;  %v9227_v3 = vadd.f32 %v9114_v42, %v8762_v10  ;;  %v9130_v24 = vpop.f32.mrf.mxu1  ;;  %v9261_v41 = vadd.f32 %v17444_v16, %v9229_v55  ;;  %v9329_v6 = vsel %vm4661_vm8, %v9292_v2, 0.0 }
 0x342   :  { %v9325_v40 = vsel %vm4661_vm8, %v9290_v45, 0.0  ;;  %v9259_v9 = vadd.f32 %v17444_v16, %v9227_v3  ;;  %v9293_v21 = vmax.f32 %v9261_v41, 0.0 }
 0x343   :  { %v9326_v61 = vadd.f32 %v9325_v40, %v9324_v35 }
 0x344   :  { %v9291_v52 = vmax.f32 %v9259_v9, 0.0  ;;  %v11488_v63 = vpop.f32.mrf.mxu0  ;;  %v9331_v35 = vsel %vm4661_vm8, %v9293_v21, 0.0 }
 0x345   :  { %v11526_v26 = vpop.f32.mrf.mxu1  ;;  %v8767_v15 = vadd.f32 %v11488_v63, %v17353_v37 }
 0x346   :  { %v9327_v22 = vsel %vm4661_vm8, %v9291_v52, 0.0  ;;  %v8662_v53 = vpop.f32.mrf.mxu0 }
 0x347   :  { %v9328_v1 = vadd.f32 %v9327_v22, %v9326_v61  ;;  %v9143_v42 = vpop.f32.mrf.mxu1  ;;  %v8765_v51 = vadd.f32 %v8662_v53, %v17355_v18  ;;  %v9232_v55 = vadd.f32 %v11522_v27, %v8767_v15 }
 0x348   :  { %v11489_v5 = vpop.f32.mrf.mxu0 }
 0x349   :  { %v9330_v0 = vadd.f32 %v9329_v6, %v9328_v1  ;;  %v9230_v10 = vadd.f32 %v9127_v20, %v8765_v51  ;;  %v8768_v46 = vadd.f32 %v11489_v5, %v17358_v62  ;;  %v11527_v40 = vpop.f32.mrf.mxu1  ;;  %v9264_v61 = vadd.f32 %v17444_v16, %v9232_v55 }
 0x34a   :  { %v8665_v3 = vpop.f32.mrf.mxu0 }
 0x34b   :  { %v9332_v45 = vadd.f32 %v9331_v35, %v9330_v0  ;;  %v9262_v37 = vadd.f32 %v17444_v16, %v9230_v10  ;;  %v9233_v41 = vadd.f32 %v11523_v33, %v8768_v46  ;;  %v8766_v9 = vadd.f32 %v8665_v3, %v17360_v36  ;;  %v9146_v52 = vpop.f32.mrf.mxu1 }
 0x34c   :  { %v9296_v22 = vmax.f32 %v9264_v61, 0.0 }
 0x34d   :  { %v9294_v2 = vmax.f32 %v9262_v37, 0.0  ;;  %v9231_v18 = vadd.f32 %v9130_v24, %v8766_v9  ;;  %v9265_v27 = vadd.f32 %v17444_v16, %v9233_v41 }
 0x34e   :  { %v9337_v5 = vsel %vm4661_vm8, %v9296_v22, 0.0 }
 0x34f   :  { %v9333_v63 = vsel %vm4661_vm8, %v9294_v2, 0.0  ;;  %v9263_v20 = vadd.f32 %v17444_v16, %v9231_v18  ;;  %v9297_v36 = vmax.f32 %v9265_v27, 0.0  ;;  %v18241_v27 = vld [vmem:[#allocation99_spill] sm:$0xff] }
 0x350   :  { %v9334_v62 = vadd.f32 %v9333_v63, %v9332_v45 }
 0x351   :  { %v11492_v21 = vpop.f32.mrf.mxu0  ;;  %v9295_v15 = vmax.f32 %v9263_v20, 0.0  ;;  %v4693_v20 = vrot.slane %v18241_v27, 4 }
 0x352   :  { %v8771_v1 = vadd.f32 %v11492_v21, %v17364_v13  ;;  %v9339_v13 = vsel %vm4661_vm8, %v9297_v36, 0.0 }
 0x353   :  { %v8678_v33 = vpop.f32.mrf.mxu0  ;;  %v11530_v53 = vpop.f32.mrf.mxu1  ;;  %v9335_v6 = vsel %vm4661_vm8, %v9295_v15, 0.0 }
 0x354   :  { %v8769_v24 = vadd.f32 %v8678_v33, %v17367_v34  ;;  %v9336_v51 = vadd.f32 %v9335_v6, %v9334_v62  ;;  %v9236_v35 = vadd.f32 %v11526_v26, %v8771_v1  ;;  %v4694_v6 = vadd.f32 %v4693_v20, %v18241_v27 }
 0x355   :  { %v11493_v0 = vpop.f32.mrf.mxu0  ;;  %v9159_v3 = vpop.f32.mrf.mxu1 }
 0x356   :  { %v9234_v55 = vadd.f32 %v9143_v42, %v8769_v24  ;;  %v8772_v10 = vadd.f32 %v11493_v0, %v17370_v54  ;;  %v9338_v46 = vadd.f32 %v9337_v5, %v9336_v51  ;;  %v9268_v34 = vadd.f32 %v17444_v16, %v9236_v35 }
 0x357   :  { %v8681_v45 = vpop.f32.mrf.mxu0  ;;  %v11531_v63 = vpop.f32.mrf.mxu1 }
 0x358   :  { %v9266_v37 = vadd.f32 %v17444_v16, %v9234_v55  ;;  %v9237_v41 = vadd.f32 %v11527_v40, %v8772_v10  ;;  %v8770_v9 = vadd.f32 %v8681_v45, %v17372_v58  ;;  %v9340_v61 = vadd.f32 %v9339_v13, %v9338_v46 }
 0x359   :  { %v9300_v21 = vmax.f32 %v9268_v34, 0.0  ;;  %v9162_v15 = vpop.f32.mrf.mxu1  ;;  %v7696_v58 = vadd.f32 %v17388_v43, %v17303_v38  ;;  %v4695_v13 = vrot.slane %v4694_v6, 2 }
 0x35a   :  { %v9298_v2 = vmax.f32 %v9266_v37, 0.0  ;;  %v9235_v18 = vadd.f32 %v9146_v52, %v8770_v9  ;;  %v9269_v54 = vadd.f32 %v17444_v16, %v9237_v41 }
 0x35b   :  { %v9345_v0 = vsel %vm4661_vm8, %v9300_v21, 0.0  ;;  %v8053_v45 = vadd.f32 %v17383_v8, %v7696_v58 }
 0x35c   :  { %v9341_v26 = vsel %vm4661_vm8, %v9298_v2, 0.0  ;;  %v9267_v42 = vadd.f32 %v17444_v16, %v9235_v18  ;;  %v9301_v1 = vmax.f32 %v9269_v54, 0.0  ;;  %v4696_v18 = vadd.f32 %v4695_v13, %v4694_v6 }
 0x35d   :  { %v9342_v62 = vadd.f32 %v9341_v26, %v9340_v61 }
 0x35e   :  { %v9299_v22 = vmax.f32 %v9267_v42, 0.0  ;;  %v11496_v40 = vpop.f32.mrf.mxu0  ;;  %v9347_v38 = vsel %vm4661_vm8, %v9301_v1, 0.0  ;;  %v4697_v21 = vrot.slane %v4696_v18, 1 }
 0x35f   :  { %v8775_v33 = vadd.f32 %v11496_v40, %v17380_v29 }
 0x360   :  { %v9343_v52 = vsel %vm4661_vm8, %v9299_v22, 0.0  ;;  %v8694_v36 = vpop.f32.mrf.mxu0  ;;  %v7700_v22 = vadd.f32 %v17402_v59, %v17315_v50 }
 0x361   :  { %v9344_v24 = vadd.f32 %v9343_v52, %v9342_v62  ;;  %v8773_v51 = vadd.f32 %v8694_v36, %v17386_v48  ;;  %v11534_v46 = vpop.f32.mrf.mxu1  ;;  %v9240_v43 = vadd.f32 %v11530_v53, %v8775_v33 }
 0x362   :  { %v11497_v5 = vpop.f32.mrf.mxu0 }
 0x363   :  { %v9346_v35 = vadd.f32 %v9345_v0, %v9344_v24  ;;  %v9238_v55 = vadd.f32 %v9159_v3, %v8773_v51  ;;  %v8776_v10 = vadd.f32 %v11497_v5, %v17390_v23  ;;  %v9175_v34 = vpop.f32.mrf.mxu1  ;;  %v9272_v2 = vadd.f32 %v17444_v16, %v9240_v43 }
 0x364   :  { %v8697_v29 = vpop.f32.mrf.mxu0  ;;  %v7699_v23 = vadd.f32 %v17395_v30, %v17309_v47  ;;  %v4698_v5 = vadd.f32 %v4697_v21, %v4696_v18 }
 0x365   :  { %v9348_v37 = vadd.f32 %v9347_v38, %v9346_v35  ;;  %v9270_v41 = vadd.f32 %v17444_v16, %v9238_v55  ;;  %v9241_v9 = vadd.f32 %v11531_v63, %v8776_v10  ;;  %v8774_v48 = vadd.f32 %v8697_v29, %v8053_v45  ;;  %v11535_v27 = vpop.f32.mrf.mxu1 }
 0x366   :  { %v9304_v20 = vmax.f32 %v9272_v2, 0.0  ;;  %v8057_v38 = vadd.f32 %v17397_v31, %v7700_v22 }
 0x367   :  { %v9349_v61 = vrot.slane %v9348_v37, 4  ;;  %v9239_v3 = vadd.f32 %v9162_v15, %v8774_v48  ;;  %v9302_v53 = vmax.f32 %v9270_v41, 0.0  ;;  %v9273_v8 = vadd.f32 %v17444_v16, %v9241_v9  ;;  %v9178_v24 = vpop.f32.mrf.mxu1 }
 0x368   :  { %v8056_v15 = vadd.f32 %v17392_v32, %v7699_v23  ;;  %v9358_v51 = vsel %vm4661_vm8, %v9304_v20, 0.0  ;;  %v7703_v9 = vadd.f32 %v17411_v60, %v17321_v28 }
 0x369   :  { %v9350_v26 = vadd.f32 %v9349_v61, %v9348_v37  ;;  %v9271_v54 = vadd.f32 %v17444_v16, %v9239_v3  ;;  %v9355_v47 = vsel %vm4661_vm8, %v9302_v53, 0.0  ;;  %v9305_v30 = vmax.f32 %v9273_v8, 0.0 }
 0x36a   :  { %v8060_v23 = vadd.f32 %v17404_v57, %v7703_v9 }
 0x36b   :  { %v9351_v42 = vrot.slane %v9350_v26, 2  ;;  %v9303_v63 = vmax.f32 %v9271_v54, 0.0  ;;  %v9360_v32 = vsel %vm4661_vm8, %v9305_v30, 0.0 }
 0x36c   :  { %v11500_v62 = vpop.f32.mrf.mxu0 }
 0x36d   :  { %v9352_v40 = vadd.f32 %v9351_v42, %v9350_v26  ;;  %v9356_v58 = vsel %vm4661_vm8, %v9303_v63, 0.0  ;;  %v8779_v1 = vadd.f32 %v11500_v62, %v17399_v11  ;;  %v11538_v13 = vpop.f32.mrf.mxu1  ;;  %v7704_v26 = vadd.f32 %v17418_v17, %v17327_v25 }
 0x36e   :  { %v8710_v52 = vpop.f32.mrf.mxu0  ;;  %v9357_v36 = vadd.f32 %v9356_v58, %v9355_v47 }
 0x36f   :  { %v9353_v33 = vrot.slane %v9352_v40, 1  ;;  %v8777_v6 = vadd.f32 %v8710_v52, %v8056_v15  ;;  %v9244_v55 = vadd.f32 %v11534_v46, %v8779_v1  ;;  %v8061_v25 = vadd.f32 %v17408_v44, %v7704_v26 }
 0x370   :  { %v11501_v0 = vpop.f32.mrf.mxu0  ;;  %v9359_v59 = vadd.f32 %v9358_v51, %v9357_v36 }
 0x371   :  { %v9354_v50 = vadd.f32 %v9353_v33, %v9352_v40  ;;  %v9242_v35 = vadd.f32 %v9175_v34, %v8777_v6  ;;  %v8780_v10 = vadd.f32 %v11501_v0, %v17406_v19  ;;  %v9276_v61 = vadd.f32 %v17444_v16, %v9244_v55  ;;  %v9191_v34 = vpop.f32.mrf.mxu1 }
 0x372   :  { %v8713_v11 = vpop.f32.mrf.mxu0  ;;  %v9361_v29 = vadd.f32 %v9360_v32, %v9359_v59 }
 0x373   :  { %v17515_v43 = vadd.f32 %v9354_v50, %v4698_v5  ;;  %v9274_v45 = vadd.f32 %v17444_v16, %v9242_v35  ;;  %v9245_v37 = vadd.f32 %v11535_v27, %v8780_v10  ;;  %v8778_v41 = vadd.f32 %v8713_v11, %v8057_v38  ;;  %v11539_v54 = vpop.f32.mrf.mxu1 }
 0x374   :  { %v9308_v53 = vmax.f32 %v9276_v61, 0.0  ;;  %v7708_v10 = vadd.f32 %v17432_v39, %v17335_v49  ;;  %v18244_v49 = vld [vmem:[#allocation84_spill] sm:$0xff] }
 0x375   :  { %v9306_v48 = vmax.f32 %v9274_v45, 0.0  ;;  %v9243_v46 = vadd.f32 %v9178_v24, %v8778_v41  ;;  %v9277_v2 = vadd.f32 %v17444_v16, %v9245_v37  ;;  %v9194_v47 = vpop.f32.mrf.mxu1 }
 0x376   :  { %v9366_v57 = vsel %vm4661_vm8, %v9308_v53, 0.0  ;;  %v8065_v39 = vadd.f32 %v18244_v49, %v7708_v10 }
 0x377   :  { %v9362_v19 = vsel %vm4661_vm8, %v9306_v48, 0.0  ;;  %v9275_v3 = vadd.f32 %v17444_v16, %v9243_v46  ;;  %v9309_v27 = vmax.f32 %v9277_v2, 0.0  ;;  %v18243_v46 = vld [vmem:[#allocation91_spill] sm:$0xff] }
 0x378   :  { %v9363_v31 = vadd.f32 %v9362_v19, %v9361_v29  ;;  %v11504_v18 = vpop.f32.mrf.mxu0 }
 0x379   :  { %v9307_v28 = vmax.f32 %v9275_v3, 0.0  ;;  %v8783_v60 = vadd.f32 %v11504_v18, %v17413_v56  ;;  %v9368_v30 = vsel %vm4661_vm8, %v9309_v27, 0.0 }
 0x37a   :  { %v8726_v8 = vpop.f32.mrf.mxu0 }
 0x37b   :  { %v8781_v42 = vadd.f32 %v8726_v8, %v8060_v23  ;;  %v9364_v20 = vsel %vm4661_vm8, %v9307_v28, 0.0  ;;  %v9248_v40 = vadd.f32 %v11538_v13, %v8783_v60  ;;  %v11542_v44 = vpop.f32.mrf.mxu1 }
 0x37c   :  { %v11505_v63 = vpop.f32.mrf.mxu0  ;;  %v9365_v62 = vadd.f32 %v9364_v20, %v9363_v31  ;;  %v18245_v20 = vld [vmem:[#allocation107_spill] sm:$0xff] }
 0x37d   :  { %v9246_v21 = vadd.f32 %v9191_v34, %v8781_v42  ;;  %v8784_v22 = vadd.f32 %v11505_v63, %v17420_v12  ;;  %v9280_v36 = vadd.f32 %v17444_v16, %v9248_v40  ;;  %v7707_v12 = vadd.f32 %v17423_v4, %v17331_v14  ;;  %v9207_v32 = vpop.f32.mrf.mxu1  ;;  %v18242_v4 = vld [vmem:[#allocation8_spill] sm:$0xff] }
 0x37e   :  { %v8729_v17 = vpop.f32.mrf.mxu0  ;;  %v9367_v15 = vadd.f32 %v9366_v57, %v9365_v62  ;;  %v4730_v63 = vrot.slane %v18245_v20, 4 }
 0x37f   :  { %v9278_v56 = vadd.f32 %v17444_v16, %v9246_v21  ;;  %v9249_v58 = vadd.f32 %v11539_v54, %v8784_v22  ;;  %v8782_v1 = vadd.f32 %v8729_v17, %v8061_v25  ;;  %v9312_v50 = vmax.f32 %v9280_v36, 0.0  ;;  %v11543_v48 = vpop.f32.mrf.mxu1 }
 0x380   :  { %v9369_v33 = vadd.f32 %v9368_v30, %v9367_v15  ;;  %v8064_v55 = vadd.f32 %v17416_v7, %v7707_v12  ;;  %v4731_v40 = vadd.f32 %v4730_v63, %v18245_v20 }
 0x381   :  { %v9310_v52 = vmax.f32 %v9278_v56, 0.0  ;;  %v9247_v6 = vadd.f32 %v9194_v47, %v8782_v1  ;;  %v9281_v0 = vadd.f32 %v17444_v16, %v9249_v58  ;;  %v9374_v37 = vsel %vm4661_vm8, %v9312_v50, 0.0  ;;  %v9210_v53 = vpop.f32.mrf.mxu1 }
 0x382   :  { %v4732_v47 = vrot.slane %v4731_v40, 2 }
 0x383   :  { %v9370_v24 = vsel %vm4661_vm8, %v9310_v52, 0.0  ;;  %v9279_v5 = vadd.f32 %v17444_v16, %v9247_v6  ;;  %v9313_v38 = vmax.f32 %v9281_v0, 0.0 }
 0x384   :  { %v9371_v51 = vadd.f32 %v9370_v24, %v9369_v33  ;;  %v4733_v1 = vadd.f32 %v4732_v47, %v4731_v40 }
 0x385   :  { %v9311_v59 = vmax.f32 %v9279_v5, 0.0  ;;  %v11508_v35 = vpop.f32.mrf.mxu0  ;;  %v9376_v7 = vsel %vm4661_vm8, %v9313_v38, 0.0 }
 0x386   :  { %v8787_v11 = vadd.f32 %v11508_v35, %v18242_v4  ;;  %v4734_v33 = vrot.slane %v4733_v1, 1 }
 0x387   :  { %v9372_v14 = vsel %vm4661_vm8, %v9311_v59, 0.0  ;;  %v8742_v45 = vpop.f32.mrf.mxu0 }
 0x388   :  { %v9373_v29 = vadd.f32 %v9372_v14, %v9371_v51  ;;  %v8785_v13 = vadd.f32 %v8742_v45, %v8064_v55  ;;  %v9252_v34 = vadd.f32 %v11542_v44, %v8787_v11  ;;  %v4735_v12 = vadd.f32 %v4734_v33, %v4733_v1 }
 0x389   :  { %v11509_v41 = vpop.f32.mrf.mxu0  ;;  %v9394_v44 = vpack.c.bf16 %v17515_v43, %v17515_v43 }
 0x38a   :  { %v9375_v9 = vadd.f32 %v9374_v37, %v9373_v29  ;;  %v9250_v61 = vadd.f32 %v9207_v32, %v8785_v13  ;;  %v8788_v19 = vadd.f32 %v11509_v41, %v18243_v46  ;;  %v9284_v28 = vadd.f32 %v17444_v16, %v9252_v34  ;;  %v10619_v32 = vld [vmem:[%s17572_s4] ss:$0 sm:$0xff] }
 0x38b   :  { %v8745_v31 = vpop.f32.mrf.mxu0  ;;  %v9409_v5 = vunpack.c.l.b16 %v9394_v44 }
 0x38c   :  { %v9282_v2 = vadd.f32 %v17444_v16, %v9250_v61  ;;  %v9377_v3 = vadd.f32 %v9376_v7, %v9375_v9  ;;  %v9253_v18 = vadd.f32 %v11543_v48, %v8788_v19  ;;  %v8786_v23 = vadd.f32 %v8745_v31, %v8065_v39 }
 0x38d   :  { %v9316_v62 = vmax.f32 %v9284_v28, 0.0 }
 0x38e   :  { %v9314_v26 = vmax.f32 %v9282_v2, 0.0  ;;  %v9251_v60 = vadd.f32 %v9210_v53, %v8786_v23  ;;  %v9285_v42 = vadd.f32 %v17444_v16, %v9253_v18 }
 0x38f   :  { %v9382_v17 = vsel %vm4661_vm8, %v9316_v62, 0.0 }
 0x390   :  { %v9378_v8 = vsel %vm4661_vm8, %v9314_v26, 0.0  ;;  %v9283_v27 = vadd.f32 %v17444_v16, %v9251_v60  ;;  %v9317_v22 = vmax.f32 %v9285_v42, 0.0 }
 0x391   :  { %v9379_v54 = vadd.f32 %v9378_v8, %v9377_v3 }
 0x392   :  { %v9315_v21 = vmax.f32 %v9283_v27, 0.0  ;;  %v9384_v56 = vsel %vm4661_vm8, %v9317_v22, 0.0 }
 0x394   :  { %v9380_v57 = vsel %vm4661_vm8, %v9315_v21, 0.0 }
 0x395   :  { %v9381_v25 = vadd.f32 %v9380_v57, %v9379_v54 }
 0x397   :  { %v9383_v15 = vadd.f32 %v9382_v17, %v9381_v25 }
 0x399   :  { %v9385_v30 = vadd.f32 %v9384_v56, %v9383_v15 }
 0x39b   :  { %v9386_v58 = vrot.slane %v9385_v30, 4 }
 0x39d   :  { %v9387_v16 = vadd.f32 %v9386_v58, %v9385_v30 }
 0x39f   :  { %v9388_v52 = vrot.slane %v9387_v16, 2 }
 0x3a1   :  { %v9389_v36 = vadd.f32 %v9388_v52, %v9387_v16 }
 0x3a3   :  { %v9390_v6 = vrot.slane %v9389_v36, 1 }
 0x3a5   :  { %v9391_v24 = vadd.f32 %v9390_v6, %v9389_v36 }
 0x3a7   :  { %v9393_v51 = vadd.f32 %v9391_v24, %v4735_v12 }
 0x3a9   :  { %v9395_v0 = vpack.c.bf16 %v9393_v51, %v9393_v51 }
 0x3ab   :  { %v9410_v50 = vunpack.c.l.b16 %v9395_v0 }
 0x3ad   :  { %v9412_v59 = vsel %vm9411_vm10, %v9410_v50, %v9409_v5 }
 0x3ae   :  { %v9413_v35 = vpack.c.b16 %v9412_v59, %v9412_v59 }
 0x3b0   :  { %11549 = vmatmul.mubr.msk.bf16.vlgmr.msra.gmra.mxu0 %vm4661_vm8, %v9413_v35 }
 0x470   :  { %v9463_v55 = vpop.f32.mrf.mxu0 }
 0x471   :  { %v9464_v10 = vadd.f32 %v10619_v32, %v9463_v55 }
 0x472   :  { %v11550_v43 = vpop.f32.mrf.mxu0 }
 0x473   :  { %9470 = vst.msk [vmem:[#allocation2] sm:$0x3] %vm9469_vm11, %v9464_v10 }
 0x474   :  { %v9466_v38 = vpop.f32.mrf.mxu0 }
 0x475   :  { %11745 = shalt.err (!%p11742_p4)
}
 0x476   :  { %9480 = dma.vmem_to_hbm [thread:$0]  %s9478_s28, 32, %s17573_s5, [#allocation3]   ;;  %v11551_v14 = vpop.f32.mrf.mxu0 }
 0x477   :  { %11754 = dma.done.wait [#allocation3], 32  }
 0x478   :  { %11755 = vsyncadd [#allocation3], 4294967264 }
 0x479   :  { %9484 = vsyncpa [#allocation3], 1 }

</bundles_post_ra>
